<compile_context>
chip_gen: v6e
topology: v6e:2x2x1
jax: 0.10.0
libtpu: 0.0.40
codegen_flags: <defaults>
</compile_context>

<pallas_src>
import jax
import jax.numpy as jnp
from jax.experimental import pallas as pl
from jax.experimental.pallas import tpu as pltpu

EPS = 1e-5
LANE = 128             # channel dims are zero-padded to multiples of the lane width
_M_TILE_TARGET = 512   # pixels per grid step for the 1x1-conv / finalize stages
_MIB = 1024 * 1024


def _vmem_limit_bytes():
    """Generation-aware VMEM request: headroom on v7x (64 MiB cap), most of 128 MiB elsewhere."""
    cap = 128 * _MIB
    try:
        cap = int(getattr(pltpu.get_tpu_info(), "vmem_capacity_bytes", cap)) or cap
    except Exception:
        pass
    return max(32 * _MIB, min(cap - 16 * _MIB, 100 * _MIB))


def _cparams():
    # 1-D grids; every step writes disjoint output blocks -> "parallel" (megacore-shardable).
    return pltpu.CompilerParams(dimension_semantics=("parallel",),
                                vmem_limit_bytes=_vmem_limit_bytes())


# --------------------------------------------------------------------------- #
# In-kernel helpers
# --------------------------------------------------------------------------- #
def _pack_stats(z):
    """Pack per-channel (sum, sumsq) of a (rows, C) f32 block into an (8, C) tile.

    Row 0 = sum, row 1 = sum of squares, rows 2..7 = 0.  An 8-sublane block keeps
    the store aligned; the wrapper does the tiny cross-tile reduce.
    """
    s = jnp.sum(z, axis=0, keepdims=True)
    ss = jnp.sum(z * z, axis=0, keepdims=True)
    row = jax.lax.broadcasted_iota(jnp.int32, (8, 1), 0)
    return jnp.where(row == 0, s, jnp.where(row == 1, ss, 0.0))


# --------------------------------------------------------------------------- #
# Kernels
# --------------------------------------------------------------------------- #
def _stage1_kernel(x_ref, w_ref, z_ref, st_ref):
    # conv1 (1x1) as a bf16 MXU matmul + BN1 partial stats (x is already bf16).
    z = jnp.dot(x_ref[...], w_ref[...], preferred_element_type=jnp.float32)
    z_ref[...] = z.astype(z_ref.dtype)
    st_ref[...] = _pack_stats(z)


def _make_conv2_kernel(H, W, top, cp):
    """BN1+ReLU prologue -> 3x3 conv as 9 halo'd matmuls -> BN2 partial stats."""
    hw = H * W
    taps = [(kh - 1, kw - 1) for kh in range(3) for kw in range(3)]

    def kernel(z1_ref, s1_ref, b1_ref, w2_ref, wpos_ref, z2_ref, st_ref, pad_ref):
        # Fused BN1 + ReLU of the previous stage's raw (bf16) matmul output.
        a = jnp.maximum(z1_ref[...].astype(jnp.float32) * s1_ref[...] + b1_ref[...],
                        0.0)

        # Zero ONLY the top/bottom halo rows; the interior is fully overwritten.
        halo_zeros = jnp.zeros((top, cp), jnp.bfloat16)
        pad_ref[pl.ds(0, top), :] = halo_zeros
        pad_ref[pl.ds(top + hw, top), :] = halo_zeros
        pad_ref[pl.ds(top, hw), :] = a.astype(jnp.bfloat16)

        # Hoisted horizontal-wrap masks (computed once, reused across the taps).
        wpos = wpos_ref[...]                       # (hw, 1) f32: pixel column index
        keep_l = wpos >= 1.0                       # reading column w-1 is in-image
        keep_r = wpos <= float(W - 2)              # reading column w+1 is in-image

        # TODO(synk): on v6e/v7x pack tap pairs along channels (K=256) to fill the
        # 256-deep MXU; on v5e the 128x128 MXU is already full.
        acc = None
        for t, (dh, dw) in enumerate(taps):
            # Tap (dh, dw) for output pixel o reads haloed row top + dh*W + dw + o.
            xt = pad_ref[pl.ds(top + dh * W + dw, hw), :]
            if dw == -1:
                xt = jnp.where(keep_l, xt, jnp.zeros_like(xt))
            elif dw == 1:
                xt = jnp.where(keep_r, xt, jnp.zeros_like(xt))
            contrib = jnp.dot(xt, w2_ref[pl.ds(t * cp, cp), :],
                              preferred_element_type=jnp.float32)
            # Linear accumulation chain (lets v7x's MRB accumulate in place).
            acc = contrib if acc is None else acc + contrib

        z2_ref[...] = acc.astype(z2_ref.dtype)
        st_ref[...] = _pack_stats(acc)

    return kernel


def _make_stage3_kernel(m_true, tm, needs_mask):
    """Fused BN2+ReLU prologue -> conv3 (1x1) matmul + BN3 partial stats."""

    def kernel(z2_ref, s2_ref, b2_ref, w_ref, z_ref, st_ref):
        a = jnp.maximum(z2_ref[...].astype(jnp.float32) * s2_ref[...] + b2_ref[...],
                        0.0)
        if needs_mask:
            # Zero rows past the true M (the z2 tail past M was never written).
            row = (pl.program_id(0) * tm
                   + jax.lax.broadcasted_iota(jnp.int32, a.shape, 0))
            a = jnp.where(row < m_true, a, 0.0)
        z = jnp.dot(a.astype(jnp.bfloat16), w_ref[...],
                    preferred_element_type=jnp.float32)
        z_ref[...] = z.astype(z_ref.dtype)
        st_ref[...] = _pack_stats(z)

    return kernel


def _finalize_kernel(z3_ref, res_ref, s3_ref, b3_ref, o_ref):
    # BN3 + residual add + ReLU + skip_add_relu epilogue (all bf16 in/out).
    y = z3_ref[...].astype(jnp.float32) * s3_ref[...] + b3_ref[...]
    res = res_ref[...].astype(jnp.float32)
    out = jnp.maximum(y + res, 0.0)
    # TODO(synk): nn.quantized.FloatFunctional.forward() raises in PyTorch; the
    # module calls skip_add_relu(out, residual) after the explicit add+relu, so we
    # interpret it as add_relu and apply relu(out + residual) a second time.
    o_ref[...] = jnp.maximum(out + res, 0.0).astype(o_ref.dtype)


# --------------------------------------------------------------------------- #
# Wrapper-side glue
# --------------------------------------------------------------------------- #
def _round_up(n, m):
    return ((n + m - 1) // m) * m


def _pad2(a, rows, cols):
    return jnp.pad(a, ((0, rows - a.shape[0]), (0, cols - a.shape[1])))


def _pad1(v, n):
    return jnp.pad(v, (0, n - v.shape[0]))


def _scale_bias(stats, count, gamma_p, beta_p):
    """Combine per-tile (sum, sumsq) partials into per-channel BN scale/bias."""
    c = stats.shape[-1]
    st = stats.reshape(-1, 8, c)
    s = jnp.sum(st[:, 0, :], axis=0)
    ss = jnp.sum(st[:, 1, :], axis=0)
    mean = s / count
    var = jnp.maximum(ss / count - mean * mean, 0.0)      # biased var (BN training)
    scale = gamma_p * jax.lax.rsqrt(var + EPS)
    bias = beta_p - mean * scale
    return scale.reshape(1, -1), bias.reshape(1, -1)


def bottleneck_forward(x_nchw, params):
    """Bottleneck(inplanes, planes, stride=1, downsample=None) forward (train-mode BN)."""
    N, Cin, H, W = x_nchw.shape
    P = params["w1"].shape[1]
    Cout = params["w3"].shape[1]
    assert Cout == Cin, "residual add requires inplanes == planes * 4"
    HW = H * W
    M = N * HW
    assert HW % 8 == 0  # TODO(synk): pad spatial dims when H*W is not a multiple of 8

    cin_p = _round_up(Cin, LANE)
    p_p = _round_up(P, LANE)
    c4_p = _round_up(Cout, LANE)

    # M tiling: fixed-size tiles, pad M up (never fall back to a tiny divisor).
    tm = min(_M_TILE_TARGET, _round_up(M, 8))
    m_pad = _round_up(M, tm)
    nt = m_pad // tm
    needs_mask = m_pad != M

    # ---- layout + padding (one-time glue) -----------------------------------
    x_nhwc = jnp.transpose(x_nchw, (0, 2, 3, 1)).astype(jnp.float32)
    # Single bf16 copy of x feeds both stage 1 and the finalize residual.
    x_flat = _pad2(x_nhwc.reshape(M, Cin), m_pad, cin_p).astype(jnp.bfloat16)

    w1 = _pad2(params["w1"], cin_p, p_p).astype(jnp.bfloat16)       # (cin_p, p_p)
    w2 = params["w2"].reshape(9, P, P)                              # (kh*kw, ci, co)
    w2 = jnp.pad(w2, ((0, 0), (0, p_p - P), (0, p_p - P)))
    w2 = w2.reshape(9 * p_p, p_p).astype(jnp.bfloat16)              # (9*p_p, p_p)
    w3 = _pad2(params["w3"], p_p, c4_p).astype(jnp.bfloat16)        # (p_p, c4_p)

    g1, b1 = _pad1(params["g1"], p_p), _pad1(params["b1"], p_p)
    g2, b2 = _pad1(params["g2"], p_p), _pad1(params["b2"], p_p)
    g3, b3 = _pad1(params["g3"], c4_p), _pad1(params["b3"], c4_p)

    # ---- stage 1: conv1 (1x1) + BN1 partial stats ----------------------------
    z1, st1 = pl.pallas_call(
        _stage1_kernel,
        out_shape=(jax.ShapeDtypeStruct((m_pad, p_p), jnp.bfloat16),
                   jax.ShapeDtypeStruct((nt * 8, p_p), jnp.float32)),
        grid=(nt,),
        in_specs=[pl.BlockSpec((tm, cin_p), lambda i: (i, 0)),
                  pl.BlockSpec((cin_p, p_p), lambda i: (0, 0))],
        out_specs=(pl.BlockSpec((tm, p_p), lambda i: (i, 0)),
                   pl.BlockSpec((8, p_p), lambda i: (i, 0))),
        compiler_params=_cparams(),
    )(x_flat, w1)
    scale1, bias1 = _scale_bias(st1, M, g1, b1)

    # ---- stage 2: fused BN1+ReLU -> conv2 (3x3) via halo'd VMEM slab ---------
    # TODO(synk): on v7x split each image into row blocks (grid=(N, H//h)) so both
    # TensorCores are busy at small batch and the slab working set shrinks.
    top = _round_up(W + 1, 8)                 # 8-aligned zero halo above/below
    wpos = jnp.tile(jnp.arange(W, dtype=jnp.float32), H).reshape(HW, 1)
    z2, st2 = pl.pallas_call(
        _make_conv2_kernel(H, W, top, p_p),
        out_shape=(jax.ShapeDtypeStruct((m_pad, p_p), jnp.bfloat16),
                   jax.ShapeDtypeStruct((N * 8, p_p), jnp.float32)),
        grid=(N,),
        in_specs=[pl.BlockSpec((HW, p_p), lambda i: (i, 0)),
                  pl.BlockSpec((1, p_p), lambda i: (0, 0)),
                  pl.BlockSpec((1, p_p), lambda i: (0, 0)),
                  pl.BlockSpec((9 * p_p, p_p), lambda i: (0, 0)),
                  pl.BlockSpec((HW, 1), lambda i: (0, 0))],
        out_specs=(pl.BlockSpec((HW, p_p), lambda i: (i, 0)),
                   pl.BlockSpec((8, p_p), lambda i: (i, 0))),
        scratch_shapes=[pltpu.VMEM((HW + 2 * top, p_p), jnp.bfloat16)],
        compiler_params=_cparams(),
    )(z1, scale1, bias1, w2, wpos)
    scale2, bias2 = _scale_bias(st2, M, g2, b2)

    # ---- stage 3: fused BN2+ReLU -> conv3 (1x1) + BN3 partial stats ----------
    z3, st3 = pl.pallas_call(
        _make_stage3_kernel(M, tm, needs_mask),
        out_shape=(jax.ShapeDtypeStruct((m_pad, c4_p), jnp.bfloat16),
                   jax.ShapeDtypeStruct((nt * 8, c4_p), jnp.float32)),
        grid=(nt,),
        in_specs=[pl.BlockSpec((tm, p_p), lambda i: (i, 0)),
                  pl.BlockSpec((1, p_p), lambda i: (0, 0)),
                  pl.BlockSpec((1, p_p), lambda i: (0, 0)),
                  pl.BlockSpec((p_p, c4_p), lambda i: (0, 0))],
        out_specs=(pl.BlockSpec((tm, c4_p), lambda i: (i, 0)),
                   pl.BlockSpec((8, c4_p), lambda i: (i, 0))),
        compiler_params=_cparams(),
    )(z2, scale2, bias2, w3)
    scale3, bias3 = _scale_bias(st3, M, g3, b3)

    # ---- stage 4: BN3 + residual add/ReLU + skip_add_relu epilogue -----------
    out = pl.pallas_call(
        _finalize_kernel,
        out_shape=jax.ShapeDtypeStruct((m_pad, c4_p), jnp.bfloat16),
        grid=(nt,),
        in_specs=[pl.BlockSpec((tm, c4_p), lambda i: (i, 0)),
                  pl.BlockSpec((tm, c4_p), lambda i: (i, 0)),
                  pl.BlockSpec((1, c4_p), lambda i: (0, 0)),
                  pl.BlockSpec((1, c4_p), lambda i: (0, 0))],
        out_specs=pl.BlockSpec((tm, c4_p), lambda i: (i, 0)),
        compiler_params=_cparams(),
    )(z3, x_flat, scale3, bias3)

    # Tail: slice off padding, back to NCHW f32.  (If the downstream block uses
    # this same kernel family, keep the padded (M, c4_p) bf16 slab instead.)
    out = out[:M, :Cout].astype(jnp.float32).reshape(N, H, W, Cout)
    return jnp.transpose(out, (0, 3, 1, 2))


# --------------------------------------------------------------------------- #
# Pure-JAX reference (NCHW, training-mode BN with affine) for validation
# --------------------------------------------------------------------------- #
def _reference_forward(x, params):
    def bn(z, g, b):
        m = z.mean(axis=(0, 2, 3), keepdims=True)
        v = ((z - m) ** 2).mean(axis=(0, 2, 3), keepdims=True)
        zn = (z - m) * jax.lax.rsqrt(v + EPS)
        return zn * g[None, :, None, None] + b[None, :, None, None]

    dn = ("NCHW", "OIHW", "NCHW")
    w1 = params["w1"].T[:, :, None, None]                      # (P, Cin, 1, 1)
    w2 = jnp.transpose(params["w2"], (3, 2, 0, 1))              # (P, P, 3, 3)
    w3 = params["w3"].T[:, :, None, None]                       # (4P, P, 1, 1)

    out = jax.nn.relu(bn(jax.lax.conv_general_dilated(
        x, w1, (1, 1), "VALID", dimension_numbers=dn), params["g1"], params["b1"]))
    out = jax.nn.relu(bn(jax.lax.conv_general_dilated(
        out, w2, (1, 1), ((1, 1), (1, 1)), dimension_numbers=dn),
        params["g2"], params["b2"]))
    out = bn(jax.lax.conv_general_dilated(
        out, w3, (1, 1), "VALID", dimension_numbers=dn), params["g3"], params["b3"])
    out = jax.nn.relu(out + x)
    return jax.nn.relu(out + x)


if __name__ == "__main__":
    # Small Bottleneck: inplanes=16, planes=4 (expansion 4), batch=2, spatial=16.
    inplanes, planes = 16, 4
    N, H, W = 2, 16, 16

    key = jax.random.PRNGKey(0)
    k = jax.random.split(key, 10)
    params = {
        "w1": jax.random.normal(k[0], (inplanes, planes), jnp.float32) * 0.1,
        "g1": 1.0 + 0.2 * jax.random.normal(k[1], (planes,), jnp.float32),
        "b1": 0.1 * jax.random.normal(k[2], (planes,), jnp.float32),
        "w2": jax.random.normal(k[3], (3, 3, planes, planes), jnp.float32) * 0.1,
        "g2": 1.0 + 0.2 * jax.random.normal(k[4], (planes,), jnp.float32),
        "b2": 0.1 * jax.random.normal(k[5], (planes,), jnp.float32),
        "w3": jax.random.normal(k[6], (planes, 4 * planes), jnp.float32) * 0.1,
        "g3": 1.0 + 0.2 * jax.random.normal(k[7], (4 * planes,), jnp.float32),
        "b3": 0.1 * jax.random.normal(k[8], (4 * planes,), jnp.float32),
    }
    x = jax.random.normal(k[9], (N, inplanes, H, W), jnp.float32)

    out = jax.block_until_ready(jax.jit(bottleneck_forward)(x, params))
    ref = jax.block_until_ready(_reference_forward(x, params))

    assert out.shape == (N, inplanes, H, W)
    # bf16 MXU inputs + bf16 storage of x/z1/z2/z3/output => ~1e-2-level deviations vs f32.
    assert jnp.allclose(out, ref, rtol=5e-2, atol=5e-2), "mismatch vs reference"
    print("KERNEL_OK")
</pallas_src>

<mosaic_0001>
module attributes {stable_mosaic.version = 11 : i64} {
  func.func @_stage1_kernel(%arg0: i32, %arg1: memref<512x128xbf16, #tpu.memory_space<vmem>>, %arg2: memref<128x128xbf16, #tpu.memory_space<vmem>>, %arg3: memref<512x128xbf16, #tpu.memory_space<vmem>>, %arg4: memref<8x128xf32, #tpu.memory_space<vmem>>) attributes {dimension_semantics = [#tpu.dimension_semantics<parallel>], iteration_bounds = array<i64: 1>, scalar_prefetch = 0 : i64, scratch_operands = 0 : i64, tpu.core_type = #tpu.core_type<tc>, window_params = [{transform_indices = @transform_0, window_bounds = array<i64: 512, 128>}, {pipeline_mode = #tpu.pipeline_mode<synchronous>, transform_indices = @transform_1, window_bounds = array<i64: 128, 128>}, {transform_indices = @transform_2, window_bounds = array<i64: 512, 128>}, {transform_indices = @transform_3, window_bounds = array<i64: 8, 128>}]} {
    %c0 = arith.constant 0 : index
    %c0_0 = arith.constant 0 : index
    %0 = vector.load %arg1[%c0, %c0_0] : memref<512x128xbf16, #tpu.memory_space<vmem>>, vector<512x128xbf16>
    %c0_1 = arith.constant 0 : index
    %c0_2 = arith.constant 0 : index
    %1 = vector.load %arg2[%c0_1, %c0_2] : memref<128x128xbf16, #tpu.memory_space<vmem>>, vector<128x128xbf16>
    %cst = arith.constant dense<0.000000e+00> : vector<512x128xf32>
    %2 = tpu.matmul %0, %1, %cst {dimension_numbers = #tpu.dot_dimension_numbers<[1], [0], [0], [1], [0, 0, 1, 1], [], []>} : vector<512x128xbf16>, vector<128x128xbf16>, vector<512x128xf32> -> vector<512x128xf32>
    %3 = arith.truncf %2 : vector<512x128xf32> to vector<512x128xbf16>
    %c0_3 = arith.constant 0 : index
    %c0_4 = arith.constant 0 : index
    %4 = vector.load %arg3[%c0_3, %c0_4] : memref<512x128xbf16, #tpu.memory_space<vmem>>, vector<512x128xbf16>
    tpu.vector_store %arg3[%c0_3, %c0_4], %3 {strides = array<i32>} : memref<512x128xbf16, #tpu.memory_space<vmem>>, vector<512x128xbf16>,
    %cst_5 = arith.constant dense<0.000000e+00> : vector<128xf32>
    %5 = vector.multi_reduction <add>, %2, %cst_5 [0] : vector<512x128xf32> to vector<128xf32>
    %6 = vector.shape_cast %5 : vector<128xf32> to vector<1x128xf32>
    %7 = arith.mulf %2, %2 : vector<512x128xf32>
    %cst_6 = arith.constant dense<0.000000e+00> : vector<128xf32>
    %8 = vector.multi_reduction <add>, %7, %cst_6 [0] : vector<512x128xf32> to vector<128xf32>
    %9 = vector.shape_cast %8 : vector<128xf32> to vector<1x128xf32>
    %10 = tpu.iota {dimensions = array<i32: 0>} : vector<8x1xi32>
    %c0_i32 = arith.constant 0 : i32
    %11 = vector.broadcast %c0_i32 : i32 to vector<8x1xi32>
    %12 = arith.cmpi eq, %10, %11 : vector<8x1xi32>
    %c1_i32 = arith.constant 1 : i32
    %13 = vector.broadcast %c1_i32 : i32 to vector<8x1xi32>
    %14 = arith.cmpi eq, %10, %13 : vector<8x1xi32>
    %cst_7 = arith.constant 0.000000e+00 : f32
    %15 = vector.shape_cast %14 : vector<8x1xi1> to vector<8x1xi1>
    %16 = vector.broadcast %15 : vector<8x1xi1> to vector<8x128xi1>
    %17 = vector.shape_cast %9 : vector<1x128xf32> to vector<1x128xf32>
    %18 = vector.broadcast %17 : vector<1x128xf32> to vector<8x128xf32>
    %19 = vector.broadcast %cst_7 : f32 to vector<8x128xf32>
    %20 = arith.select %16, %18, %19 : vector<8x128xi1>, vector<8x128xf32>
    %21 = vector.shape_cast %12 : vector<8x1xi1> to vector<8x1xi1>
    %22 = vector.broadcast %21 : vector<8x1xi1> to vector<8x128xi1>
    %23 = vector.shape_cast %6 : vector<1x128xf32> to vector<1x128xf32>
    %24 = vector.broadcast %23 : vector<1x128xf32> to vector<8x128xf32>
    %25 = arith.select %22, %24, %20 : vector<8x128xi1>, vector<8x128xf32>
    %c0_8 = arith.constant 0 : index
    %c0_9 = arith.constant 0 : index
    %26 = vector.load %arg4[%c0_8, %c0_9] : memref<8x128xf32, #tpu.memory_space<vmem>>, vector<8x128xf32>
    tpu.vector_store %arg4[%c0_8, %c0_9], %25 {strides = array<i32>} : memref<8x128xf32, #tpu.memory_space<vmem>>, vector<8x128xf32>,
    return
  }
  func.func @transform_0(%arg0: i32) -> (i32, i32) {
    %c0_i32 = arith.constant 0 : i32
    %c0_i32_0 = arith.constant 0 : i32
    return %arg0, %c0_i32 : i32, i32
  }
  func.func @transform_1(%arg0: i32) -> (i32, i32) {
    %c0_i32 = arith.constant 0 : i32
    %c0_i32_0 = arith.constant 0 : i32
    %c0_i32_1 = arith.constant 0 : i32
    return %c0_i32, %c0_i32_0 : i32, i32
  }
  func.func @transform_2(%arg0: i32) -> (i32, i32) {
    %c0_i32 = arith.constant 0 : i32
    %c0_i32_0 = arith.constant 0 : i32
    return %arg0, %c0_i32 : i32, i32
  }
  func.func @transform_3(%arg0: i32) -> (i32, i32) {
    %c0_i32 = arith.constant 0 : i32
    %c0_i32_0 = arith.constant 0 : i32
    return %arg0, %c0_i32 : i32, i32
  }
}

module attributes {stable_mosaic.version = 11 : i64} {
  func.func @kernel(%arg0: i32, %arg1: memref<256x128xbf16, #tpu.memory_space<vmem>>, %arg2: memref<1x128xf32, #tpu.memory_space<vmem>>, %arg3: memref<1x128xf32, #tpu.memory_space<vmem>>, %arg4: memref<1152x128xbf16, #tpu.memory_space<vmem>>, %arg5: memref<256x1xf32, #tpu.memory_space<vmem>>, %arg6: memref<256x128xbf16, #tpu.memory_space<vmem>>, %arg7: memref<8x128xf32, #tpu.memory_space<vmem>>, %arg8: memref<304x128xbf16, #tpu.memory_space<vmem>>) attributes {dimension_semantics = [#tpu.dimension_semantics<parallel>], iteration_bounds = array<i64: 2>, scalar_prefetch = 0 : i64, scratch_operands = 1 : i64, tpu.core_type = #tpu.core_type<tc>, window_params = [{transform_indices = @transform_0, window_bounds = array<i64: 256, 128>}, {pipeline_mode = #tpu.pipeline_mode<synchronous>, transform_indices = @transform_1, window_bounds = array<i64: 1, 128>}, {pipeline_mode = #tpu.pipeline_mode<synchronous>, transform_indices = @transform_2, window_bounds = array<i64: 1, 128>}, {pipeline_mode = #tpu.pipeline_mode<synchronous>, transform_indices = @transform_3, window_bounds = array<i64: 1152, 128>}, {pipeline_mode = #tpu.pipeline_mode<synchronous>, transform_indices = @transform_4, window_bounds = array<i64: 256, 1>}, {transform_indices = @transform_5, window_bounds = array<i64: 256, 128>}, {transform_indices = @transform_6, window_bounds = array<i64: 8, 128>}]} {
    %c0 = arith.constant 0 : index
    %c0_0 = arith.constant 0 : index
    %0 = vector.load %arg1[%c0, %c0_0] : memref<256x128xbf16, #tpu.memory_space<vmem>>, vector<256x128xbf16>
    %1 = arith.extf %0 : vector<256x128xbf16> to vector<256x128xf32>
    %c0_1 = arith.constant 0 : index
    %c0_2 = arith.constant 0 : index
    %2 = vector.load %arg2[%c0_1, %c0_2] : memref<1x128xf32, #tpu.memory_space<vmem>>, vector<1x128xf32>
    %3 = vector.broadcast %2 : vector<1x128xf32> to vector<256x128xf32>
    %4 = arith.mulf %1, %3 : vector<256x128xf32>
    %c0_3 = arith.constant 0 : index
    %c0_4 = arith.constant 0 : index
    %5 = vector.load %arg3[%c0_3, %c0_4] : memref<1x128xf32, #tpu.memory_space<vmem>>, vector<1x128xf32>
    %6 = vector.broadcast %5 : vector<1x128xf32> to vector<256x128xf32>
    %7 = arith.addf %4, %6 : vector<256x128xf32>
    %cst = arith.constant 0.000000e+00 : f32
    %8 = vector.broadcast %cst : f32 to vector<256x128xf32>
    %9 = arith.maximumf %7, %8 : vector<256x128xf32>
    %cst_5 = arith.constant 0.000000e+00 : bf16
    %10 = vector.broadcast %cst_5 : bf16 to vector<24x128xbf16>
    %c0_6 = arith.constant 0 : index
    %c0_7 = arith.constant 0 : index
    %11 = vector.load %arg8[%c0_6, %c0_7] : memref<304x128xbf16, #tpu.memory_space<vmem>>, vector<24x128xbf16>
    tpu.vector_store %arg8[%c0_6, %c0_7], %10 {strides = array<i32>} : memref<304x128xbf16, #tpu.memory_space<vmem>>, vector<24x128xbf16>,
    %c280 = arith.constant 280 : index
    %c0_8 = arith.constant 0 : index
    %12 = vector.load %arg8[%c280, %c0_8] : memref<304x128xbf16, #tpu.memory_space<vmem>>, vector<24x128xbf16>
    tpu.vector_store %arg8[%c280, %c0_8], %10 {strides = array<i32>} : memref<304x128xbf16, #tpu.memory_space<vmem>>, vector<24x128xbf16>,
    %13 = arith.truncf %9 : vector<256x128xf32> to vector<256x128xbf16>
    %c24 = arith.constant 24 : index
    %c0_9 = arith.constant 0 : index
    %14 = vector.load %arg8[%c24, %c0_9] : memref<304x128xbf16, #tpu.memory_space<vmem>>, vector<256x128xbf16>
    tpu.vector_store %arg8[%c24, %c0_9], %13 {strides = array<i32>} : memref<304x128xbf16, #tpu.memory_space<vmem>>, vector<256x128xbf16>,
    %c0_10 = arith.constant 0 : index
    %c0_11 = arith.constant 0 : index
    %15 = vector.load %arg5[%c0_10, %c0_11] : memref<256x1xf32, #tpu.memory_space<vmem>>, vector<256x1xf32>
    %cst_12 = arith.constant 1.000000e+00 : f32
    %16 = vector.broadcast %cst_12 : f32 to vector<256x1xf32>
    %17 = arith.cmpf oge, %15, %16 : vector<256x1xf32>
    %cst_13 = arith.constant 1.400000e+01 : f32
    %18 = vector.broadcast %cst_13 : f32 to vector<256x1xf32>
    %19 = arith.cmpf ole, %15, %18 : vector<256x1xf32>
    %c7 = arith.constant 7 : index
    %c0_14 = arith.constant 0 : index
    %20 = vector.load %arg8[%c7, %c0_14] : memref<304x128xbf16, #tpu.memory_space<vmem>>, vector<256x128xbf16>
    %cst_15 = arith.constant 0.000000e+00 : bf16
    %21 = vector.broadcast %cst_15 : bf16 to vector<256x128xbf16>
    %22 = vector.shape_cast %17 : vector<256x1xi1> to vector<256x1xi1>
    %23 = vector.broadcast %22 : vector<256x1xi1> to vector<256x128xi1>
    %24 = arith.select %23, %20, %21 : vector<256x128xi1>, vector<256x128xbf16>
    %c0_16 = arith.constant 0 : index
    %c0_17 = arith.constant 0 : index
    %25 = vector.load %arg4[%c0_16, %c0_17] : memref<1152x128xbf16, #tpu.memory_space<vmem>>, vector<128x128xbf16>
    %cst_18 = arith.constant dense<0.000000e+00> : vector<256x128xf32>
    %26 = tpu.matmul %24, %25, %cst_18 {dimension_numbers = #tpu.dot_dimension_numbers<[1], [0], [0], [1], [0, 0, 1, 1], [], []>} : vector<256x128xbf16>, vector<128x128xbf16>, vector<256x128xf32> -> vector<256x128xf32>
    %c8 = arith.constant 8 : index
    %c0_19 = arith.constant 0 : index
    %27 = vector.load %arg8[%c8, %c0_19] : memref<304x128xbf16, #tpu.memory_space<vmem>>, vector<256x128xbf16>
    %c128 = arith.constant 128 : index
    %c0_20 = arith.constant 0 : index
    %28 = vector.load %arg4[%c128, %c0_20] : memref<1152x128xbf16, #tpu.memory_space<vmem>>, vector<128x128xbf16>
    %cst_21 = arith.constant dense<0.000000e+00> : vector<256x128xf32>
    %29 = tpu.matmul %27, %28, %cst_21 {dimension_numbers = #tpu.dot_dimension_numbers<[1], [0], [0], [1], [0, 0, 1, 1], [], []>} : vector<256x128xbf16>, vector<128x128xbf16>, vector<256x128xf32> -> vector<256x128xf32>
    %30 = arith.addf %26, %29 : vector<256x128xf32>
    %c9 = arith.constant 9 : index
    %c0_22 = arith.constant 0 : index
    %31 = vector.load %arg8[%c9, %c0_22] : memref<304x128xbf16, #tpu.memory_space<vmem>>, vector<256x128xbf16>
    %cst_23 = arith.constant 0.000000e+00 : bf16
    %32 = vector.broadcast %cst_23 : bf16 to vector<256x128xbf16>
    %33 = vector.shape_cast %19 : vector<256x1xi1> to vector<256x1xi1>
    %34 = vector.broadcast %33 : vector<256x1xi1> to vector<256x128xi1>
    %35 = arith.select %34, %31, %32 : vector<256x128xi1>, vector<256x128xbf16>
    %c256 = arith.constant 256 : index
    %c0_24 = arith.constant 0 : index
    %36 = vector.load %arg4[%c256, %c0_24] : memref<1152x128xbf16, #tpu.memory_space<vmem>>, vector<128x128xbf16>
    %cst_25 = arith.constant dense<0.000000e+00> : vector<256x128xf32>
    %37 = tpu.matmul %35, %36, %cst_25 {dimension_numbers = #tpu.dot_dimension_numbers<[1], [0], [0], [1], [0, 0, 1, 1], [], []>} : vector<256x128xbf16>, vector<128x128xbf16>, vector<256x128xf32> -> vector<256x128xf32>
    %38 = arith.addf %30, %37 : vector<256x128xf32>
    %c23 = arith.constant 23 : index
    %c0_26 = arith.constant 0 : index
    %39 = vector.load %arg8[%c23, %c0_26] : memref<304x128xbf16, #tpu.memory_space<vmem>>, vector<256x128xbf16>
    %cst_27 = arith.constant 0.000000e+00 : bf16
    %40 = vector.broadcast %cst_27 : bf16 to vector<256x128xbf16>
    %41 = vector.shape_cast %17 : vector<256x1xi1> to vector<256x1xi1>
    %42 = vector.broadcast %41 : vector<256x1xi1> to vector<256x128xi1>
    %43 = arith.select %42, %39, %40 : vector<256x128xi1>, vector<256x128xbf16>
    %c384 = arith.constant 384 : index
    %c0_28 = arith.constant 0 : index
    %44 = vector.load %arg4[%c384, %c0_28] : memref<1152x128xbf16, #tpu.memory_space<vmem>>, vector<128x128xbf16>
    %cst_29 = arith.constant dense<0.000000e+00> : vector<256x128xf32>
    %45 = tpu.matmul %43, %44, %cst_29 {dimension_numbers = #tpu.dot_dimension_numbers<[1], [0], [0], [1], [0, 0, 1, 1], [], []>} : vector<256x128xbf16>, vector<128x128xbf16>, vector<256x128xf32> -> vector<256x128xf32>
    %46 = arith.addf %38, %45 : vector<256x128xf32>
    %c24_30 = arith.constant 24 : index
    %c0_31 = arith.constant 0 : index
    %47 = vector.load %arg8[%c24_30, %c0_31] : memref<304x128xbf16, #tpu.memory_space<vmem>>, vector<256x128xbf16>
    %c512 = arith.constant 512 : index
    %c0_32 = arith.constant 0 : index
    %48 = vector.load %arg4[%c512, %c0_32] : memref<1152x128xbf16, #tpu.memory_space<vmem>>, vector<128x128xbf16>
    %cst_33 = arith.constant dense<0.000000e+00> : vector<256x128xf32>
    %49 = tpu.matmul %47, %48, %cst_33 {dimension_numbers = #tpu.dot_dimension_numbers<[1], [0], [0], [1], [0, 0, 1, 1], [], []>} : vector<256x128xbf16>, vector<128x128xbf16>, vector<256x128xf32> -> vector<256x128xf32>
    %50 = arith.addf %46, %49 : vector<256x128xf32>
    %c25 = arith.constant 25 : index
    %c0_34 = arith.constant 0 : index
    %51 = vector.load %arg8[%c25, %c0_34] : memref<304x128xbf16, #tpu.memory_space<vmem>>, vector<256x128xbf16>
    %cst_35 = arith.constant 0.000000e+00 : bf16
    %52 = vector.broadcast %cst_35 : bf16 to vector<256x128xbf16>
    %53 = vector.shape_cast %19 : vector<256x1xi1> to vector<256x1xi1>
    %54 = vector.broadcast %53 : vector<256x1xi1> to vector<256x128xi1>
    %55 = arith.select %54, %51, %52 : vector<256x128xi1>, vector<256x128xbf16>
    %c640 = arith.constant 640 : index
    %c0_36 = arith.constant 0 : index
    %56 = vector.load %arg4[%c640, %c0_36] : memref<1152x128xbf16, #tpu.memory_space<vmem>>, vector<128x128xbf16>
    %cst_37 = arith.constant dense<0.000000e+00> : vector<256x128xf32>
    %57 = tpu.matmul %55, %56, %cst_37 {dimension_numbers = #tpu.dot_dimension_numbers<[1], [0], [0], [1], [0, 0, 1, 1], [], []>} : vector<256x128xbf16>, vector<128x128xbf16>, vector<256x128xf32> -> vector<256x128xf32>
    %58 = arith.addf %50, %57 : vector<256x128xf32>
    %c39 = arith.constant 39 : index
    %c0_38 = arith.constant 0 : index
    %59 = vector.load %arg8[%c39, %c0_38] : memref<304x128xbf16, #tpu.memory_space<vmem>>, vector<256x128xbf16>
    %cst_39 = arith.constant 0.000000e+00 : bf16
    %60 = vector.broadcast %cst_39 : bf16 to vector<256x128xbf16>
    %61 = vector.shape_cast %17 : vector<256x1xi1> to vector<256x1xi1>
    %62 = vector.broadcast %61 : vector<256x1xi1> to vector<256x128xi1>
    %63 = arith.select %62, %59, %60 : vector<256x128xi1>, vector<256x128xbf16>
    %c768 = arith.constant 768 : index
    %c0_40 = arith.constant 0 : index
    %64 = vector.load %arg4[%c768, %c0_40] : memref<1152x128xbf16, #tpu.memory_space<vmem>>, vector<128x128xbf16>
    %cst_41 = arith.constant dense<0.000000e+00> : vector<256x128xf32>
    %65 = tpu.matmul %63, %64, %cst_41 {dimension_numbers = #tpu.dot_dimension_numbers<[1], [0], [0], [1], [0, 0, 1, 1], [], []>} : vector<256x128xbf16>, vector<128x128xbf16>, vector<256x128xf32> -> vector<256x128xf32>
    %66 = arith.addf %58, %65 : vector<256x128xf32>
    %c40 = arith.constant 40 : index
    %c0_42 = arith.constant 0 : index
    %67 = vector.load %arg8[%c40, %c0_42] : memref<304x128xbf16, #tpu.memory_space<vmem>>, vector<256x128xbf16>
    %c896 = arith.constant 896 : index
    %c0_43 = arith.constant 0 : index
    %68 = vector.load %arg4[%c896, %c0_43] : memref<1152x128xbf16, #tpu.memory_space<vmem>>, vector<128x128xbf16>
    %cst_44 = arith.constant dense<0.000000e+00> : vector<256x128xf32>
    %69 = tpu.matmul %67, %68, %cst_44 {dimension_numbers = #tpu.dot_dimension_numbers<[1], [0], [0], [1], [0, 0, 1, 1], [], []>} : vector<256x128xbf16>, vector<128x128xbf16>, vector<256x128xf32> -> vector<256x128xf32>
    %70 = arith.addf %66, %69 : vector<256x128xf32>
    %c41 = arith.constant 41 : index
    %c0_45 = arith.constant 0 : index
    %71 = vector.load %arg8[%c41, %c0_45] : memref<304x128xbf16, #tpu.memory_space<vmem>>, vector<256x128xbf16>
    %cst_46 = arith.constant 0.000000e+00 : bf16
    %72 = vector.broadcast %cst_46 : bf16 to vector<256x128xbf16>
    %73 = vector.shape_cast %19 : vector<256x1xi1> to vector<256x1xi1>
    %74 = vector.broadcast %73 : vector<256x1xi1> to vector<256x128xi1>
    %75 = arith.select %74, %71, %72 : vector<256x128xi1>, vector<256x128xbf16>
    %c1024 = arith.constant 1024 : index
    %c0_47 = arith.constant 0 : index
    %76 = vector.load %arg4[%c1024, %c0_47] : memref<1152x128xbf16, #tpu.memory_space<vmem>>, vector<128x128xbf16>
    %cst_48 = arith.constant dense<0.000000e+00> : vector<256x128xf32>
    %77 = tpu.matmul %75, %76, %cst_48 {dimension_numbers = #tpu.dot_dimension_numbers<[1], [0], [0], [1], [0, 0, 1, 1], [], []>} : vector<256x128xbf16>, vector<128x128xbf16>, vector<256x128xf32> -> vector<256x128xf32>
    %78 = arith.addf %70, %77 : vector<256x128xf32>
    %79 = arith.truncf %78 : vector<256x128xf32> to vector<256x128xbf16>
    %c0_49 = arith.constant 0 : index
    %c0_50 = arith.constant 0 : index
    %80 = vector.load %arg6[%c0_49, %c0_50] : memref<256x128xbf16, #tpu.memory_space<vmem>>, vector<256x128xbf16>
    tpu.vector_store %arg6[%c0_49, %c0_50], %79 {strides = array<i32>} : memref<256x128xbf16, #tpu.memory_space<vmem>>, vector<256x128xbf16>,
    %cst_51 = arith.constant dense<0.000000e+00> : vector<128xf32>
    %81 = vector.multi_reduction <add>, %78, %cst_51 [0] : vector<256x128xf32> to vector<128xf32>
    %82 = vector.shape_cast %81 : vector<128xf32> to vector<1x128xf32>
    %83 = arith.mulf %78, %78 : vector<256x128xf32>
    %cst_52 = arith.constant dense<0.000000e+00> : vector<128xf32>
    %84 = vector.multi_reduction <add>, %83, %cst_52 [0] : vector<256x128xf32> to vector<128xf32>
    %85 = vector.shape_cast %84 : vector<128xf32> to vector<1x128xf32>
    %86 = tpu.iota {dimensions = array<i32: 0>} : vector<8x1xi32>
    %c0_i32 = arith.constant 0 : i32
    %87 = vector.broadcast %c0_i32 : i32 to vector<8x1xi32>
    %88 = arith.cmpi eq, %86, %87 : vector<8x1xi32>
    %c1_i32 = arith.constant 1 : i32
    %89 = vector.broadcast %c1_i32 : i32 to vector<8x1xi32>
    %90 = arith.cmpi eq, %86, %89 : vector<8x1xi32>
    %cst_53 = arith.constant 0.000000e+00 : f32
    %91 = vector.shape_cast %90 : vector<8x1xi1> to vector<8x1xi1>
    %92 = vector.broadcast %91 : vector<8x1xi1> to vector<8x128xi1>
    %93 = vector.shape_cast %85 : vector<1x128xf32> to vector<1x128xf32>
    %94 = vector.broadcast %93 : vector<1x128xf32> to vector<8x128xf32>
    %95 = vector.broadcast %cst_53 : f32 to vector<8x128xf32>
    %96 = arith.select %92, %94, %95 : vector<8x128xi1>, vector<8x128xf32>
    %97 = vector.shape_cast %88 : vector<8x1xi1> to vector<8x1xi1>
    %98 = vector.broadcast %97 : vector<8x1xi1> to vector<8x128xi1>
    %99 = vector.shape_cast %82 : vector<1x128xf32> to vector<1x128xf32>
    %100 = vector.broadcast %99 : vector<1x128xf32> to vector<8x128xf32>
    %101 = arith.select %98, %100, %96 : vector<8x128xi1>, vector<8x128xf32>
    %c0_54 = arith.constant 0 : index
    %c0_55 = arith.constant 0 : index
    %102 = vector.load %arg7[%c0_54, %c0_55] : memref<8x128xf32, #tpu.memory_space<vmem>>, vector<8x128xf32>
    tpu.vector_store %arg7[%c0_54, %c0_55], %101 {strides = array<i32>} : memref<8x128xf32, #tpu.memory_space<vmem>>, vector<8x128xf32>,
    return
  }
  func.func @transform_0(%arg0: i32) -> (i32, i32) {
    %c0_i32 = arith.constant 0 : i32
    %c0_i32_0 = arith.constant 0 : i32
    return %arg0, %c0_i32 : i32, i32
  }
  func.func @transform_1(%arg0: i32) -> (i32, i32) {
    %c0_i32 = arith.constant 0 : i32
    %c0_i32_0 = arith.constant 0 : i32
    %c0_i32_1 = arith.constant 0 : i32
    return %c0_i32, %c0_i32_0 : i32, i32
  }
  func.func @transform_2(%arg0: i32) -> (i32, i32) {
    %c0_i32 = arith.constant 0 : i32
    %c0_i32_0 = arith.constant 0 : i32
    %c0_i32_1 = arith.constant 0 : i32
    return %c0_i32, %c0_i32_0 : i32, i32
  }
  func.func @transform_3(%arg0: i32) -> (i32, i32) {
    %c0_i32 = arith.constant 0 : i32
    %c0_i32_0 = arith.constant 0 : i32
    %c0_i32_1 = arith.constant 0 : i32
    return %c0_i32, %c0_i32_0 : i32, i32
  }
  func.func @transform_4(%arg0: i32) -> (i32, i32) {
    %c0_i32 = arith.constant 0 : i32
    %c0_i32_0 = arith.constant 0 : i32
    %c0_i32_1 = arith.constant 0 : i32
    return %c0_i32, %c0_i32_0 : i32, i32
  }
  func.func @transform_5(%arg0: i32) -> (i32, i32) {
    %c0_i32 = arith.constant 0 : i32
    %c0_i32_0 = arith.constant 0 : i32
    return %arg0, %c0_i32 : i32, i32
  }
  func.func @transform_6(%arg0: i32) -> (i32, i32) {
    %c0_i32 = arith.constant 0 : i32
    %c0_i32_0 = arith.constant 0 : i32
    return %arg0, %c0_i32 : i32, i32
  }
}

module attributes {stable_mosaic.version = 11 : i64} {
  func.func @kernel(%arg0: i32, %arg1: memref<512x128xbf16, #tpu.memory_space<vmem>>, %arg2: memref<1x128xf32, #tpu.memory_space<vmem>>, %arg3: memref<1x128xf32, #tpu.memory_space<vmem>>, %arg4: memref<128x128xbf16, #tpu.memory_space<vmem>>, %arg5: memref<512x128xbf16, #tpu.memory_space<vmem>>, %arg6: memref<8x128xf32, #tpu.memory_space<vmem>>) attributes {dimension_semantics = [#tpu.dimension_semantics<parallel>], iteration_bounds = array<i64: 1>, scalar_prefetch = 0 : i64, scratch_operands = 0 : i64, tpu.core_type = #tpu.core_type<tc>, window_params = [{transform_indices = @transform_0, window_bounds = array<i64: 512, 128>}, {pipeline_mode = #tpu.pipeline_mode<synchronous>, transform_indices = @transform_1, window_bounds = array<i64: 1, 128>}, {pipeline_mode = #tpu.pipeline_mode<synchronous>, transform_indices = @transform_2, window_bounds = array<i64: 1, 128>}, {pipeline_mode = #tpu.pipeline_mode<synchronous>, transform_indices = @transform_3, window_bounds = array<i64: 128, 128>}, {transform_indices = @transform_4, window_bounds = array<i64: 512, 128>}, {transform_indices = @transform_5, window_bounds = array<i64: 8, 128>}]} {
    %c0 = arith.constant 0 : index
    %c0_0 = arith.constant 0 : index
    %0 = vector.load %arg1[%c0, %c0_0] : memref<512x128xbf16, #tpu.memory_space<vmem>>, vector<512x128xbf16>
    %1 = arith.extf %0 : vector<512x128xbf16> to vector<512x128xf32>
    %c0_1 = arith.constant 0 : index
    %c0_2 = arith.constant 0 : index
    %2 = vector.load %arg2[%c0_1, %c0_2] : memref<1x128xf32, #tpu.memory_space<vmem>>, vector<1x128xf32>
    %3 = vector.broadcast %2 : vector<1x128xf32> to vector<512x128xf32>
    %4 = arith.mulf %1, %3 : vector<512x128xf32>
    %c0_3 = arith.constant 0 : index
    %c0_4 = arith.constant 0 : index
    %5 = vector.load %arg3[%c0_3, %c0_4] : memref<1x128xf32, #tpu.memory_space<vmem>>, vector<1x128xf32>
    %6 = vector.broadcast %5 : vector<1x128xf32> to vector<512x128xf32>
    %7 = arith.addf %4, %6 : vector<512x128xf32>
    %cst = arith.constant 0.000000e+00 : f32
    %8 = vector.broadcast %cst : f32 to vector<512x128xf32>
    %9 = arith.maximumf %7, %8 : vector<512x128xf32>
    %10 = arith.truncf %9 : vector<512x128xf32> to vector<512x128xbf16>
    %c0_5 = arith.constant 0 : index
    %c0_6 = arith.constant 0 : index
    %11 = vector.load %arg4[%c0_5, %c0_6] : memref<128x128xbf16, #tpu.memory_space<vmem>>, vector<128x128xbf16>
    %cst_7 = arith.constant dense<0.000000e+00> : vector<512x128xf32>
    %12 = tpu.matmul %10, %11, %cst_7 {dimension_numbers = #tpu.dot_dimension_numbers<[1], [0], [0], [1], [0, 0, 1, 1], [], []>} : vector<512x128xbf16>, vector<128x128xbf16>, vector<512x128xf32> -> vector<512x128xf32>
    %13 = arith.truncf %12 : vector<512x128xf32> to vector<512x128xbf16>
    %c0_8 = arith.constant 0 : index
    %c0_9 = arith.constant 0 : index
    %14 = vector.load %arg5[%c0_8, %c0_9] : memref<512x128xbf16, #tpu.memory_space<vmem>>, vector<512x128xbf16>
    tpu.vector_store %arg5[%c0_8, %c0_9], %13 {strides = array<i32>} : memref<512x128xbf16, #tpu.memory_space<vmem>>, vector<512x128xbf16>,
    %cst_10 = arith.constant dense<0.000000e+00> : vector<128xf32>
    %15 = vector.multi_reduction <add>, %12, %cst_10 [0] : vector<512x128xf32> to vector<128xf32>
    %16 = vector.shape_cast %15 : vector<128xf32> to vector<1x128xf32>
    %17 = arith.mulf %12, %12 : vector<512x128xf32>
    %cst_11 = arith.constant dense<0.000000e+00> : vector<128xf32>
    %18 = vector.multi_reduction <add>, %17, %cst_11 [0] : vector<512x128xf32> to vector<128xf32>
    %19 = vector.shape_cast %18 : vector<128xf32> to vector<1x128xf32>
    %20 = tpu.iota {dimensions = array<i32: 0>} : vector<8x1xi32>
    %c0_i32 = arith.constant 0 : i32
    %21 = vector.broadcast %c0_i32 : i32 to vector<8x1xi32>
    %22 = arith.cmpi eq, %20, %21 : vector<8x1xi32>
    %c1_i32 = arith.constant 1 : i32
    %23 = vector.broadcast %c1_i32 : i32 to vector<8x1xi32>
    %24 = arith.cmpi eq, %20, %23 : vector<8x1xi32>
    %cst_12 = arith.constant 0.000000e+00 : f32
    %25 = vector.shape_cast %24 : vector<8x1xi1> to vector<8x1xi1>
    %26 = vector.broadcast %25 : vector<8x1xi1> to vector<8x128xi1>
    %27 = vector.shape_cast %19 : vector<1x128xf32> to vector<1x128xf32>
    %28 = vector.broadcast %27 : vector<1x128xf32> to vector<8x128xf32>
    %29 = vector.broadcast %cst_12 : f32 to vector<8x128xf32>
    %30 = arith.select %26, %28, %29 : vector<8x128xi1>, vector<8x128xf32>
    %31 = vector.shape_cast %22 : vector<8x1xi1> to vector<8x1xi1>
    %32 = vector.broadcast %31 : vector<8x1xi1> to vector<8x128xi1>
    %33 = vector.shape_cast %16 : vector<1x128xf32> to vector<1x128xf32>
    %34 = vector.broadcast %33 : vector<1x128xf32> to vector<8x128xf32>
    %35 = arith.select %32, %34, %30 : vector<8x128xi1>, vector<8x128xf32>
    %c0_13 = arith.constant 0 : index
    %c0_14 = arith.constant 0 : index
    %36 = vector.load %arg6[%c0_13, %c0_14] : memref<8x128xf32, #tpu.memory_space<vmem>>, vector<8x128xf32>
    tpu.vector_store %arg6[%c0_13, %c0_14], %35 {strides = array<i32>} : memref<8x128xf32, #tpu.memory_space<vmem>>, vector<8x128xf32>,
    return
  }
  func.func @transform_0(%arg0: i32) -> (i32, i32) {
    %c0_i32 = arith.constant 0 : i32
    %c0_i32_0 = arith.constant 0 : i32
    return %arg0, %c0_i32 : i32, i32
  }
  func.func @transform_1(%arg0: i32) -> (i32, i32) {
    %c0_i32 = arith.constant 0 : i32
    %c0_i32_0 = arith.constant 0 : i32
    %c0_i32_1 = arith.constant 0 : i32
    return %c0_i32, %c0_i32_0 : i32, i32
  }
  func.func @transform_2(%arg0: i32) -> (i32, i32) {
    %c0_i32 = arith.constant 0 : i32
    %c0_i32_0 = arith.constant 0 : i32
    %c0_i32_1 = arith.constant 0 : i32
    return %c0_i32, %c0_i32_0 : i32, i32
  }
  func.func @transform_3(%arg0: i32) -> (i32, i32) {
    %c0_i32 = arith.constant 0 : i32
    %c0_i32_0 = arith.constant 0 : i32
    %c0_i32_1 = arith.constant 0 : i32
    return %c0_i32, %c0_i32_0 : i32, i32
  }
  func.func @transform_4(%arg0: i32) -> (i32, i32) {
    %c0_i32 = arith.constant 0 : i32
    %c0_i32_0 = arith.constant 0 : i32
    return %arg0, %c0_i32 : i32, i32
  }
  func.func @transform_5(%arg0: i32) -> (i32, i32) {
    %c0_i32 = arith.constant 0 : i32
    %c0_i32_0 = arith.constant 0 : i32
    return %arg0, %c0_i32 : i32, i32
  }
}

module attributes {stable_mosaic.version = 11 : i64} {
  func.func @_finalize_kernel(%arg0: i32, %arg1: memref<512x128xbf16, #tpu.memory_space<vmem>>, %arg2: memref<512x128xbf16, #tpu.memory_space<vmem>>, %arg3: memref<1x128xf32, #tpu.memory_space<vmem>>, %arg4: memref<1x128xf32, #tpu.memory_space<vmem>>, %arg5: memref<512x128xbf16, #tpu.memory_space<vmem>>) attributes {dimension_semantics = [#tpu.dimension_semantics<parallel>], iteration_bounds = array<i64: 1>, scalar_prefetch = 0 : i64, scratch_operands = 0 : i64, tpu.core_type = #tpu.core_type<tc>, window_params = [{transform_indices = @transform_0, window_bounds = array<i64: 512, 128>}, {transform_indices = @transform_1, window_bounds = array<i64: 512, 128>}, {pipeline_mode = #tpu.pipeline_mode<synchronous>, transform_indices = @transform_2, window_bounds = array<i64: 1, 128>}, {pipeline_mode = #tpu.pipeline_mode<synchronous>, transform_indices = @transform_3, window_bounds = array<i64: 1, 128>}, {transform_indices = @transform_4, window_bounds = array<i64: 512, 128>}]} {
    %c0 = arith.constant 0 : index
    %c0_0 = arith.constant 0 : index
    %0 = vector.load %arg1[%c0, %c0_0] : memref<512x128xbf16, #tpu.memory_space<vmem>>, vector<512x128xbf16>
    %1 = arith.extf %0 : vector<512x128xbf16> to vector<512x128xf32>
    %c0_1 = arith.constant 0 : index
    %c0_2 = arith.constant 0 : index
    %2 = vector.load %arg3[%c0_1, %c0_2] : memref<1x128xf32, #tpu.memory_space<vmem>>, vector<1x128xf32>
    %3 = vector.broadcast %2 : vector<1x128xf32> to vector<512x128xf32>
    %4 = arith.mulf %1, %3 : vector<512x128xf32>
    %c0_3 = arith.constant 0 : index
    %c0_4 = arith.constant 0 : index
    %5 = vector.load %arg4[%c0_3, %c0_4] : memref<1x128xf32, #tpu.memory_space<vmem>>, vector<1x128xf32>
    %6 = vector.broadcast %5 : vector<1x128xf32> to vector<512x128xf32>
    %7 = arith.addf %4, %6 : vector<512x128xf32>
    %c0_5 = arith.constant 0 : index
    %c0_6 = arith.constant 0 : index
    %8 = vector.load %arg2[%c0_5, %c0_6] : memref<512x128xbf16, #tpu.memory_space<vmem>>, vector<512x128xbf16>
    %9 = arith.extf %8 : vector<512x128xbf16> to vector<512x128xf32>
    %10 = arith.addf %7, %9 : vector<512x128xf32>
    %cst = arith.constant 0.000000e+00 : f32
    %11 = vector.broadcast %cst : f32 to vector<512x128xf32>
    %12 = arith.maximumf %10, %11 : vector<512x128xf32>
    %13 = arith.addf %12, %9 : vector<512x128xf32>
    %cst_7 = arith.constant 0.000000e+00 : f32
    %14 = vector.broadcast %cst_7 : f32 to vector<512x128xf32>
    %15 = arith.maximumf %13, %14 : vector<512x128xf32>
    %16 = arith.truncf %15 : vector<512x128xf32> to vector<512x128xbf16>
    %c0_8 = arith.constant 0 : index
    %c0_9 = arith.constant 0 : index
    %17 = vector.load %arg5[%c0_8, %c0_9] : memref<512x128xbf16, #tpu.memory_space<vmem>>, vector<512x128xbf16>
    tpu.vector_store %arg5[%c0_8, %c0_9], %16 {strides = array<i32>} : memref<512x128xbf16, #tpu.memory_space<vmem>>, vector<512x128xbf16>,
    return
  }
  func.func @transform_0(%arg0: i32) -> (i32, i32) {
    %c0_i32 = arith.constant 0 : i32
    %c0_i32_0 = arith.constant 0 : i32
    return %arg0, %c0_i32 : i32, i32
  }
  func.func @transform_1(%arg0: i32) -> (i32, i32) {
    %c0_i32 = arith.constant 0 : i32
    %c0_i32_0 = arith.constant 0 : i32
    return %arg0, %c0_i32 : i32, i32
  }
  func.func @transform_2(%arg0: i32) -> (i32, i32) {
    %c0_i32 = arith.constant 0 : i32
    %c0_i32_0 = arith.constant 0 : i32
    %c0_i32_1 = arith.constant 0 : i32
    return %c0_i32, %c0_i32_0 : i32, i32
  }
  func.func @transform_3(%arg0: i32) -> (i32, i32) {
    %c0_i32 = arith.constant 0 : i32
    %c0_i32_0 = arith.constant 0 : i32
    %c0_i32_1 = arith.constant 0 : i32
    return %c0_i32, %c0_i32_0 : i32, i32
  }
  func.func @transform_4(%arg0: i32) -> (i32, i32) {
    %c0_i32 = arith.constant 0 : i32
    %c0_i32_0 = arith.constant 0 : i32
    return %arg0, %c0_i32 : i32, i32
  }
}

</mosaic_0001>

<bundles_post_ra>
// kernel: tile.0
= control target key start
LH: loop header
LB: loop body
LE: loop exit
PB: predicated region body
PF: predicated region fallthrough
CT: control target
= control target key end

     0   :  { %vm3_vm0 = vcmask 7168   ;;  %s550_s10 = smov 127   ;;  %s551_s27 = smov 125   ;;  %s1092_s0 = inlined_call_operand.vmem [shape: f32[16,16], index: 0, kind: input, shape index: {}]   ;;  %s1093_s1 = inlined_call_operand.vmem [shape: f32[256,1], index: 1, kind: output, shape index: {}]  }
   0x1   :  { %v44_v0 = vld [vmem:[%s1092_s0] sm:$0xff]   ;;  %v412_v1 = vld [vmem:[%s1092_s0 + $0x8] sm:$0xff]   ;;  %s549_s0 = smov 126   ;;  %s552_s28 = smov 124  }
   0x2   :  { %45 = vrot.lane.b32.xlu1 %v44_v0, %s549_s0  ;;  %20 = vrot.lane.b32.xlu0 %v44_v0, %s550_s10  ;;  %4 = vst.msk [vmem:[%s1093_s1] ss:$16 sm:$0x3] %vm3_vm0, %v44_v0   ;;  %5 = vst.msk [vmem:[%s1093_s1] ss:$16 sm:$0xc] %vm3_vm0, %v44_v0  }
   0x3   :  { %6 = vst.msk [vmem:[%s1093_s1] ss:$16 sm:$0x30] %vm3_vm0, %v44_v0   ;;  %7 = vst.msk [vmem:[%s1093_s1] ss:$16 sm:$0xc0] %vm3_vm0, %v44_v0  }
   0x4   :  { %395 = vst.msk [vmem:[%s1093_s1 + $0x80] ss:$16 sm:$0x3] %vm3_vm0, %v412_v1   ;;  %396 = vst.msk [vmem:[%s1093_s1 + $0x80] ss:$16 sm:$0xc] %vm3_vm0, %v412_v1  }
   0x5   :  { %397 = vst.msk [vmem:[%s1093_s1 + $0x80] ss:$16 sm:$0x30] %vm3_vm0, %v412_v1   ;;  %398 = vst.msk [vmem:[%s1093_s1 + $0x80] ss:$16 sm:$0xc0] %vm3_vm0, %v412_v1  }
   0x6   :  { %58 = vrot.lane.b32.xlu1 %v412_v1, %s549_s0  ;;  %33 = vrot.lane.b32.xlu0 %v412_v1, %s550_s10  ;;  %s553_s29 = smov 123   ;;  %s554_s30 = smov 122  }
   0x7   :  { %s555_s2 = smov 121   ;;  %s556_s3 = smov 120  }
   0x8   :  { %s557_s4 = smov 119   ;;  %s558_s5 = smov 118  }
   0x9   :  { %s559_s6 = smov 117   ;;  %s560_s7 = smov 116  }
   0xa   :  { %83 = vrot.lane.b32.xlu1 %v412_v1, %s551_s27  ;;  %70 = vrot.lane.b32.xlu0 %v44_v0, %s551_s27  ;;  %s561_s8 = smov 115   ;;  %s562_s9 = smov 114  }
   0xb   :  { %s563_s0 = smov 113  }
   0xe   :  { %108 = vrot.lane.b32.xlu1 %v412_v1, %s552_s28  ;;  %95 = vrot.lane.b32.xlu0 %v44_v0, %s552_s28 }
  0x12   :  { %133 = vrot.lane.b32.xlu1 %v412_v1, %s553_s29  ;;  %120 = vrot.lane.b32.xlu0 %v44_v0, %s553_s29 }
  0x16   :  { %158 = vrot.lane.b32.xlu1 %v412_v1, %s554_s30  ;;  %145 = vrot.lane.b32.xlu0 %v44_v0, %s554_s30 }
  0x1a   :  { %183 = vrot.lane.b32.xlu1 %v412_v1, %s555_s2  ;;  %170 = vrot.lane.b32.xlu0 %v44_v0, %s555_s2 }
  0x1e   :  { %208 = vrot.lane.b32.xlu1 %v412_v1, %s556_s3  ;;  %195 = vrot.lane.b32.xlu0 %v44_v0, %s556_s3 }
  0x22   :  { %233 = vrot.lane.b32.xlu1 %v412_v1, %s557_s4  ;;  %220 = vrot.lane.b32.xlu0 %v44_v0, %s557_s4 }
  0x26   :  { %258 = vrot.lane.b32.xlu1 %v412_v1, %s558_s5  ;;  %245 = vrot.lane.b32.xlu0 %v44_v0, %s558_s5 }
  0x2a   :  { %283 = vrot.lane.b32.xlu1 %v412_v1, %s559_s6  ;;  %270 = vrot.lane.b32.xlu0 %v44_v0, %s559_s6 }
  0x2e   :  { %308 = vrot.lane.b32.xlu1 %v412_v1, %s560_s7  ;;  %295 = vrot.lane.b32.xlu0 %v44_v0, %s560_s7 }
  0x32   :  { %333 = vrot.lane.b32.xlu1 %v412_v1, %s561_s8  ;;  %320 = vrot.lane.b32.xlu0 %v44_v0, %s561_s8 }
  0x36   :  { %358 = vrot.lane.b32.xlu1 %v412_v1, %s562_s9  ;;  %345 = vrot.lane.b32.xlu0 %v44_v0, %s562_s9 }
  0x3a   :  { %383 = vrot.lane.b32.xlu1 %v412_v1, %s563_s0  ;;  %370 = vrot.lane.b32.xlu0 %v44_v0, %s563_s0 }
  0x74   :  { %v46_v2 = vpop.permute.xlu1 %45   ;;  %v21_v3 = vpop.permute.xlu0 %20  }
  0x75   :  { %408 = vst.msk [vmem:[%s1093_s1 + $0x2] ss:$16 sm:$0x3] %vm3_vm0, %v46_v2   ;;  %409 = vst.msk [vmem:[%s1093_s1 + $0x2] ss:$16 sm:$0xc] %vm3_vm0, %v46_v2  }
  0x76   :  { %410 = vst.msk [vmem:[%s1093_s1 + $0x2] ss:$16 sm:$0x30] %vm3_vm0, %v46_v2   ;;  %411 = vst.msk [vmem:[%s1093_s1 + $0x2] ss:$16 sm:$0xc0] %vm3_vm0, %v46_v2  }
  0x77   :  { %399 = vst.msk [vmem:[%s1093_s1 + $0x1] ss:$16 sm:$0x3] %vm3_vm0, %v21_v3   ;;  %400 = vst.msk [vmem:[%s1093_s1 + $0x1] ss:$16 sm:$0xc] %vm3_vm0, %v21_v3  }
  0x78   :  { %401 = vst.msk [vmem:[%s1093_s1 + $0x1] ss:$16 sm:$0x30] %vm3_vm0, %v21_v3   ;;  %402 = vst.msk [vmem:[%s1093_s1 + $0x1] ss:$16 sm:$0xc0] %vm3_vm0, %v21_v3   ;;  %v59_v4 = vpop.permute.xlu1 %58   ;;  %v34_v5 = vpop.permute.xlu0 %33  }
  0x79   :  { %413 = vst.msk [vmem:[%s1093_s1 + $0x82] ss:$16 sm:$0x3] %vm3_vm0, %v59_v4   ;;  %414 = vst.msk [vmem:[%s1093_s1 + $0x82] ss:$16 sm:$0xc] %vm3_vm0, %v59_v4  }
  0x7a   :  { %415 = vst.msk [vmem:[%s1093_s1 + $0x82] ss:$16 sm:$0x30] %vm3_vm0, %v59_v4   ;;  %416 = vst.msk [vmem:[%s1093_s1 + $0x82] ss:$16 sm:$0xc0] %vm3_vm0, %v59_v4  }
  0x7b   :  { %404 = vst.msk [vmem:[%s1093_s1 + $0x81] ss:$16 sm:$0x3] %vm3_vm0, %v34_v5   ;;  %405 = vst.msk [vmem:[%s1093_s1 + $0x81] ss:$16 sm:$0xc] %vm3_vm0, %v34_v5  }
  0x7c   :  { %406 = vst.msk [vmem:[%s1093_s1 + $0x81] ss:$16 sm:$0x30] %vm3_vm0, %v34_v5   ;;  %407 = vst.msk [vmem:[%s1093_s1 + $0x81] ss:$16 sm:$0xc0] %vm3_vm0, %v34_v5   ;;  %v84_v6 = vpop.permute.xlu1 %83   ;;  %v71_v7 = vpop.permute.xlu0 %70  }
  0x7d   :  { %422 = vst.msk [vmem:[%s1093_s1 + $0x83] ss:$16 sm:$0x3] %vm3_vm0, %v84_v6   ;;  %423 = vst.msk [vmem:[%s1093_s1 + $0x83] ss:$16 sm:$0xc] %vm3_vm0, %v84_v6  }
  0x7e   :  { %424 = vst.msk [vmem:[%s1093_s1 + $0x83] ss:$16 sm:$0x30] %vm3_vm0, %v84_v6   ;;  %425 = vst.msk [vmem:[%s1093_s1 + $0x83] ss:$16 sm:$0xc0] %vm3_vm0, %v84_v6  }
  0x7f   :  { %417 = vst.msk [vmem:[%s1093_s1 + $0x3] ss:$16 sm:$0x3] %vm3_vm0, %v71_v7   ;;  %418 = vst.msk [vmem:[%s1093_s1 + $0x3] ss:$16 sm:$0xc] %vm3_vm0, %v71_v7  }
  0x80   :  { %419 = vst.msk [vmem:[%s1093_s1 + $0x3] ss:$16 sm:$0x30] %vm3_vm0, %v71_v7   ;;  %420 = vst.msk [vmem:[%s1093_s1 + $0x3] ss:$16 sm:$0xc0] %vm3_vm0, %v71_v7   ;;  %v109_v8 = vpop.permute.xlu1 %108   ;;  %v96_v9 = vpop.permute.xlu0 %95  }
  0x81   :  { %431 = vst.msk [vmem:[%s1093_s1 + $0x84] ss:$16 sm:$0x3] %vm3_vm0, %v109_v8   ;;  %432 = vst.msk [vmem:[%s1093_s1 + $0x84] ss:$16 sm:$0xc] %vm3_vm0, %v109_v8  }
  0x82   :  { %433 = vst.msk [vmem:[%s1093_s1 + $0x84] ss:$16 sm:$0x30] %vm3_vm0, %v109_v8   ;;  %434 = vst.msk [vmem:[%s1093_s1 + $0x84] ss:$16 sm:$0xc0] %vm3_vm0, %v109_v8  }
  0x83   :  { %426 = vst.msk [vmem:[%s1093_s1 + $0x4] ss:$16 sm:$0x3] %vm3_vm0, %v96_v9   ;;  %427 = vst.msk [vmem:[%s1093_s1 + $0x4] ss:$16 sm:$0xc] %vm3_vm0, %v96_v9  }
  0x84   :  { %428 = vst.msk [vmem:[%s1093_s1 + $0x4] ss:$16 sm:$0x30] %vm3_vm0, %v96_v9   ;;  %429 = vst.msk [vmem:[%s1093_s1 + $0x4] ss:$16 sm:$0xc0] %vm3_vm0, %v96_v9   ;;  %v134_v10 = vpop.permute.xlu1 %133   ;;  %v121_v11 = vpop.permute.xlu0 %120  }
  0x85   :  { %440 = vst.msk [vmem:[%s1093_s1 + $0x85] ss:$16 sm:$0x3] %vm3_vm0, %v134_v10   ;;  %441 = vst.msk [vmem:[%s1093_s1 + $0x85] ss:$16 sm:$0xc] %vm3_vm0, %v134_v10  }
  0x86   :  { %442 = vst.msk [vmem:[%s1093_s1 + $0x85] ss:$16 sm:$0x30] %vm3_vm0, %v134_v10   ;;  %443 = vst.msk [vmem:[%s1093_s1 + $0x85] ss:$16 sm:$0xc0] %vm3_vm0, %v134_v10  }
  0x87   :  { %435 = vst.msk [vmem:[%s1093_s1 + $0x5] ss:$16 sm:$0x3] %vm3_vm0, %v121_v11   ;;  %436 = vst.msk [vmem:[%s1093_s1 + $0x5] ss:$16 sm:$0xc] %vm3_vm0, %v121_v11  }
  0x88   :  { %437 = vst.msk [vmem:[%s1093_s1 + $0x5] ss:$16 sm:$0x30] %vm3_vm0, %v121_v11   ;;  %438 = vst.msk [vmem:[%s1093_s1 + $0x5] ss:$16 sm:$0xc0] %vm3_vm0, %v121_v11   ;;  %v159_v12 = vpop.permute.xlu1 %158   ;;  %v146_v13 = vpop.permute.xlu0 %145  }
  0x89   :  { %449 = vst.msk [vmem:[%s1093_s1 + $0x86] ss:$16 sm:$0x3] %vm3_vm0, %v159_v12   ;;  %450 = vst.msk [vmem:[%s1093_s1 + $0x86] ss:$16 sm:$0xc] %vm3_vm0, %v159_v12  }
  0x8a   :  { %451 = vst.msk [vmem:[%s1093_s1 + $0x86] ss:$16 sm:$0x30] %vm3_vm0, %v159_v12   ;;  %452 = vst.msk [vmem:[%s1093_s1 + $0x86] ss:$16 sm:$0xc0] %vm3_vm0, %v159_v12  }
  0x8b   :  { %444 = vst.msk [vmem:[%s1093_s1 + $0x6] ss:$16 sm:$0x3] %vm3_vm0, %v146_v13   ;;  %445 = vst.msk [vmem:[%s1093_s1 + $0x6] ss:$16 sm:$0xc] %vm3_vm0, %v146_v13  }
  0x8c   :  { %446 = vst.msk [vmem:[%s1093_s1 + $0x6] ss:$16 sm:$0x30] %vm3_vm0, %v146_v13   ;;  %447 = vst.msk [vmem:[%s1093_s1 + $0x6] ss:$16 sm:$0xc0] %vm3_vm0, %v146_v13   ;;  %v184_v14 = vpop.permute.xlu1 %183   ;;  %v171_v15 = vpop.permute.xlu0 %170  }
  0x8d   :  { %458 = vst.msk [vmem:[%s1093_s1 + $0x87] ss:$16 sm:$0x3] %vm3_vm0, %v184_v14   ;;  %459 = vst.msk [vmem:[%s1093_s1 + $0x87] ss:$16 sm:$0xc] %vm3_vm0, %v184_v14  }
  0x8e   :  { %460 = vst.msk [vmem:[%s1093_s1 + $0x87] ss:$16 sm:$0x30] %vm3_vm0, %v184_v14   ;;  %461 = vst.msk [vmem:[%s1093_s1 + $0x87] ss:$16 sm:$0xc0] %vm3_vm0, %v184_v14  }
  0x8f   :  { %453 = vst.msk [vmem:[%s1093_s1 + $0x7] ss:$16 sm:$0x3] %vm3_vm0, %v171_v15   ;;  %454 = vst.msk [vmem:[%s1093_s1 + $0x7] ss:$16 sm:$0xc] %vm3_vm0, %v171_v15  }
  0x90   :  { %455 = vst.msk [vmem:[%s1093_s1 + $0x7] ss:$16 sm:$0x30] %vm3_vm0, %v171_v15   ;;  %456 = vst.msk [vmem:[%s1093_s1 + $0x7] ss:$16 sm:$0xc0] %vm3_vm0, %v171_v15   ;;  %v209_v16 = vpop.permute.xlu1 %208   ;;  %v196_v17 = vpop.permute.xlu0 %195  }
  0x91   :  { %467 = vst.msk [vmem:[%s1093_s1 + $0x88] ss:$16 sm:$0x3] %vm3_vm0, %v209_v16   ;;  %468 = vst.msk [vmem:[%s1093_s1 + $0x88] ss:$16 sm:$0xc] %vm3_vm0, %v209_v16  }
  0x92   :  { %469 = vst.msk [vmem:[%s1093_s1 + $0x88] ss:$16 sm:$0x30] %vm3_vm0, %v209_v16   ;;  %470 = vst.msk [vmem:[%s1093_s1 + $0x88] ss:$16 sm:$0xc0] %vm3_vm0, %v209_v16  }
  0x93   :  { %462 = vst.msk [vmem:[%s1093_s1 + $0x8] ss:$16 sm:$0x3] %vm3_vm0, %v196_v17   ;;  %463 = vst.msk [vmem:[%s1093_s1 + $0x8] ss:$16 sm:$0xc] %vm3_vm0, %v196_v17  }
  0x94   :  { %464 = vst.msk [vmem:[%s1093_s1 + $0x8] ss:$16 sm:$0x30] %vm3_vm0, %v196_v17   ;;  %465 = vst.msk [vmem:[%s1093_s1 + $0x8] ss:$16 sm:$0xc0] %vm3_vm0, %v196_v17   ;;  %v234_v18 = vpop.permute.xlu1 %233   ;;  %v221_v19 = vpop.permute.xlu0 %220  }
  0x95   :  { %476 = vst.msk [vmem:[%s1093_s1 + $0x89] ss:$16 sm:$0x3] %vm3_vm0, %v234_v18   ;;  %477 = vst.msk [vmem:[%s1093_s1 + $0x89] ss:$16 sm:$0xc] %vm3_vm0, %v234_v18  }
  0x96   :  { %478 = vst.msk [vmem:[%s1093_s1 + $0x89] ss:$16 sm:$0x30] %vm3_vm0, %v234_v18   ;;  %479 = vst.msk [vmem:[%s1093_s1 + $0x89] ss:$16 sm:$0xc0] %vm3_vm0, %v234_v18  }
  0x97   :  { %471 = vst.msk [vmem:[%s1093_s1 + $0x9] ss:$16 sm:$0x3] %vm3_vm0, %v221_v19   ;;  %472 = vst.msk [vmem:[%s1093_s1 + $0x9] ss:$16 sm:$0xc] %vm3_vm0, %v221_v19  }
  0x98   :  { %473 = vst.msk [vmem:[%s1093_s1 + $0x9] ss:$16 sm:$0x30] %vm3_vm0, %v221_v19   ;;  %474 = vst.msk [vmem:[%s1093_s1 + $0x9] ss:$16 sm:$0xc0] %vm3_vm0, %v221_v19   ;;  %v259_v20 = vpop.permute.xlu1 %258   ;;  %v246_v21 = vpop.permute.xlu0 %245  }
  0x99   :  { %485 = vst.msk [vmem:[%s1093_s1 + $0x8a] ss:$16 sm:$0x3] %vm3_vm0, %v259_v20   ;;  %486 = vst.msk [vmem:[%s1093_s1 + $0x8a] ss:$16 sm:$0xc] %vm3_vm0, %v259_v20  }
  0x9a   :  { %487 = vst.msk [vmem:[%s1093_s1 + $0x8a] ss:$16 sm:$0x30] %vm3_vm0, %v259_v20   ;;  %488 = vst.msk [vmem:[%s1093_s1 + $0x8a] ss:$16 sm:$0xc0] %vm3_vm0, %v259_v20  }
  0x9b   :  { %480 = vst.msk [vmem:[%s1093_s1 + $0xa] ss:$16 sm:$0x3] %vm3_vm0, %v246_v21   ;;  %481 = vst.msk [vmem:[%s1093_s1 + $0xa] ss:$16 sm:$0xc] %vm3_vm0, %v246_v21  }
  0x9c   :  { %482 = vst.msk [vmem:[%s1093_s1 + $0xa] ss:$16 sm:$0x30] %vm3_vm0, %v246_v21   ;;  %483 = vst.msk [vmem:[%s1093_s1 + $0xa] ss:$16 sm:$0xc0] %vm3_vm0, %v246_v21   ;;  %v284_v22 = vpop.permute.xlu1 %283   ;;  %v271_v23 = vpop.permute.xlu0 %270  }
  0x9d   :  { %494 = vst.msk [vmem:[%s1093_s1 + $0x8b] ss:$16 sm:$0x3] %vm3_vm0, %v284_v22   ;;  %495 = vst.msk [vmem:[%s1093_s1 + $0x8b] ss:$16 sm:$0xc] %vm3_vm0, %v284_v22  }
  0x9e   :  { %496 = vst.msk [vmem:[%s1093_s1 + $0x8b] ss:$16 sm:$0x30] %vm3_vm0, %v284_v22   ;;  %497 = vst.msk [vmem:[%s1093_s1 + $0x8b] ss:$16 sm:$0xc0] %vm3_vm0, %v284_v22  }
  0x9f   :  { %489 = vst.msk [vmem:[%s1093_s1 + $0xb] ss:$16 sm:$0x3] %vm3_vm0, %v271_v23   ;;  %490 = vst.msk [vmem:[%s1093_s1 + $0xb] ss:$16 sm:$0xc] %vm3_vm0, %v271_v23  }
  0xa0   :  { %491 = vst.msk [vmem:[%s1093_s1 + $0xb] ss:$16 sm:$0x30] %vm3_vm0, %v271_v23   ;;  %492 = vst.msk [vmem:[%s1093_s1 + $0xb] ss:$16 sm:$0xc0] %vm3_vm0, %v271_v23   ;;  %v309_v24 = vpop.permute.xlu1 %308   ;;  %v296_v25 = vpop.permute.xlu0 %295  }
  0xa1   :  { %503 = vst.msk [vmem:[%s1093_s1 + $0x8c] ss:$16 sm:$0x3] %vm3_vm0, %v309_v24   ;;  %504 = vst.msk [vmem:[%s1093_s1 + $0x8c] ss:$16 sm:$0xc] %vm3_vm0, %v309_v24  }
  0xa2   :  { %505 = vst.msk [vmem:[%s1093_s1 + $0x8c] ss:$16 sm:$0x30] %vm3_vm0, %v309_v24   ;;  %506 = vst.msk [vmem:[%s1093_s1 + $0x8c] ss:$16 sm:$0xc0] %vm3_vm0, %v309_v24  }
  0xa3   :  { %498 = vst.msk [vmem:[%s1093_s1 + $0xc] ss:$16 sm:$0x3] %vm3_vm0, %v296_v25   ;;  %499 = vst.msk [vmem:[%s1093_s1 + $0xc] ss:$16 sm:$0xc] %vm3_vm0, %v296_v25  }
  0xa4   :  { %500 = vst.msk [vmem:[%s1093_s1 + $0xc] ss:$16 sm:$0x30] %vm3_vm0, %v296_v25   ;;  %501 = vst.msk [vmem:[%s1093_s1 + $0xc] ss:$16 sm:$0xc0] %vm3_vm0, %v296_v25   ;;  %v334_v26 = vpop.permute.xlu1 %333   ;;  %v321_v27 = vpop.permute.xlu0 %320  }
  0xa5   :  { %512 = vst.msk [vmem:[%s1093_s1 + $0x8d] ss:$16 sm:$0x3] %vm3_vm0, %v334_v26   ;;  %513 = vst.msk [vmem:[%s1093_s1 + $0x8d] ss:$16 sm:$0xc] %vm3_vm0, %v334_v26  }
  0xa6   :  { %514 = vst.msk [vmem:[%s1093_s1 + $0x8d] ss:$16 sm:$0x30] %vm3_vm0, %v334_v26   ;;  %515 = vst.msk [vmem:[%s1093_s1 + $0x8d] ss:$16 sm:$0xc0] %vm3_vm0, %v334_v26  }
  0xa7   :  { %507 = vst.msk [vmem:[%s1093_s1 + $0xd] ss:$16 sm:$0x3] %vm3_vm0, %v321_v27   ;;  %508 = vst.msk [vmem:[%s1093_s1 + $0xd] ss:$16 sm:$0xc] %vm3_vm0, %v321_v27  }
  0xa8   :  { %509 = vst.msk [vmem:[%s1093_s1 + $0xd] ss:$16 sm:$0x30] %vm3_vm0, %v321_v27   ;;  %510 = vst.msk [vmem:[%s1093_s1 + $0xd] ss:$16 sm:$0xc0] %vm3_vm0, %v321_v27   ;;  %v359_v28 = vpop.permute.xlu1 %358   ;;  %v346_v29 = vpop.permute.xlu0 %345  }
  0xa9   :  { %521 = vst.msk [vmem:[%s1093_s1 + $0x8e] ss:$16 sm:$0x3] %vm3_vm0, %v359_v28   ;;  %522 = vst.msk [vmem:[%s1093_s1 + $0x8e] ss:$16 sm:$0xc] %vm3_vm0, %v359_v28  }
  0xaa   :  { %523 = vst.msk [vmem:[%s1093_s1 + $0x8e] ss:$16 sm:$0x30] %vm3_vm0, %v359_v28   ;;  %524 = vst.msk [vmem:[%s1093_s1 + $0x8e] ss:$16 sm:$0xc0] %vm3_vm0, %v359_v28  }
  0xab   :  { %516 = vst.msk [vmem:[%s1093_s1 + $0xe] ss:$16 sm:$0x3] %vm3_vm0, %v346_v29   ;;  %517 = vst.msk [vmem:[%s1093_s1 + $0xe] ss:$16 sm:$0xc] %vm3_vm0, %v346_v29  }
  0xac   :  { %518 = vst.msk [vmem:[%s1093_s1 + $0xe] ss:$16 sm:$0x30] %vm3_vm0, %v346_v29   ;;  %519 = vst.msk [vmem:[%s1093_s1 + $0xe] ss:$16 sm:$0xc0] %vm3_vm0, %v346_v29   ;;  %v384_v30 = vpop.permute.xlu1 %383   ;;  %v371_v31 = vpop.permute.xlu0 %370  }
  0xad   :  { %530 = vst.msk [vmem:[%s1093_s1 + $0x8f] ss:$16 sm:$0x3] %vm3_vm0, %v384_v30   ;;  %531 = vst.msk [vmem:[%s1093_s1 + $0x8f] ss:$16 sm:$0xc] %vm3_vm0, %v384_v30  }
  0xae   :  { %532 = vst.msk [vmem:[%s1093_s1 + $0x8f] ss:$16 sm:$0x30] %vm3_vm0, %v384_v30   ;;  %533 = vst.msk [vmem:[%s1093_s1 + $0x8f] ss:$16 sm:$0xc0] %vm3_vm0, %v384_v30  }
  0xaf   :  { %525 = vst.msk [vmem:[%s1093_s1 + $0xf] ss:$16 sm:$0x3] %vm3_vm0, %v371_v31   ;;  %526 = vst.msk [vmem:[%s1093_s1 + $0xf] ss:$16 sm:$0xc] %vm3_vm0, %v371_v31  }
  0xb0   :  { %527 = vst.msk [vmem:[%s1093_s1 + $0xf] ss:$16 sm:$0x30] %vm3_vm0, %v371_v31   ;;  %528 = vst.msk [vmem:[%s1093_s1 + $0xf] ss:$16 sm:$0xc0] %vm3_vm0, %v371_v31  }

// kernel: bottleneck_forward.4
= control target key start
LH: loop header
LB: loop body
LE: loop exit
PB: predicated region body
PF: predicated region fallthrough
CT: control target
= control target key end

     0   :  { %s2130_s1 = inlined_call_operand.vmem [shape: bf16[128,128], index: 1, kind: input, shape index: {}]   ;;  %s2131_s0 = inlined_call_operand.vmem [shape: bf16[512,128], index: 0, kind: input, shape index: {}]   ;;  %s2132_s2 = inlined_call_operand.vmem [shape: bf16[512,128], index: 2, kind: output, shape index: {0}]   ;;  %s2133_s3 = inlined_call_operand.vmem [shape: f32[8,128], index: 3, kind: output, shape index: {1}]  }
   0x1   :  { %v1659_v0 = vld [vmem:[%s2130_s1 + $0x38] sm:$0xff]   ;;  %v1660_v1 = vld [vmem:[%s2130_s1 + $0x30] sm:$0xff]   ;;  %v1661_v2 = vld [vmem:[%s2130_s1 + $0x28] sm:$0xff]  }
   0x2   :  { %1563 = vmatprep.subr.bf16.mxu0 %v1659_v0  ;;  %1643 = vmatprep.subr.bf16.mxu1 %v1659_v0  ;;  %v1662_v3 = vld [vmem:[%s2130_s1 + $0x20] sm:$0xff]   ;;  %v1663_v5 = vld [vmem:[%s2130_s1 + $0x18] sm:$0xff]   ;;  %v1664_v6 = vld [vmem:[%s2130_s1 + $0x10] sm:$0xff]  }
   0x3   :  { %1564 = vmatpush3.bf16.msra.mxu0 %v1659_v0  ;;  %1651 = vmatpush3.bf16.msra.mxu1 %v1659_v0  ;;  %v1667_v4 = vld [vmem:[%s2131_s0] sm:$0xff]   ;;  %v1665_v7 = vld [vmem:[%s2130_s1 + $0x8] sm:$0xff]   ;;  %v1669_v11 = vld [vmem:[%s2131_s0 + $0x10] sm:$0xff]  }
   0x4   :  { %1565 = vmatprep.subr.bf16.mxu0 %v1660_v1  ;;  %1644 = vmatprep.subr.bf16.mxu1 %v1660_v1  ;;  %v1666_v8 = vld [vmem:[%s2130_s1] sm:$0xff]   ;;  %v1668_v10 = vld [vmem:[%s2131_s0 + $0x8] sm:$0xff]   ;;  %v1685_v13 = vld [vmem:[%s2131_s0 + $0x90] sm:$0xff]  }
   0x5   :  { %1579 = vmatprep.mubr.bf16.mxu0 %v1667_v4  ;;  %v1683_v9 = vld [vmem:[%s2131_s0 + $0x80] sm:$0xff]   ;;  %v1684_v12 = vld [vmem:[%s2131_s0 + $0x88] sm:$0xff]   ;;  %v1670_v14 = vld [vmem:[%s2131_s0 + $0x18] sm:$0xff]  }
   0x6   :  { %1611 = vmatprep.mubr.bf16.mxu1 %v1683_v9  ;;  %v1671_v15 = vld [vmem:[%s2131_s0 + $0x20] sm:$0xff]   ;;  %v1686_v16 = vld [vmem:[%s2131_s0 + $0x98] sm:$0xff]   ;;  %v1672_v18 = vld [vmem:[%s2131_s0 + $0x28] sm:$0xff]  }
   0x7   :  { %1566 = vmatpush3.bf16.msra.mxu0 %v1660_v1  ;;  %1652 = vmatpush3.bf16.msra.mxu1 %v1660_v1  ;;  %v1687_v17 = vld [vmem:[%s2131_s0 + $0xa0] sm:$0xff]   ;;  %v1688_v19 = vld [vmem:[%s2131_s0 + $0xa8] sm:$0xff]   ;;  %v1673_v20 = vld [vmem:[%s2131_s0 + $0x30] sm:$0xff]  }
   0x8   :  { %1567 = vmatprep.subr.bf16.mxu0 %v1661_v2  ;;  %1645 = vmatprep.subr.bf16.mxu1 %v1661_v2  ;;  %v1689_v21 = vld [vmem:[%s2131_s0 + $0xb0] sm:$0xff]   ;;  %v1674_v22 = vld [vmem:[%s2131_s0 + $0x38] sm:$0xff]   ;;  %v1675_v24 = vld [vmem:[%s2131_s0 + $0x40] sm:$0xff]  }
   0x9   :  { %v1690_v23 = vld [vmem:[%s2131_s0 + $0xb8] sm:$0xff]   ;;  %v1691_v25 = vld [vmem:[%s2131_s0 + $0xc0] sm:$0xff]   ;;  %v1676_v26 = vld [vmem:[%s2131_s0 + $0x48] sm:$0xff]  }
   0xa   :  { %v1692_v27 = vld [vmem:[%s2131_s0 + $0xc8] sm:$0xff]   ;;  %v1677_v28 = vld [vmem:[%s2131_s0 + $0x50] sm:$0xff]   ;;  %v1678_v30 = vld [vmem:[%s2131_s0 + $0x58] sm:$0xff]  }
   0xb   :  { %1568 = vmatpush3.bf16.msra.mxu0 %v1661_v2  ;;  %1653 = vmatpush3.bf16.msra.mxu1 %v1661_v2  ;;  %v1693_v29 = vld [vmem:[%s2131_s0 + $0xd0] sm:$0xff]   ;;  %v1694_v31 = vld [vmem:[%s2131_s0 + $0xd8] sm:$0xff]   ;;  %v1679_v32 = vld [vmem:[%s2131_s0 + $0x60] sm:$0xff]  }
   0xc   :  { %1569 = vmatprep.subr.bf16.mxu0 %v1662_v3  ;;  %1646 = vmatprep.subr.bf16.mxu1 %v1662_v3  ;;  %v1695_v33 = vld [vmem:[%s2131_s0 + $0xe0] sm:$0xff]   ;;  %v1680_v34 = vld [vmem:[%s2131_s0 + $0x68] sm:$0xff]   ;;  %v1681_v36 = vld [vmem:[%s2131_s0 + $0x70] sm:$0xff]  }
   0xd   :  { %v1696_v35 = vld [vmem:[%s2131_s0 + $0xe8] sm:$0xff]   ;;  %v1697_v37 = vld [vmem:[%s2131_s0 + $0xf0] sm:$0xff]   ;;  %v1682_v38 = vld [vmem:[%s2131_s0 + $0x78] sm:$0xff]  }
   0xe   :  { %v1698_v39 = vld [vmem:[%s2131_s0 + $0xf8] sm:$0xff]  }
   0xf   :  { %1570 = vmatpush3.bf16.msra.mxu0 %v1662_v3  ;;  %1654 = vmatpush3.bf16.msra.mxu1 %v1662_v3 }
  0x10   :  { %1571 = vmatprep.subr.bf16.mxu0 %v1663_v5  ;;  %1647 = vmatprep.subr.bf16.mxu1 %v1663_v5 }
  0x13   :  { %1572 = vmatpush3.bf16.msra.mxu0 %v1663_v5  ;;  %1655 = vmatpush3.bf16.msra.mxu1 %v1663_v5 }
  0x14   :  { %1573 = vmatprep.subr.bf16.mxu0 %v1664_v6  ;;  %1648 = vmatprep.subr.bf16.mxu1 %v1664_v6 }
  0x17   :  { %1574 = vmatpush3.bf16.msra.mxu0 %v1664_v6  ;;  %1656 = vmatpush3.bf16.msra.mxu1 %v1664_v6 }
  0x18   :  { %1575 = vmatprep.subr.bf16.mxu0 %v1665_v7  ;;  %1649 = vmatprep.subr.bf16.mxu1 %v1665_v7 }
  0x1b   :  { %1576 = vmatpush3.bf16.msra.mxu0 %v1665_v7  ;;  %1657 = vmatpush3.bf16.msra.mxu1 %v1665_v7 }
  0x1c   :  { %1577 = vmatprep.subr.bf16.mxu0 %v1666_v8  ;;  %1650 = vmatprep.subr.bf16.mxu1 %v1666_v8 }
  0x1f   :  { %1578 = vmatpush3.bf16.msra.mxu0 %v1666_v8  ;;  %1658 = vmatpush3.bf16.msra.mxu1 %v1666_v8 }
  0x22   :  { %1580 = vmatmul.mubr.bf16.vlgmr.msra.gmra.mxu0 %v1668_v10  ;;  %1612 = vmatmul.mubr.bf16.vlgmr.msra.gmra.mxu1 %v1684_v12 }
  0x23   :  { %1583 = vmatprep.mubr.bf16.mxu0 %v1669_v11  ;;  %1615 = vmatprep.mubr.bf16.mxu1 %v1685_v13 }
  0x2a   :  { %1584 = vmatmul.mubr.bf16.gmra.mxu0 %v1670_v14  ;;  %1616 = vmatmul.mubr.bf16.gmra.mxu1 %v1686_v16 }
  0x2b   :  { %1587 = vmatprep.mubr.bf16.mxu0 %v1671_v15  ;;  %1619 = vmatprep.mubr.bf16.mxu1 %v1687_v17 }
  0x32   :  { %1588 = vmatmul.mubr.bf16.gmra.mxu0 %v1672_v18  ;;  %1620 = vmatmul.mubr.bf16.gmra.mxu1 %v1688_v19 }
  0x33   :  { %1591 = vmatprep.mubr.bf16.mxu0 %v1673_v20  ;;  %1623 = vmatprep.mubr.bf16.mxu1 %v1689_v21 }
  0x3a   :  { %1592 = vmatmul.mubr.bf16.gmra.mxu0 %v1674_v22  ;;  %1624 = vmatmul.mubr.bf16.gmra.mxu1 %v1690_v23 }
  0x3b   :  { %1595 = vmatprep.mubr.bf16.mxu0 %v1675_v24  ;;  %1627 = vmatprep.mubr.bf16.mxu1 %v1691_v25 }
  0x42   :  { %1596 = vmatmul.mubr.bf16.gmra.mxu0 %v1676_v26  ;;  %1628 = vmatmul.mubr.bf16.gmra.mxu1 %v1692_v27 }
  0x43   :  { %1599 = vmatprep.mubr.bf16.mxu0 %v1677_v28  ;;  %1631 = vmatprep.mubr.bf16.mxu1 %v1693_v29 }
  0x4a   :  { %1600 = vmatmul.mubr.bf16.gmra.mxu0 %v1678_v30  ;;  %1632 = vmatmul.mubr.bf16.gmra.mxu1 %v1694_v31 }
  0x4b   :  { %1603 = vmatprep.mubr.bf16.mxu0 %v1679_v32  ;;  %1635 = vmatprep.mubr.bf16.mxu1 %v1695_v33 }
  0x52   :  { %1604 = vmatmul.mubr.bf16.gmra.mxu0 %v1680_v34  ;;  %1636 = vmatmul.mubr.bf16.gmra.mxu1 %v1696_v35 }
  0x53   :  { %1607 = vmatprep.mubr.bf16.mxu0 %v1681_v36  ;;  %1639 = vmatprep.mubr.bf16.mxu1 %v1697_v37 }
  0x5a   :  { %1608 = vmatmul.mubr.bf16.gmra.mxu0 %v1682_v38  ;;  %1640 = vmatmul.mubr.bf16.gmra.mxu1 %v1698_v39 }
  0xe2   :  { %v1581_v40 = vpop.f32.mrf.mxu0  ;;  %v1839_v41 = vpop.f32.mrf.mxu1 }
  0xe3   :  { %v1014_v57 = vmul.f32 %v1581_v40, %v1581_v40 }
  0xe4   :  { %v368_v42 = vpop.f32.mrf.mxu0  ;;  %v1841_v43 = vpop.f32.mrf.mxu1 }
  0xe5   :  { %v1012_v48 = vmul.f32 %v368_v42, %v368_v42 }
  0xe6   :  { %v1582_v44 = vpop.f32.mrf.mxu0  ;;  %v1843_v45 = vpop.f32.mrf.mxu1 }
  0xe7   :  { %v1340_v46 = vpack.c.bf16 %v1582_v44, %v1581_v40  ;;  %v1420_v47 = vpack.c.bf16 %v1843_v45, %v1839_v41  ;;  %v1015_v62 = vmul.f32 %v1582_v44, %v1582_v44 }
  0xe8   :  { %v371_v49 = vpop.f32.mrf.mxu0  ;;  %v1847_v50 = vpop.f32.mrf.mxu1 }
  0xe9   :  { %1492 = vst [vmem:[%s2132_s2 + $0x8] sm:$0xff] %v1340_v46   ;;  %v1335_v51 = vpack.c.bf16 %v371_v49, %v368_v42  ;;  %v943_v52 = vadd.f32 %v371_v49, %v368_v42  ;;  %v1013_v53 = vmul.f32 %v371_v49, %v371_v49  ;;  %1508 = vst [vmem:[%s2132_s2 + $0x88] sm:$0xff] %v1420_v47  }
  0xea   :  { %v1415_v54 = vpack.c.bf16 %v1847_v50, %v1841_v43  ;;  %v1585_v55 = vpop.f32.mrf.mxu0  ;;  %v1857_v56 = vpop.f32.mrf.mxu1 }
  0xeb   :  { %1336 = vst [vmem:[%s2132_s2] sm:$0xff] %v1335_v51   ;;  %v944_v58 = vadd.f32 %v1581_v40, %v943_v52  ;;  %v1076_v59 = vadd.f32 %v1013_v53, %v1012_v48  ;;  %v1018_v17 = vmul.f32 %v1585_v55, %v1585_v55 }
  0xec   :  { %1507 = vst [vmem:[%s2132_s2 + $0x80] sm:$0xff] %v1415_v54   ;;  %v384_v60 = vpop.f32.mrf.mxu0  ;;  %v1865_v61 = vpop.f32.mrf.mxu1 }
  0xed   :  { %v1077_v63 = vadd.f32 %v1076_v59, %v1014_v57  ;;  %v945_v0 = vadd.f32 %v1582_v44, %v944_v58  ;;  %v1016_v4 = vmul.f32 %v384_v60, %v384_v60 }
  0xee   :  { %v1586_v1 = vpop.f32.mrf.mxu0  ;;  %v1867_v2 = vpop.f32.mrf.mxu1 }
  0xef   :  { %v946_v3 = vadd.f32 %v945_v0, %v384_v60  ;;  %v1078_v5 = vadd.f32 %v1077_v63, %v1015_v62  ;;  %v1350_v6 = vpack.c.bf16 %v1586_v1, %v1585_v55  ;;  %v1430_v8 = vpack.c.bf16 %v1867_v2, %v1857_v56 }
  0xf0   :  { %v387_v7 = vpop.f32.mrf.mxu0  ;;  %v1871_v9 = vpop.f32.mrf.mxu1  ;;  %v1019_v22 = vmul.f32 %v1586_v1, %v1586_v1 }
  0xf1   :  { %v1079_v10 = vadd.f32 %v1078_v5, %v1016_v4  ;;  %1494 = vst [vmem:[%s2132_s2 + $0x18] sm:$0xff] %v1350_v6   ;;  %v1345_v11 = vpack.c.bf16 %v387_v7, %v384_v60  ;;  %v947_v12 = vadd.f32 %v946_v3, %v387_v7  ;;  %v1017_v13 = vmul.f32 %v387_v7, %v387_v7 }
  0xf2   :  { %v1589_v14 = vpop.f32.mrf.mxu0  ;;  %1510 = vst [vmem:[%s2132_s2 + $0x98] sm:$0xff] %v1430_v8   ;;  %v1425_v15 = vpack.c.bf16 %v1871_v9, %v1865_v61  ;;  %v1881_v16 = vpop.f32.mrf.mxu1 }
  0xf3   :  { %1493 = vst [vmem:[%s2132_s2 + $0x10] sm:$0xff] %v1345_v11   ;;  %v948_v18 = vadd.f32 %v1585_v55, %v947_v12  ;;  %v1080_v19 = vadd.f32 %v1079_v10, %v1017_v13  ;;  %v1022_v42 = vmul.f32 %v1589_v14, %v1589_v14 }
  0xf4   :  { %v400_v20 = vpop.f32.mrf.mxu0  ;;  %1509 = vst [vmem:[%s2132_s2 + $0x90] sm:$0xff] %v1425_v15   ;;  %v1889_v21 = vpop.f32.mrf.mxu1 }
  0xf5   :  { %v1081_v23 = vadd.f32 %v1080_v19, %v1018_v17  ;;  %v949_v24 = vadd.f32 %v1586_v1, %v948_v18  ;;  %v1020_v28 = vmul.f32 %v400_v20, %v400_v20 }
  0xf6   :  { %v1590_v25 = vpop.f32.mrf.mxu0  ;;  %v1891_v26 = vpop.f32.mrf.mxu1 }
  0xf7   :  { %v950_v27 = vadd.f32 %v949_v24, %v400_v20  ;;  %v1082_v29 = vadd.f32 %v1081_v23, %v1019_v22  ;;  %v1360_v30 = vpack.c.bf16 %v1590_v25, %v1589_v14  ;;  %v1440_v32 = vpack.c.bf16 %v1891_v26, %v1881_v16 }
  0xf8   :  { %v403_v31 = vpop.f32.mrf.mxu0  ;;  %v1895_v33 = vpop.f32.mrf.mxu1  ;;  %v1023_v49 = vmul.f32 %v1590_v25, %v1590_v25 }
  0xf9   :  { %v1083_v34 = vadd.f32 %v1082_v29, %v1020_v28  ;;  %1496 = vst [vmem:[%s2132_s2 + $0x28] sm:$0xff] %v1360_v30   ;;  %v1355_v35 = vpack.c.bf16 %v403_v31, %v400_v20  ;;  %v951_v36 = vadd.f32 %v950_v27, %v403_v31  ;;  %v1021_v37 = vmul.f32 %v403_v31, %v403_v31 }
  0xfa   :  { %v1593_v38 = vpop.f32.mrf.mxu0  ;;  %1512 = vst [vmem:[%s2132_s2 + $0xa8] sm:$0xff] %v1440_v32   ;;  %v1435_v39 = vpack.c.bf16 %v1895_v33, %v1889_v21  ;;  %v1905_v40 = vpop.f32.mrf.mxu1 }
  0xfb   :  { %1495 = vst [vmem:[%s2132_s2 + $0x20] sm:$0xff] %v1355_v35   ;;  %v952_v44 = vadd.f32 %v1589_v14, %v951_v36  ;;  %v1084_v46 = vadd.f32 %v1083_v34, %v1021_v37  ;;  %v1026_v8 = vmul.f32 %v1593_v38, %v1593_v38 }
  0xfc   :  { %v416_v47 = vpop.f32.mrf.mxu0  ;;  %1511 = vst [vmem:[%s2132_s2 + $0xa0] sm:$0xff] %v1435_v39   ;;  %v1913_v48 = vpop.f32.mrf.mxu1 }
  0xfd   :  { %v1085_v51 = vadd.f32 %v1084_v46, %v1022_v42  ;;  %v953_v52 = vadd.f32 %v1590_v25, %v952_v44  ;;  %v1024_v57 = vmul.f32 %v416_v47, %v416_v47 }
  0xfe   :  { %v1594_v53 = vpop.f32.mrf.mxu0  ;;  %v1915_v54 = vpop.f32.mrf.mxu1 }
  0xff   :  { %v954_v55 = vadd.f32 %v953_v52, %v416_v47  ;;  %v1086_v58 = vadd.f32 %v1085_v51, %v1023_v49  ;;  %v1370_v59 = vpack.c.bf16 %v1594_v53, %v1593_v38  ;;  %v1450_v62 = vpack.c.bf16 %v1915_v54, %v1905_v40 }
 0x100   :  { %v419_v60 = vpop.f32.mrf.mxu0  ;;  %v1919_v63 = vpop.f32.mrf.mxu1  ;;  %v1027_v14 = vmul.f32 %v1594_v53, %v1594_v53 }
 0x101   :  { %v1087_v0 = vadd.f32 %v1086_v58, %v1024_v57  ;;  %1498 = vst [vmem:[%s2132_s2 + $0x38] sm:$0xff] %v1370_v59   ;;  %v1365_v1 = vpack.c.bf16 %v419_v60, %v416_v47  ;;  %v955_v3 = vadd.f32 %v954_v55, %v419_v60  ;;  %v1025_v4 = vmul.f32 %v419_v60, %v419_v60 }
 0x102   :  { %v1597_v5 = vpop.f32.mrf.mxu0  ;;  %1514 = vst [vmem:[%s2132_s2 + $0xb8] sm:$0xff] %v1450_v62   ;;  %v1445_v6 = vpack.c.bf16 %v1919_v63, %v1913_v48  ;;  %v1929_v7 = vpop.f32.mrf.mxu1 }
 0x103   :  { %1497 = vst [vmem:[%s2132_s2 + $0x30] sm:$0xff] %v1365_v1   ;;  %v956_v10 = vadd.f32 %v1593_v38, %v955_v3  ;;  %v1088_v11 = vadd.f32 %v1087_v0, %v1025_v4  ;;  %v1030_v37 = vmul.f32 %v1597_v5, %v1597_v5 }
 0x104   :  { %v432_v12 = vpop.f32.mrf.mxu0  ;;  %1513 = vst [vmem:[%s2132_s2 + $0xb0] sm:$0xff] %v1445_v6   ;;  %v1937_v13 = vpop.f32.mrf.mxu1 }
 0x105   :  { %v1089_v15 = vadd.f32 %v1088_v11, %v1026_v8  ;;  %v957_v17 = vadd.f32 %v1594_v53, %v956_v10  ;;  %v1028_v22 = vmul.f32 %v432_v12, %v432_v12 }
 0x106   :  { %v1598_v18 = vpop.f32.mrf.mxu0  ;;  %v1939_v19 = vpop.f32.mrf.mxu1 }
 0x107   :  { %v958_v20 = vadd.f32 %v957_v17, %v432_v12  ;;  %v1090_v23 = vadd.f32 %v1089_v15, %v1027_v14  ;;  %v1380_v24 = vpack.c.bf16 %v1598_v18, %v1597_v5  ;;  %v1460_v27 = vpack.c.bf16 %v1939_v19, %v1929_v7 }
 0x108   :  { %v435_v25 = vpop.f32.mrf.mxu0  ;;  %v1943_v28 = vpop.f32.mrf.mxu1  ;;  %v1031_v46 = vmul.f32 %v1598_v18, %v1598_v18 }
 0x109   :  { %v1091_v29 = vadd.f32 %v1090_v23, %v1028_v22  ;;  %1500 = vst [vmem:[%s2132_s2 + $0x48] sm:$0xff] %v1380_v24   ;;  %v1375_v30 = vpack.c.bf16 %v435_v25, %v432_v12  ;;  %v959_v31 = vadd.f32 %v958_v20, %v435_v25  ;;  %v1029_v32 = vmul.f32 %v435_v25, %v435_v25 }
 0x10a   :  { %v1601_v34 = vpop.f32.mrf.mxu0  ;;  %1516 = vst [vmem:[%s2132_s2 + $0xc8] sm:$0xff] %v1460_v27   ;;  %v1455_v35 = vpack.c.bf16 %v1943_v28, %v1937_v13  ;;  %v1953_v36 = vpop.f32.mrf.mxu1 }
 0x10b   :  { %1499 = vst [vmem:[%s2132_s2 + $0x40] sm:$0xff] %v1375_v30   ;;  %v960_v38 = vadd.f32 %v1597_v5, %v959_v31  ;;  %v1092_v39 = vadd.f32 %v1091_v29, %v1029_v32  ;;  %v1034_v10 = vmul.f32 %v1601_v34, %v1601_v34 }
 0x10c   :  { %v448_v42 = vpop.f32.mrf.mxu0  ;;  %1515 = vst [vmem:[%s2132_s2 + $0xc0] sm:$0xff] %v1455_v35   ;;  %v1961_v44 = vpop.f32.mrf.mxu1 }
 0x10d   :  { %v1093_v47 = vadd.f32 %v1092_v39, %v1030_v37  ;;  %v961_v49 = vadd.f32 %v1598_v18, %v960_v38  ;;  %v1032_v55 = vmul.f32 %v448_v42, %v448_v42 }
 0x10e   :  { %v1602_v51 = vpop.f32.mrf.mxu0  ;;  %v1963_v52 = vpop.f32.mrf.mxu1 }
 0x10f   :  { %v962_v53 = vadd.f32 %v961_v49, %v448_v42  ;;  %v1094_v57 = vadd.f32 %v1093_v47, %v1031_v46  ;;  %v1390_v58 = vpack.c.bf16 %v1602_v51, %v1601_v34  ;;  %v1470_v60 = vpack.c.bf16 %v1963_v52, %v1953_v36 }
 0x110   :  { %v451_v59 = vpop.f32.mrf.mxu0  ;;  %v1967_v62 = vpop.f32.mrf.mxu1  ;;  %v1035_v17 = vmul.f32 %v1602_v51, %v1602_v51 }
 0x111   :  { %v1095_v0 = vadd.f32 %v1094_v57, %v1032_v55  ;;  %1502 = vst [vmem:[%s2132_s2 + $0x58] sm:$0xff] %v1390_v58   ;;  %v1385_v1 = vpack.c.bf16 %v451_v59, %v448_v42  ;;  %v963_v3 = vadd.f32 %v962_v53, %v451_v59  ;;  %v1033_v4 = vmul.f32 %v451_v59, %v451_v59 }
 0x112   :  { %v1605_v5 = vpop.f32.mrf.mxu0  ;;  %1518 = vst [vmem:[%s2132_s2 + $0xd8] sm:$0xff] %v1470_v60   ;;  %v1465_v6 = vpack.c.bf16 %v1967_v62, %v1961_v44  ;;  %v1977_v8 = vpop.f32.mrf.mxu1 }
 0x113   :  { %1501 = vst [vmem:[%s2132_s2 + $0x50] sm:$0xff] %v1385_v1   ;;  %v964_v11 = vadd.f32 %v1601_v34, %v963_v3  ;;  %v1096_v12 = vadd.f32 %v1095_v0, %v1033_v4  ;;  %v1038_v47 = vmul.f32 %v1605_v5, %v1605_v5 }
 0x114   :  { %v464_v14 = vpop.f32.mrf.mxu0  ;;  %1517 = vst [vmem:[%s2132_s2 + $0xd0] sm:$0xff] %v1465_v6   ;;  %v1985_v15 = vpop.f32.mrf.mxu1 }
 0x115   :  { %v1097_v18 = vadd.f32 %v1096_v12, %v1034_v10  ;;  %v965_v20 = vadd.f32 %v1602_v51, %v964_v11  ;;  %v1036_v25 = vmul.f32 %v464_v14, %v464_v14 }
 0x116   :  { %v1606_v22 = vpop.f32.mrf.mxu0  ;;  %v1987_v23 = vpop.f32.mrf.mxu1 }
 0x117   :  { %v966_v24 = vadd.f32 %v965_v20, %v464_v14  ;;  %v1098_v27 = vadd.f32 %v1097_v18, %v1035_v17  ;;  %v1400_v29 = vpack.c.bf16 %v1606_v22, %v1605_v5  ;;  %v1480_v31 = vpack.c.bf16 %v1987_v23, %v1977_v8 }
 0x118   :  { %v467_v30 = vpop.f32.mrf.mxu0  ;;  %v1991_v32 = vpop.f32.mrf.mxu1  ;;  %v1039_v57 = vmul.f32 %v1606_v22, %v1606_v22 }
 0x119   :  { %v1099_v34 = vadd.f32 %v1098_v27, %v1036_v25  ;;  %1504 = vst [vmem:[%s2132_s2 + $0x68] sm:$0xff] %v1400_v29   ;;  %v1395_v35 = vpack.c.bf16 %v467_v30, %v464_v14  ;;  %v967_v37 = vadd.f32 %v966_v24, %v467_v30  ;;  %v1037_v38 = vmul.f32 %v467_v30, %v467_v30 }
 0x11a   :  { %v1609_v39 = vpop.f32.mrf.mxu0  ;;  %1520 = vst [vmem:[%s2132_s2 + $0xe8] sm:$0xff] %v1480_v31   ;;  %v1475_v42 = vpack.c.bf16 %v1991_v32, %v1985_v15  ;;  %v2001_v46 = vpop.f32.mrf.mxu1  ;;  %v1044_v31 = vmul.f32 %v1841_v43, %v1841_v43 }
 0x11b   :  { %1503 = vst [vmem:[%s2132_s2 + $0x60] sm:$0xff] %v1395_v35   ;;  %v968_v49 = vadd.f32 %v1605_v5, %v967_v37  ;;  %v1100_v51 = vadd.f32 %v1099_v34, %v1037_v38  ;;  %v1045_v38 = vmul.f32 %v1847_v50, %v1847_v50 }
 0x11c   :  { %v480_v53 = vpop.f32.mrf.mxu0  ;;  %1519 = vst [vmem:[%s2132_s2 + $0xe0] sm:$0xff] %v1475_v42   ;;  %v2009_v55 = vpop.f32.mrf.mxu1  ;;  %v1046_v42 = vmul.f32 %v1839_v41, %v1839_v41 }
 0x11d   :  { %v1101_v58 = vadd.f32 %v1100_v51, %v1038_v47  ;;  %v969_v59 = vadd.f32 %v1606_v22, %v968_v49  ;;  %v1040_v3 = vmul.f32 %v480_v53, %v480_v53  ;;  %v1042_v22 = vmul.f32 %v1609_v39, %v1609_v39 }
 0x11e   :  { %v1610_v60 = vpop.f32.mrf.mxu0  ;;  %v2011_v0 = vpop.f32.mrf.mxu1  ;;  %v1047_v51 = vmul.f32 %v1843_v45, %v1843_v45 }
 0x11f   :  { %v970_v1 = vadd.f32 %v969_v59, %v480_v53  ;;  %v1102_v4 = vadd.f32 %v1101_v58, %v1039_v57  ;;  %v1410_v6 = vpack.c.bf16 %v1610_v60, %v1609_v39  ;;  %v1490_v5 = vpack.c.bf16 %v2011_v0, %v2001_v46 }
 0x120   :  { %v483_v10 = vpop.f32.mrf.mxu0  ;;  %v2015_v11 = vpop.f32.mrf.mxu1  ;;  %v1043_v27 = vmul.f32 %v1610_v60, %v1610_v60  ;;  %v1048_v58 = vmul.f32 %v1865_v61, %v1865_v61 }
 0x121   :  { %v1103_v12 = vadd.f32 %v1102_v4, %v1040_v3  ;;  %1506 = vst [vmem:[%s2132_s2 + $0x78] sm:$0xff] %v1410_v6   ;;  %v1405_v14 = vpack.c.bf16 %v483_v10, %v480_v53  ;;  %v971_v17 = vadd.f32 %v970_v1, %v483_v10  ;;  %v1041_v18 = vmul.f32 %v483_v10, %v483_v10 }
 0x122   :  { %1522 = vst [vmem:[%s2132_s2 + $0xf8] sm:$0xff] %v1490_v5   ;;  %v1485_v20 = vpack.c.bf16 %v2015_v11, %v2009_v55  ;;  %v1049_v1 = vmul.f32 %v1871_v9, %v1871_v9  ;;  %v1052_v5 = vmul.f32 %v1889_v21, %v1889_v21 }
 0x123   :  { %1505 = vst [vmem:[%s2132_s2 + $0x70] sm:$0xff] %v1405_v14   ;;  %v972_v24 = vadd.f32 %v1609_v39, %v971_v17  ;;  %v1104_v25 = vadd.f32 %v1103_v12, %v1041_v18  ;;  %v1053_v17 = vmul.f32 %v1895_v33, %v1895_v33 }
 0x124   :  { %1521 = vst [vmem:[%s2132_s2 + $0xf0] sm:$0xff] %v1485_v20  }
 0x125   :  { %v973_v29 = vadd.f32 %v1610_v60, %v972_v24  ;;  %v1105_v30 = vadd.f32 %v1104_v25, %v1042_v22  ;;  %v1056_v25 = vmul.f32 %v1913_v48, %v1913_v48 }
 0x127   :  { %v1106_v34 = vadd.f32 %v1105_v30, %v1043_v27  ;;  %v974_v35 = vadd.f32 %v973_v29, %v1841_v43  ;;  %v1057_v30 = vmul.f32 %v1919_v63, %v1919_v63 }
 0x129   :  { %v975_v37 = vadd.f32 %v974_v35, %v1847_v50  ;;  %v1107_v39 = vadd.f32 %v1106_v34, %v1044_v31 }
 0x12b   :  { %v976_v47 = vadd.f32 %v1839_v41, %v975_v37  ;;  %v1108_v49 = vadd.f32 %v1107_v39, %v1045_v38  ;;  %v1050_v41 = vmul.f32 %v1857_v56, %v1857_v56  ;;  %v1060_v38 = vmul.f32 %v1937_v13, %v1937_v13 }
 0x12d   :  { %v1109_v53 = vadd.f32 %v1108_v49, %v1046_v42  ;;  %v977_v57 = vadd.f32 %v1843_v45, %v976_v47  ;;  %v1051_v45 = vmul.f32 %v1867_v2, %v1867_v2  ;;  %v1061_v47 = vmul.f32 %v1943_v28, %v1943_v28 }
 0x12f   :  { %v978_v43 = vadd.f32 %v977_v57, %v1865_v61  ;;  %v1110_v59 = vadd.f32 %v1109_v53, %v1047_v51 }
 0x131   :  { %v1111_v50 = vadd.f32 %v1110_v59, %v1048_v58  ;;  %v979_v60 = vadd.f32 %v978_v43, %v1871_v9  ;;  %v1064_v43 = vmul.f32 %v1961_v44, %v1961_v44 }
 0x133   :  { %v980_v3 = vadd.f32 %v1857_v56, %v979_v60  ;;  %v1112_v4 = vadd.f32 %v1111_v50, %v1049_v1  ;;  %v1054_v56 = vmul.f32 %v1881_v16, %v1881_v16  ;;  %v1065_v50 = vmul.f32 %v1967_v62, %v1967_v62 }
 0x135   :  { %v1113_v6 = vadd.f32 %v1112_v4, %v1050_v41  ;;  %v981_v10 = vadd.f32 %v1867_v2, %v980_v3  ;;  %v1055_v2 = vmul.f32 %v1891_v26, %v1891_v26  ;;  %v1068_v4 = vmul.f32 %v1985_v15, %v1985_v15 }
 0x137   :  { %v982_v61 = vadd.f32 %v981_v10, %v1889_v21  ;;  %v1114_v12 = vadd.f32 %v1113_v6, %v1051_v45  ;;  %v1069_v10 = vmul.f32 %v1991_v32, %v1991_v32 }
 0x139   :  { %v1115_v14 = vadd.f32 %v1114_v12, %v1052_v5  ;;  %v983_v9 = vadd.f32 %v982_v61, %v1895_v33 }
 0x13b   :  { %v984_v18 = vadd.f32 %v1881_v16, %v983_v9  ;;  %v1116_v20 = vadd.f32 %v1115_v14, %v1053_v17  ;;  %v1058_v16 = vmul.f32 %v1905_v40, %v1905_v40  ;;  %v1072_v9 = vmul.f32 %v2009_v55, %v2009_v55 }
 0x13d   :  { %v1117_v22 = vadd.f32 %v1116_v20, %v1054_v56  ;;  %v985_v24 = vadd.f32 %v1891_v26, %v984_v18  ;;  %v1059_v26 = vmul.f32 %v1915_v54, %v1915_v54  ;;  %v1073_v18 = vmul.f32 %v2015_v11, %v2015_v11 }
 0x13f   :  { %v986_v21 = vadd.f32 %v985_v24, %v1913_v48  ;;  %v1118_v27 = vadd.f32 %v1117_v22, %v1055_v2 }
 0x141   :  { %v1119_v29 = vadd.f32 %v1118_v27, %v1056_v25  ;;  %v987_v33 = vadd.f32 %v986_v21, %v1919_v63 }
 0x143   :  { %v988_v31 = vadd.f32 %v1905_v40, %v987_v33  ;;  %v1120_v34 = vadd.f32 %v1119_v29, %v1057_v30  ;;  %v1062_v40 = vmul.f32 %v1929_v7, %v1929_v7  ;;  %v1145_v29 = vlaneseq }
 0x145   :  { %v1121_v35 = vadd.f32 %v1120_v34, %v1058_v16  ;;  %v989_v37 = vadd.f32 %v1915_v54, %v988_v31  ;;  %v1063_v54 = vmul.f32 %v1939_v19, %v1939_v19  ;;  %v1146_v31 = vshrl.u32 %v1145_v29, 7 }
 0x147   :  { %v990_v48 = vadd.f32 %v989_v37, %v1937_v13  ;;  %v1122_v39 = vadd.f32 %v1121_v35, %v1059_v26  ;;  %vm1148_vm0 = vcmp.eq.s32.totalorder %v1146_v31, 1  ;;  %vm1147_vm1 = vcmp.eq.s32.totalorder %v1146_v31, 0 }
 0x149   :  { %v1123_v42 = vadd.f32 %v1122_v39, %v1060_v38  ;;  %v991_v63 = vadd.f32 %v990_v48, %v1943_v28 }
 0x14b   :  { %v992_v49 = vadd.f32 %v1929_v7, %v991_v63  ;;  %v1124_v51 = vadd.f32 %v1123_v42, %v1061_v47  ;;  %v1066_v7 = vmul.f32 %v1953_v36, %v1953_v36 }
 0x14d   :  { %v1125_v53 = vadd.f32 %v1124_v51, %v1062_v40  ;;  %v993_v57 = vadd.f32 %v1939_v19, %v992_v49  ;;  %v1067_v19 = vmul.f32 %v1963_v52, %v1963_v52 }
 0x14f   :  { %v994_v13 = vadd.f32 %v993_v57, %v1961_v44  ;;  %v1126_v58 = vadd.f32 %v1125_v53, %v1063_v54 }
 0x151   :  { %v1127_v59 = vadd.f32 %v1126_v58, %v1064_v43  ;;  %v995_v28 = vadd.f32 %v994_v13, %v1967_v62 }
 0x153   :  { %v996_v60 = vadd.f32 %v1953_v36, %v995_v28  ;;  %v1128_v1 = vadd.f32 %v1127_v59, %v1065_v50  ;;  %v1070_v36 = vmul.f32 %v1977_v8, %v1977_v8 }
 0x155   :  { %v1129_v41 = vadd.f32 %v1128_v1, %v1066_v7  ;;  %v997_v3 = vadd.f32 %v1963_v52, %v996_v60  ;;  %v1071_v52 = vmul.f32 %v1987_v23, %v1987_v23 }
 0x157   :  { %v998_v44 = vadd.f32 %v997_v3, %v1985_v15  ;;  %v1130_v45 = vadd.f32 %v1129_v41, %v1067_v19 }
 0x159   :  { %v1131_v6 = vadd.f32 %v1130_v45, %v1068_v4  ;;  %v999_v62 = vadd.f32 %v998_v44, %v1991_v32 }
 0x15b   :  { %v1000_v61 = vadd.f32 %v1977_v8, %v999_v62  ;;  %v1132_v5 = vadd.f32 %v1131_v6, %v1069_v10  ;;  %v1074_v8 = vmul.f32 %v2001_v46, %v2001_v46 }
 0x15d   :  { %v1133_v12 = vadd.f32 %v1132_v5, %v1070_v36  ;;  %v1001_v14 = vadd.f32 %v1987_v23, %v1000_v61  ;;  %v1075_v23 = vmul.f32 %v2011_v0, %v2011_v0 }
 0x15f   :  { %v1002_v15 = vadd.f32 %v1001_v14, %v2009_v55  ;;  %v1134_v17 = vadd.f32 %v1133_v12, %v1071_v52 }
 0x161   :  { %v1135_v56 = vadd.f32 %v1134_v17, %v1072_v9  ;;  %v1003_v32 = vadd.f32 %v1002_v15, %v2015_v11 }
 0x163   :  { %v1004_v20 = vadd.f32 %v2001_v46, %v1003_v32  ;;  %v1136_v2 = vadd.f32 %v1135_v56, %v1073_v18 }
 0x165   :  { %v1005_v22 = vadd.f32 %v2011_v0, %v1004_v20  ;;  %v1137_v24 = vadd.f32 %v1136_v2, %v1074_v8 }
 0x167   :  { %v1006_v55 = vrot.slane %v1005_v22, 4  ;;  %v1138_v21 = vadd.f32 %v1137_v24, %v1075_v23 }
 0x169   :  { %v1007_v25 = vadd.f32 %v1006_v55, %v1005_v22  ;;  %v1139_v27 = vrot.slane %v1138_v21, 4 }
 0x16b   :  { %v1008_v33 = vrot.slane %v1007_v25, 2  ;;  %v1140_v30 = vadd.f32 %v1139_v27, %v1138_v21 }
 0x16d   :  { %v1009_v11 = vadd.f32 %v1008_v33, %v1007_v25  ;;  %v1141_v16 = vrot.slane %v1140_v30, 2 }
 0x16f   :  { %v1142_v34 = vadd.f32 %v1141_v16, %v1140_v30  ;;  %v1010_v26 = vrot.slane %v1009_v11, 1 }
 0x171   :  { %v1143_v46 = vrot.slane %v1142_v34, 1  ;;  %v1011_v37 = vadd.f32 %v1010_v26, %v1009_v11 }
 0x173   :  { %v1144_v35 = vadd.f32 %v1143_v46, %v1142_v34 }
 0x175   :  { %v1151_v48 = vsel %vm1148_vm0, %v1144_v35, 0.0 }
 0x176   :  { %v1154_v0 = vsel %vm1147_vm1, %v1011_v37, %v1151_v48 }
 0x177   :  { %1155 = vst [vmem:[%s2133_s3] sm:$0xff] %v1154_v0 }

// kernel: bottleneck_forward.7
= control target key start
LH: loop header
LB: loop body
LE: loop exit
PB: predicated region body
PF: predicated region fallthrough
CT: control target
= control target key end

     0   :  { %s2097_s0 = inlined_call_operand.vmem [shape: bf16[512,128], index: 0, kind: input, shape index: {}]   ;;  %s2098_s1 = inlined_call_operand.vmem [shape: bf16[512,128], index: 1, kind: input, shape index: {}]   ;;  %s2099_s2 = inlined_call_operand.vmem [shape: f32[1,128], index: 2, kind: input, shape index: {}]   ;;  %s2100_s3 = inlined_call_operand.vmem [shape: f32[1,128], index: 3, kind: input, shape index: {}]   ;;  %s2101_s4 = inlined_call_operand.vmem [shape: bf16[512,128], index: 4, kind: output, shape index: {}]  }
   0x1   :  { %v1126_v0 = vld [vmem:[%s2097_s0] sm:$0xff]   ;;  %v1541_v5 = vld [vmem:[%s2097_s0 + $0x8] sm:$0xff]   ;;  %v1542_v12 = vld [vmem:[%s2097_s0 + $0x10] sm:$0xff]  }
   0x2   :  { %v1667_v1 = vld [vmem:[%s2099_s2] ss:$0 sm:$0xff]  ;;  %v1127_v2 = vunpack.c.l.bf16 %v1126_v0  ;;  %v1128_v3 = vunpack.c.h.bf16 %v1126_v0  ;;  %v1572_v6 = vld [vmem:[%s2098_s1 + $0x8] sm:$0xff]   ;;  %v1131_v10 = vunpack.c.l.bf16 %v1541_v5  ;;  %v1132_v11 = vunpack.c.h.bf16 %v1541_v5  ;;  %v1573_v13 = vld [vmem:[%s2098_s1 + $0x10] sm:$0xff]  }
   0x3   :  { %v1254_v4 = vld [vmem:[%s2098_s1] sm:$0xff]   ;;  %v1259_v16 = vunpack.c.l.bf16 %v1572_v6  ;;  %v1260_v17 = vunpack.c.h.bf16 %v1572_v6  ;;  %v1135_v20 = vunpack.c.l.bf16 %v1542_v12  ;;  %v1136_v21 = vunpack.c.h.bf16 %v1542_v12  ;;  %v1543_v22 = vld [vmem:[%s2097_s0 + $0x18] sm:$0xff]  }
   0x4   :  { %v1681_v7 = vld [vmem:[%s2100_s3] ss:$0 sm:$0xff]  ;;  %v1255_v8 = vunpack.c.l.bf16 %v1254_v4  ;;  %v1256_v9 = vunpack.c.h.bf16 %v1254_v4  ;;  %v152_v14 = vmul.f32 %v1127_v2, %v1667_v1  ;;  %v153_v15 = vmul.f32 %v1128_v3, %v1667_v1  ;;  %v1574_v47 = vld [vmem:[%s2098_s1 + $0x18] sm:$0xff]  }
   0x5   :  { %v154_v18 = vmul.f32 %v1131_v10, %v1667_v1  ;;  %v155_v19 = vmul.f32 %v1132_v11, %v1667_v1  ;;  %v1263_v25 = vunpack.c.l.bf16 %v1573_v13  ;;  %v1264_v26 = vunpack.c.h.bf16 %v1573_v13  ;;  %v1544_v56 = vld [vmem:[%s2097_s0 + $0x20] sm:$0xff]  }
   0x6   :  { %v223_v23 = vadd.f32 %v1681_v7, %v152_v14  ;;  %v224_v24 = vadd.f32 %v1681_v7, %v153_v15  ;;  %v156_v29 = vmul.f32 %v1135_v20, %v1667_v1  ;;  %v157_v30 = vmul.f32 %v1136_v21, %v1667_v1  ;;  %v1575_v2 = vld [vmem:[%s2098_s1 + $0x20] sm:$0xff]  }
   0x7   :  { %v225_v27 = vadd.f32 %v1681_v7, %v154_v18  ;;  %v226_v28 = vadd.f32 %v1681_v7, %v155_v19  ;;  %v1139_v33 = vunpack.c.l.bf16 %v1543_v22  ;;  %v1140_v34 = vunpack.c.h.bf16 %v1543_v22 }
   0x8   :  { %v415_v31 = vadd.f32 %v1255_v8, %v223_v23  ;;  %v416_v32 = vadd.f32 %v1256_v9, %v224_v24  ;;  %v227_v37 = vadd.f32 %v1681_v7, %v156_v29  ;;  %v228_v38 = vadd.f32 %v1681_v7, %v157_v30 }
   0x9   :  { %v417_v35 = vadd.f32 %v1259_v16, %v225_v27  ;;  %v418_v36 = vadd.f32 %v1260_v17, %v226_v28  ;;  %v158_v41 = vmul.f32 %v1139_v33, %v1667_v1  ;;  %v159_v42 = vmul.f32 %v1140_v34, %v1667_v1 }
   0xa   :  { %v479_v39 = vmax.f32 %v415_v31, 0.0  ;;  %v480_v40 = vmax.f32 %v416_v32, 0.0  ;;  %v419_v45 = vadd.f32 %v1263_v25, %v227_v37  ;;  %v420_v46 = vadd.f32 %v1264_v26, %v228_v38  ;;  %v1577_v31 = vld [vmem:[%s2098_s1 + $0x30] sm:$0xff]  }
   0xb   :  { %v481_v43 = vmax.f32 %v417_v35, 0.0  ;;  %v482_v44 = vmax.f32 %v418_v36, 0.0  ;;  %v229_v50 = vadd.f32 %v1681_v7, %v158_v41  ;;  %v230_v51 = vadd.f32 %v1681_v7, %v159_v42 }
   0xc   :  { %v543_v48 = vadd.f32 %v1255_v8, %v479_v39  ;;  %v544_v49 = vadd.f32 %v1256_v9, %v480_v40  ;;  %v483_v54 = vmax.f32 %v419_v45, 0.0  ;;  %v484_v55 = vmax.f32 %v420_v46, 0.0  ;;  %v1545_v8 = vld [vmem:[%s2097_s0 + $0x28] sm:$0xff]   ;;  %v1547_v40 = vld [vmem:[%s2097_s0 + $0x38] sm:$0xff]  }
   0xd   :  { %v545_v52 = vadd.f32 %v1259_v16, %v481_v43  ;;  %v546_v53 = vadd.f32 %v1260_v17, %v482_v44  ;;  %v1267_v59 = vunpack.c.l.bf16 %v1574_v47  ;;  %v1268_v60 = vunpack.c.h.bf16 %v1574_v47  ;;  %v1576_v17 = vld [vmem:[%s2098_s1 + $0x28] sm:$0xff]  }
   0xe   :  { %v607_v57 = vmax.f32 %v543_v48, 0.0  ;;  %v608_v58 = vmax.f32 %v544_v49, 0.0  ;;  %v547_v63 = vadd.f32 %v1263_v25, %v483_v54  ;;  %v548_v0 = vadd.f32 %v1264_v26, %v484_v55  ;;  %v1546_v26 = vld [vmem:[%s2097_s0 + $0x30] sm:$0xff]  }
   0xf   :  { %v609_v61 = vmax.f32 %v545_v52, 0.0  ;;  %v610_v62 = vmax.f32 %v546_v53, 0.0  ;;  %v421_v4 = vadd.f32 %v1267_v59, %v229_v50  ;;  %v422_v5 = vadd.f32 %v1268_v60, %v230_v51 }
  0x10   :  { %v1384_v3 = vpack.c.bf16 %v608_v58, %v607_v57  ;;  %v1143_v6 = vunpack.c.l.bf16 %v1544_v56  ;;  %v611_v10 = vmax.f32 %v547_v63, 0.0  ;;  %v612_v11 = vmax.f32 %v548_v0, 0.0  ;;  %v1578_v57 = vld [vmem:[%s2098_s1 + $0x38] sm:$0xff]  }
  0x11   :  { %v1389_v9 = vpack.c.bf16 %v610_v62, %v609_v61  ;;  %v1144_v12 = vunpack.c.h.bf16 %v1544_v56  ;;  %v485_v13 = vmax.f32 %v421_v4, 0.0  ;;  %v486_v14 = vmax.f32 %v422_v5, 0.0 }
  0x12   :  { %1385 = vst [vmem:[%s2101_s4] sm:$0xff] %v1384_v3   ;;  %v160_v15 = vmul.f32 %v1143_v6, %v1667_v1  ;;  %v1271_v16 = vunpack.c.l.bf16 %v1575_v2  ;;  %v1394_v18 = vpack.c.bf16 %v612_v11, %v611_v10  ;;  %v1272_v20 = vunpack.c.h.bf16 %v1575_v2 }
  0x13   :  { %1603 = vst [vmem:[%s2101_s4 + $0x8] sm:$0xff] %v1389_v9   ;;  %v161_v19 = vmul.f32 %v1144_v12, %v1667_v1  ;;  %v1147_v21 = vunpack.c.l.bf16 %v1545_v8  ;;  %v549_v22 = vadd.f32 %v1267_v59, %v485_v13  ;;  %v550_v23 = vadd.f32 %v1268_v60, %v486_v14  ;;  %v1579_v13 = vld [vmem:[%s2098_s1 + $0x40] sm:$0xff]  }
  0x14   :  { %v231_v24 = vadd.f32 %v1681_v7, %v160_v15  ;;  %v1148_v25 = vunpack.c.h.bf16 %v1545_v8  ;;  %1604 = vst [vmem:[%s2101_s4 + $0x10] sm:$0xff] %v1394_v18   ;;  %v1275_v29 = vunpack.c.l.bf16 %v1576_v17  ;;  %v1276_v30 = vunpack.c.h.bf16 %v1576_v17  ;;  %v1548_v8 = vld [vmem:[%s2097_s0 + $0x40] sm:$0xff]  }
  0x15   :  { %v232_v27 = vadd.f32 %v1681_v7, %v161_v19  ;;  %v162_v28 = vmul.f32 %v1147_v21, %v1667_v1  ;;  %v613_v32 = vmax.f32 %v549_v22, 0.0  ;;  %v614_v33 = vmax.f32 %v550_v23, 0.0  ;;  %v1549_v22 = vld [vmem:[%s2097_s0 + $0x48] sm:$0xff]  }
  0x16   :  { %v423_v34 = vadd.f32 %v1271_v16, %v231_v24  ;;  %v163_v35 = vmul.f32 %v1148_v25, %v1667_v1  ;;  %v1151_v38 = vunpack.c.l.bf16 %v1546_v26  ;;  %v1152_v39 = vunpack.c.h.bf16 %v1546_v26 }
  0x17   :  { %v424_v36 = vadd.f32 %v1272_v20, %v232_v27  ;;  %v233_v37 = vadd.f32 %v1681_v7, %v162_v28  ;;  %v1399_v41 = vpack.c.bf16 %v614_v33, %v613_v32  ;;  %v1279_v44 = vunpack.c.l.bf16 %v1577_v31 }
  0x18   :  { %v487_v42 = vmax.f32 %v423_v34, 0.0  ;;  %v234_v43 = vadd.f32 %v1681_v7, %v163_v35  ;;  %v164_v47 = vmul.f32 %v1151_v38, %v1667_v1  ;;  %v165_v48 = vmul.f32 %v1152_v39, %v1667_v1 }
  0x19   :  { %v488_v45 = vmax.f32 %v424_v36, 0.0  ;;  %v425_v46 = vadd.f32 %v1275_v29, %v233_v37  ;;  %1605 = vst [vmem:[%s2101_s4 + $0x18] sm:$0xff] %v1399_v41   ;;  %v1280_v51 = vunpack.c.h.bf16 %v1577_v31  ;;  %v1155_v52 = vunpack.c.l.bf16 %v1547_v40  ;;  %v1580_v31 = vld [vmem:[%s2098_s1 + $0x48] sm:$0xff]  }
  0x1a   :  { %v551_v49 = vadd.f32 %v1271_v16, %v487_v42  ;;  %v426_v50 = vadd.f32 %v1276_v30, %v234_v43  ;;  %v235_v55 = vadd.f32 %v1681_v7, %v164_v47  ;;  %v236_v56 = vadd.f32 %v1681_v7, %v165_v48 }
  0x1b   :  { %v552_v53 = vadd.f32 %v1272_v20, %v488_v45  ;;  %v489_v54 = vmax.f32 %v425_v46, 0.0  ;;  %v1156_v60 = vunpack.c.h.bf16 %v1547_v40  ;;  %v166_v61 = vmul.f32 %v1155_v52, %v1667_v1  ;;  %v1550_v40 = vld [vmem:[%s2097_s0 + $0x50] sm:$0xff]  }
  0x1c   :  { %v615_v58 = vmax.f32 %v551_v49, 0.0  ;;  %v490_v59 = vmax.f32 %v426_v50, 0.0  ;;  %v427_v0 = vadd.f32 %v1279_v44, %v235_v55  ;;  %v428_v2 = vadd.f32 %v1280_v51, %v236_v56  ;;  %v1581_v45 = vld [vmem:[%s2098_s1 + $0x50] sm:$0xff]  }
  0x1d   :  { %v616_v62 = vmax.f32 %v552_v53, 0.0  ;;  %v553_v63 = vadd.f32 %v1275_v29, %v489_v54  ;;  %v167_v4 = vmul.f32 %v1156_v60, %v1667_v1  ;;  %v237_v5 = vadd.f32 %v1681_v7, %v166_v61 }
  0x1e   :  { %v554_v3 = vadd.f32 %v1276_v30, %v490_v59  ;;  %v1283_v6 = vunpack.c.l.bf16 %v1578_v57  ;;  %v491_v11 = vmax.f32 %v427_v0, 0.0  ;;  %v492_v12 = vmax.f32 %v428_v2, 0.0 }
  0x1f   :  { %v1404_v9 = vpack.c.bf16 %v616_v62, %v615_v58  ;;  %v617_v10 = vmax.f32 %v553_v63, 0.0  ;;  %v238_v15 = vadd.f32 %v1681_v7, %v167_v4  ;;  %v1284_v16 = vunpack.c.h.bf16 %v1578_v57  ;;  %v1551_v58 = vld [vmem:[%s2097_s0 + $0x58] sm:$0xff]  }
  0x20   :  { %v618_v14 = vmax.f32 %v554_v3, 0.0  ;;  %v429_v17 = vadd.f32 %v1283_v6, %v237_v5  ;;  %v555_v18 = vadd.f32 %v1279_v44, %v491_v11  ;;  %v556_v19 = vadd.f32 %v1280_v51, %v492_v12 }
  0x21   :  { %1606 = vst [vmem:[%s2101_s4 + $0x20] sm:$0xff] %v1404_v9   ;;  %v1159_v20 = vunpack.c.l.bf16 %v1548_v8  ;;  %v1160_v21 = vunpack.c.h.bf16 %v1548_v8  ;;  %v430_v24 = vadd.f32 %v1284_v16, %v238_v15  ;;  %v1287_v26 = vunpack.c.l.bf16 %v1579_v13  ;;  %v1582_v9 = vld [vmem:[%s2098_s1 + $0x58] sm:$0xff]  }
  0x22   :  { %v1409_v23 = vpack.c.bf16 %v618_v14, %v617_v10  ;;  %v493_v25 = vmax.f32 %v429_v17, 0.0  ;;  %v619_v27 = vmax.f32 %v555_v18, 0.0  ;;  %v620_v28 = vmax.f32 %v556_v19, 0.0  ;;  %v1552_v18 = vld [vmem:[%s2097_s0 + $0x60] sm:$0xff]  }
  0x23   :  { %v168_v29 = vmul.f32 %v1159_v20, %v1667_v1  ;;  %v169_v30 = vmul.f32 %v1160_v21, %v1667_v1  ;;  %v494_v32 = vmax.f32 %v430_v24, 0.0  ;;  %v1288_v34 = vunpack.c.h.bf16 %v1579_v13 }
  0x24   :  { %1607 = vst [vmem:[%s2101_s4 + $0x28] sm:$0xff] %v1409_v23   ;;  %v557_v33 = vadd.f32 %v1283_v6, %v493_v25  ;;  %v1163_v35 = vunpack.c.l.bf16 %v1549_v22  ;;  %v1414_v36 = vpack.c.bf16 %v620_v28, %v619_v27  ;;  %v1164_v39 = vunpack.c.h.bf16 %v1549_v22  ;;  %v1583_v27 = vld [vmem:[%s2098_s1 + $0x60] sm:$0xff]  }
  0x25   :  { %v239_v37 = vadd.f32 %v1681_v7, %v168_v29  ;;  %v240_v38 = vadd.f32 %v1681_v7, %v169_v30  ;;  %v558_v41 = vadd.f32 %v1284_v16, %v494_v32  ;;  %v1291_v44 = vunpack.c.l.bf16 %v1580_v31 }
  0x26   :  { %v621_v42 = vmax.f32 %v557_v33, 0.0  ;;  %v170_v43 = vmul.f32 %v1163_v35, %v1667_v1  ;;  %1608 = vst [vmem:[%s2101_s4 + $0x30] sm:$0xff] %v1414_v36   ;;  %v171_v48 = vmul.f32 %v1164_v39, %v1667_v1  ;;  %v1292_v49 = vunpack.c.h.bf16 %v1580_v31  ;;  %v1553_v36 = vld [vmem:[%s2097_s0 + $0x68] sm:$0xff]  }
  0x27   :  { %v431_v46 = vadd.f32 %v1287_v26, %v239_v37  ;;  %v432_v47 = vadd.f32 %v1288_v34, %v240_v38  ;;  %v622_v50 = vmax.f32 %v558_v41, 0.0  ;;  %v1167_v52 = vunpack.c.l.bf16 %v1550_v40 }
  0x28   :  { %v241_v51 = vadd.f32 %v1681_v7, %v170_v43  ;;  %v1168_v53 = vunpack.c.h.bf16 %v1550_v40  ;;  %v242_v56 = vadd.f32 %v1681_v7, %v171_v48  ;;  %v1295_v57 = vunpack.c.l.bf16 %v1581_v45 }
  0x29   :  { %v495_v54 = vmax.f32 %v431_v46, 0.0  ;;  %v496_v55 = vmax.f32 %v432_v47, 0.0  ;;  %v1419_v59 = vpack.c.bf16 %v622_v50, %v621_v42  ;;  %v172_v61 = vmul.f32 %v1167_v52, %v1667_v1 }
  0x2a   :  { %v433_v60 = vadd.f32 %v1291_v44, %v241_v51  ;;  %v173_v62 = vmul.f32 %v1168_v53, %v1667_v1  ;;  %v434_v2 = vadd.f32 %v1292_v49, %v242_v56  ;;  %v1296_v3 = vunpack.c.h.bf16 %v1581_v45  ;;  %v1584_v45 = vld [vmem:[%s2098_s1 + $0x68] sm:$0xff]  }
  0x2b   :  { %v559_v63 = vadd.f32 %v1287_v26, %v495_v54  ;;  %v560_v0 = vadd.f32 %v1288_v34, %v496_v55  ;;  %1609 = vst [vmem:[%s2101_s4 + $0x38] sm:$0xff] %v1419_v59   ;;  %v243_v5 = vadd.f32 %v1681_v7, %v172_v61  ;;  %v1171_v8 = vunpack.c.l.bf16 %v1551_v58  ;;  %v1554_v54 = vld [vmem:[%s2097_s0 + $0x70] sm:$0xff]  }
  0x2c   :  { %v497_v4 = vmax.f32 %v433_v60, 0.0  ;;  %v244_v6 = vadd.f32 %v1681_v7, %v173_v62  ;;  %v498_v12 = vmax.f32 %v434_v2, 0.0  ;;  %v1172_v13 = vunpack.c.h.bf16 %v1551_v58  ;;  %v1585_v59 = vld [vmem:[%s2098_s1 + $0x70] sm:$0xff]  }
  0x2d   :  { %v623_v10 = vmax.f32 %v559_v63, 0.0  ;;  %v624_v11 = vmax.f32 %v560_v0, 0.0  ;;  %v435_v15 = vadd.f32 %v1295_v57, %v243_v5  ;;  %v174_v17 = vmul.f32 %v1171_v8, %v1667_v1 }
  0x2e   :  { %v561_v14 = vadd.f32 %v1291_v44, %v497_v4  ;;  %v436_v16 = vadd.f32 %v1296_v3, %v244_v6  ;;  %v562_v20 = vadd.f32 %v1292_v49, %v498_v12  ;;  %v175_v21 = vmul.f32 %v1172_v13, %v1667_v1 }
  0x2f   :  { %v1424_v19 = vpack.c.bf16 %v624_v11, %v623_v10  ;;  %v1299_v22 = vunpack.c.l.bf16 %v1582_v9  ;;  %v499_v24 = vmax.f32 %v435_v15, 0.0  ;;  %v245_v26 = vadd.f32 %v1681_v7, %v174_v17  ;;  %v1555_v10 = vld [vmem:[%s2097_s0 + $0x78] sm:$0xff]  }
  0x30   :  { %v625_v23 = vmax.f32 %v561_v14, 0.0  ;;  %v500_v25 = vmax.f32 %v436_v16, 0.0  ;;  %v626_v28 = vmax.f32 %v562_v20, 0.0  ;;  %v246_v29 = vadd.f32 %v1681_v7, %v175_v21 }
  0x31   :  { %1610 = vst [vmem:[%s2101_s4 + $0x40] sm:$0xff] %v1424_v19   ;;  %v1300_v30 = vunpack.c.h.bf16 %v1582_v9  ;;  %v1175_v31 = vunpack.c.l.bf16 %v1552_v18  ;;  %v563_v32 = vadd.f32 %v1295_v57, %v499_v24  ;;  %v437_v34 = vadd.f32 %v1299_v22, %v245_v26  ;;  %v1586_v19 = vld [vmem:[%s2098_s1 + $0x78] sm:$0xff]  }
  0x32   :  { %v564_v33 = vadd.f32 %v1296_v3, %v500_v25  ;;  %v1176_v35 = vunpack.c.h.bf16 %v1552_v18  ;;  %v1429_v37 = vpack.c.bf16 %v626_v28, %v625_v23  ;;  %v1303_v40 = vunpack.c.l.bf16 %v1583_v27 }
  0x33   :  { %v438_v38 = vadd.f32 %v1300_v30, %v246_v29  ;;  %v176_v39 = vmul.f32 %v1175_v31, %v1667_v1  ;;  %v627_v41 = vmax.f32 %v563_v32, 0.0  ;;  %v501_v43 = vmax.f32 %v437_v34, 0.0  ;;  %v1556_v32 = vld [vmem:[%s2097_s0 + $0x80] sm:$0xff]  }
  0x34   :  { %v628_v42 = vmax.f32 %v564_v33, 0.0  ;;  %v177_v44 = vmul.f32 %v1176_v35, %v1667_v1  ;;  %1611 = vst [vmem:[%s2101_s4 + $0x48] sm:$0xff] %v1429_v37   ;;  %v1304_v48 = vunpack.c.h.bf16 %v1583_v27  ;;  %v1179_v49 = vunpack.c.l.bf16 %v1553_v36  ;;  %v1587_v37 = vld [vmem:[%s2098_s1 + $0x80] sm:$0xff]  }
  0x35   :  { %v502_v46 = vmax.f32 %v438_v38, 0.0  ;;  %v247_v47 = vadd.f32 %v1681_v7, %v176_v39  ;;  %v565_v51 = vadd.f32 %v1299_v22, %v501_v43  ;;  %v1180_v53 = vunpack.c.h.bf16 %v1553_v36 }
  0x36   :  { %v1434_v50 = vpack.c.bf16 %v628_v42, %v627_v41  ;;  %v248_v52 = vadd.f32 %v1681_v7, %v177_v44  ;;  %v178_v57 = vmul.f32 %v1179_v49, %v1667_v1  ;;  %v1307_v58 = vunpack.c.l.bf16 %v1584_v45 }
  0x37   :  { %v566_v55 = vadd.f32 %v1300_v30, %v502_v46  ;;  %v439_v56 = vadd.f32 %v1303_v40, %v247_v47  ;;  %v629_v60 = vmax.f32 %v565_v51, 0.0  ;;  %v179_v62 = vmul.f32 %v1180_v53, %v1667_v1 }
  0x38   :  { %1612 = vst [vmem:[%s2101_s4 + $0x50] sm:$0xff] %v1434_v50   ;;  %v440_v61 = vadd.f32 %v1304_v48, %v248_v52  ;;  %v1308_v63 = vunpack.c.h.bf16 %v1584_v45  ;;  %v249_v3 = vadd.f32 %v1681_v7, %v178_v57  ;;  %v1183_v4 = vunpack.c.l.bf16 %v1554_v54  ;;  %v1557_v50 = vld [vmem:[%s2097_s0 + $0x88] sm:$0xff]  }
  0x39   :  { %v630_v0 = vmax.f32 %v566_v55, 0.0  ;;  %v503_v2 = vmax.f32 %v439_v56, 0.0  ;;  %v250_v6 = vadd.f32 %v1681_v7, %v179_v62  ;;  %v1184_v8 = vunpack.c.h.bf16 %v1554_v54  ;;  %v1588_v55 = vld [vmem:[%s2098_s1 + $0x88] sm:$0xff]  }
  0x3a   :  { %v504_v5 = vmax.f32 %v440_v61, 0.0  ;;  %v1311_v9 = vunpack.c.l.bf16 %v1585_v59  ;;  %v441_v13 = vadd.f32 %v1307_v58, %v249_v3  ;;  %v180_v14 = vmul.f32 %v1183_v4, %v1667_v1 }
  0x3b   :  { %v1439_v11 = vpack.c.bf16 %v630_v0, %v629_v60  ;;  %v567_v12 = vadd.f32 %v1303_v40, %v503_v2  ;;  %v442_v16 = vadd.f32 %v1308_v63, %v250_v6  ;;  %v181_v17 = vmul.f32 %v1184_v8, %v1667_v1 }
  0x3c   :  { %v568_v15 = vadd.f32 %v1304_v48, %v504_v5  ;;  %v1312_v18 = vunpack.c.h.bf16 %v1585_v59  ;;  %v505_v21 = vmax.f32 %v441_v13, 0.0  ;;  %v251_v22 = vadd.f32 %v1681_v7, %v180_v14  ;;  %v1558_v5 = vld [vmem:[%s2097_s0 + $0x90] sm:$0xff]  }
  0x3d   :  { %1613 = vst [vmem:[%s2101_s4 + $0x58] sm:$0xff] %v1439_v11   ;;  %v631_v20 = vmax.f32 %v567_v12, 0.0  ;;  %v1187_v23 = vunpack.c.l.bf16 %v1555_v10  ;;  %v506_v25 = vmax.f32 %v442_v16, 0.0  ;;  %v252_v26 = vadd.f32 %v1681_v7, %v181_v17  ;;  %v1589_v11 = vld [vmem:[%s2098_s1 + $0x90] sm:$0xff]  }
  0x3e   :  { %v632_v24 = vmax.f32 %v568_v15, 0.0  ;;  %v1188_v27 = vunpack.c.h.bf16 %v1555_v10  ;;  %v569_v28 = vadd.f32 %v1307_v58, %v505_v21  ;;  %v443_v29 = vadd.f32 %v1311_v9, %v251_v22 }
  0x3f   :  { %v182_v30 = vmul.f32 %v1187_v23, %v1667_v1  ;;  %v1315_v31 = vunpack.c.l.bf16 %v1586_v19  ;;  %v570_v34 = vadd.f32 %v1308_v63, %v506_v25  ;;  %v444_v35 = vadd.f32 %v1312_v18, %v252_v26 }
  0x40   :  { %v1444_v33 = vpack.c.bf16 %v632_v24, %v631_v20  ;;  %v183_v36 = vmul.f32 %v1188_v27, %v1667_v1  ;;  %v633_v38 = vmax.f32 %v569_v28, 0.0  ;;  %v507_v39 = vmax.f32 %v443_v29, 0.0  ;;  %v1559_v24 = vld [vmem:[%s2097_s0 + $0x98] sm:$0xff]  }
  0x41   :  { %v253_v40 = vadd.f32 %v1681_v7, %v182_v30  ;;  %v1316_v41 = vunpack.c.h.bf16 %v1586_v19  ;;  %v634_v42 = vmax.f32 %v570_v34, 0.0  ;;  %v508_v43 = vmax.f32 %v444_v35, 0.0 }
  0x42   :  { %1614 = vst [vmem:[%s2101_s4 + $0x60] sm:$0xff] %v1444_v33   ;;  %v254_v44 = vadd.f32 %v1681_v7, %v183_v36  ;;  %v1191_v45 = vunpack.c.l.bf16 %v1556_v32  ;;  %v571_v46 = vadd.f32 %v1311_v9, %v507_v39  ;;  %v1192_v48 = vunpack.c.h.bf16 %v1556_v32  ;;  %v1590_v33 = vld [vmem:[%s2098_s1 + $0x98] sm:$0xff]  }
  0x43   :  { %v445_v47 = vadd.f32 %v1315_v31, %v253_v40  ;;  %v1319_v49 = vunpack.c.l.bf16 %v1587_v37  ;;  %v1449_v51 = vpack.c.bf16 %v634_v42, %v633_v38  ;;  %v572_v52 = vadd.f32 %v1312_v18, %v508_v43 }
  0x44   :  { %v446_v53 = vadd.f32 %v1316_v41, %v254_v44  ;;  %v184_v54 = vmul.f32 %v1191_v45, %v1667_v1  ;;  %v635_v56 = vmax.f32 %v571_v46, 0.0  ;;  %v185_v58 = vmul.f32 %v1192_v48, %v1667_v1  ;;  %v1560_v46 = vld [vmem:[%s2097_s0 + $0xa0] sm:$0xff]  }
  0x45   :  { %v509_v57 = vmax.f32 %v445_v47, 0.0  ;;  %v1320_v59 = vunpack.c.h.bf16 %v1587_v37  ;;  %1615 = vst [vmem:[%s2101_s4 + $0x68] sm:$0xff] %v1449_v51   ;;  %v636_v60 = vmax.f32 %v572_v52, 0.0  ;;  %v1195_v63 = vunpack.c.l.bf16 %v1557_v50  ;;  %v1591_v51 = vld [vmem:[%s2098_s1 + $0xa0] sm:$0xff]  }
  0x46   :  { %v510_v61 = vmax.f32 %v446_v53, 0.0  ;;  %v255_v62 = vadd.f32 %v1681_v7, %v184_v54  ;;  %v256_v2 = vadd.f32 %v1681_v7, %v185_v58  ;;  %v1196_v3 = vunpack.c.h.bf16 %v1557_v50 }
  0x47   :  { %v573_v0 = vadd.f32 %v1315_v31, %v509_v57  ;;  %v1323_v4 = vunpack.c.l.bf16 %v1588_v55  ;;  %v1454_v6 = vpack.c.bf16 %v636_v60, %v635_v56  ;;  %v186_v10 = vmul.f32 %v1195_v63, %v1667_v1 }
  0x48   :  { %v574_v8 = vadd.f32 %v1316_v41, %v510_v61  ;;  %v447_v9 = vadd.f32 %v1319_v49, %v255_v62  ;;  %v448_v13 = vadd.f32 %v1320_v59, %v256_v2  ;;  %v187_v14 = vmul.f32 %v1196_v3, %v1667_v1 }
  0x49   :  { %v637_v12 = vmax.f32 %v573_v0, 0.0  ;;  %v1324_v15 = vunpack.c.h.bf16 %v1588_v55  ;;  %1616 = vst [vmem:[%s2101_s4 + $0x70] sm:$0xff] %v1454_v6   ;;  %v257_v18 = vadd.f32 %v1681_v7, %v186_v10  ;;  %v1199_v19 = vunpack.c.l.bf16 %v1558_v5  ;;  %v1561_v0 = vld [vmem:[%s2097_s0 + $0xa8] sm:$0xff]  }
  0x4a   :  { %v638_v16 = vmax.f32 %v574_v8, 0.0  ;;  %v511_v17 = vmax.f32 %v447_v9, 0.0  ;;  %v512_v20 = vmax.f32 %v448_v13, 0.0  ;;  %v258_v21 = vadd.f32 %v1681_v7, %v187_v14  ;;  %v1592_v6 = vld [vmem:[%s2098_s1 + $0xa8] sm:$0xff]  }
  0x4b   :  { %v1200_v22 = vunpack.c.h.bf16 %v1558_v5  ;;  %v1327_v23 = vunpack.c.l.bf16 %v1589_v11  ;;  %v449_v27 = vadd.f32 %v1323_v4, %v257_v18  ;;  %v188_v28 = vmul.f32 %v1199_v19, %v1667_v1 }
  0x4c   :  { %v1459_v25 = vpack.c.bf16 %v638_v16, %v637_v12  ;;  %v575_v26 = vadd.f32 %v1319_v49, %v511_v17  ;;  %v576_v29 = vadd.f32 %v1320_v59, %v512_v20  ;;  %v450_v30 = vadd.f32 %v1324_v15, %v258_v21  ;;  %v1562_v20 = vld [vmem:[%s2097_s0 + $0xb0] sm:$0xff]  }
  0x4d   :  { %v189_v31 = vmul.f32 %v1200_v22, %v1667_v1  ;;  %v1328_v32 = vunpack.c.h.bf16 %v1589_v11  ;;  %v513_v35 = vmax.f32 %v449_v27, 0.0  ;;  %v259_v36 = vadd.f32 %v1681_v7, %v188_v28 }
  0x4e   :  { %1617 = vst [vmem:[%s2101_s4 + $0x78] sm:$0xff] %v1459_v25   ;;  %v639_v34 = vmax.f32 %v575_v26, 0.0  ;;  %v1203_v37 = vunpack.c.l.bf16 %v1559_v24  ;;  %v640_v38 = vmax.f32 %v576_v29, 0.0  ;;  %v514_v39 = vmax.f32 %v450_v30, 0.0  ;;  %v1593_v25 = vld [vmem:[%s2098_s1 + $0xb0] sm:$0xff]  }
  0x4f   :  { %v260_v40 = vadd.f32 %v1681_v7, %v189_v31  ;;  %v1204_v41 = vunpack.c.h.bf16 %v1559_v24  ;;  %v577_v42 = vadd.f32 %v1323_v4, %v513_v35  ;;  %v451_v43 = vadd.f32 %v1327_v23, %v259_v36 }
  0x50   :  { %v190_v44 = vmul.f32 %v1203_v37, %v1667_v1  ;;  %v1331_v45 = vunpack.c.l.bf16 %v1590_v33  ;;  %v1464_v47 = vpack.c.bf16 %v640_v38, %v639_v34  ;;  %v578_v48 = vadd.f32 %v1324_v15, %v514_v39  ;;  %v1563_v38 = vld [vmem:[%s2097_s0 + $0xb8] sm:$0xff]  }
  0x51   :  { %v452_v49 = vadd.f32 %v1328_v32, %v260_v40  ;;  %v191_v50 = vmul.f32 %v1204_v41, %v1667_v1  ;;  %v641_v52 = vmax.f32 %v577_v42, 0.0  ;;  %v515_v53 = vmax.f32 %v451_v43, 0.0 }
  0x52   :  { %v261_v54 = vadd.f32 %v1681_v7, %v190_v44  ;;  %v1332_v55 = vunpack.c.h.bf16 %v1590_v33  ;;  %1618 = vst [vmem:[%s2101_s4 + $0x80] sm:$0xff] %v1464_v47   ;;  %v642_v56 = vmax.f32 %v578_v48, 0.0  ;;  %v1207_v59 = vunpack.c.l.bf16 %v1560_v46  ;;  %v1594_v47 = vld [vmem:[%s2098_s1 + $0xb8] sm:$0xff]  }
  0x53   :  { %v516_v57 = vmax.f32 %v452_v49, 0.0  ;;  %v262_v58 = vadd.f32 %v1681_v7, %v191_v50  ;;  %v579_v60 = vadd.f32 %v1327_v23, %v515_v53  ;;  %v1208_v62 = vunpack.c.h.bf16 %v1560_v46 }
  0x54   :  { %v453_v61 = vadd.f32 %v1331_v45, %v261_v54  ;;  %v1335_v63 = vunpack.c.l.bf16 %v1591_v51  ;;  %v1469_v2 = vpack.c.bf16 %v642_v56, %v641_v52  ;;  %v192_v5 = vmul.f32 %v1207_v59, %v1667_v1 }
  0x55   :  { %v580_v3 = vadd.f32 %v1328_v32, %v516_v57  ;;  %v454_v4 = vadd.f32 %v1332_v55, %v262_v58  ;;  %v643_v8 = vmax.f32 %v579_v60, 0.0  ;;  %v193_v10 = vmul.f32 %v1208_v62, %v1667_v1  ;;  %v1564_v60 = vld [vmem:[%s2097_s0 + $0xc0] sm:$0xff]  }
  0x56   :  { %v517_v9 = vmax.f32 %v453_v61, 0.0  ;;  %v1336_v11 = vunpack.c.h.bf16 %v1591_v51  ;;  %1619 = vst [vmem:[%s2101_s4 + $0x88] sm:$0xff] %v1469_v2   ;;  %v263_v14 = vadd.f32 %v1681_v7, %v192_v5  ;;  %v1211_v15 = vunpack.c.l.bf16 %v1561_v0  ;;  %v1595_v2 = vld [vmem:[%s2098_s1 + $0xc0] sm:$0xff]  }
  0x57   :  { %v644_v12 = vmax.f32 %v580_v3, 0.0  ;;  %v518_v13 = vmax.f32 %v454_v4, 0.0  ;;  %v264_v17 = vadd.f32 %v1681_v7, %v193_v10  ;;  %v1212_v18 = vunpack.c.h.bf16 %v1561_v0 }
  0x58   :  { %v581_v16 = vadd.f32 %v1331_v45, %v517_v9  ;;  %v1339_v19 = vunpack.c.l.bf16 %v1592_v6  ;;  %v455_v23 = vadd.f32 %v1335_v63, %v263_v14  ;;  %v194_v24 = vmul.f32 %v1211_v15, %v1667_v1 }
  0x59   :  { %v1474_v21 = vpack.c.bf16 %v644_v12, %v643_v8  ;;  %v582_v22 = vadd.f32 %v1332_v55, %v518_v13  ;;  %v456_v27 = vadd.f32 %v1336_v11, %v264_v17  ;;  %v195_v28 = vmul.f32 %v1212_v18, %v1667_v1 }
  0x5a   :  { %v645_v26 = vmax.f32 %v581_v16, 0.0  ;;  %v1340_v29 = vunpack.c.h.bf16 %v1592_v6  ;;  %v519_v31 = vmax.f32 %v455_v23, 0.0  ;;  %v265_v32 = vadd.f32 %v1681_v7, %v194_v24  ;;  %v1565_v16 = vld [vmem:[%s2097_s0 + $0xc8] sm:$0xff]  }
  0x5b   :  { %1620 = vst [vmem:[%s2101_s4 + $0x90] sm:$0xff] %v1474_v21   ;;  %v646_v30 = vmax.f32 %v582_v22, 0.0  ;;  %v1215_v33 = vunpack.c.l.bf16 %v1562_v20  ;;  %v520_v34 = vmax.f32 %v456_v27, 0.0  ;;  %v266_v35 = vadd.f32 %v1681_v7, %v195_v28  ;;  %v1596_v21 = vld [vmem:[%s2098_s1 + $0xc8] sm:$0xff]  }
  0x5c   :  { %v1216_v36 = vunpack.c.h.bf16 %v1562_v20  ;;  %v1343_v37 = vunpack.c.l.bf16 %v1593_v25  ;;  %v583_v40 = vadd.f32 %v1335_v63, %v519_v31  ;;  %v457_v41 = vadd.f32 %v1339_v19, %v265_v32 }
  0x5d   :  { %v1479_v39 = vpack.c.bf16 %v646_v30, %v645_v26  ;;  %v196_v42 = vmul.f32 %v1215_v33, %v1667_v1  ;;  %v584_v43 = vadd.f32 %v1336_v11, %v520_v34  ;;  %v458_v44 = vadd.f32 %v1340_v29, %v266_v35  ;;  %v1566_v34 = vld [vmem:[%s2097_s0 + $0xd0] sm:$0xff]  }
  0x5e   :  { %v197_v45 = vmul.f32 %v1216_v36, %v1667_v1  ;;  %v1344_v46 = vunpack.c.h.bf16 %v1593_v25  ;;  %v647_v48 = vmax.f32 %v583_v40, 0.0  ;;  %v521_v49 = vmax.f32 %v457_v41, 0.0 }
  0x5f   :  { %1621 = vst [vmem:[%s2101_s4 + $0x98] sm:$0xff] %v1479_v39   ;;  %v267_v50 = vadd.f32 %v1681_v7, %v196_v42  ;;  %v1219_v51 = vunpack.c.l.bf16 %v1563_v38  ;;  %v648_v52 = vmax.f32 %v584_v43, 0.0  ;;  %v522_v53 = vmax.f32 %v458_v44, 0.0  ;;  %v1597_v39 = vld [vmem:[%s2098_s1 + $0xd0] sm:$0xff]  }
  0x60   :  { %v268_v54 = vadd.f32 %v1681_v7, %v197_v45  ;;  %v1220_v55 = vunpack.c.h.bf16 %v1563_v38  ;;  %v585_v56 = vadd.f32 %v1339_v19, %v521_v49  ;;  %v1347_v59 = vunpack.c.l.bf16 %v1594_v47 }
  0x61   :  { %v459_v57 = vadd.f32 %v1343_v37, %v267_v50  ;;  %v198_v58 = vmul.f32 %v1219_v51, %v1667_v1  ;;  %v1484_v61 = vpack.c.bf16 %v648_v52, %v647_v48  ;;  %v586_v62 = vadd.f32 %v1340_v29, %v522_v53  ;;  %v1567_v52 = vld [vmem:[%s2097_s0 + $0xd8] sm:$0xff]  }
  0x62   :  { %v460_v63 = vadd.f32 %v1344_v46, %v268_v54  ;;  %v199_v0 = vmul.f32 %v1220_v55, %v1667_v1  ;;  %v649_v3 = vmax.f32 %v585_v56, 0.0  ;;  %v1348_v6 = vunpack.c.h.bf16 %v1594_v47  ;;  %v2012_v55 = vld [vmem:[%s2099_s2] ss:$0 sm:$0xff] }
  0x63   :  { %v523_v4 = vmax.f32 %v459_v57, 0.0  ;;  %v269_v5 = vadd.f32 %v1681_v7, %v198_v58  ;;  %1622 = vst [vmem:[%s2101_s4 + $0xa0] sm:$0xff] %v1484_v61   ;;  %v650_v8 = vmax.f32 %v586_v62, 0.0  ;;  %v1223_v11 = vunpack.c.l.bf16 %v1564_v60 }
  0x64   :  { %v524_v9 = vmax.f32 %v460_v63, 0.0  ;;  %v270_v10 = vadd.f32 %v1681_v7, %v199_v0  ;;  %v1224_v14 = vunpack.c.h.bf16 %v1564_v60  ;;  %v1351_v15 = vunpack.c.l.bf16 %v1595_v2  ;;  %v1598_v60 = vld [vmem:[%s2098_s1 + $0xd8] sm:$0xff]   ;;  %v2025_v63 = vld [vmem:[%s2100_s3] ss:$0 sm:$0xff] }
  0x65   :  { %v587_v12 = vadd.f32 %v1343_v37, %v523_v4  ;;  %v461_v13 = vadd.f32 %v1347_v59, %v269_v5  ;;  %v1489_v17 = vpack.c.bf16 %v650_v8, %v649_v3  ;;  %v200_v20 = vmul.f32 %v1223_v11, %v1667_v1 }
  0x66   :  { %v588_v18 = vadd.f32 %v1344_v46, %v524_v9  ;;  %v462_v19 = vadd.f32 %v1348_v6, %v270_v10  ;;  %v201_v24 = vmul.f32 %v1224_v14, %v1667_v1  ;;  %v1352_v25 = vunpack.c.h.bf16 %v1595_v2 }
  0x67   :  { %v651_v22 = vmax.f32 %v587_v12, 0.0  ;;  %v525_v23 = vmax.f32 %v461_v13, 0.0  ;;  %1623 = vst [vmem:[%s2101_s4 + $0xa8] sm:$0xff] %v1489_v17   ;;  %v271_v28 = vadd.f32 %v1681_v7, %v200_v20  ;;  %v1227_v29 = vunpack.c.l.bf16 %v1565_v16  ;;  %v1568_v12 = vld [vmem:[%s2097_s0 + $0xe0] sm:$0xff]  }
  0x68   :  { %v652_v26 = vmax.f32 %v588_v18, 0.0  ;;  %v526_v27 = vmax.f32 %v462_v19, 0.0  ;;  %v272_v31 = vadd.f32 %v1681_v7, %v201_v24  ;;  %v1228_v32 = vunpack.c.h.bf16 %v1565_v16  ;;  %v1599_v17 = vld [vmem:[%s2098_s1 + $0xe0] sm:$0xff]  }
  0x69   :  { %v589_v30 = vadd.f32 %v1347_v59, %v525_v23  ;;  %v1355_v33 = vunpack.c.l.bf16 %v1596_v21  ;;  %v463_v37 = vadd.f32 %v1351_v15, %v271_v28  ;;  %v202_v38 = vmul.f32 %v1227_v29, %v1667_v1 }
  0x6a   :  { %v1494_v35 = vpack.c.bf16 %v652_v26, %v651_v22  ;;  %v590_v36 = vadd.f32 %v1348_v6, %v526_v27  ;;  %v464_v41 = vadd.f32 %v1352_v25, %v272_v31  ;;  %v203_v42 = vmul.f32 %v1228_v32, %v1667_v1 }
  0x6b   :  { %v653_v40 = vmax.f32 %v589_v30, 0.0  ;;  %v1356_v43 = vunpack.c.h.bf16 %v1596_v21  ;;  %v527_v45 = vmax.f32 %v463_v37, 0.0  ;;  %v273_v46 = vadd.f32 %v1681_v7, %v202_v38  ;;  %v1569_v30 = vld [vmem:[%s2097_s0 + $0xe8] sm:$0xff]  }
  0x6c   :  { %1624 = vst [vmem:[%s2101_s4 + $0xb0] sm:$0xff] %v1494_v35   ;;  %v654_v44 = vmax.f32 %v590_v36, 0.0  ;;  %v1231_v47 = vunpack.c.l.bf16 %v1566_v34  ;;  %v528_v48 = vmax.f32 %v464_v41, 0.0  ;;  %v274_v49 = vadd.f32 %v1681_v7, %v203_v42  ;;  %v1600_v35 = vld [vmem:[%s2098_s1 + $0xe8] sm:$0xff]  }
  0x6d   :  { %v1232_v50 = vunpack.c.h.bf16 %v1566_v34  ;;  %v1359_v51 = vunpack.c.l.bf16 %v1597_v39  ;;  %v591_v53 = vadd.f32 %v1351_v15, %v527_v45  ;;  %v465_v54 = vadd.f32 %v1355_v33, %v273_v46 }
  0x6e   :  { %v1499_v1 = vpack.c.bf16 %v654_v44, %v653_v40  ;;  %v204_v56 = vmul.f32 %v2012_v55, %v1231_v47  ;;  %v592_v57 = vadd.f32 %v1352_v25, %v528_v48  ;;  %v466_v58 = vadd.f32 %v1356_v43, %v274_v49  ;;  %v1570_v48 = vld [vmem:[%s2097_s0 + $0xf0] sm:$0xff]  }
  0x6f   :  { %v205_v7 = vmul.f32 %v2012_v55, %v1232_v50  ;;  %v1360_v59 = vunpack.c.h.bf16 %v1597_v39  ;;  %v655_v61 = vmax.f32 %v591_v53, 0.0  ;;  %v529_v62 = vmax.f32 %v465_v54, 0.0 }
  0x70   :  { %1625 = vst [vmem:[%s2101_s4 + $0xb8] sm:$0xff] %v1499_v1   ;;  %v275_v0 = vadd.f32 %v2025_v63, %v204_v56  ;;  %v1235_v2 = vunpack.c.l.bf16 %v1567_v52  ;;  %v656_v3 = vmax.f32 %v592_v57, 0.0  ;;  %v530_v4 = vmax.f32 %v466_v58, 0.0  ;;  %v1601_v1 = vld [vmem:[%s2098_s1 + $0xf0] sm:$0xff]  }
  0x71   :  { %v276_v5 = vadd.f32 %v2025_v63, %v205_v7  ;;  %v1236_v6 = vunpack.c.h.bf16 %v1567_v52  ;;  %v593_v8 = vadd.f32 %v1355_v33, %v529_v62  ;;  %v1363_v11 = vunpack.c.l.bf16 %v1598_v60 }
  0x72   :  { %v467_v9 = vadd.f32 %v1359_v51, %v275_v0  ;;  %v206_v10 = vmul.f32 %v2012_v55, %v1235_v2  ;;  %v1504_v13 = vpack.c.bf16 %v656_v3, %v655_v61  ;;  %v594_v14 = vadd.f32 %v1356_v43, %v530_v4  ;;  %v1571_v3 = vld [vmem:[%s2097_s0 + $0xf8] sm:$0xff]  }
  0x73   :  { %v468_v15 = vadd.f32 %v1360_v59, %v276_v5  ;;  %v207_v16 = vmul.f32 %v2012_v55, %v1236_v6  ;;  %v657_v18 = vmax.f32 %v593_v8, 0.0  ;;  %v1364_v21 = vunpack.c.h.bf16 %v1598_v60 }
  0x74   :  { %v531_v19 = vmax.f32 %v467_v9, 0.0  ;;  %v277_v20 = vadd.f32 %v2025_v63, %v206_v10  ;;  %1626 = vst [vmem:[%s2101_s4 + $0xc0] sm:$0xff] %v1504_v13   ;;  %v658_v22 = vmax.f32 %v594_v14, 0.0  ;;  %v1239_v25 = vunpack.c.l.bf16 %v1568_v12  ;;  %v1602_v13 = vld [vmem:[%s2098_s1 + $0xf8] sm:$0xff]  }
  0x75   :  { %v532_v23 = vmax.f32 %v468_v15, 0.0  ;;  %v278_v24 = vadd.f32 %v2025_v63, %v207_v16  ;;  %v1240_v28 = vunpack.c.h.bf16 %v1568_v12  ;;  %v1367_v29 = vunpack.c.l.bf16 %v1599_v17 }
  0x76   :  { %v595_v26 = vadd.f32 %v1359_v51, %v531_v19  ;;  %v469_v27 = vadd.f32 %v1363_v11, %v277_v20  ;;  %v1509_v31 = vpack.c.bf16 %v658_v22, %v657_v18  ;;  %v208_v34 = vmul.f32 %v2012_v55, %v1239_v25 }
  0x77   :  { %v596_v32 = vadd.f32 %v1360_v59, %v532_v23  ;;  %v470_v33 = vadd.f32 %v1364_v21, %v278_v24  ;;  %v209_v38 = vmul.f32 %v2012_v55, %v1240_v28  ;;  %v1368_v39 = vunpack.c.h.bf16 %v1599_v17 }
  0x78   :  { %v659_v36 = vmax.f32 %v595_v26, 0.0  ;;  %v533_v37 = vmax.f32 %v469_v27, 0.0  ;;  %1627 = vst [vmem:[%s2101_s4 + $0xc8] sm:$0xff] %v1509_v31   ;;  %v279_v42 = vadd.f32 %v2025_v63, %v208_v34  ;;  %v1243_v43 = vunpack.c.l.bf16 %v1569_v30 }
  0x79   :  { %v660_v40 = vmax.f32 %v596_v32, 0.0  ;;  %v534_v41 = vmax.f32 %v470_v33, 0.0  ;;  %v280_v45 = vadd.f32 %v2025_v63, %v209_v38  ;;  %v1244_v46 = vunpack.c.h.bf16 %v1569_v30 }
  0x7a   :  { %v597_v44 = vadd.f32 %v1363_v11, %v533_v37  ;;  %v1371_v47 = vunpack.c.l.bf16 %v1600_v35  ;;  %v471_v51 = vadd.f32 %v1367_v29, %v279_v42  ;;  %v210_v52 = vmul.f32 %v2012_v55, %v1243_v43 }
  0x7b   :  { %v1514_v49 = vpack.c.bf16 %v660_v40, %v659_v36  ;;  %v598_v50 = vadd.f32 %v1364_v21, %v534_v41  ;;  %v472_v54 = vadd.f32 %v1368_v39, %v280_v45  ;;  %v211_v56 = vmul.f32 %v2012_v55, %v1244_v46 }
  0x7c   :  { %v661_v53 = vmax.f32 %v597_v44, 0.0  ;;  %v1372_v57 = vunpack.c.h.bf16 %v1600_v35  ;;  %v535_v7 = vmax.f32 %v471_v51, 0.0  ;;  %v281_v59 = vadd.f32 %v2025_v63, %v210_v52 }
  0x7d   :  { %1628 = vst [vmem:[%s2101_s4 + $0xd0] sm:$0xff] %v1514_v49   ;;  %v662_v58 = vmax.f32 %v598_v50, 0.0  ;;  %v1247_v60 = vunpack.c.l.bf16 %v1570_v48  ;;  %v536_v61 = vmax.f32 %v472_v54, 0.0  ;;  %v282_v62 = vadd.f32 %v2025_v63, %v211_v56 }
  0x7e   :  { %v1248_v0 = vunpack.c.h.bf16 %v1570_v48  ;;  %v1375_v2 = vunpack.c.l.bf16 %v1601_v1  ;;  %v599_v5 = vadd.f32 %v1367_v29, %v535_v7  ;;  %v473_v6 = vadd.f32 %v1371_v47, %v281_v59 }
  0x7f   :  { %v1519_v4 = vpack.c.bf16 %v662_v58, %v661_v53  ;;  %v212_v8 = vmul.f32 %v2012_v55, %v1247_v60  ;;  %v600_v9 = vadd.f32 %v1368_v39, %v536_v61  ;;  %v474_v10 = vadd.f32 %v1372_v57, %v282_v62 }
  0x80   :  { %v213_v11 = vmul.f32 %v2012_v55, %v1248_v0  ;;  %v1376_v12 = vunpack.c.h.bf16 %v1601_v1  ;;  %v663_v14 = vmax.f32 %v599_v5, 0.0  ;;  %v537_v15 = vmax.f32 %v473_v6, 0.0 }
  0x81   :  { %1629 = vst [vmem:[%s2101_s4 + $0xd8] sm:$0xff] %v1519_v4   ;;  %v283_v16 = vadd.f32 %v2025_v63, %v212_v8  ;;  %v1251_v17 = vunpack.c.l.bf16 %v1571_v3  ;;  %v664_v18 = vmax.f32 %v600_v9, 0.0  ;;  %v538_v19 = vmax.f32 %v474_v10, 0.0 }
  0x82   :  { %v284_v20 = vadd.f32 %v2025_v63, %v213_v11  ;;  %v1252_v21 = vunpack.c.h.bf16 %v1571_v3  ;;  %v601_v22 = vadd.f32 %v1371_v47, %v537_v15  ;;  %v1379_v25 = vunpack.c.l.bf16 %v1602_v13 }
  0x83   :  { %v475_v23 = vadd.f32 %v1375_v2, %v283_v16  ;;  %v214_v24 = vmul.f32 %v2012_v55, %v1251_v17  ;;  %v1524_v26 = vpack.c.bf16 %v664_v18, %v663_v14  ;;  %v602_v27 = vadd.f32 %v1372_v57, %v538_v19 }
  0x84   :  { %v476_v28 = vadd.f32 %v1376_v12, %v284_v20  ;;  %v215_v29 = vmul.f32 %v2012_v55, %v1252_v21  ;;  %v665_v30 = vmax.f32 %v601_v22, 0.0  ;;  %v1380_v33 = vunpack.c.h.bf16 %v1602_v13 }
  0x85   :  { %v539_v31 = vmax.f32 %v475_v23, 0.0  ;;  %v285_v32 = vadd.f32 %v2025_v63, %v214_v24  ;;  %1630 = vst [vmem:[%s2101_s4 + $0xe0] sm:$0xff] %v1524_v26   ;;  %v666_v34 = vmax.f32 %v602_v27, 0.0 }
  0x86   :  { %v540_v35 = vmax.f32 %v476_v28, 0.0  ;;  %v286_v36 = vadd.f32 %v2025_v63, %v215_v29 }
  0x87   :  { %v603_v37 = vadd.f32 %v1375_v2, %v539_v31  ;;  %v477_v38 = vadd.f32 %v1379_v25, %v285_v32  ;;  %v1529_v39 = vpack.c.bf16 %v666_v34, %v665_v30 }
  0x88   :  { %v604_v40 = vadd.f32 %v1376_v12, %v540_v35  ;;  %v478_v41 = vadd.f32 %v1380_v33, %v286_v36 }
  0x89   :  { %v667_v42 = vmax.f32 %v603_v37, 0.0  ;;  %v541_v55 = vmax.f32 %v477_v38, 0.0  ;;  %1631 = vst [vmem:[%s2101_s4 + $0xe8] sm:$0xff] %v1529_v39  }
  0x8a   :  { %v668_v43 = vmax.f32 %v604_v40, 0.0  ;;  %v542_v44 = vmax.f32 %v478_v41, 0.0 }
  0x8b   :  { %v605_v45 = vadd.f32 %v1379_v25, %v541_v55 }
  0x8c   :  { %v1534_v46 = vpack.c.bf16 %v668_v43, %v667_v42  ;;  %v606_v47 = vadd.f32 %v1380_v33, %v542_v44 }
  0x8d   :  { %v669_v48 = vmax.f32 %v605_v45, 0.0 }
  0x8e   :  { %1632 = vst [vmem:[%s2101_s4 + $0xf0] sm:$0xff] %v1534_v46   ;;  %v670_v63 = vmax.f32 %v606_v47, 0.0 }
  0x90   :  { %v1539_v49 = vpack.c.bf16 %v670_v63, %v669_v48 }
  0x92   :  { %1633 = vst [vmem:[%s2101_s4 + $0xf8] sm:$0xff] %v1539_v49  }

// kernel: bottleneck_forward.6
= control target key start
LH: loop header
LB: loop body
LE: loop exit
PB: predicated region body
PF: predicated region fallthrough
CT: control target
= control target key end

     0   :  { %s2525_s3 = inlined_call_operand.vmem [shape: bf16[128,128], index: 3, kind: input, shape index: {}]   ;;  %s2526_s0 = inlined_call_operand.vmem [shape: bf16[512,128], index: 0, kind: input, shape index: {}]   ;;  %s2527_s1 = inlined_call_operand.vmem [shape: f32[1,128], index: 1, kind: input, shape index: {}]   ;;  %s2528_s2 = inlined_call_operand.vmem [shape: f32[1,128], index: 2, kind: input, shape index: {}]   ;;  %s2529_s4 = inlined_call_operand.vmem [shape: bf16[512,128], index: 4, kind: output, shape index: {0}]   ;;  %s2530_s5 = inlined_call_operand.vmem [shape: f32[8,128], index: 5, kind: output, shape index: {1}]  }
   0x1   :  { %v1904_v0 = vld [vmem:[%s2525_s3 + $0x38] sm:$0xff]   ;;  %v1905_v1 = vld [vmem:[%s2525_s3 + $0x30] sm:$0xff]   ;;  %v1906_v2 = vld [vmem:[%s2525_s3 + $0x28] sm:$0xff]  }
   0x2   :  { %1808 = vmatprep.subr.bf16.mxu0 %v1904_v0  ;;  %1888 = vmatprep.subr.bf16.mxu1 %v1904_v0  ;;  %v1907_v3 = vld [vmem:[%s2525_s3 + $0x20] sm:$0xff]   ;;  %v1706_v8 = vld [vmem:[%s2526_s0 + $0x8] sm:$0xff]   ;;  %v1707_v9 = vld [vmem:[%s2526_s0 + $0x10] sm:$0xff]  }
   0x3   :  { %1809 = vmatpush3.bf16.msra.mxu0 %v1904_v0  ;;  %1896 = vmatpush3.bf16.msra.mxu1 %v1904_v0  ;;  %v1419_v4 = vld [vmem:[%s2526_s0] sm:$0xff]   ;;  %v1908_v13 = vld [vmem:[%s2525_s3 + $0x18] sm:$0xff]   ;;  %v1424_v14 = vunpack.c.l.bf16 %v1706_v8  ;;  %v1425_v15 = vunpack.c.h.bf16 %v1706_v8  ;;  %v1428_v16 = vunpack.c.l.bf16 %v1707_v9  ;;  %v1429_v19 = vunpack.c.h.bf16 %v1707_v9  ;;  %v1909_v22 = vld [vmem:[%s2525_s3 + $0x10] sm:$0xff]  }
   0x4   :  { %1810 = vmatprep.subr.bf16.mxu0 %v1905_v1  ;;  %1889 = vmatprep.subr.bf16.mxu1 %v1905_v1  ;;  %v1960_v5 = vld [vmem:[%s2527_s1] ss:$0 sm:$0xff]  ;;  %v1420_v6 = vunpack.c.l.bf16 %v1419_v4  ;;  %v1421_v7 = vunpack.c.h.bf16 %v1419_v4  ;;  %v1708_v26 = vld [vmem:[%s2526_s0 + $0x18] sm:$0xff]   ;;  %v1910_v31 = vld [vmem:[%s2525_s3 + $0x8] sm:$0xff]  }
   0x5   :  { %v1971_v10 = vld [vmem:[%s2528_s2] ss:$0 sm:$0xff]  ;;  %v157_v23 = vmul.f32 %v1424_v14, %v1960_v5  ;;  %v158_v24 = vmul.f32 %v1425_v15, %v1960_v5  ;;  %v159_v25 = vmul.f32 %v1428_v16, %v1960_v5  ;;  %v160_v28 = vmul.f32 %v1429_v19, %v1960_v5  ;;  %v1710_v38 = vld [vmem:[%s2526_s0 + $0x28] sm:$0xff]   ;;  %v1711_v41 = vld [vmem:[%s2526_s0 + $0x30] sm:$0xff]  }
   0x6   :  { %v155_v11 = vmul.f32 %v1420_v6, %v1960_v5  ;;  %v156_v12 = vmul.f32 %v1421_v7, %v1960_v5  ;;  %v1709_v29 = vld [vmem:[%s2526_s0 + $0x20] sm:$0xff]   ;;  %v1432_v30 = vunpack.c.l.bf16 %v1708_v26  ;;  %v1433_v35 = vunpack.c.h.bf16 %v1708_v26  ;;  %v1712_v42 = vld [vmem:[%s2526_s0 + $0x38] sm:$0xff]   ;;  %v1714_v63 = vld [vmem:[%s2526_s0 + $0x48] sm:$0xff]  }
   0x7   :  { %1811 = vmatpush3.bf16.msra.mxu0 %v1905_v1  ;;  %1897 = vmatpush3.bf16.msra.mxu1 %v1905_v1  ;;  %v228_v32 = vadd.f32 %v1971_v10, %v157_v23  ;;  %v229_v33 = vadd.f32 %v1971_v10, %v158_v24  ;;  %v230_v34 = vadd.f32 %v1971_v10, %v159_v25  ;;  %v1436_v37 = vunpack.c.l.bf16 %v1709_v29  ;;  %v1911_v43 = vld [vmem:[%s2525_s3] sm:$0xff]   ;;  %v1715_v4 = vld [vmem:[%s2526_s0 + $0x50] sm:$0xff]   ;;  %v1716_v23 = vld [vmem:[%s2526_s0 + $0x58] sm:$0xff]  }
   0x8   :  { %1812 = vmatprep.subr.bf16.mxu0 %v1906_v2  ;;  %1890 = vmatprep.subr.bf16.mxu1 %v1906_v2  ;;  %v226_v17 = vadd.f32 %v1971_v10, %v155_v11  ;;  %v227_v18 = vadd.f32 %v1971_v10, %v156_v12  ;;  %v231_v36 = vadd.f32 %v1971_v10, %v160_v28  ;;  %v1437_v40 = vunpack.c.h.bf16 %v1709_v29  ;;  %v1713_v48 = vld [vmem:[%s2526_s0 + $0x40] sm:$0xff]  }
   0x9   :  { %v161_v39 = vmul.f32 %v1432_v30, %v1960_v5  ;;  %v292_v44 = vmax.f32 %v228_v32, 0.0  ;;  %v293_v45 = vmax.f32 %v229_v33, 0.0  ;;  %v294_v46 = vmax.f32 %v230_v34, 0.0 }
   0xa   :  { %v290_v20 = vmax.f32 %v226_v17, 0.0  ;;  %v291_v21 = vmax.f32 %v227_v18, 0.0  ;;  %v162_v47 = vmul.f32 %v1433_v35, %v1960_v5  ;;  %v295_v49 = vmax.f32 %v231_v36, 0.0 }
   0xb   :  { %1813 = vmatpush3.bf16.msra.mxu0 %v1906_v2  ;;  %1898 = vmatpush3.bf16.msra.mxu1 %v1906_v2  ;;  %v163_v50 = vmul.f32 %v1436_v37, %v1960_v5  ;;  %v1440_v51 = vunpack.c.l.bf16 %v1710_v38  ;;  %v1441_v52 = vunpack.c.h.bf16 %v1710_v38  ;;  %v1444_v53 = vunpack.c.l.bf16 %v1711_v41 }
   0xc   :  { %1814 = vmatprep.subr.bf16.mxu0 %v1907_v3  ;;  %1891 = vmatprep.subr.bf16.mxu1 %v1907_v3  ;;  %v354_v27 = vpack.c.bf16 %v291_v21, %v290_v20  ;;  %v1445_v54 = vunpack.c.h.bf16 %v1711_v41  ;;  %v1448_v55 = vunpack.c.l.bf16 %v1712_v42  ;;  %v1449_v56 = vunpack.c.h.bf16 %v1712_v42 }
   0xd   :  { %v164_v57 = vmul.f32 %v1437_v40, %v1960_v5  ;;  %v1452_v58 = vunpack.c.l.bf16 %v1713_v48  ;;  %v1453_v59 = vunpack.c.h.bf16 %v1713_v48  ;;  %v355_v60 = vpack.c.bf16 %v293_v45, %v292_v44  ;;  %v1721_v44 = vld [vmem:[%s2526_s0 + $0x80] sm:$0xff]  }
   0xe   :  { %1824 = vmatprep.mubr.bf16.mxu0 %v354_v27  ;;  %v232_v61 = vadd.f32 %v1971_v10, %v161_v39  ;;  %v233_v62 = vadd.f32 %v1971_v10, %v162_v47  ;;  %v356_v0 = vpack.c.bf16 %v295_v49, %v294_v46  ;;  %v234_v1 = vadd.f32 %v1971_v10, %v163_v50 }
   0xf   :  { %1815 = vmatpush3.bf16.msra.mxu0 %v1907_v3  ;;  %1899 = vmatpush3.bf16.msra.mxu1 %v1907_v3  ;;  %v165_v2 = vmul.f32 %v1440_v51, %v1960_v5  ;;  %v166_v3 = vmul.f32 %v1441_v52, %v1960_v5  ;;  %v167_v6 = vmul.f32 %v1444_v53, %v1960_v5  ;;  %v1456_v14 = vunpack.c.l.bf16 %v1714_v63  ;;  %v2064_v52 = vld [vmem:[%s2526_s0 + $0x60] sm:$0xff]  }
  0x10   :  { %1816 = vmatprep.subr.bf16.mxu0 %v1908_v13  ;;  %1892 = vmatprep.subr.bf16.mxu1 %v1908_v13  ;;  %v168_v7 = vmul.f32 %v1445_v54, %v1960_v5  ;;  %v169_v8 = vmul.f32 %v1448_v55, %v1960_v5  ;;  %v170_v9 = vmul.f32 %v1449_v56, %v1960_v5  ;;  %v296_v15 = vmax.f32 %v232_v61, 0.0 }
  0x11   :  { %v235_v11 = vadd.f32 %v1971_v10, %v164_v57  ;;  %v171_v12 = vmul.f32 %v1452_v58, %v1960_v5  ;;  %v297_v16 = vmax.f32 %v233_v62, 0.0  ;;  %v1457_v17 = vunpack.c.h.bf16 %v1714_v63 }
  0x12   :  { %v1460_v18 = vunpack.c.l.bf16 %v1715_v4  ;;  %v298_v19 = vmax.f32 %v234_v1, 0.0  ;;  %v236_v20 = vadd.f32 %v1971_v10, %v165_v2  ;;  %v237_v21 = vadd.f32 %v1971_v10, %v166_v3 }
  0x13   :  { %1817 = vmatpush3.bf16.msra.mxu0 %v1908_v13  ;;  %1900 = vmatpush3.bf16.msra.mxu1 %v1908_v13  ;;  %v172_v13 = vmul.f32 %v1453_v59, %v1960_v5  ;;  %v238_v24 = vadd.f32 %v1971_v10, %v167_v6  ;;  %v239_v25 = vadd.f32 %v1971_v10, %v168_v7  ;;  %v299_v28 = vmax.f32 %v235_v11, 0.0  ;;  %v1722_v59 = vld [vmem:[%s2526_s0 + $0x88] sm:$0xff]   ;;  %v1724_v11 = vld [vmem:[%s2526_s0 + $0x98] sm:$0xff]  }
  0x14   :  { %1818 = vmatprep.subr.bf16.mxu0 %v1909_v22  ;;  %1893 = vmatprep.subr.bf16.mxu1 %v1909_v22  ;;  %v240_v26 = vadd.f32 %v1971_v10, %v169_v8  ;;  %v241_v27 = vadd.f32 %v1971_v10, %v170_v9  ;;  %v242_v29 = vadd.f32 %v1971_v10, %v171_v12  ;;  %v1464_v35 = vunpack.c.l.bf16 %v1716_v23 }
  0x15   :  { %v243_v30 = vadd.f32 %v1971_v10, %v172_v13  ;;  %v357_v32 = vpack.c.bf16 %v297_v16, %v296_v15  ;;  %v174_v33 = vmul.f32 %v1457_v17, %v1960_v5  ;;  %v175_v34 = vmul.f32 %v1460_v18, %v1960_v5 }
  0x16   :  { %v300_v36 = vmax.f32 %v236_v20, 0.0  ;;  %v301_v37 = vmax.f32 %v237_v21, 0.0  ;;  %v1465_v39 = vunpack.c.h.bf16 %v1716_v23  ;;  %v302_v40 = vmax.f32 %v238_v24, 0.0  ;;  %v1725_v24 = vld [vmem:[%s2526_s0 + $0xa0] sm:$0xff]  }
  0x17   :  { %1819 = vmatpush3.bf16.msra.mxu0 %v1909_v22  ;;  %1901 = vmatpush3.bf16.msra.mxu1 %v1909_v22  ;;  %v1461_v22 = vunpack.c.h.bf16 %v1715_v4  ;;  %v303_v41 = vmax.f32 %v239_v25, 0.0  ;;  %v304_v42 = vmax.f32 %v240_v26, 0.0  ;;  %v358_v45 = vpack.c.bf16 %v299_v28, %v298_v19 }
  0x18   :  { %1820 = vmatprep.subr.bf16.mxu0 %v1910_v31  ;;  %1894 = vmatprep.subr.bf16.mxu1 %v1910_v31  ;;  %v306_v46 = vmax.f32 %v242_v29, 0.0  ;;  %v307_v47 = vmax.f32 %v243_v30, 0.0  ;;  %v245_v49 = vadd.f32 %v1971_v10, %v174_v33  ;;  %v2058_v50 = vadd.f32 %v1971_v10, %v175_v34  ;;  %v1726_v33 = vld [vmem:[%s2526_s0 + $0xa8] sm:$0xff]  }
  0x19   :  { %v176_v38 = vmul.f32 %v1461_v22, %v1960_v5  ;;  %v177_v51 = vmul.f32 %v1464_v35, %v1960_v5  ;;  %v178_v54 = vmul.f32 %v1465_v39, %v1960_v5  ;;  %v1484_v55 = vunpack.c.l.bf16 %v1721_v44 }
  0x1a   :  { %v359_v56 = vpack.c.bf16 %v301_v37, %v300_v36  ;;  %v360_v57 = vpack.c.bf16 %v303_v41, %v302_v40  ;;  %v1468_v62 = vunpack.c.l.bf16 %v2064_v52  ;;  %v1485_v63 = vunpack.c.h.bf16 %v1721_v44 }
  0x1b   :  { %1821 = vmatpush3.bf16.msra.mxu0 %v1910_v31  ;;  %1902 = vmatpush3.bf16.msra.mxu1 %v1910_v31  ;;  %v173_v31 = vmul.f32 %v1456_v14, %v1960_v5  ;;  %v2067_v53 = vadd.f32 %v1971_v10, %v176_v38  ;;  %v309_v1 = vmax.f32 %v245_v49, 0.0  ;;  %v310_v2 = vmax.f32 %v2058_v50, 0.0 }
  0x1c   :  { %1822 = vmatprep.subr.bf16.mxu0 %v1911_v43  ;;  %1895 = vmatprep.subr.bf16.mxu1 %v1911_v43  ;;  %v2083_v3 = vadd.f32 %v1971_v10, %v177_v51  ;;  %v187_v4 = vmul.f32 %v1484_v55, %v1960_v5  ;;  %v2088_v7 = vadd.f32 %v1971_v10, %v178_v54  ;;  %v1488_v9 = vunpack.c.l.bf16 %v1722_v59 }
  0x1d   :  { %v244_v48 = vadd.f32 %v1971_v10, %v173_v31  ;;  %v311_v6 = vmax.f32 %v2067_v53, 0.0  ;;  %v188_v8 = vmul.f32 %v1485_v63, %v1960_v5  ;;  %v1469_v12 = vunpack.c.h.bf16 %v2064_v52 }
  0x1e   :  { %v258_v13 = vadd.f32 %v1971_v10, %v187_v4  ;;  %v1489_v14 = vunpack.c.h.bf16 %v1722_v59  ;;  %v2097_v16 = vmul.f32 %v1468_v62, %v1960_v5  ;;  %v189_v18 = vmul.f32 %v1488_v9, %v1960_v5 }
  0x1f   :  { %1823 = vmatpush3.bf16.msra.mxu0 %v1911_v43  ;;  %1903 = vmatpush3.bf16.msra.mxu1 %v1911_v43  ;;  %v305_v43 = vmax.f32 %v241_v27, 0.0  ;;  %v308_v61 = vmax.f32 %v244_v48, 0.0  ;;  %v259_v17 = vadd.f32 %v1971_v10, %v188_v8  ;;  %v1496_v23 = vunpack.c.l.bf16 %v1724_v11 }
  0x20   :  { %v322_v20 = vmax.f32 %v258_v13, 0.0  ;;  %v190_v21 = vmul.f32 %v1489_v14, %v1960_v5  ;;  %v260_v27 = vadd.f32 %v1971_v10, %v189_v18  ;;  %v1497_v31 = vunpack.c.h.bf16 %v1724_v11  ;;  %v1729_v18 = vld [vmem:[%s2526_s0 + $0xc0] sm:$0xff]  }
  0x21   :  { %v2070_v58 = vpack.c.bf16 %v305_v43, %v304_v42  ;;  %v2106_v25 = vpack.c.bf16 %v309_v1, %v308_v61  ;;  %v323_v26 = vmax.f32 %v259_v17, 0.0  ;;  %v1500_v37 = vunpack.c.l.bf16 %v1725_v24  ;;  %v1728_v1 = vld [vmem:[%s2526_s0 + $0xb8] sm:$0xff]  }
  0x22   :  { %1825 = vmatmul.mubr.bf16.vlgmr.msra.gmra.mxu0 %v355_v60  ;;  %v2075_v60 = vpack.c.bf16 %v307_v47, %v306_v46  ;;  %v261_v29 = vadd.f32 %v1971_v10, %v190_v21  ;;  %v324_v35 = vmax.f32 %v260_v27, 0.0  ;;  %v194_v40 = vmul.f32 %v1497_v31, %v1960_v5  ;;  %v1727_v46 = vld [vmem:[%s2526_s0 + $0xb0] sm:$0xff]   ;;  %v1718_v47 = vld [vmem:[%s2526_s0 + $0x68] sm:$0xff]  }
  0x23   :  { %1828 = vmatprep.mubr.bf16.mxu0 %v356_v0  ;;  %v1723_v0 = vld [vmem:[%s2526_s0 + $0x90] sm:$0xff]   ;;  %v370_v34 = vpack.c.bf16 %v323_v26, %v322_v20  ;;  %v1501_v43 = vunpack.c.h.bf16 %v1725_v24  ;;  %v195_v44 = vmul.f32 %v1500_v37, %v1960_v5  ;;  %v1505_v54 = vunpack.c.h.bf16 %v1726_v33 }
  0x24   :  { %v1492_v15 = vunpack.c.l.bf16 %v1723_v0  ;;  %v1493_v19 = vunpack.c.h.bf16 %v1723_v0  ;;  %v325_v38 = vmax.f32 %v261_v29, 0.0  ;;  %v265_v49 = vadd.f32 %v1971_v10, %v194_v40  ;;  %v1731_v40 = vld [vmem:[%s2526_s0 + $0xd0] sm:$0xff]  }
  0x25   :  { %1856 = vmatprep.mubr.bf16.mxu1 %v370_v34  ;;  %v198_v62 = vmul.f32 %v1505_v54, %v1960_v5  ;;  %v1508_v63 = vunpack.c.l.bf16 %v1727_v46  ;;  %v1509_v0 = vunpack.c.h.bf16 %v1727_v46  ;;  %v312_v4 = vmax.f32 %v2083_v3, 0.0 }
  0x26   :  { %v191_v22 = vmul.f32 %v1492_v15, %v1960_v5  ;;  %v192_v28 = vmul.f32 %v1493_v19, %v1960_v5  ;;  %v371_v48 = vpack.c.bf16 %v325_v38, %v324_v35  ;;  %v329_v61 = vmax.f32 %v265_v49, 0.0 }
  0x27   :  { %v1472_v8 = vunpack.c.l.bf16 %v1718_v47  ;;  %v313_v13 = vmax.f32 %v2088_v7, 0.0  ;;  %v1473_v14 = vunpack.c.h.bf16 %v1718_v47  ;;  %v199_v15 = vmul.f32 %v1508_v63, %v1960_v5 }
  0x28   :  { %v262_v30 = vadd.f32 %v1971_v10, %v191_v22  ;;  %v263_v36 = vadd.f32 %v1971_v10, %v192_v28  ;;  %1857 = vmatmul.mubr.bf16.vlgmr.msra.gmra.mxu1 %v371_v48  ;;  %v200_v17 = vmul.f32 %v1509_v0, %v1960_v5  ;;  %v180_v3 = vmul.f32 %v1469_v12, %v1960_v5 }
  0x29   :  { %v1512_v19 = vunpack.c.l.bf16 %v1728_v1  ;;  %v1513_v20 = vunpack.c.h.bf16 %v1728_v1  ;;  %v270_v24 = vadd.f32 %v1971_v10, %v199_v15  ;;  %v1516_v27 = vunpack.c.l.bf16 %v1729_v18  ;;  %v1732_v15 = vld [vmem:[%s2526_s0 + $0xd8] sm:$0xff]  }
  0x2a   :  { %1829 = vmatmul.mubr.bf16.gmra.mxu0 %v357_v32  ;;  %v193_v32 = vmul.f32 %v1496_v23, %v1960_v5  ;;  %v326_v39 = vmax.f32 %v262_v30, 0.0  ;;  %v327_v42 = vmax.f32 %v263_v36, 0.0  ;;  %v269_v23 = vadd.f32 %v1971_v10, %v198_v62 }
  0x2b   :  { %1832 = vmatprep.mubr.bf16.mxu0 %v358_v45  ;;  %v1504_v45 = vunpack.c.l.bf16 %v1726_v33  ;;  %v1517_v52 = vunpack.c.h.bf16 %v1729_v18  ;;  %v364_v12 = vpack.c.bf16 %v311_v6, %v310_v2  ;;  %v250_v28 = vadd.f32 %v1971_v10, %v2097_v16  ;;  %v1720_v33 = vld [vmem:[%s2526_s0 + $0x78] sm:$0xff]   ;;  %v1730_v16 = vld [vmem:[%s2526_s0 + $0xc8] sm:$0xff]  }
  0x2c   :  { %v264_v41 = vadd.f32 %v1971_v10, %v193_v32  ;;  %v372_v55 = vpack.c.bf16 %v327_v42, %v326_v39  ;;  %v251_v31 = vadd.f32 %v1971_v10, %v180_v3  ;;  %v181_v32 = vmul.f32 %v1472_v8, %v1960_v5 }
  0x2d   :  { %v197_v59 = vmul.f32 %v1504_v45, %v1960_v5  ;;  %v201_v34 = vmul.f32 %v1512_v19, %v1960_v5  ;;  %v202_v50 = vmul.f32 %v1513_v20, %v1960_v5  ;;  %v365_v35 = vpack.c.bf16 %v313_v13, %v312_v4 }
  0x2e   :  { %v328_v51 = vmax.f32 %v264_v41, 0.0  ;;  %1860 = vmatprep.mubr.bf16.mxu1 %v372_v55  ;;  %v182_v53 = vmul.f32 %v1473_v14, %v1960_v5  ;;  %v333_v6 = vmax.f32 %v269_v23, 0.0  ;;  %v334_v36 = vmax.f32 %v270_v24, 0.0 }
  0x2f   :  { %v268_v22 = vadd.f32 %v1971_v10, %v197_v59  ;;  %v203_v38 = vmul.f32 %v1516_v27, %v1960_v5  ;;  %v204_v39 = vmul.f32 %v1517_v52, %v1960_v5  ;;  %v314_v41 = vmax.f32 %v250_v28, 0.0 }
  0x30   :  { %v373_v21 = vpack.c.bf16 %v329_v61, %v328_v51  ;;  %v315_v45 = vmax.f32 %v251_v31, 0.0  ;;  %v272_v46 = vadd.f32 %v1971_v10, %v201_v34  ;;  %v273_v47 = vadd.f32 %v1971_v10, %v202_v50 }
  0x31   :  { %v332_v2 = vmax.f32 %v268_v22, 0.0  ;;  %v1520_v48 = vunpack.c.l.bf16 %v1730_v16  ;;  %v1521_v51 = vunpack.c.h.bf16 %v1730_v16  ;;  %v1524_v54 = vunpack.c.l.bf16 %v1731_v40 }
  0x32   :  { %1833 = vmatmul.mubr.bf16.gmra.mxu0 %v359_v56  ;;  %v196_v56 = vmul.f32 %v1501_v43, %v1960_v5  ;;  %1861 = vmatmul.mubr.bf16.gmra.mxu1 %v373_v21  ;;  %v1525_v55 = vunpack.c.h.bf16 %v1731_v40  ;;  %v275_v59 = vadd.f32 %v1971_v10, %v204_v39  ;;  %v253_v61 = vadd.f32 %v1971_v10, %v182_v53  ;;  %v1733_v21 = vld [vmem:[%s2526_s0 + $0xe0] sm:$0xff]  }
  0x33   :  { %1836 = vmatprep.mubr.bf16.mxu0 %v360_v57  ;;  %v266_v57 = vadd.f32 %v1971_v10, %v195_v44  ;;  %v1480_v44 = vunpack.c.l.bf16 %v1720_v33  ;;  %v375_v49 = vpack.c.bf16 %v333_v6, %v332_v2  ;;  %v1481_v0 = vunpack.c.h.bf16 %v1720_v33 }
  0x34   :  { %v267_v9 = vadd.f32 %v1971_v10, %v196_v56  ;;  %v252_v56 = vadd.f32 %v1971_v10, %v181_v32  ;;  %v366_v1 = vpack.c.bf16 %v315_v45, %v314_v41  ;;  %v336_v4 = vmax.f32 %v272_v46, 0.0  ;;  %v1735_v41 = vld [vmem:[%s2526_s0 + $0xf0] sm:$0xff]  }
  0x35   :  { %v330_v11 = vmax.f32 %v266_v57, 0.0  ;;  %v274_v57 = vadd.f32 %v1971_v10, %v203_v38  ;;  %v337_v8 = vmax.f32 %v273_v47, 0.0  ;;  %v207_v13 = vmul.f32 %v1524_v54, %v1960_v5 }
  0x36   :  { %v331_v7 = vmax.f32 %v267_v9, 0.0  ;;  %v205_v9 = vmul.f32 %v1520_v48, %v1960_v5  ;;  %v208_v14 = vmul.f32 %v1525_v55, %v1960_v5  ;;  %v339_v3 = vmax.f32 %v275_v59, 0.0 }
  0x37   :  { %v338_v18 = vmax.f32 %v274_v57, 0.0  ;;  %v186_v20 = vmul.f32 %v1481_v0, %v1960_v5  ;;  %v377_v23 = vpack.c.bf16 %v337_v8, %v336_v4  ;;  %v278_v27 = vadd.f32 %v1971_v10, %v207_v13 }
  0x38   :  { %v374_v26 = vpack.c.bf16 %v331_v7, %v330_v11  ;;  %v206_v11 = vmul.f32 %v1521_v51, %v1960_v5  ;;  %v317_v7 = vmax.f32 %v253_v61, 0.0  ;;  %v276_v24 = vadd.f32 %v1971_v10, %v205_v9 }
  0x39   :  { %v279_v52 = vadd.f32 %v1971_v10, %v208_v14  ;;  %v378_v28 = vpack.c.bf16 %v339_v3, %v338_v18  ;;  %v257_v33 = vadd.f32 %v1971_v10, %v186_v20  ;;  %v342_v2 = vmax.f32 %v278_v27, 0.0 }
  0x3a   :  { %1837 = vmatmul.mubr.bf16.gmra.mxu0 %v2070_v58  ;;  %v1719_v58 = vld [vmem:[%s2526_s0 + $0x70] sm:$0xff]   ;;  %1864 = vmatprep.mubr.bf16.mxu1 %v374_v26  ;;  %v1528_v26 = vunpack.c.l.bf16 %v1732_v15  ;;  %v340_v50 = vmax.f32 %v276_v24, 0.0  ;;  %v1540_v51 = vunpack.c.l.bf16 %v1735_v41  ;;  %v1541_v54 = vunpack.c.h.bf16 %v1735_v41 }
  0x3b   :  { %1840 = vmatprep.mubr.bf16.mxu0 %v2075_v60  ;;  %v271_v60 = vadd.f32 %v1971_v10, %v200_v17  ;;  %v1476_v29 = vunpack.c.l.bf16 %v1719_v58  ;;  %v1477_v30 = vunpack.c.h.bf16 %v1719_v58  ;;  %1865 = vmatmul.mubr.bf16.gmra.mxu1 %v375_v49  ;;  %v185_v17 = vmul.f32 %v1480_v44, %v1960_v5 }
  0x3c   :  { %v316_v58 = vmax.f32 %v252_v56, 0.0  ;;  %v343_v6 = vmax.f32 %v279_v52, 0.0  ;;  %v321_v40 = vmax.f32 %v257_v33, 0.0  ;;  %v216_v0 = vmul.f32 %v1541_v54, %v1960_v5 }
  0x3d   :  { %v335_v37 = vmax.f32 %v271_v60, 0.0  ;;  %v183_v42 = vmul.f32 %v1476_v29, %v1960_v5  ;;  %v184_v43 = vmul.f32 %v1477_v30, %v1960_v5  ;;  %v277_v60 = vadd.f32 %v1971_v10, %v206_v11 }
  0x3e   :  { %v1532_v29 = vunpack.c.l.bf16 %v1733_v21  ;;  %v1533_v30 = vunpack.c.h.bf16 %v1733_v21  ;;  %v367_v31 = vpack.c.bf16 %v317_v7, %v316_v58  ;;  %v256_v32 = vadd.f32 %v1971_v10, %v185_v17 }
  0x3f   :  { %v254_v62 = vadd.f32 %v1971_v10, %v183_v42  ;;  %v255_v63 = vadd.f32 %v1971_v10, %v184_v43  ;;  %v341_v53 = vmax.f32 %v277_v60, 0.0  ;;  %v380_v45 = vpack.c.bf16 %v343_v6, %v342_v2 }
  0x40   :  { %v212_v38 = vmul.f32 %v1533_v30, %v1960_v5  ;;  %v320_v39 = vmax.f32 %v256_v32, 0.0  ;;  %v287_v17 = vadd.f32 %v1971_v10, %v216_v0 }
  0x41   :  { %v318_v19 = vmax.f32 %v254_v62, 0.0  ;;  %v319_v22 = vmax.f32 %v255_v63, 0.0  ;;  %v379_v44 = vpack.c.bf16 %v341_v53, %v340_v50  ;;  %v215_v63 = vmul.f32 %v1540_v51, %v1960_v5 }
  0x42   :  { %1841 = vmatmul.mubr.bf16.gmra.mxu0 %v2106_v25  ;;  %v376_v25 = vpack.c.bf16 %v335_v37, %v334_v36  ;;  %v1734_v36 = vld [vmem:[%s2526_s0 + $0xe8] sm:$0xff]   ;;  %v211_v37 = vmul.f32 %v1532_v29, %v1960_v5  ;;  %v283_v49 = vadd.f32 %v1971_v10, %v212_v38  ;;  %v369_v55 = vpack.c.bf16 %v321_v40, %v320_v39 }
  0x43   :  { %1844 = vmatprep.mubr.bf16.mxu0 %v364_v12  ;;  %v1529_v12 = vunpack.c.h.bf16 %v1732_v15  ;;  %v368_v34 = vpack.c.bf16 %v319_v22, %v318_v19  ;;  %v1536_v43 = vunpack.c.l.bf16 %v1734_v36  ;;  %v1537_v47 = vunpack.c.h.bf16 %v1734_v36 }
  0x44   :  { %1868 = vmatprep.mubr.bf16.mxu1 %v376_v25  ;;  %v282_v48 = vadd.f32 %v1971_v10, %v211_v37  ;;  %v347_v62 = vmax.f32 %v283_v49, 0.0  ;;  %v286_v15 = vadd.f32 %v1971_v10, %v215_v63  ;;  %v351_v20 = vmax.f32 %v287_v17, 0.0 }
  0x45   :  { %1869 = vmatmul.mubr.bf16.gmra.mxu1 %v377_v23  ;;  %v210_v16 = vmul.f32 %v1529_v12, %v1960_v5  ;;  %v213_v56 = vmul.f32 %v1536_v43, %v1960_v5  ;;  %v214_v59 = vmul.f32 %v1537_v47, %v1960_v5 }
  0x46   :  { %1872 = vmatprep.mubr.bf16.mxu1 %v378_v28  ;;  %v346_v61 = vmax.f32 %v282_v48, 0.0  ;;  %v350_v19 = vmax.f32 %v286_v15, 0.0 }
  0x47   :  { %v281_v46 = vadd.f32 %v1971_v10, %v210_v16  ;;  %v284_v4 = vadd.f32 %v1971_v10, %v213_v56  ;;  %v285_v9 = vadd.f32 %v1971_v10, %v214_v59 }
  0x48   :  { %v382_v14 = vpack.c.bf16 %v347_v62, %v346_v61  ;;  %v384_v24 = vpack.c.bf16 %v351_v20, %v350_v19 }
  0x49   :  { %v345_v57 = vmax.f32 %v281_v46, 0.0  ;;  %v348_v18 = vmax.f32 %v284_v4, 0.0  ;;  %v349_v3 = vmax.f32 %v285_v9, 0.0 }
  0x4a   :  { %1845 = vmatmul.mubr.bf16.gmra.mxu0 %v365_v35  ;;  %v209_v35 = vmul.f32 %v1528_v26, %v1960_v5 }
  0x4b   :  { %1848 = vmatprep.mubr.bf16.mxu0 %v366_v1  ;;  %v1736_v1 = vld [vmem:[%s2526_s0 + $0xf8] sm:$0xff]   ;;  %v383_v21 = vpack.c.bf16 %v349_v3, %v348_v18 }
  0x4c   :  { %v280_v42 = vadd.f32 %v1971_v10, %v209_v35  ;;  %v1544_v11 = vunpack.c.l.bf16 %v1736_v1  ;;  %v1545_v13 = vunpack.c.h.bf16 %v1736_v1 }
  0x4d   :  { %1873 = vmatmul.mubr.bf16.gmra.mxu1 %v379_v44 }
  0x4e   :  { %v344_v25 = vmax.f32 %v280_v42, 0.0  ;;  %1876 = vmatprep.mubr.bf16.mxu1 %v380_v45  ;;  %v217_v58 = vmul.f32 %v1544_v11, %v1960_v5  ;;  %v218_v7 = vmul.f32 %v1545_v13, %v1960_v5 }
  0x50   :  { %v381_v8 = vpack.c.bf16 %v345_v57, %v344_v25  ;;  %v288_v22 = vadd.f32 %v1971_v10, %v217_v58  ;;  %v289_v23 = vadd.f32 %v1971_v10, %v218_v7 }
  0x52   :  { %1849 = vmatmul.mubr.bf16.gmra.mxu0 %v367_v31  ;;  %v352_v26 = vmax.f32 %v288_v22, 0.0  ;;  %v353_v60 = vmax.f32 %v289_v23, 0.0 }
  0x53   :  { %1852 = vmatprep.mubr.bf16.mxu0 %v368_v34 }
  0x54   :  { %v385_v27 = vpack.c.bf16 %v353_v60, %v352_v26 }
  0x55   :  { %1877 = vmatmul.mubr.bf16.gmra.mxu1 %v381_v8 }
  0x56   :  { %1880 = vmatprep.mubr.bf16.mxu1 %v382_v14 }
  0x5a   :  { %1853 = vmatmul.mubr.bf16.gmra.mxu0 %v369_v55 }
  0x5d   :  { %1881 = vmatmul.mubr.bf16.gmra.mxu1 %v383_v21 }
  0x5e   :  { %1884 = vmatprep.mubr.bf16.mxu1 %v384_v24 }
  0x65   :  { %1885 = vmatmul.mubr.bf16.gmra.mxu1 %v385_v27 }
  0xe2   :  { %v1826_v52 = vpop.f32.mrf.mxu0 }
  0xe3   :  { %v1130_v34 = vmul.f32 %v1826_v52, %v1826_v52 }
  0xe4   :  { %v484_v12 = vpop.f32.mrf.mxu0 }
  0xe5   :  { %v1128_v30 = vmul.f32 %v484_v12, %v484_v12 }
  0xe6   :  { %v1827_v28 = vpop.f32.mrf.mxu0 }
  0xe7   :  { %v1554_v29 = vpack.c.bf16 %v1827_v28, %v1826_v52  ;;  %v1131_v2 = vmul.f32 %v1827_v28, %v1827_v28 }
  0xe8   :  { %v487_v5 = vpop.f32.mrf.mxu0  ;;  %v2246_v0 = vpop.f32.mrf.mxu1 }
  0xe9   :  { %1737 = vst [vmem:[%s2529_s4 + $0x8] sm:$0xff] %v1554_v29   ;;  %v1549_v31 = vpack.c.bf16 %v487_v5, %v484_v12  ;;  %v1059_v32 = vadd.f32 %v487_v5, %v484_v12  ;;  %v1129_v10 = vmul.f32 %v487_v5, %v487_v5 }
  0xea   :  { %v1830_v33 = vpop.f32.mrf.mxu0  ;;  %v2251_v13 = vpop.f32.mrf.mxu1 }
  0xeb   :  { %1550 = vst [vmem:[%s2529_s4] sm:$0xff] %v1549_v31   ;;  %v1060_v50 = vadd.f32 %v1826_v52, %v1059_v32  ;;  %v1192_v35 = vadd.f32 %v1129_v10, %v1128_v30  ;;  %v1134_v47 = vmul.f32 %v1830_v33, %v1830_v33 }
  0xec   :  { %v500_v53 = vpop.f32.mrf.mxu0  ;;  %v2256_v3 = vpop.f32.mrf.mxu1 }
  0xed   :  { %v1193_v6 = vadd.f32 %v1192_v35, %v1130_v34  ;;  %v1061_v16 = vadd.f32 %v1827_v28, %v1060_v50  ;;  %v1132_v38 = vmul.f32 %v500_v53, %v500_v53  ;;  %v1634_v20 = vpack.c.bf16 %v2256_v3, %v2246_v0 }
  0xee   :  { %v1831_v36 = vpop.f32.mrf.mxu0  ;;  %v2260_v22 = vpop.f32.mrf.mxu1 }
  0xef   :  { %v1062_v37 = vadd.f32 %v1061_v16, %v500_v53  ;;  %v1194_v39 = vadd.f32 %v1193_v6, %v1131_v2  ;;  %v1564_v40 = vpack.c.bf16 %v1831_v36, %v1830_v33  ;;  %v1135_v54 = vmul.f32 %v1831_v36, %v1831_v36  ;;  %1753 = vst [vmem:[%s2529_s4 + $0x88] sm:$0xff] %v1634_v20  }
  0xf0   :  { %v503_v41 = vpop.f32.mrf.mxu0  ;;  %v1629_v52 = vpack.c.bf16 %v2260_v22, %v2251_v13 }
  0xf1   :  { %v1195_v42 = vadd.f32 %v1194_v39, %v1132_v38  ;;  %1739 = vst [vmem:[%s2529_s4 + $0x18] sm:$0xff] %v1564_v40   ;;  %v1559_v43 = vpack.c.bf16 %v503_v41, %v500_v53  ;;  %v1063_v44 = vadd.f32 %v1062_v37, %v503_v41  ;;  %v1133_v45 = vmul.f32 %v503_v41, %v503_v41 }
  0xf2   :  { %v1834_v46 = vpop.f32.mrf.mxu0  ;;  %v2267_v12 = vpop.f32.mrf.mxu1  ;;  %1752 = vst [vmem:[%s2529_s4 + $0x80] sm:$0xff] %v1629_v52  }
  0xf3   :  { %1738 = vst [vmem:[%s2529_s4 + $0x10] sm:$0xff] %v1559_v43   ;;  %v1064_v48 = vadd.f32 %v1830_v33, %v1063_v44  ;;  %v1196_v49 = vadd.f32 %v1195_v42, %v1133_v45  ;;  %v1138_v14 = vmul.f32 %v1834_v46, %v1834_v46 }
  0xf4   :  { %v516_v51 = vpop.f32.mrf.mxu0  ;;  %v2275_v32 = vpop.f32.mrf.mxu1 }
  0xf5   :  { %v1197_v55 = vadd.f32 %v1196_v49, %v1134_v47  ;;  %v1065_v56 = vadd.f32 %v1831_v36, %v1064_v48  ;;  %v1136_v59 = vmul.f32 %v516_v51, %v516_v51 }
  0xf6   :  { %v1835_v25 = vpop.f32.mrf.mxu0  ;;  %v2280_v35 = vpop.f32.mrf.mxu1 }
  0xf7   :  { %v1066_v57 = vadd.f32 %v1065_v56, %v516_v51  ;;  %v1198_v61 = vadd.f32 %v1197_v55, %v1135_v54  ;;  %v1574_v62 = vpack.c.bf16 %v1835_v25, %v1834_v46  ;;  %v1139_v58 = vmul.f32 %v1835_v25, %v1835_v25 }
  0xf8   :  { %v519_v63 = vpop.f32.mrf.mxu0  ;;  %v1644_v16 = vpack.c.bf16 %v2280_v35, %v2267_v12  ;;  %v2284_v37 = vpop.f32.mrf.mxu1 }
  0xf9   :  { %v1199_v1 = vadd.f32 %v1198_v61, %v1136_v59  ;;  %1741 = vst [vmem:[%s2529_s4 + $0x28] sm:$0xff] %v1574_v62   ;;  %v1569_v4 = vpack.c.bf16 %v519_v63, %v516_v51  ;;  %v1067_v8 = vadd.f32 %v1066_v57, %v519_v63  ;;  %v1137_v9 = vmul.f32 %v519_v63, %v519_v63 }
  0xfa   :  { %v1838_v11 = vpop.f32.mrf.mxu0  ;;  %1755 = vst [vmem:[%s2529_s4 + $0x98] sm:$0xff] %v1644_v16   ;;  %v1639_v43 = vpack.c.bf16 %v2284_v37, %v2275_v32 }
  0xfb   :  { %1740 = vst [vmem:[%s2529_s4 + $0x20] sm:$0xff] %v1569_v4   ;;  %v1068_v15 = vadd.f32 %v1834_v46, %v1067_v8  ;;  %v1200_v17 = vadd.f32 %v1199_v1, %v1137_v9  ;;  %v1142_v10 = vmul.f32 %v1838_v11, %v1838_v11  ;;  %v2291_v44 = vpop.f32.mrf.mxu1 }
  0xfc   :  { %v532_v18 = vpop.f32.mrf.mxu0  ;;  %1754 = vst [vmem:[%s2529_s4 + $0x90] sm:$0xff] %v1639_v43  }
  0xfd   :  { %v1201_v7 = vadd.f32 %v1200_v17, %v1138_v14  ;;  %v1069_v19 = vadd.f32 %v1835_v25, %v1068_v15  ;;  %v1140_v24 = vmul.f32 %v532_v18, %v532_v18  ;;  %v2299_v51 = vpop.f32.mrf.mxu1 }
  0xfe   :  { %v1839_v21 = vpop.f32.mrf.mxu0 }
  0xff   :  { %v1070_v23 = vadd.f32 %v1069_v19, %v532_v18  ;;  %v1202_v26 = vadd.f32 %v1201_v7, %v1139_v58  ;;  %v1584_v60 = vpack.c.bf16 %v1839_v21, %v1838_v11  ;;  %v1143_v53 = vmul.f32 %v1839_v21, %v1839_v21  ;;  %v2304_v57 = vpop.f32.mrf.mxu1 }
 0x100   :  { %v535_v27 = vpop.f32.mrf.mxu0  ;;  %v1654_v63 = vpack.c.bf16 %v2304_v57, %v2291_v44 }
 0x101   :  { %v1203_v28 = vadd.f32 %v1202_v26, %v1140_v24  ;;  %1743 = vst [vmem:[%s2529_s4 + $0x38] sm:$0xff] %v1584_v60   ;;  %v1579_v29 = vpack.c.bf16 %v535_v27, %v532_v18  ;;  %v1071_v5 = vadd.f32 %v1070_v23, %v535_v27  ;;  %v1141_v30 = vmul.f32 %v535_v27, %v535_v27  ;;  %v2308_v4 = vpop.f32.mrf.mxu1 }
 0x102   :  { %v1842_v31 = vpop.f32.mrf.mxu0  ;;  %1757 = vst [vmem:[%s2529_s4 + $0xa8] sm:$0xff] %v1654_v63   ;;  %v1649_v17 = vpack.c.bf16 %v2308_v4, %v2299_v51 }
 0x103   :  { %1742 = vst [vmem:[%s2529_s4 + $0x30] sm:$0xff] %v1579_v29   ;;  %v1072_v33 = vadd.f32 %v1838_v11, %v1071_v5  ;;  %v1204_v34 = vadd.f32 %v1203_v28, %v1141_v30  ;;  %v1146_v54 = vmul.f32 %v1842_v31, %v1842_v31 }
 0x104   :  { %v548_v50 = vpop.f32.mrf.mxu0  ;;  %1756 = vst [vmem:[%s2529_s4 + $0xa0] sm:$0xff] %v1649_v17  }
 0x105   :  { %v1205_v2 = vadd.f32 %v1204_v34, %v1142_v10  ;;  %v1073_v6 = vadd.f32 %v1839_v21, %v1072_v33  ;;  %v1144_v39 = vmul.f32 %v548_v50, %v548_v50  ;;  %v2315_v18 = vpop.f32.mrf.mxu1 }
 0x106   :  { %v1843_v36 = vpop.f32.mrf.mxu0 }
 0x107   :  { %v1074_v38 = vadd.f32 %v1073_v6, %v548_v50  ;;  %v1206_v40 = vadd.f32 %v1205_v2, %v1143_v53  ;;  %v1594_v41 = vpack.c.bf16 %v1843_v36, %v1842_v31  ;;  %v1147_v59 = vmul.f32 %v1843_v36, %v1843_v36  ;;  %v2323_v23 = vpop.f32.mrf.mxu1 }
 0x108   :  { %v551_v42 = vpop.f32.mrf.mxu0 }
 0x109   :  { %v1207_v45 = vadd.f32 %v1206_v40, %v1144_v39  ;;  %1745 = vst [vmem:[%s2529_s4 + $0x48] sm:$0xff] %v1594_v41   ;;  %v1589_v46 = vpack.c.bf16 %v551_v42, %v548_v50  ;;  %v1075_v47 = vadd.f32 %v1074_v38, %v551_v42  ;;  %v1145_v48 = vmul.f32 %v551_v42, %v551_v42  ;;  %v2328_v52 = vpop.f32.mrf.mxu1 }
 0x10a   :  { %v1846_v49 = vpop.f32.mrf.mxu0  ;;  %v1664_v30 = vpack.c.bf16 %v2328_v52, %v2315_v18 }
 0x10b   :  { %1744 = vst [vmem:[%s2529_s4 + $0x40] sm:$0xff] %v1589_v46   ;;  %v1076_v55 = vadd.f32 %v1842_v31, %v1075_v47  ;;  %v1208_v56 = vadd.f32 %v1207_v45, %v1145_v48  ;;  %v1150_v24 = vmul.f32 %v1846_v49, %v1846_v49  ;;  %v2332_v10 = vpop.f32.mrf.mxu1 }
 0x10c   :  { %v564_v25 = vpop.f32.mrf.mxu0  ;;  %1759 = vst [vmem:[%s2529_s4 + $0xb8] sm:$0xff] %v1664_v30   ;;  %v1659_v6 = vpack.c.bf16 %v2332_v10, %v2323_v23 }
 0x10d   :  { %v1209_v61 = vadd.f32 %v1208_v56, %v1146_v54  ;;  %v1077_v62 = vadd.f32 %v1843_v36, %v1076_v55  ;;  %v1148_v9 = vmul.f32 %v564_v25, %v564_v25  ;;  %v2339_v16 = vpop.f32.mrf.mxu1 }
 0x10e   :  { %v1847_v1 = vpop.f32.mrf.mxu0  ;;  %1758 = vst [vmem:[%s2529_s4 + $0xb0] sm:$0xff] %v1659_v6   ;;  %v1162_v6 = vmul.f32 %v2246_v0, %v2246_v0 }
 0x10f   :  { %v1078_v8 = vadd.f32 %v1077_v62, %v564_v25  ;;  %v1210_v11 = vadd.f32 %v1209_v61, %v1147_v59  ;;  %v1604_v14 = vpack.c.bf16 %v1847_v1, %v1846_v49  ;;  %v1151_v28 = vmul.f32 %v1847_v1, %v1847_v1  ;;  %v2347_v42 = vpop.f32.mrf.mxu1 }
 0x110   :  { %v567_v15 = vpop.f32.mrf.mxu0 }
 0x111   :  { %v1211_v58 = vadd.f32 %v1210_v11, %v1148_v9  ;;  %1747 = vst [vmem:[%s2529_s4 + $0x58] sm:$0xff] %v1604_v14   ;;  %v1599_v7 = vpack.c.bf16 %v567_v15, %v564_v25  ;;  %v1079_v19 = vadd.f32 %v1078_v8, %v567_v15  ;;  %v1149_v20 = vmul.f32 %v567_v15, %v567_v15  ;;  %v2352_v48 = vpop.f32.mrf.mxu1 }
 0x112   :  { %v1850_v21 = vpop.f32.mrf.mxu0  ;;  %v1674_v56 = vpack.c.bf16 %v2352_v48, %v2339_v16 }
 0x113   :  { %1746 = vst [vmem:[%s2529_s4 + $0x50] sm:$0xff] %v1599_v7   ;;  %v1080_v26 = vadd.f32 %v1846_v49, %v1079_v19  ;;  %v1212_v60 = vadd.f32 %v1211_v58, %v1149_v20  ;;  %v1154_v43 = vmul.f32 %v1850_v21, %v1850_v21  ;;  %v2356_v59 = vpop.f32.mrf.mxu1 }
 0x114   :  { %v580_v27 = vpop.f32.mrf.mxu0  ;;  %1761 = vst [vmem:[%s2529_s4 + $0xc8] sm:$0xff] %v1674_v56   ;;  %v1669_v9 = vpack.c.bf16 %v2356_v59, %v2347_v42  ;;  %v1165_v56 = vmul.f32 %v2284_v37, %v2284_v37 }
 0x115   :  { %v1213_v29 = vadd.f32 %v1212_v60, %v1150_v24  ;;  %v1081_v5 = vadd.f32 %v1847_v1, %v1080_v26  ;;  %v1152_v34 = vmul.f32 %v580_v27, %v580_v27  ;;  %v2363_v11 = vpop.f32.mrf.mxu1 }
 0x116   :  { %v1851_v31 = vpop.f32.mrf.mxu0  ;;  %1760 = vst [vmem:[%s2529_s4 + $0xc0] sm:$0xff] %v1669_v9  }
 0x117   :  { %v1082_v33 = vadd.f32 %v1081_v5, %v580_v27  ;;  %v1214_v50 = vadd.f32 %v1213_v29, %v1151_v28  ;;  %v1614_v53 = vpack.c.bf16 %v1851_v31, %v1850_v21  ;;  %v1155_v49 = vmul.f32 %v1851_v31, %v1851_v31  ;;  %v2371_v7 = vpop.f32.mrf.mxu1 }
 0x118   :  { %v583_v2 = vpop.f32.mrf.mxu0  ;;  %v1160_v5 = vmul.f32 %v2251_v13, %v2251_v13 }
 0x119   :  { %v1215_v36 = vadd.f32 %v1214_v50, %v1152_v34  ;;  %1749 = vst [vmem:[%s2529_s4 + $0x68] sm:$0xff] %v1614_v53   ;;  %v1609_v38 = vpack.c.bf16 %v583_v2, %v580_v27  ;;  %v1083_v39 = vadd.f32 %v1082_v33, %v583_v2  ;;  %v1153_v40 = vmul.f32 %v583_v2, %v583_v2  ;;  %v2376_v24 = vpop.f32.mrf.mxu1 }
 0x11a   :  { %v1854_v41 = vpop.f32.mrf.mxu0  ;;  %v1684_v28 = vpack.c.bf16 %v2376_v24, %v2363_v11  ;;  %v1161_v53 = vmul.f32 %v2260_v22, %v2260_v22 }
 0x11b   :  { %1748 = vst [vmem:[%s2529_s4 + $0x60] sm:$0xff] %v1609_v38   ;;  %v1084_v45 = vadd.f32 %v1850_v21, %v1083_v39  ;;  %v1216_v46 = vadd.f32 %v1215_v36, %v1153_v40  ;;  %v1158_v19 = vmul.f32 %v1854_v41, %v1854_v41  ;;  %v2380_v29 = vpop.f32.mrf.mxu1  ;;  %v1163_v40 = vmul.f32 %v2256_v3, %v2256_v3 }
 0x11c   :  { %v596_v47 = vpop.f32.mrf.mxu0  ;;  %1763 = vst [vmem:[%s2529_s4 + $0xd8] sm:$0xff] %v1684_v28   ;;  %v1679_v33 = vpack.c.bf16 %v2380_v29, %v2371_v7 }
 0x11d   :  { %v1217_v54 = vadd.f32 %v1216_v46, %v1154_v43  ;;  %v1085_v55 = vadd.f32 %v1851_v31, %v1084_v45  ;;  %v1156_v62 = vmul.f32 %v596_v47, %v596_v47  ;;  %v2390_v34 = vpop.f32.mrf.mxu1 }
 0x11e   :  { %v1855_v25 = vpop.f32.mrf.mxu0  ;;  %1762 = vst [vmem:[%s2529_s4 + $0xd0] sm:$0xff] %v1679_v33  }
 0x11f   :  { %v1086_v61 = vadd.f32 %v1085_v55, %v596_v47  ;;  %v1218_v63 = vadd.f32 %v1217_v54, %v1155_v49  ;;  %v1624_v1 = vpack.c.bf16 %v1855_v25, %v1854_v41  ;;  %v1159_v26 = vmul.f32 %v1855_v25, %v1855_v25 }
 0x120   :  { %v599_v8 = vpop.f32.mrf.mxu0 }
 0x121   :  { %v1219_v14 = vadd.f32 %v1218_v63, %v1156_v62  ;;  %1751 = vst [vmem:[%s2529_s4 + $0x78] sm:$0xff] %v1624_v1   ;;  %v1619_v15 = vpack.c.bf16 %v599_v8, %v596_v47  ;;  %v1087_v17 = vadd.f32 %v1086_v61, %v599_v8  ;;  %v1157_v58 = vmul.f32 %v599_v8, %v599_v8 }
 0x122   :  { %v1164_v47 = vmul.f32 %v2275_v32, %v2275_v32  ;;  %v1167_v1 = vmul.f32 %v2280_v35, %v2280_v35 }
 0x123   :  { %1750 = vst [vmem:[%s2529_s4 + $0x70] sm:$0xff] %v1619_v15   ;;  %v1088_v20 = vadd.f32 %v1854_v41, %v1087_v17  ;;  %v1220_v21 = vadd.f32 %v1219_v14, %v1157_v58  ;;  %v1168_v17 = vmul.f32 %v2299_v51, %v2299_v51 }
 0x125   :  { %v1089_v60 = vadd.f32 %v1855_v25, %v1088_v20  ;;  %v1221_v27 = vadd.f32 %v1220_v21, %v1158_v19  ;;  %v1166_v25 = vmul.f32 %v2267_v12, %v2267_v12  ;;  %v1169_v20 = vmul.f32 %v2308_v4, %v2308_v4 }
 0x127   :  { %v1222_v30 = vadd.f32 %v1221_v27, %v1159_v26  ;;  %v1090_v31 = vadd.f32 %v1089_v60, %v2251_v13  ;;  %v2398_v13 = vpop.f32.mrf.mxu1  ;;  %v1171_v60 = vmul.f32 %v2304_v57, %v2304_v57 }
 0x129   :  { %v1091_v50 = vadd.f32 %v1090_v31, %v2260_v22  ;;  %v1223_v2 = vadd.f32 %v1222_v30, %v1160_v5  ;;  %v2403_v39 = vpop.f32.mrf.mxu1 }
 0x12a   :  { %v1694_v43 = vpack.c.bf16 %v2403_v39, %v2390_v34 }
 0x12b   :  { %v1092_v36 = vadd.f32 %v2246_v0, %v1091_v50  ;;  %v1224_v38 = vadd.f32 %v1223_v2, %v1161_v53  ;;  %v2410_v45 = vpop.f32.mrf.mxu1  ;;  %v1173_v50 = vmul.f32 %v2332_v10, %v2332_v10 }
 0x12c   :  { %1765 = vst [vmem:[%s2529_s4 + $0xe8] sm:$0xff] %v1694_v43   ;;  %v1689_v49 = vpack.c.bf16 %v2410_v45, %v2398_v13 }
 0x12d   :  { %v1225_v41 = vadd.f32 %v1224_v38, %v1162_v6  ;;  %v1093_v22 = vadd.f32 %v2256_v3, %v1092_v36  ;;  %v2420_v54 = vpop.f32.mrf.mxu1  ;;  %v1176_v38 = vmul.f32 %v2347_v42, %v2347_v42 }
 0x12e   :  { %1764 = vst [vmem:[%s2529_s4 + $0xe0] sm:$0xff] %v1689_v49   ;;  %v1180_v49 = vmul.f32 %v2371_v7, %v2371_v7 }
 0x12f   :  { %v1094_v46 = vadd.f32 %v1093_v22, %v2275_v32  ;;  %v1226_v0 = vadd.f32 %v1225_v41, %v1163_v40  ;;  %v2428_v32 = vpop.f32.mrf.mxu1  ;;  %v1177_v22 = vmul.f32 %v2356_v59, %v2356_v59 }
 0x131   :  { %v1227_v3 = vadd.f32 %v1226_v0, %v1164_v47  ;;  %v1095_v55 = vadd.f32 %v1094_v46, %v2284_v37  ;;  %v2433_v63 = vpop.f32.mrf.mxu1 }
 0x132   :  { %v1704_v9 = vpack.c.bf16 %v2433_v63, %v2420_v54 }
 0x133   :  { %v1096_v61 = vadd.f32 %v2267_v12, %v1095_v55  ;;  %v1228_v62 = vadd.f32 %v1227_v3, %v1165_v56  ;;  %v2440_v14 = vpop.f32.mrf.mxu1  ;;  %v1181_v56 = vmul.f32 %v2380_v29, %v2380_v29 }
 0x134   :  { %1767 = vst [vmem:[%s2529_s4 + $0xf8] sm:$0xff] %v1704_v9   ;;  %v1699_v58 = vpack.c.bf16 %v2440_v14, %v2428_v32 }
 0x135   :  { %v1229_v8 = vadd.f32 %v1228_v62, %v1166_v25  ;;  %v1097_v37 = vadd.f32 %v2280_v35, %v1096_v61 }
 0x136   :  { %1766 = vst [vmem:[%s2529_s4 + $0xf0] sm:$0xff] %v1699_v58  }
 0x137   :  { %v1098_v15 = vadd.f32 %v1097_v37, %v2299_v51  ;;  %v1230_v12 = vadd.f32 %v1229_v8, %v1167_v1  ;;  %v1170_v51 = vmul.f32 %v2291_v44, %v2291_v44  ;;  %v1184_v8 = vmul.f32 %v2398_v13, %v2398_v13 }
 0x139   :  { %v1231_v19 = vadd.f32 %v1230_v12, %v1168_v17  ;;  %v1099_v35 = vadd.f32 %v1098_v15, %v2308_v4  ;;  %v1172_v4 = vmul.f32 %v2323_v23, %v2323_v23  ;;  %v1185_v15 = vmul.f32 %v2410_v45, %v2410_v45 }
 0x13b   :  { %v1100_v21 = vadd.f32 %v2291_v44, %v1099_v35  ;;  %v1232_v26 = vadd.f32 %v1231_v19, %v1169_v20  ;;  %v1174_v44 = vmul.f32 %v2315_v18, %v2315_v18  ;;  %v1188_v35 = vmul.f32 %v2428_v32, %v2428_v32 }
 0x13d   :  { %v1233_v27 = vadd.f32 %v1232_v26, %v1170_v51  ;;  %v1101_v28 = vadd.f32 %v2304_v57, %v1100_v21  ;;  %v1175_v57 = vmul.f32 %v2328_v52, %v2328_v52  ;;  %v1189_v21 = vmul.f32 %v2440_v14, %v2440_v14 }
 0x13f   :  { %v1102_v5 = vadd.f32 %v1101_v28, %v2323_v23  ;;  %v1234_v30 = vadd.f32 %v1233_v27, %v1171_v60 }
 0x141   :  { %v1235_v31 = vadd.f32 %v1234_v30, %v1172_v4  ;;  %v1103_v33 = vadd.f32 %v1102_v5, %v2332_v10 }
 0x143   :  { %v1104_v53 = vadd.f32 %v2315_v18, %v1103_v33  ;;  %v1236_v2 = vadd.f32 %v1235_v31, %v1173_v50  ;;  %v1178_v18 = vmul.f32 %v2339_v16, %v2339_v16  ;;  %v1261_v31 = vlaneseq }
 0x145   :  { %v1237_v6 = vadd.f32 %v1236_v2, %v1174_v44  ;;  %v1105_v36 = vadd.f32 %v2328_v52, %v1104_v53  ;;  %v1179_v52 = vmul.f32 %v2352_v48, %v2352_v48  ;;  %v1262_v53 = vshrl.u32 %v1261_v31, 7 }
 0x147   :  { %v1106_v23 = vadd.f32 %v1105_v36, %v2347_v42  ;;  %v1238_v40 = vadd.f32 %v1237_v6, %v1175_v57  ;;  %vm1264_vm0 = vcmp.eq.s32.totalorder %v1262_v53, 1  ;;  %vm1263_vm1 = vcmp.eq.s32.totalorder %v1262_v53, 0 }
 0x149   :  { %v1239_v41 = vadd.f32 %v1238_v40, %v1176_v38  ;;  %v1107_v10 = vadd.f32 %v1106_v23, %v2356_v59 }
 0x14b   :  { %v1108_v43 = vadd.f32 %v2339_v16, %v1107_v10  ;;  %v1240_v46 = vadd.f32 %v1239_v41, %v1177_v22  ;;  %v1182_v16 = vmul.f32 %v2363_v11, %v2363_v11 }
 0x14d   :  { %v1241_v47 = vadd.f32 %v1240_v46, %v1178_v18  ;;  %v1109_v0 = vadd.f32 %v2352_v48, %v1108_v43  ;;  %v1183_v48 = vmul.f32 %v2376_v24, %v2376_v24 }
 0x14f   :  { %v1110_v42 = vadd.f32 %v1109_v0, %v2371_v7  ;;  %v1242_v3 = vadd.f32 %v1241_v47, %v1179_v52 }
 0x151   :  { %v1243_v55 = vadd.f32 %v1242_v3, %v1180_v49  ;;  %v1111_v59 = vadd.f32 %v1110_v42, %v2380_v29 }
 0x153   :  { %v1112_v25 = vadd.f32 %v2363_v11, %v1111_v59  ;;  %v1244_v61 = vadd.f32 %v1243_v55, %v1181_v56  ;;  %v1186_v11 = vmul.f32 %v2390_v34, %v2390_v34 }
 0x155   :  { %v1245_v62 = vadd.f32 %v1244_v61, %v1182_v16  ;;  %v1113_v1 = vadd.f32 %v2376_v24, %v1112_v25  ;;  %v1187_v24 = vmul.f32 %v2403_v39, %v2403_v39 }
 0x157   :  { %v1114_v7 = vadd.f32 %v1113_v1, %v2398_v13  ;;  %v1246_v37 = vadd.f32 %v1245_v62, %v1183_v48 }
 0x159   :  { %v1247_v9 = vadd.f32 %v1246_v37, %v1184_v8  ;;  %v1115_v29 = vadd.f32 %v1114_v7, %v2410_v45 }
 0x15b   :  { %v1116_v17 = vadd.f32 %v2390_v34, %v1115_v29  ;;  %v1248_v12 = vadd.f32 %v1247_v9, %v1185_v15  ;;  %v1190_v34 = vmul.f32 %v2420_v54, %v2420_v54 }
 0x15d   :  { %v1249_v58 = vadd.f32 %v1248_v12, %v1186_v11  ;;  %v1117_v19 = vadd.f32 %v2403_v39, %v1116_v17  ;;  %v1191_v39 = vmul.f32 %v2433_v63, %v2433_v63 }
 0x15f   :  { %v1118_v13 = vadd.f32 %v1117_v19, %v2428_v32  ;;  %v1250_v20 = vadd.f32 %v1249_v58, %v1187_v24 }
 0x161   :  { %v1251_v51 = vadd.f32 %v1250_v20, %v1188_v35  ;;  %v1119_v45 = vadd.f32 %v1118_v13, %v2440_v14 }
 0x163   :  { %v1120_v26 = vadd.f32 %v2420_v54, %v1119_v45  ;;  %v1252_v60 = vadd.f32 %v1251_v51, %v1189_v21 }
 0x165   :  { %v1121_v27 = vadd.f32 %v2433_v63, %v1120_v26  ;;  %v1253_v28 = vadd.f32 %v1252_v60, %v1190_v34 }
 0x167   :  { %v1122_v32 = vrot.slane %v1121_v27, 4  ;;  %v1254_v5 = vadd.f32 %v1253_v28, %v1191_v39 }
 0x169   :  { %v1123_v4 = vadd.f32 %v1122_v32, %v1121_v27  ;;  %v1255_v30 = vrot.slane %v1254_v5, 4 }
 0x16b   :  { %v1124_v33 = vrot.slane %v1123_v4, 2  ;;  %v1256_v50 = vadd.f32 %v1255_v30, %v1254_v5 }
 0x16d   :  { %v1125_v14 = vadd.f32 %v1124_v33, %v1123_v4  ;;  %v1257_v44 = vrot.slane %v1256_v50, 2 }
 0x16f   :  { %v1258_v2 = vadd.f32 %v1257_v44, %v1256_v50  ;;  %v1126_v57 = vrot.slane %v1125_v14, 1 }
 0x171   :  { %v1259_v54 = vrot.slane %v1258_v2, 1  ;;  %v1127_v36 = vadd.f32 %v1126_v57, %v1125_v14 }
 0x173   :  { %v1260_v6 = vadd.f32 %v1259_v54, %v1258_v2 }
 0x175   :  { %v1267_v23 = vsel %vm1264_vm0, %v1260_v6, 0.0 }
 0x176   :  { %v1270_v63 = vsel %vm1263_vm1, %v1127_v36, %v1267_v23 }
 0x177   :  { %1271 = vst [vmem:[%s2530_s5] sm:$0xff] %v1270_v63 }

// kernel: bottleneck_forward.5
= control target key start
LH: loop header
LB: loop body
LE: loop exit
PB: predicated region body
PF: predicated region fallthrough
CT: control target
= control target key end

     0   :  { %s8104_s21 = smov 0   ;;  %s11341_s0 = inlined_call_operand.vmem [shape: bf16[512,128], index: 0, kind: input, shape index: {}]   ;;  %s11342_s1 = inlined_call_operand.vmem [shape: f32[1,128], index: 1, kind: input, shape index: {}]   ;;  %s11343_s2 = inlined_call_operand.vmem [shape: f32[1,128], index: 2, kind: input, shape index: {}]   ;;  %s11344_s3 = inlined_call_operand.vmem [shape: bf16[1152,128], index: 3, kind: input, shape index: {}]   ;;  %s11345_s4 = inlined_call_operand.vmem [shape: f32[256,1], index: 4, kind: input, shape index: {}]   ;;  %s11346_s5 = inlined_call_operand.vmem [shape: bf16[512,128], index: 5, kind: output, shape index: {0}]   ;;  %s11347_s6 = inlined_call_operand.vmem [shape: f32[16,128], index: 6, kind: output, shape index: {1}]  }
   0x1 LB: > { %s8110_s22 = sadd.s32 4294967295, %s8066_s21   ;;  %p6580_p0 = scmp.ge.s32.totalorder %s8066_s21, 1  ;;  %s8066_s21 = sphi %s8104_s21, %s17_s21  }
   0x2   : > { %p216_p1 = scmp.lt.s32.totalorder %s8066_s21, 3 }
   0x4   : > { %p217_p2 = pnand %p6580_p0, %p216_p1 }
   0x6   : > { %220 = sbr.rel (%p217_p2) target bundleno = 829 (0x33d), region = 40 }
   0xb   : > { %v611_v0 = vld [vmem:[%s11345_s4 + $0x10] sm:$0xff]  ;;  %v609_v1 = vld [vmem:[%s11345_s4] sm:$0xff]  ;;  %v612_v2 = vld [vmem:[%s11345_s4 + $0x18] sm:$0xff]  ;;  %v11364_v3 = vmov 0   ;;  %s6581_s15 = sshll.u32 %s8110_s22, 5  ;;  %p262_p4 = scmp.lt.s32.totalorder %s8110_s22, 1 }
   0xc   : > { %7878 = vset.pattern.permute.xlu1 %v11364_v3  ;;  %443 = vst [vmem:[#allocation2] sm:$0xf] %v11364_v3  ;;  %444 = vst [vmem:[#allocation2 + $0x4] sm:$0xf] %v11364_v3  ;;  %7877 = vset.pattern.permute.xlu0 %v11364_v3  ;;  %vm643_vm0 = vcmp.ge.f32.partialorder %v611_v0, 1.0  ;;  %vm641_vm1 = vcmp.ge.f32.partialorder %v609_v1, 1.0 }
   0xd   : > { %445 = vst [vmem:[#allocation2 + $0x8] sm:$0xf] %v11364_v3  ;;  %446 = vst [vmem:[#allocation2 + $0x8c] sm:$0xf] %v11364_v3  ;;  %vm644_vm2 = vcmp.ge.f32.partialorder %v612_v2, 1.0  ;;  %v610_v4 = vld [vmem:[%s11345_s4 + $0x8] sm:$0xff] }
   0xe   : > { %447 = vst [vmem:[#allocation2 + $0x90] sm:$0xf] %v11364_v3  ;;  %448 = vst [vmem:[#allocation2 + $0x94] sm:$0xf] %v11364_v3  ;;  %v740_v5 = vsel %vm643_vm0, 1, %v11364_v3  ;;  %v738_v6 = vsel %vm641_vm1, 1, %v11364_v3 }
   0xf   : > { %vm642_vm3 = vcmp.ge.f32.partialorder %v610_v4, 1.0  ;;  %v613_v7 = vld [vmem:[%s11345_s4 + $0x20] sm:$0xff]  ;;  %777 = vperm.xlu1 %7878, %v740_v5   ;;  %771 = vperm.xlu0 %7877, %v738_v6   ;;  %v741_v8 = vsel %vm644_vm2, 1, %v11364_v3  ;;  %vm673_vm4 = vcmp.le.f32.partialorder %v609_v1, 14.0  ;;  %v614_v10 = vld [vmem:[%s11345_s4 + $0x28] sm:$0xff]  ;;  %vm674_vm7 = vcmp.le.f32.partialorder %v610_v4, 14.0 }
  0x10   : > { %v739_v9 = vsel %vm642_vm3, 1, %v11364_v3  ;;  %vm645_vm5 = vcmp.ge.f32.partialorder %v613_v7, 1.0  ;;  %v2181_v11 = vsel %vm673_vm4, 1, %v11364_v3  ;;  %vm646_vm6 = vcmp.ge.f32.partialorder %v614_v10, 1.0  ;;  %v7879_v13 = vld [vmem:[%s11344_s3 + $0x78] sm:$0xff]   ;;  %v615_v19 = vld [vmem:[%s11345_s4 + $0x30] sm:$0xff] }
  0x11   : > { %v742_v12 = vsel %vm645_vm5, 1, %v11364_v3  ;;  %v743_v14 = vsel %vm646_vm6, 1, %v11364_v3  ;;  %v2182_v15 = vsel %vm674_vm7, 1, %v11364_v3  ;;  %vm676_vm8 = vcmp.le.f32.partialorder %v612_v2, 14.0  ;;  %7852 = vmatprep.subr.bf16.mxu1 %v7879_v13  ;;  %7420 = vmatprep.subr.bf16.mxu0 %v7879_v13  ;;  %v616_v18 = vld [vmem:[%s11345_s4 + $0x38] sm:$0xff]  ;;  %v618_v20 = vld [vmem:[%s11345_s4 + $0x48] sm:$0xff] }
  0x12   : > { %vm675_vm9 = vcmp.le.f32.partialorder %v611_v0, 14.0  ;;  %7860 = vmatpush3.bf16.msra.mxu1 %v7879_v13  ;;  %7421 = vmatpush3.bf16.msra.mxu0 %v7879_v13  ;;  %v2184_v16 = vsel %vm676_vm8, 1, %v11364_v3  ;;  %vm678_vm10 = vcmp.le.f32.partialorder %v614_v10, 14.0  ;;  %vm677_vm11 = vcmp.le.f32.partialorder %v613_v7, 14.0  ;;  %v7880_v21 = vld [vmem:[%s11344_s3 + $0x70] sm:$0xff]   ;;  %v617_v22 = vld [vmem:[%s11345_s4 + $0x40] sm:$0xff] }
  0x13   : > { %780 = vperm.xlu1 %7878, %v741_v8   ;;  %774 = vperm.xlu0 %7877, %v739_v9   ;;  %v2183_v17 = vsel %vm675_vm9, 1, %v11364_v3  ;;  %v7881_v23 = vld [vmem:[%s11344_s3 + $0x68] sm:$0xff]   ;;  %vm648_vm12 = vcmp.ge.f32.partialorder %v616_v18, 1.0  ;;  %vm647_vm13 = vcmp.ge.f32.partialorder %v615_v19, 1.0  ;;  %v2186_v24 = vsel %vm678_vm10, 1, %v11364_v3  ;;  %v620_v26 = vld [vmem:[%s11345_s4 + $0x58] sm:$0xff] }
  0x14   : > { %v2185_v25 = vsel %vm677_vm11, 1, %v11364_v3  ;;  %vm650_vm14 = vcmp.ge.f32.partialorder %v618_v20, 1.0  ;;  %7853 = vmatprep.subr.bf16.mxu1 %v7880_v21  ;;  %7422 = vmatprep.subr.bf16.mxu0 %v7880_v21  ;;  %vm649_vm15 = vcmp.ge.f32.partialorder %v617_v22, 1.0  ;;  %v619_v27 = vld [vmem:[%s11345_s4 + $0x50] sm:$0xff]  ;;  %v622_v28 = vld [vmem:[%s11345_s4 + $0x68] sm:$0xff]  ;;  %v745_v29 = vsel %vm648_vm12, 1, %v11364_v3 }
  0x15   : > { %v744_v30 = vsel %vm647_vm13, 1, %v11364_v3  ;;  %vm680_vm0 = vcmp.le.f32.partialorder %v616_v18, 14.0  ;;  %v621_v31 = vld [vmem:[%s11345_s4 + $0x60] sm:$0xff]  ;;  %v747_v33 = vsel %vm650_vm14, 1, %v11364_v3  ;;  %vm679_vm1 = vcmp.le.f32.partialorder %v615_v19, 14.0  ;;  %v624_v34 = vld [vmem:[%s11345_s4 + $0x78] sm:$0xff] }
  0x16   : > { %7861 = vmatpush3.bf16.msra.mxu1 %v7880_v21  ;;  %7423 = vmatpush3.bf16.msra.mxu0 %v7880_v21  ;;  %v7882_v32 = vld [vmem:[%s11344_s3 + $0x60] sm:$0xff]   ;;  %vm682_vm2 = vcmp.le.f32.partialorder %v618_v20, 14.0  ;;  %vm681_vm3 = vcmp.le.f32.partialorder %v617_v22, 14.0  ;;  %v746_v35 = vsel %vm649_vm15, 1, %v11364_v3  ;;  %vm652_vm4 = vcmp.ge.f32.partialorder %v620_v26, 1.0  ;;  %v623_v36 = vld [vmem:[%s11345_s4 + $0x70] sm:$0xff] }
  0x17   : > { %2214 = vperm.xlu1 %7878, %v2181_v11   ;;  %783 = vperm.xlu0 %7877, %v742_v12   ;;  %vm651_vm5 = vcmp.ge.f32.partialorder %v619_v27, 1.0  ;;  %vm654_vm6 = vcmp.ge.f32.partialorder %v622_v28, 1.0  ;;  %v626_v37 = vld [vmem:[%s11345_s4 + $0x88] sm:$0xff]  ;;  %v2188_v38 = vsel %vm680_vm0, 1, %v11364_v3  ;;  %vm653_vm7 = vcmp.ge.f32.partialorder %v621_v31, 1.0  ;;  %v625_v42 = vld [vmem:[%s11345_s4 + $0x80] sm:$0xff] }
  0x18   : > { %7854 = vmatprep.subr.bf16.mxu1 %v7881_v23  ;;  %7424 = vmatprep.subr.bf16.mxu0 %v7881_v23  ;;  %vm684_vm8 = vcmp.le.f32.partialorder %v620_v26, 14.0  ;;  %vm683_vm9 = vcmp.le.f32.partialorder %v619_v27, 14.0  ;;  %v2187_v39 = vsel %vm679_vm1, 1, %v11364_v3  ;;  %v8210_v40 = vsel %vm682_vm2, 1, %v11364_v3  ;;  %v7883_v43 = vld [vmem:[%s11344_s3 + $0x58] sm:$0xff]   ;;  %v627_v51 = vld [vmem:[%s11345_s4 + $0x90] sm:$0xff] }
  0x19   : > { %v8214_v41 = vsel %vm681_vm3, 1, %v11364_v3  ;;  %vm686_vm10 = vcmp.le.f32.partialorder %v622_v28, 14.0  ;;  %v8224_v44 = vsel %vm652_vm4, 1, %v11364_v3  ;;  %v8228_v45 = vsel %vm651_vm5, 1, %v11364_v3  ;;  %v628_v50 = vld [vmem:[%s11345_s4 + $0x98] sm:$0xff]  ;;  %v630_v53 = vld [vmem:[%s11345_s4 + $0xa8] sm:$0xff] }
  0x1a   : > { %7862 = vmatpush3.bf16.msra.mxu1 %v7881_v23  ;;  %7425 = vmatpush3.bf16.msra.mxu0 %v7881_v23  ;;  %v8232_v46 = vsel %vm654_vm6, 1, %v11364_v3  ;;  %vm685_vm11 = vcmp.le.f32.partialorder %v621_v31, 14.0  ;;  %v8236_v47 = vsel %vm653_vm7, 1, %v11364_v3  ;;  %v8240_v48 = vsel %vm684_vm8, 1, %v11364_v3  ;;  %v7884_v55 = vld [vmem:[%s11344_s3 + $0x50] sm:$0xff]   ;;  %v8284_v60 = vld [vmem:[%s11345_s4 + $0xa0] sm:$0xff] }
  0x1b   : > { %786 = vperm.xlu1 %7878, %v743_v14   ;;  %2217 = vperm.xlu0 %7877, %v2182_v15   ;;  %v8244_v49 = vsel %vm683_vm9, 1, %v11364_v3  ;;  %vm656_vm12 = vcmp.ge.f32.partialorder %v624_v34, 1.0  ;;  %v8254_v52 = vsel %vm686_vm10, 1, %v11364_v3  ;;  %vm655_vm13 = vcmp.ge.f32.partialorder %v623_v36, 1.0  ;;  %p251_p3 = scmp.lt.s32.totalorder %s6581_s15, 63  ;;  %v7885_v0 = vld [vmem:[%s11344_s3 + $0x48] sm:$0xff]  }
  0x1c   : > { %7855 = vmatprep.subr.bf16.mxu1 %v7882_v32  ;;  %7426 = vmatprep.subr.bf16.mxu0 %v7882_v32  ;;  %vm658_vm14 = vcmp.ge.f32.partialorder %v626_v37, 1.0  ;;  %vm657_vm15 = vcmp.ge.f32.partialorder %v625_v42, 1.0  ;;  %v8260_v54 = vsel %vm685_vm11, 1, %v11364_v3  ;;  %vm688_vm0 = vcmp.le.f32.partialorder %v624_v34, 14.0  ;;  %v7886_v6 = vld [vmem:[%s11344_s3 + $0x40] sm:$0xff]   ;;  %v8381_v31 = vld [vmem:[%s11344_s3 + $0x38] sm:$0xff]  }
  0x1d   : > { %vm687_vm1 = vcmp.le.f32.partialorder %v623_v36, 14.0  ;;  %v8267_v56 = vsel %vm656_vm12, 1, %v11364_v3  ;;  %vm690_vm2 = vcmp.le.f32.partialorder %v626_v37, 14.0  ;;  %v8271_v57 = vsel %vm655_vm13, 1, %v11364_v3  ;;  %s12169_s15 = smov (!%p251_p3, %s6581_s15), 63  ;;  %s12171_s22 = smov (!%p262_p4, %s8110_s22), 1 }
  0x1e   : > { %7863 = vmatpush3.bf16.msra.mxu1 %v7882_v32  ;;  %7427 = vmatpush3.bf16.msra.mxu0 %v7882_v32  ;;  %v8275_v58 = vsel %vm658_vm14, 1, %v11364_v3  ;;  %v8279_v59 = vsel %vm657_vm15, 1, %v11364_v3  ;;  %vm689_vm3 = vcmp.le.f32.partialorder %v625_v42, 14.0  ;;  %v8289_v61 = vsel %vm688_vm0, 1, %v11364_v3  ;;  %s6582_s14 = sshll.u32 %s12169_s15, 2  ;;  %s6585_s15 = sshll.u32 %s12171_s22, 3 }
  0x1f   : > { %2223 = vperm.xlu1 %7878, %v2184_v16   ;;  %2220 = vperm.xlu0 %7877, %v2183_v17   ;;  %v8292_v62 = vsel %vm687_vm1, 1, %v11364_v3  ;;  %vm660_vm4 = vcmp.ge.f32.partialorder %v628_v50, 1.0  ;;  %vm659_vm5 = vcmp.ge.f32.partialorder %v627_v51, 1.0  ;;  %v8295_v63 = vsel %vm690_vm2, 1, %v11364_v3  ;;  %s8329_s20 = scalar_lea.vmem %s11341_s0, %s6582_s14  ;;  %v8334_v7 = vld [vmem:[%s11342_s1] ss:$0 sm:$0xff]  ;;  %s265_s29 = scalar_lea.vmem %s11347_s6, %s6585_s15 }
  0x20   : > { %7856 = vmatprep.subr.bf16.mxu1 %v7883_v43  ;;  %7428 = vmatprep.subr.bf16.mxu0 %v7883_v43  ;;  %vm662_vm6 = vcmp.ge.f32.partialorder %v630_v53, 1.0  ;;  %v8306_v1 = vsel %vm689_vm3, 1, %v11364_v3  ;;  %vm661_vm7 = vcmp.ge.f32.partialorder %v8284_v60, 1.0  ;;  %vm692_vm8 = vcmp.le.f32.partialorder %v628_v50, 14.0  ;;  %v8346_v11 = vld [vmem:[%s8329_s20 + $0x30] sm:$0xff]   ;;  %v7165_v12 = vld [vmem:[%s8329_s20 + $0x38] sm:$0xff]  }
  0x21   : > { %vm691_vm9 = vcmp.le.f32.partialorder %v627_v51, 14.0  ;;  %v8311_v2 = vsel %vm660_vm4, 1, %v11364_v3  ;;  %v8315_v4 = vsel %vm659_vm5, 1, %v11364_v3  ;;  %vm694_vm10 = vcmp.le.f32.partialorder %v630_v53, 14.0  ;;  %v7166_v13 = vld [vmem:[%s8329_s20 + $0x40] sm:$0xff]   ;;  %v8361_v19 = vld [vmem:[%s8329_s20 + $0x8] sm:$0xff]  }
  0x22   : > { %7864 = vmatpush3.bf16.msra.mxu1 %v7883_v43  ;;  %7429 = vmatpush3.bf16.msra.mxu0 %v7883_v43  ;;  %v8319_v5 = vsel %vm662_vm6, 1, %v11364_v3  ;;  %v8337_v8 = vsel %vm661_vm7, 1, %v11364_v3  ;;  %v8340_v9 = vsel %vm692_vm8, 1, %v11364_v3  ;;  %v8343_v10 = vsel %vm691_vm9, 1, %v11364_v3  ;;  %v8358_v18 = vld [vmem:[%s8329_s20] sm:$0xff]   ;;  %v8364_v20 = vld [vmem:[%s8329_s20 + $0x48] sm:$0xff]  }
  0x23   : > { %2229 = vperm.xlu1 %7878, %v2186_v24   ;;  %2226 = vperm.xlu0 %7877, %v2185_v25   ;;  %v8354_v14 = vsel %vm694_vm10, 1, %v11364_v3  ;;  %v6967_v15 = vunpack.c.h.bf16 %v8346_v11  ;;  %v6970_v16 = vunpack.c.l.bf16 %v7165_v12  ;;  %v6971_v17 = vunpack.c.h.bf16 %v7165_v12  ;;  %v8369_v23 = vld [vmem:[%s11343_s2] ss:$0 sm:$0xff] }
  0x24   : > { %7857 = vmatprep.subr.bf16.mxu1 %v7884_v55  ;;  %7430 = vmatprep.subr.bf16.mxu0 %v7884_v55  ;;  %v6974_v21 = vunpack.c.l.bf16 %v7166_v13  ;;  %v6975_v22 = vunpack.c.h.bf16 %v7166_v13  ;;  %v6943_v24 = vunpack.c.h.bf16 %v8358_v18  ;;  %v6946_v25 = vunpack.c.l.bf16 %v8361_v19 }
  0x25   : > { %v353_v26 = vmul.f32 %v6967_v15, %v8334_v7  ;;  %v354_v27 = vmul.f32 %v6970_v16, %v8334_v7  ;;  %v355_v28 = vmul.f32 %v6971_v17, %v8334_v7  ;;  %vm693_vm11 = vcmp.le.f32.partialorder %v8284_v60, 14.0  ;;  %v8407_v16 = vld [vmem:[%s8329_s20 + $0x18] sm:$0xff]  }
  0x26   : > { %7865 = vmatpush3.bf16.msra.mxu1 %v7884_v55  ;;  %7431 = vmatpush3.bf16.msra.mxu0 %v7884_v55  ;;  %v341_v32 = vmul.f32 %v6943_v24, %v8334_v7  ;;  %v357_v34 = vmul.f32 %v6975_v22, %v8334_v7  ;;  %v706_v55 = vld [vmem:[#allocation2 + $0x4] sm:$0xf]  ;;  %v707_v24 = vld [vmem:[#allocation2 + $0x8] sm:$0xf] }
  0x27   : > { %792 = vperm.xlu1 %7878, %v745_v29   ;;  %789 = vperm.xlu0 %7877, %v744_v30   ;;  %v6978_v29 = vunpack.c.l.bf16 %v8364_v20  ;;  %v356_v30 = vmul.f32 %v6974_v21, %v8334_v7  ;;  %v392_v36 = vadd.f32 %v8369_v23, %v353_v26  ;;  %v393_v37 = vadd.f32 %v8369_v23, %v354_v27 }
  0x28   : > { %7858 = vmatprep.subr.bf16.mxu1 %v7885_v0  ;;  %7432 = vmatprep.subr.bf16.mxu0 %v7885_v0  ;;  %v396_v53 = vadd.f32 %v8369_v23, %v357_v34  ;;  %v6947_v21 = vunpack.c.h.bf16 %v8361_v19  ;;  %v6620_v34 = vcombine.low %v706_v55, %v707_v24 }
  0x29   : > { %v358_v43 = vmul.f32 %v6978_v29, %v8334_v7  ;;  %v425_v50 = vmax.f32 %v393_v37, 0.0  ;;  %v7168_v29 = vld [vmem:[%s8329_s20 + $0x50] sm:$0xff]  }
  0x2a   : > { %7866 = vmatpush3.bf16.msra.mxu1 %v7885_v0  ;;  %7433 = vmatpush3.bf16.msra.mxu0 %v7885_v0 }
  0x2b   : > { %798 = vperm.xlu1 %7878, %v747_v33   ;;  %795 = vperm.xlu0 %7877, %v746_v35   ;;  %v342_v33 = vmul.f32 %v6946_v25, %v8334_v7  ;;  %v8389_v35 = vld [vmem:[%s11344_s3 + $0xb8] sm:$0xff]   ;;  %v397_v15 = vadd.f32 %v8369_v23, %v358_v43 }
  0x2c   : > { %7859 = vmatprep.subr.bf16.mxu1 %v7886_v6  ;;  %7434 = vmatprep.subr.bf16.mxu0 %v7886_v6 }
  0x2d   : > { %v381_v42 = vadd.f32 %v8369_v23, %v342_v33  ;;  %v429_v27 = vmax.f32 %v397_v15, 0.0  ;;  %7436 = vmatprep.mubr.bf16.mxu0 %v6620_v34 }
  0x2e   : > { %7867 = vmatpush3.bf16.msra.mxu1 %v7886_v6  ;;  %7435 = vmatpush3.bf16.msra.mxu0 %v7886_v6  ;;  %v8415_v6 = vld [vmem:[%s11345_s4 + $0xb8] sm:$0xff] }
  0x2f   : > { %2235 = vperm.xlu1 %7878, %v2188_v38   ;;  %2232 = vperm.xlu0 %7877, %v2187_v39   ;;  %v394_v38 = vadd.f32 %v8369_v23, %v355_v28  ;;  %v6942_v39 = vunpack.c.l.bf16 %v8358_v18  ;;  %v413_v13 = vmax.f32 %v381_v42, 0.0  ;;  %v428_v18 = vmax.f32 %v396_v53, 0.0 }
  0x30   : > { %7468 = vmatprep.subr.bf16.mxu1 %v8381_v31  ;;  %7516 = vmatprep.subr.bf16.mxu0 %v8389_v35  ;;  %vm664_vm12 = vcmp.ge.f32.partialorder %v8415_v6, 1.0  ;;  %vm696_vm0 = vcmp.le.f32.partialorder %v8415_v6, 14.0  ;;  %v8611_v6 = vld [vmem:[%s11345_s4 + $0xd0] sm:$0xff] }
  0x31   : > { %v426_v51 = vmax.f32 %v394_v38, 0.0  ;;  %v7047_v19 = vpack.c.bf16 %v429_v27, %v428_v18  ;;  %vm667_vm5 = vcmp.ge.f32.partialorder %v8611_v6, 1.0  ;;  %vm699_vm9 = vcmp.le.f32.partialorder %v8611_v6, 14.0 }
  0x33   : > { %2241 = vperm.xlu1 %7878, %v8210_v40   ;;  %2238 = vperm.xlu0 %7877, %v8214_v41   ;;  %v395_v40 = vadd.f32 %v8369_v23, %v356_v30  ;;  %v380_v41 = vadd.f32 %v8369_v23, %v341_v32  ;;  %v343_v30 = vmul.f32 %v6947_v21, %v8334_v7  ;;  %v8444_v21 = vld [vmem:[%s8329_s20 + $0x68] sm:$0xff]  }
  0x34   : > { %7182 = vst [vmem:[#allocation2 + $0x50] sm:$0xff] %v7047_v19   ;;  %v6994_v19 = vunpack.c.l.bf16 %v8444_v21 }
  0x35   : > { %v427_v0 = vmax.f32 %v395_v40, 0.0  ;;  %v412_v12 = vmax.f32 %v380_v41, 0.0  ;;  %v6982_v40 = vunpack.c.l.bf16 %v7168_v29  ;;  %v7169_v41 = vld [vmem:[%s8329_s20 + $0x58] sm:$0xff]  }
  0x37   : > { %804 = vperm.xlu1 %7878, %v8224_v44   ;;  %801 = vperm.xlu0 %7877, %v8228_v45   ;;  %v7160_v44 = vld [vmem:[%s8329_s20 + $0x10] sm:$0xff]   ;;  %v424_v45 = vmax.f32 %v392_v36, 0.0  ;;  %v7042_v25 = vpack.c.bf16 %v427_v0, %v426_v51  ;;  %v7007_v26 = vpack.c.bf16 %v413_v13, %v412_v12  ;;  %v6979_v36 = vunpack.c.h.bf16 %v8364_v20  ;;  %v7170_v12 = vld [vmem:[%s8329_s20 + $0x60] sm:$0xff]  }
  0x38   : > { %v6950_v22 = vunpack.c.l.bf16 %v7160_v44  ;;  %v6951_v28 = vunpack.c.h.bf16 %v7160_v44  ;;  %v6986_v0 = vunpack.c.l.bf16 %v7169_v41  ;;  %v6991_v60 = vunpack.c.h.bf16 %v7170_v12 }
  0x39   : > { %v7037_v17 = vpack.c.bf16 %v425_v50, %v424_v45  ;;  %7181 = vst [vmem:[#allocation2 + $0x48] sm:$0xff] %v7042_v25   ;;  %7174 = vst [vmem:[#allocation2 + $0x10] sm:$0xff] %v7007_v26   ;;  %v359_v20 = vmul.f32 %v6979_v36, %v8334_v7  ;;  %v360_v50 = vmul.f32 %v6982_v40, %v8334_v7 }
  0x3a   : > { %v344_v32 = vmul.f32 %v6950_v22, %v8334_v7  ;;  %v345_v33 = vmul.f32 %v6951_v28, %v8334_v7  ;;  %v8449_v22 = vsel %vm693_vm11, 1, %v11364_v3 }
  0x3b   : > { %810 = vperm.xlu1 %7878, %v8232_v46   ;;  %807 = vperm.xlu0 %7877, %v8236_v47   ;;  %7180 = vst [vmem:[#allocation2 + $0x40] sm:$0xff] %v7037_v17   ;;  %v6954_v46 = vunpack.c.l.bf16 %v8407_v16  ;;  %v340_v47 = vmul.f32 %v6942_v39, %v8334_v7  ;;  %v382_v39 = vadd.f32 %v8369_v23, %v343_v30 }
  0x3c   : > { %v383_v42 = vadd.f32 %v8369_v23, %v344_v32  ;;  %v384_v43 = vadd.f32 %v8369_v23, %v345_v33  ;;  %v398_v55 = vadd.f32 %v8369_v23, %v359_v20  ;;  %v399_v17 = vadd.f32 %v8369_v23, %v360_v50  ;;  %v725_v33 = vld [vmem:[#allocation2 + $0x50] sm:$0xf] }
  0x3d   : > { %v346_v37 = vmul.f32 %v6954_v46, %v8334_v7  ;;  %v379_v38 = vadd.f32 %v8369_v23, %v340_v47  ;;  %v414_v45 = vmax.f32 %v382_v39, 0.0  ;;  %v6987_v46 = vunpack.c.h.bf16 %v7169_v41 }
  0x3e   : > { %v415_v51 = vmax.f32 %v383_v42, 0.0  ;;  %v416_v53 = vmax.f32 %v384_v43, 0.0  ;;  %v430_v26 = vmax.f32 %v398_v55, 0.0  ;;  %v6990_v47 = vunpack.c.l.bf16 %v7170_v12  ;;  %v7890_v43 = vld [vmem:[%s11344_s3 + $0x30] sm:$0xff]  }
  0x3f   : > { %2247 = vperm.xlu1 %7878, %v8240_v48   ;;  %2244 = vperm.xlu0 %7877, %v8244_v49   ;;  %v6983_v48 = vunpack.c.h.bf16 %v7168_v29  ;;  %v385_v49 = vadd.f32 %v8369_v23, %v346_v37  ;;  %v411_v44 = vmax.f32 %v379_v38, 0.0  ;;  %v431_v34 = vmax.f32 %v399_v17, 0.0  ;;  %v8488_v12 = vld [vmem:[%s11345_s4 + $0xb0] sm:$0xff] }
  0x40   : > { %v7012_v25 = vpack.c.bf16 %v415_v51, %v414_v45  ;;  %v723_v27 = vld [vmem:[#allocation2 + $0x48] sm:$0xf]  ;;  %v363_v37 = vmul.f32 %v6987_v46, %v8334_v7  ;;  %v364_v38 = vmul.f32 %v6990_v47, %v8334_v7  ;;  %v365_v41 = vmul.f32 %v6991_v60, %v8334_v7  ;;  %v8478_v50 = vld [vmem:[#allocation2 + $0x10] sm:$0xf] }
  0x41   : > { %v417_v13 = vmax.f32 %v385_v49, 0.0  ;;  %v6876_v15 = vpack.c.bf16 %v411_v44, %v411_v44  ;;  %v361_v18 = vmul.f32 %v6983_v48, %v8334_v7  ;;  %v366_v42 = vmul.f32 %v6994_v19, %v8334_v7  ;;  %v8473_v44 = vld [vmem:[%s8329_s20 + $0x70] sm:$0xff]   ;;  %v8476_v45 = vld [vmem:[%s8329_s20 + $0x28] sm:$0xff]  }
  0x42   : > { %v722_v24 = vld [vmem:[#allocation2 + $0x44] sm:$0xf]  ;;  %7175 = vst [vmem:[#allocation2 + $0x18] sm:$0xff] %v7012_v25   ;;  %v7052_v20 = vpack.c.bf16 %v431_v34, %v430_v26  ;;  %v402_v48 = vadd.f32 %v8369_v23, %v363_v37  ;;  %v403_v49 = vadd.f32 %v8369_v23, %v364_v38  ;;  %v6962_v25 = vunpack.c.l.bf16 %v8476_v45  ;;  %v8500_v26 = vld [vmem:[%s11345_s4 + $0xc8] sm:$0xff]  ;;  %v726_v38 = vld [vmem:[#allocation2 + $0x54] sm:$0xf] }
  0x43   : > { %2253 = vperm.xlu1 %7878, %v8254_v52   ;;  %2250 = vperm.xlu0 %7877, %v8260_v54   ;;  %v362_v52 = vmul.f32 %v6986_v0, %v8334_v7  ;;  %v724_v54 = vld [vmem:[#allocation2 + $0x4c] sm:$0xf]  ;;  %577 = vst [vmem:[#allocation2 + $0xc] sm:$0xf] %v6876_v15  ;;  %v7017_v28 = vpack.c.bf16 %v417_v13, %v416_v53  ;;  %v6955_v0 = vunpack.c.h.bf16 %v8407_v16  ;;  %vm663_vm13 = vcmp.ge.f32.partialorder %v8488_v12, 1.0 }
  0x44   : > { %v400_v29 = vadd.f32 %v8369_v23, %v361_v18  ;;  %v6628_v30 = vcombine.low %v722_v24, %v723_v27  ;;  %v6629_v39 = vcombine.low %v724_v54, %v725_v33  ;;  %v404_v53 = vadd.f32 %v8369_v23, %v365_v41  ;;  %7183 = vst [vmem:[#allocation2 + $0x58] sm:$0xff] %v7052_v20  }
  0x45   : > { %v401_v32 = vadd.f32 %v8369_v23, %v362_v52  ;;  %7176 = vst [vmem:[#allocation2 + $0x20] sm:$0xff] %v7017_v28   ;;  %v405_v55 = vadd.f32 %v8369_v23, %v366_v42  ;;  %v434_v13 = vmax.f32 %v402_v48, 0.0  ;;  %v435_v15 = vmax.f32 %v403_v49, 0.0  ;;  %v8507_v52 = vld [vmem:[#allocation2 + $0x14] sm:$0xf] }
  0x46   : > { %v432_v36 = vmax.f32 %v400_v29, 0.0  ;;  %7452 = vmatprep.mubr.bf16.mxu1 %v6628_v30  ;;  %v6995_v18 = vunpack.c.h.bf16 %v8444_v21  ;;  %v7898_v21 = vld [vmem:[%s11344_s3 + $0x28] sm:$0xff]   ;;  %v7900_v29 = vld [vmem:[%s11344_s3 + $0xb0] sm:$0xff]   ;;  %v6966_v60 = vunpack.c.l.bf16 %v8346_v11  ;;  %vm666_vm14 = vcmp.ge.f32.partialorder %v8500_v26, 1.0 }
  0x47   : > { %816 = vperm.xlu1 %7878, %v8267_v56   ;;  %813 = vperm.xlu0 %7877, %v8271_v57   ;;  %v433_v40 = vmax.f32 %v401_v32, 0.0  ;;  %v7162_v56 = vld [vmem:[%s8329_s20 + $0x20] sm:$0xff]   ;;  %v8465_v57 = vsel %vm664_vm12, 1, %v11364_v3  ;;  %v7062_v27 = vpack.c.bf16 %v435_v15, %v434_v13  ;;  %v7173_v32 = vld [vmem:[%s8329_s20 + $0x78] sm:$0xff]   ;;  %v6999_v11 = vunpack.c.h.bf16 %v8473_v44 }
  0x48   : > { %7453 = vmatmul.mubr.bf16.vlgmr.msra.gmra.mxu1 %v6629_v39  ;;  %v6958_v17 = vunpack.c.l.bf16 %v7162_v56  ;;  %v6959_v16 = vunpack.c.h.bf16 %v7162_v56  ;;  %v367_v28 = vmul.f32 %v6995_v18, %v8334_v7  ;;  %v437_v39 = vmax.f32 %v405_v55, 0.0 }
  0x49   : > { %v7057_v51 = vpack.c.bf16 %v433_v40, %v432_v36  ;;  %7469 = vmatpush3.bf16.msra.mxu1 %v8381_v31  ;;  %v711_v19 = vld [vmem:[#allocation2 + $0x18] sm:$0xf]  ;;  %7185 = vst [vmem:[#allocation2 + $0x68] sm:$0xff] %v7062_v27   ;;  %v8522_v33 = vld [vmem:[#allocation2 + $0x1c] sm:$0xf]  ;;  %v7899_v40 = vld [vmem:[%s11344_s3 + $0x20] sm:$0xff]   ;;  %v6963_v27 = vunpack.c.h.bf16 %v8476_v45 }
  0x4a   : > { %v8492_v24 = vld [vmem:[#allocation2 + $0xc] sm:$0xf]  ;;  %7470 = vmatprep.subr.bf16.mxu1 %v7890_v43  ;;  %v348_v54 = vmul.f32 %v6958_v17, %v8334_v7  ;;  %v349_v30 = vmul.f32 %v6959_v16, %v8334_v7  ;;  %v406_v37 = vadd.f32 %v8369_v23, %v367_v28  ;;  %vm695_vm1 = vcmp.le.f32.partialorder %v8488_v12, 14.0  ;;  %v7914_v12 = vld [vmem:[%s11344_s3 + $0x98] sm:$0xff]  }
  0x4b   : > { %822 = vperm.xlu1 %7878, %v8275_v58   ;;  %819 = vperm.xlu0 %7877, %v8279_v59   ;;  %7184 = vst [vmem:[#allocation2 + $0x60] sm:$0xff] %v7057_v51   ;;  %v347_v58 = vmul.f32 %v6955_v0, %v8334_v7  ;;  %v6998_v59 = vunpack.c.l.bf16 %v8473_v44  ;;  %v6621_v31 = vcombine.low %v8492_v24, %v8478_v50  ;;  %v727_v20 = vld [vmem:[#allocation2 + $0x58] sm:$0xf]  ;;  %v728_v48 = vld [vmem:[#allocation2 + $0x5c] sm:$0xf]  ;;  %v7002_v51 = vunpack.c.l.bf16 %v7173_v32  ;;  %v7906_v28 = vld [vmem:[%s11344_s3 + $0xa8] sm:$0xff]  }
  0x4c   : > { %v8524_v34 = vld [vmem:[#allocation2 + $0x20] sm:$0xf]  ;;  %v387_v36 = vadd.f32 %v8369_v23, %v348_v54  ;;  %v6630_v55 = vcombine.low %v726_v38, %v727_v20  ;;  %v438_v15 = vmax.f32 %v406_v37, 0.0  ;;  %v351_v32 = vmul.f32 %v6963_v27, %v8334_v7  ;;  %v7913_v20 = vld [vmem:[%s11344_s3 + $0x8] sm:$0xff]  }
  0x4d   : > { %v386_v46 = vadd.f32 %v8369_v23, %v347_v58  ;;  %v368_v47 = vmul.f32 %v6998_v59, %v8334_v7  ;;  %7471 = vmatpush3.bf16.msra.mxu1 %v7890_v43  ;;  %7437 = vmatmul.mubr.bf16.vlgmr.msra.gmra.mxu0 %v6621_v31  ;;  %v350_v43 = vmul.f32 %v6962_v25, %v8334_v7  ;;  %v7905_v25 = vld [vmem:[%s11344_s3 + $0x18] sm:$0xff]   ;;  %vm698_vm2 = vcmp.le.f32.partialorder %v8500_v26, 14.0  ;;  %v637_v26 = vld [vmem:[%s11345_s4 + $0xe0] sm:$0xff] }
  0x4e   : > { %7472 = vmatprep.subr.bf16.mxu1 %v7898_v21  ;;  %7517 = vmatpush3.bf16.msra.mxu0 %v8389_v35  ;;  %v419_v42 = vmax.f32 %v387_v36, 0.0  ;;  %v6623_v49 = vcombine.low %v8522_v33, %v8524_v34  ;;  %v388_v35 = vadd.f32 %v8369_v23, %v349_v30  ;;  %v352_v30 = vmul.f32 %v6966_v60, %v8334_v7  ;;  %v7907_v33 = vld [vmem:[%s11344_s3 + $0x10] sm:$0xff]   ;;  %v714_v60 = vld [vmem:[#allocation2 + $0x24] sm:$0xf] }
  0x4f   : > { %2259 = vperm.xlu1 %7878, %v8289_v61   ;;  %2256 = vperm.xlu0 %7877, %v8292_v62   ;;  %v6622_v61 = vcombine.low %v8507_v52, %v711_v19  ;;  %v436_v62 = vmax.f32 %v404_v53, 0.0  ;;  %v418_v41 = vmax.f32 %v386_v46, 0.0  ;;  %v407_v56 = vadd.f32 %v8369_v23, %v368_v47  ;;  %v8545_v53 = vld [vmem:[%s11345_s4 + $0xc0] sm:$0xff] }
  0x50   : > { %7518 = vmatprep.subr.bf16.mxu0 %v7900_v29  ;;  %v389_v59 = vadd.f32 %v8369_v23, %v350_v43  ;;  %v420_v16 = vmax.f32 %v388_v35, 0.0  ;;  %7456 = vmatprep.mubr.bf16.mxu1 %v6630_v55  ;;  %vm665_vm15 = vcmp.ge.f32.partialorder %v8545_v53, 1.0  ;;  %v731_v54 = vld [vmem:[#allocation2 + $0x68] sm:$0xf]  ;;  %v732_v19 = vld [vmem:[#allocation2 + $0x6c] sm:$0xf] }
  0x51   : > { %7440 = vmatprep.mubr.bf16.mxu0 %v6622_v61  ;;  %v7067_v44 = vpack.c.bf16 %v437_v39, %v436_v62  ;;  %v7022_v13 = vpack.c.bf16 %v419_v42, %v418_v41  ;;  %v439_v17 = vmax.f32 %v407_v56, 0.0  ;;  %7473 = vmatpush3.bf16.msra.mxu1 %v7898_v21  ;;  %v370_v21 = vmul.f32 %v7002_v51, %v8334_v7  ;;  %v7908_v36 = vld [vmem:[%s11344_s3 + $0xa0] sm:$0xff]  }
  0x52   : > { %v729_v0 = vld [vmem:[#allocation2 + $0x60] sm:$0xf]  ;;  %v730_v58 = vld [vmem:[#allocation2 + $0x64] sm:$0xf]  ;;  %7474 = vmatprep.subr.bf16.mxu1 %v7899_v40  ;;  %7519 = vmatpush3.bf16.msra.mxu0 %v7900_v29  ;;  %v421_v46 = vmax.f32 %v389_v59, 0.0  ;;  %v8584_v61 = vsel %vm666_vm14, 1, %v11364_v3 }
  0x53   : > { %2265 = vperm.xlu1 %7878, %v8295_v63   ;;  %2262 = vperm.xlu0 %7877, %v8306_v1   ;;  %v6631_v18 = vcombine.low %v728_v48, %v729_v0  ;;  %7186 = vst [vmem:[#allocation2 + $0x70] sm:$0xff] %v7067_v44   ;;  %v369_v63 = vmul.f32 %v6999_v11, %v8334_v7  ;;  %v8552_v1 = vsel %vm663_vm13, 1, %v11364_v3  ;;  %7177 = vst [vmem:[#allocation2 + $0x28] sm:$0xff] %v7022_v13   ;;  %v7920_v27 = vld [vmem:[%s11344_s3 + $0x80] sm:$0xff]  }
  0x54   : > { %v7072_v31 = vpack.c.bf16 %v439_v17, %v438_v15  ;;  %v6632_v45 = vcombine.low %v730_v58, %v731_v54  ;;  %v409_v29 = vadd.f32 %v8369_v23, %v370_v21  ;;  %v7027_v34 = vpack.c.bf16 %v421_v46, %v420_v16  ;;  %7520 = vmatprep.subr.bf16.mxu0 %v7906_v28  ;;  %v7916_v15 = vld [vmem:[%s11344_s3 + $0x90] sm:$0xff]   ;;  %v640_v46 = vld [vmem:[%s11345_s4 + $0xf8] sm:$0xff] }
  0x55   : > { %7457 = vmatmul.mubr.bf16.gmra.mxu1 %v6631_v18  ;;  %v408_v47 = vadd.f32 %v8369_v23, %v369_v63  ;;  %7441 = vmatmul.mubr.bf16.gmra.mxu0 %v6623_v49  ;;  %v390_v7 = vadd.f32 %v8369_v23, %v351_v32  ;;  %v8589_v62 = vsel %vm665_vm15, 1, %v11364_v3  ;;  %v8605_v56 = vsel %vm695_vm1, 1, %v11364_v3  ;;  %v721_v18 = vld [vmem:[#allocation2 + $0x40] sm:$0xf] }
  0x56   : > { %7187 = vst [vmem:[#allocation2 + $0x78] sm:$0xff] %v7072_v31   ;;  %7475 = vmatpush3.bf16.msra.mxu1 %v7899_v40  ;;  %7460 = vmatprep.mubr.bf16.mxu1 %v6632_v45  ;;  %v441_v37 = vmax.f32 %v409_v29, 0.0  ;;  %7178 = vst [vmem:[#allocation2 + $0x30] sm:$0xff] %v7027_v34   ;;  %v8594_v40 = vsel %vm696_vm0, 1, %v11364_v3  ;;  %vm697_vm3 = vcmp.le.f32.partialorder %v8545_v53, 14.0  ;;  %v2206_v51 = vsel %vm698_vm2, 1, %v11364_v3 }
  0x57   : > { %828 = vperm.xlu1 %7878, %v8311_v2   ;;  %825 = vperm.xlu0 %7877, %v8315_v4   ;;  %v440_v2 = vmax.f32 %v408_v47, 0.0  ;;  %v391_v4 = vadd.f32 %v8369_v23, %v352_v30  ;;  %v422_v11 = vmax.f32 %v390_v7, 0.0  ;;  %v2205_v55 = vsel %vm697_vm3, 1, %v11364_v3  ;;  %v639_v47 = vld [vmem:[%s11345_s4 + $0xf0] sm:$0xff] }
  0x58   : > { %7476 = vmatprep.subr.bf16.mxu1 %v7905_v25  ;;  %7521 = vmatpush3.bf16.msra.mxu0 %v7906_v28  ;;  %vm669_vm7 = vcmp.ge.f32.partialorder %v637_v26, 1.0  ;;  %v2207_v28 = vsel %vm699_vm9, 1, %v11364_v3  ;;  %vm701_vm11 = vcmp.le.f32.partialorder %v637_v26, 14.0  ;;  %vm672_vm12 = vcmp.ge.f32.partialorder %v640_v46, 1.0  ;;  %v4731_v26 = vld [vmem:[#allocation2 + $0x10] sm:$0x8] }
  0x59   : > { %v423_v38 = vmax.f32 %v391_v4, 0.0  ;;  %v7077_v39 = vpack.c.bf16 %v441_v37, %v440_v2  ;;  %7522 = vmatprep.subr.bf16.mxu0 %v7908_v36  ;;  %v2209_v45 = vsel %vm701_vm11, 1, %v11364_v3  ;;  %vm671_vm13 = vcmp.ge.f32.partialorder %v639_v47, 1.0 }
  0x5a   : > { %v733_v23 = vld [vmem:[#allocation2 + $0x70] sm:$0xf]  ;;  %7477 = vmatpush3.bf16.msra.mxu1 %v7905_v25  ;;  %v715_v41 = vld [vmem:[#allocation2 + $0x28] sm:$0xf]  ;;  %v734_v42 = vld [vmem:[#allocation2 + $0x74] sm:$0xf] }
  0x5b   : > { %834 = vperm.xlu1 %7878, %v8319_v5   ;;  %831 = vperm.xlu0 %7877, %v8337_v8   ;;  %v8600_v5 = vld [vmem:[%s11345_s4 + $0xd8] sm:$0xff]  ;;  %v6633_v8 = vcombine.low %v732_v19, %v733_v23  ;;  %v6624_v43 = vcombine.low %v714_v60, %v715_v41  ;;  %7188 = vst [vmem:[#allocation2 + $0x80] sm:$0xff] %v7077_v39   ;;  %v716_v44 = vld [vmem:[#allocation2 + $0x2c] sm:$0xf]  ;;  %v769_v29 = vsel %vm672_vm12, 1, %v11364_v3  ;;  %v768_v32 = vsel %vm671_vm13, 1, %v11364_v3 }
  0x5c   : > { %7478 = vmatprep.subr.bf16.mxu1 %v7907_v33  ;;  %v7032_v48 = vpack.c.bf16 %v423_v38, %v422_v11  ;;  %7523 = vmatpush3.bf16.msra.mxu0 %v7908_v36  ;;  %vm668_vm4 = vcmp.ge.f32.partialorder %v8600_v5, 1.0  ;;  %vm700_vm8 = vcmp.le.f32.partialorder %v8600_v5, 14.0  ;;  %vm704_vm14 = vcmp.le.f32.partialorder %v640_v46, 14.0  ;;  %v4734_v46 = vld [vmem:[#allocation2 + $0x1c] sm:$0xf] }
  0x5d   : > { %7461 = vmatmul.mubr.bf16.gmra.mxu1 %v6633_v8  ;;  %v735_v49 = vld [vmem:[#allocation2 + $0x78] sm:$0xf]  ;;  %7444 = vmatprep.mubr.bf16.mxu0 %v6624_v43  ;;  %v717_v0 = vld [vmem:[#allocation2 + $0x30] sm:$0xf]  ;;  %v736_v13 = vld [vmem:[#allocation2 + $0x7c] sm:$0xf] }
  0x5e   : > { %v6634_v35 = vcombine.low %v734_v42, %v735_v49  ;;  %7179 = vst [vmem:[#allocation2 + $0x38] sm:$0xff] %v7032_v48   ;;  %7479 = vmatpush3.bf16.msra.mxu1 %v7907_v33  ;;  %v6625_v53 = vcombine.low %v716_v44, %v717_v0  ;;  %7524 = vmatprep.subr.bf16.mxu0 %v7914_v12  ;;  %v718_v17 = vld [vmem:[#allocation2 + $0x34] sm:$0xf]  ;;  %v765_v16 = vsel %vm668_vm4, 1, %v11364_v3  ;;  %v2208_v54 = vsel %vm700_vm8, 1, %v11364_v3 }
  0x5f   : > { %2271 = vperm.xlu1 %7878, %v8340_v9   ;;  %2268 = vperm.xlu0 %7877, %v8343_v10   ;;  %v7915_v9 = vld [vmem:[%s11344_s3] sm:$0xff]   ;;  %v638_v10 = vld [vmem:[%s11345_s4 + $0xe8] sm:$0xff]  ;;  %vm703_vm15 = vcmp.le.f32.partialorder %v639_v47, 14.0  ;;  %v2212_v19 = vsel %vm704_vm14, 1, %v11364_v3  ;;  %vm963_vm9 = vsmask.f32 7440 }
  0x60   : > { %7464 = vmatprep.mubr.bf16.mxu1 %v6634_v35  ;;  %7480 = vmatprep.subr.bf16.mxu1 %v7913_v20  ;;  %vm670_vm6 = vcmp.ge.f32.partialorder %v638_v10, 1.0  ;;  %vm702_vm10 = vcmp.le.f32.partialorder %v638_v10, 14.0  ;;  %v2211_v33 = vsel %vm703_vm15, 1, %v11364_v3  ;;  %v3251_v10 = vld [vmem:[#allocation2 + $0xc] sm:$0xf] }
  0x61   : > { %7445 = vmatmul.mubr.bf16.gmra.mxu0 %v6625_v53  ;;  %v2210_v30 = vsel %vm702_vm10, 1, %v11364_v3 }
  0x62   : > { %v737_v58 = vld [vmem:[#allocation2 + $0x80] sm:$0xf]  ;;  %7481 = vmatpush3.bf16.msra.mxu1 %v7913_v20  ;;  %7525 = vmatpush3.bf16.msra.mxu0 %v7914_v12 }
  0x63   : > { %2277 = vperm.xlu1 %7878, %v8354_v14   ;;  %2274 = vperm.xlu0 %7877, %v8449_v22   ;;  %v6635_v59 = vcombine.low %v736_v13, %v737_v58  ;;  %v7919_v14 = vld [vmem:[%s11344_s3 + $0x88] sm:$0xff]   ;;  %v764_v22 = vsel %vm667_vm5, 1, %v11364_v3  ;;  %v3252_v58 = vld [vmem:[#allocation2 + $0x10] sm:$0xf] }
  0x64   : > { %7482 = vmatprep.subr.bf16.mxu1 %v7915_v9  ;;  %7526 = vmatprep.subr.bf16.mxu0 %v7916_v15 }
  0x65   : > { %v719_v63 = vld [vmem:[#allocation2 + $0x38] sm:$0xf]  ;;  %v720_v25 = vld [vmem:[#allocation2 + $0x3c] sm:$0xf]  ;;  %7465 = vmatmul.mubr.bf16.gmra.mxu1 %v6635_v59 }
  0x66   : > { %v6626_v31 = vcombine.low %v718_v17, %v719_v63  ;;  %v6627_v21 = vcombine.low %v720_v25, %v721_v18  ;;  %7483 = vmatpush3.bf16.msra.mxu1 %v7915_v9  ;;  %7527 = vmatpush3.bf16.msra.mxu0 %v7916_v15  ;;  %v3250_v9 = vld [vmem:[#allocation2 + $0x8] sm:$0x8]  ;;  %v4732_v17 = vld [vmem:[#allocation2 + $0x14] sm:$0xf] }
  0x67   : > { %840 = vperm.xlu1 %7878, %v8465_v57   ;;  %837 = vperm.xlu0 %7877, %v8552_v1   ;;  %v767_v57 = vsel %vm670_vm6, 1, %v11364_v3  ;;  %v766_v1 = vsel %vm669_vm7, 1, %v11364_v3  ;;  %vm962_vm7 = vsmask.f32 3328  ;;  %v8704_v25 = vld [vmem:[#allocation2 + $0x14] sm:$0xf] }
  0x68   : > { %7448 = vmatprep.mubr.bf16.mxu0 %v6626_v31  ;;  %7528 = vmatprep.subr.bf16.mxu0 %v7919_v14  ;;  %vm8689_vm10 = vmor %vm962_vm7, %vm963_vm9  ;;  %11530 = vst [vmem:[#allocation3_spill] sm:$0xff] %v8704_v25 }
  0x69   : > { %7449 = vmatmul.mubr.bf16.gmra.mxu0 %v6627_v21 }
  0x6a   : > { %7529 = vmatpush3.bf16.msra.mxu0 %v7919_v14 }
  0x6b   : > { %846 = vperm.xlu1 %7878, %v8584_v61   ;;  %843 = vperm.xlu0 %7877, %v8589_v62  }
  0x6c   : > { %7530 = vmatprep.subr.bf16.mxu0 %v7920_v27 }
  0x6e   : > { %7531 = vmatpush3.bf16.msra.mxu0 %v7920_v27 }
  0x6f   : > { %2283 = vperm.xlu1 %7878, %v8594_v40   ;;  %2280 = vperm.xlu0 %7877, %v8605_v56  }
  0x73   : > { %2289 = vperm.xlu1 %7878, %v2206_v51   ;;  %2286 = vperm.xlu0 %7877, %v2205_v55  }
  0x77   : > { %852 = vperm.xlu1 %7878, %v765_v16   ;;  %849 = vperm.xlu0 %7877, %v764_v22  }
  0x7b   : > { %858 = vperm.xlu1 %7878, %v767_v57   ;;  %855 = vperm.xlu0 %7877, %v766_v1   ;;  %v4733_v57 = vld [vmem:[#allocation2 + $0x18] sm:$0xf] }
  0x7f   : > { %2295 = vperm.xlu1 %7878, %v2208_v54   ;;  %2292 = vperm.xlu0 %7877, %v2207_v28  }
  0x83   : > { %2301 = vperm.xlu1 %7878, %v2210_v30   ;;  %2298 = vperm.xlu0 %7877, %v2209_v45  }
  0x87   : > { %864 = vperm.xlu1 %7878, %v769_v29   ;;  %861 = vperm.xlu0 %7877, %v768_v32  }
  0x8a   : > { %v778_v60 = vpop.permute.xlu1 %777  ;;  %v772_v34 = vpop.permute.xlu0 %771 }
  0x8b   : > { %vm868_vm0 = vcmp.eq.s32.totalorder %v778_v60, 1  ;;  %vm866_vm1 = vcmp.eq.s32.totalorder %v772_v34, 1  ;;  %2307 = vperm.xlu1 %7878, %v2212_v19   ;;  %2304 = vperm.xlu0 %7877, %v2211_v33  }
  0x8c   : > { %vm900_vm2 = vmpackc.low %vm868_vm0, %vm868_vm0 }
  0x8d   : > { %v932_v2 = vsel %vm900_vm2, 65537, %v11364_v3  ;;  %vm898_vm3 = vmpackc.low %vm866_vm1, %vm866_vm1 }
  0x8e   : > { %v985_v4 = vshll.u32 %v932_v2, 16  ;;  %v989_v36 = vshrl.u32 %v932_v2, 16  ;;  %v930_v37 = vsel %vm898_vm3, 65537, %v11364_v3  ;;  %v781_v7 = vpop.permute.xlu1 %780  ;;  %v775_v38 = vpop.permute.xlu0 %774 }
  0x8f   : > { %v966_v61 = vshll.u32 %v930_v37, 16  ;;  %v969_v62 = vshrl.u32 %v930_v37, 16  ;;  %vm869_vm4 = vcmp.eq.s32.totalorder %v781_v7, 1  ;;  %vm867_vm5 = vcmp.eq.s32.totalorder %v775_v38, 1 }
  0x90   : > { %v987_v23 = vrot.slane %v985_v4, 5  ;;  %v991_v39 = vrot.slane %v989_v36, 4  ;;  %vm901_vm6 = vmpackc.low %vm869_vm4, %vm869_vm4 }
  0x91   : > { %v8683_v11 = vrot.slane %v966_v61, 5  ;;  %v971_v40 = vrot.slane %v969_v62, 4  ;;  %v933_v5 = vsel %vm901_vm6, 65537, %v11364_v3  ;;  %vm899_vm8 = vmpackc.low %vm867_vm5, %vm867_vm5 }
  0x92   : > { %v992_v8 = vor.u32 %v991_v39, %v987_v23  ;;  %v995_v41 = vshll.u32 %v933_v5, 16  ;;  %v931_v42 = vsel %vm899_vm8, 65537, %v11364_v3  ;;  %v2215_v20 = vpop.permute.xlu1 %2214  ;;  %v784_v12 = vpop.permute.xlu0 %783  ;;  %v999_v51 = vshrl.u32 %v933_v5, 16 }
  0x93   : > { %v972_v56 = vor.u32 %v971_v40, %v8683_v11  ;;  %v975_v6 = vshll.u32 %v931_v42, 16  ;;  %v979_v43 = vshrl.u32 %v931_v42, 16  ;;  %vm1284_vm11 = vcmp.ne.s16.totalorder %v8683_v11, 0  ;;  %v705_v40 = vld [vmem:[#allocation2] sm:$0x8] }
  0x94   : > { %v993_v48 = vrot.slane %v992_v8, 4  ;;  %v997_v49 = vrot.slane %v995_v41, 5  ;;  %vm870_vm12 = vcmp.eq.s32.totalorder %v784_v12, 1  ;;  %v3283_v59 = vsel %vm1284_vm11, %v3250_v9, 0  ;;  %v8750_v42 = vld [vmem:[#allocation2 + $0x18] sm:$0xf] }
  0x95   : > { %v973_v35 = vrot.slane %v972_v56, 4  ;;  %v977_v55 = vrot.slane %v975_v6, 5  ;;  %v981_v0 = vrot.slane %v979_v43, 4  ;;  %v1001_v16 = vrot.slane %v999_v51, 4  ;;  %vm902_vm14 = vmpackc.low %vm870_vm12, %vm870_vm12  ;;  %11537 = vst [vmem:[#allocation6_spill] sm:$0xff] %v8750_v42 }
  0x96   : > { %v998_v15 = vsel %vm8689_vm10, %v993_v48, %v997_v49  ;;  %v787_v22 = vpop.permute.xlu1 %786  ;;  %v4764_v31 = vsel %vm1284_vm11, %v4731_v26, 0  ;;  %v8718_v54 = vpop.permute.xlu0 %2217  ;;  %v934_v45 = vsel %vm902_vm14, 65537, %v11364_v3  ;;  %vm2309_vm2 = vcmp.eq.s32.totalorder %v2215_v20, 1  ;;  %v4735_v56 = vld [vmem:[#allocation2 + $0x20] sm:$0xf] }
  0x97   : > { %v982_v53 = vor.u32 %v981_v0, %v977_v55  ;;  %v978_v13 = vsel %vm8689_vm10, %v973_v35, %v977_v55  ;;  %vm8710_vm15 = vcmp.ne.s16.totalorder %v998_v15, 0  ;;  %v1002_v29 = vor.u32 %v1001_v16, %v997_v49  ;;  %vm2341_vm5 = vmpackc.low %vm2309_vm2, %vm2309_vm2  ;;  %v7998_v20 = vld [vmem:[#allocation2 + $0x4] sm:$0xf]  ;;  %v3255_v35 = vld [vmem:[#allocation2 + $0x1c] sm:$0xf] }
  0x98   : > { %vm8698_vm13 = vcmp.ne.s16.totalorder %v978_v13, 0  ;;  %v3286_v19 = vsel %vm8710_vm15, %v8704_v25, 0  ;;  %v4767_v34 = vsel %vm8710_vm15, %v4734_v46, 0  ;;  %v1005_v4 = vshll.u32 %v934_v45, 16  ;;  %v4736_v9 = vld [vmem:[#allocation2 + $0x24] sm:$0xf] }
  0x99   : > { %v983_v63 = vrot.slane %v982_v53, 4  ;;  %v3284_v14 = vsel %vm8698_vm13, %v3251_v10, 0  ;;  %v4765_v1 = vsel %vm8698_vm13, %v4732_v17, 0  ;;  %v1009_v37 = vshrl.u32 %v934_v45, 16  ;;  %v7999_v10 = vld [vmem:[#allocation2 + $0x8] sm:$0xf] }
  0x9a   : > { %v8714_v27 = vcombine.low %v3283_v59, %v3284_v14  ;;  %v8722_v47 = vcombine.low %v4764_v31, %v4765_v1  ;;  %v2224_v36 = vpop.permute.xlu1 %2223  ;;  %vm871_vm1 = vcmp.eq.s32.totalorder %v787_v22, 1  ;;  %v8742_v7 = vpop.permute.xlu0 %2220  ;;  %v1003_v38 = vrot.slane %v1002_v29, 4 }
  0x9b   : > { %v988_v28 = vsel %vm8689_vm10, %v983_v63, %v987_v23  ;;  %v1007_v61 = vrot.slane %v1005_v4, 5  ;;  %vm903_vm3 = vmpackc.low %vm871_vm1, %vm871_vm1  ;;  %v1011_v62 = vrot.slane %v1009_v37, 4  ;;  %vm2312_vm4 = vcmp.eq.s32.totalorder %v2224_v36, 1 }
  0x9c   : > { %11533 = vst [vmem:[#allocation4_spill] sm:$0xff] %v8722_v47  ;;  %vm8724_vm0 = vcmp.ne.s16.totalorder %v988_v28, 0  ;;  %v8745_v23 = vsel %vm903_vm3, 65537, %v11364_v3  ;;  %vm2344_vm6 = vmpackc.low %vm2312_vm4, %vm2312_vm4  ;;  %v1318_v12 = vsel %vm8698_vm13, %v7998_v20, 0  ;;  %v8757_v48 = vsel %vm2341_vm5, 65537, %v11364_v3 }
  0x9d   : > { %v3285_v32 = vsel %vm8724_vm0, %v3252_v58, 0  ;;  %v4766_v33 = vsel %vm8724_vm0, %v4733_v57, 0  ;;  %v1015_v39 = vshll.u32 %v8745_v23, 16  ;;  %v1008_v5 = vsel %vm8689_vm10, %v1003_v38, %v1007_v61 }
  0x9e   : > { %v8736_v60 = vcombine.low %v3285_v32, %v3286_v19  ;;  %v8740_v2 = vcombine.low %v4766_v33, %v4767_v34  ;;  %v1012_v8 = vor.u32 %v1011_v62, %v1007_v61  ;;  %v2230_v41 = vpop.permute.xlu1 %2229  ;;  %v2227_v43 = vpop.permute.xlu0 %2226  ;;  %v1317_v51 = vsel %vm1284_vm11, %v705_v40, 0  ;;  %v8826_v61 = vld [vmem:[%s11344_s3 + $0x138] sm:$0xff]  }
  0x9f   : > { %v8752_v6 = vrot.slane %v1015_v39, 5  ;;  %v1320_v55 = vsel %vm8710_vm15, %v8492_v24, 0  ;;  %vm8764_vm7 = vcmp.ne.s16.totalorder %v1008_v5, 0  ;;  %vm2314_vm8 = vcmp.eq.s32.totalorder %v2230_v41, 1  ;;  %7612 = vmatprep.subr.bf16.mxu0 %v8826_v61 }
  0xa0   : > { %11536 = vst [vmem:[#allocation5_spill] sm:$0xff] %v8740_v2  ;;  %v1013_v49 = vrot.slane %v1012_v8, 4  ;;  %v1319_v26 = vsel %vm8724_vm0, %v7999_v10, 0  ;;  %v8774_v11 = vsel %vm2344_vm6, 65537, %v11364_v3  ;;  %vm2313_vm9 = vcmp.eq.s32.totalorder %v2227_v43, 1  ;;  %vm2346_vm13 = vmpackc.low %vm2314_vm8, %vm2314_vm8 }
  0xa1   : > { %v6644_v13 = vcombine.low %v1317_v51, %v1318_v12  ;;  %v2409_v24 = vshrl.u32 %v8757_v48, 16  ;;  %vm2310_vm12 = vcmp.eq.s32.totalorder %v8718_v54, 1  ;;  %v3287_v17 = vsel %vm8764_vm7, %v8750_v42, 0  ;;  %vm2345_vm14 = vmpackc.low %vm2313_vm9, %vm2313_vm9 }
  0xa2   : > { %v1018_v53 = vsel %vm8689_vm10, %v1013_v49, %v8752_v6  ;;  %v4768_v18 = vsel %vm8764_vm7, %v4735_v56, 0  ;;  %v6645_v16 = vcombine.low %v1319_v26, %v1320_v55  ;;  %v2435_v22 = vshrl.u32 %v8774_v11, 16  ;;  %vm2342_vm2 = vmpackc.low %vm2310_vm12, %vm2310_vm12  ;;  %v793_v46 = vpop.permute.xlu1 %792  ;;  %v790_v19 = vpop.permute.xlu0 %789 }
  0xa3   : > { %vm8777_vm11 = vcmp.ne.s16.totalorder %v1018_v53, 0  ;;  %vm2405_vm15 = vsmask.f32 256  ;;  %vm2406_vm0 = vsmask.f32 4368  ;;  %vm2311_vm1 = vcmp.eq.s32.totalorder %v8742_v7, 1 }
  0xa4   : > { %v3288_v58 = vsel %vm8777_vm11, %v3255_v35, 0  ;;  %v4769_v59 = vsel %vm8777_vm11, %v4736_v9, 0  ;;  %v1772_v21 = vshrl.u32 %v6644_v13, 16  ;;  %v1775_v57 = vshll.u32 %v6644_v13, 16  ;;  %vm2343_vm3 = vmpackc.low %vm2311_vm1, %vm2311_vm1  ;;  %v5662_v13 = vld [vmem:[#allocation2 + $0x24] sm:$0xf] }
  0xa5   : > { %v8791_v63 = vcombine.low %v3287_v17, %v3288_v58  ;;  %v8793_v14 = vcombine.low %v4768_v18, %v4769_v59  ;;  %v2412_v1 = vshll.u32 %v8757_v48, 16  ;;  %v2378_v28 = vsel %vm2346_vm13, 65537, %v11364_v3  ;;  %vm8836_vm6 = vmor %vm2405_vm15, %vm2406_vm0 }
  0xa6   : > { %v8804_v30 = vrot.slane %v2409_v24, 7  ;;  %v1322_v45 = vsel %vm8777_vm11, %v8507_v52, 0  ;;  %v2453_v29 = vshrl.u32 %v2378_v28, 16  ;;  %v2377_v32 = vsel %vm2345_vm14, 65537, %v11364_v3  ;;  %v8821_v52 = vld [vmem:[%s11344_s3 + $0xf8] sm:$0xff]   ;;  %v799_v48 = vpop.permute.xlu1 %798  ;;  %v796_v15 = vpop.permute.xlu0 %795 }
  0xa7   : > { %11542 = vst [vmem:[#allocation7_spill] sm:$0xff] %v8793_v14  ;;  %v1780_v33 = vshrl.u32 %v6645_v16, 16  ;;  %v1783_v34 = vshll.u32 %v6645_v16, 16  ;;  %v8810_v4 = vrot.slane %v2435_v22, 7  ;;  %v2444_v54 = vshrl.u32 %v2377_v32, 16  ;;  %7564 = vmatprep.subr.bf16.mxu1 %v8821_v52 }
  0xa8   : > { %v1321_v36 = vsel %vm8764_vm7, %v8478_v50, 0  ;;  %v2374_v37 = vsel %vm2342_vm2, 65537, %v11364_v3  ;;  %v8816_v7 = vrot.slane %v2453_v29, 7  ;;  %v2456_v38 = vshll.u32 %v2378_v28, 16  ;;  %v5663_v24 = vld [vmem:[#allocation2 + $0x28] sm:$0xf] }
  0xa9   : > { %v6646_v62 = vcombine.low %v1321_v36, %v1322_v45  ;;  %v2446_v39 = vrot.slane %v2444_v54, 7  ;;  %v2447_v40 = vshll.u32 %v2377_v32, 16  ;;  %vm872_vm4 = vcmp.eq.s32.totalorder %v790_v19, 1 }
  0xaa   : > { %v8828_v50 = vrot.slane %v1772_v21, 3  ;;  %v2375_v5 = vsel %vm2343_vm3, 65537, %v11364_v3  ;;  %v2458_v8 = vor.u32 %v2456_v38, %v8816_v7  ;;  %vm873_vm5 = vcmp.eq.s32.totalorder %v793_v46, 1  ;;  %vm8844_vm8 = vmpackc.low %vm872_vm4, %vm872_vm4 }
  0xab   : > { %v2417_v56 = vshrl.u32 %v2374_v37, 16  ;;  %v2442_v43 = vrot.slane %v8810_v4, 4  ;;  %v2449_v20 = vor.u32 %v2447_v40, %v2446_v39  ;;  %v2451_v12 = vrot.slane %v2446_v39, 4  ;;  %vm905_vm9 = vmpackc.low %vm873_vm5, %vm873_vm5  ;;  %v2233_v40 = vpop.permute.xlu0 %2232 }
  0xac   : > { %vm11376_vm7 = vsmask.f32 4352  ;;  %v1777_v49 = vrot.slane %v1775_v57, 4  ;;  %v1782_v35 = vrot.slane %v1780_v33, 3  ;;  %v1785_v51 = vrot.slane %v1783_v34, 4  ;;  %v2236_v33 = vpop.permute.xlu1 %2235 }
  0xad   : > { %v1019_v55 = vshrl.u32 %v8745_v23, 16  ;;  %v1789_v9 = vshrl.u32 %v6646_v62, 16  ;;  %v2426_v10 = vshrl.u32 %v2375_v5, 16  ;;  %v8850_v26 = vsel %vm8836_vm6, %v2442_v43, %v2449_v20 }
  0xae   : > { %11547 = vst [vmem:[#allocation8_spill] sm:$0xff] %v8850_v26  ;;  %v8854_v53 = vsel %vm8836_vm6, %v2451_v12, %v2458_v8  ;;  %v1792_v23 = vshll.u32 %v6646_v62, 16  ;;  %vm11352_vm11 = vcmp.ne.s16.totalorder %v8850_v26, 0  ;;  %vm875_vm13 = vcmp.eq.s32.totalorder %v799_v48, 1 }
  0xaf   : > { %11548 = vst [vmem:[#allocation9_spill] sm:$0xff] %v8854_v53  ;;  %vm11351_vm12 = vcmp.ne.s16.totalorder %v8854_v53, 0  ;;  %v8861_v17 = vor.u32 %v2412_v1, %v8804_v30  ;;  %v2415_v18 = vrot.slane %v8804_v30, 4  ;;  %v2419_v58 = vrot.slane %v2417_v56, 7  ;;  %vm907_vm14 = vmpackc.low %vm875_vm13, %vm875_vm13 }
  0xb0   : > { %v936_v59 = vsel %vm8844_vm8, 65537, %v11364_v3  ;;  %v1021_v16 = vrot.slane %v1019_v55, 4  ;;  %v5695_v22 = vsel %vm11352_vm11, %v5662_v13, 0  ;;  %v5696_v21 = vsel %vm11351_vm12, %v5663_v24, 0  ;;  %v2242_v24 = vpop.permute.xlu1 %2241 }
  0xb1   : > { %11549 = vst [vmem:[#allocation10_spill] sm:$0xff] %v8861_v17  ;;  %v937_v57 = vsel %vm905_vm9, 65537, %v11364_v3  ;;  %v2420_v28 = vshll.u32 %v2374_v37, 16  ;;  %v1791_v46 = vrot.slane %v1789_v9, 3  ;;  %v2428_v1 = vrot.slane %v2426_v10, 7  ;;  %v8896_v9 = vld [vmem:[%s8329_s20 + $0x78] sm:$0xff]   ;;  %s11252_s20 = scalar_lea.vmem %s11346_s5, %s6582_s14 }
  0xb2   : > { %v8872_v45 = vcombine.low %v5695_v22, %v5696_v21  ;;  %v1794_v30 = vrot.slane %v1792_v23, 4  ;;  %v1025_v29 = vshll.u32 %v936_v59, 16  ;;  %v1029_v32 = vshrl.u32 %v936_v59, 16  ;;  %v2148_v23 = vld [vmem:[#allocation2 + $0x4] sm:$0xf]  ;;  %v2239_v21 = vpop.permute.xlu0 %2238 }
  0xb3   : > { %v1786_v19 = vor.u32 %v1785_v51, %v1782_v35  ;;  %v2422_v34 = vor.u32 %v2420_v28, %v2419_v58  ;;  %v2438_v54 = vshll.u32 %v8774_v11, 16  ;;  %v2429_v36 = vshll.u32 %v2375_v5, 16  ;;  %v2152_v59 = vld [vmem:[#allocation2 + $0x14] sm:$0xf]  ;;  %v2153_v28 = vld [vmem:[#allocation2 + $0x18] sm:$0xf] }
  0xb4   : > { %11550 = vst [vmem:[#allocation11_spill] sm:$0xff] %v8872_v45  ;;  %v1035_v38 = vshll.u32 %v937_v57, 16  ;;  %v1039_v62 = vshrl.u32 %v937_v57, 16  ;;  %v939_v39 = vsel %vm907_vm14, 65537, %v11364_v3  ;;  %vm874_vm15 = vcmp.eq.s32.totalorder %v796_v15, 1 }
  0xb5   : > { %v1778_v37 = vor.u32 %v1777_v49, %v8828_v50  ;;  %v1022_v8 = vor.u32 %v1021_v16, %v8752_v6  ;;  %v2440_v56 = vor.u32 %v2438_v54, %v8810_v4  ;;  %v2431_v43 = vor.u32 %v2429_v36, %v2428_v1  ;;  %vm8886_vm0 = vmpackc.low %vm874_vm15, %vm874_vm15  ;;  %v7923_v4 = vld [vmem:[%s11344_s3 + $0xf0] sm:$0xff]   ;;  %v2149_v57 = vld [vmem:[#allocation2 + $0x8] sm:$0xf] }
  0xb6   : > { %v2433_v20 = vrot.slane %v2428_v1, 4  ;;  %v1027_v12 = vrot.slane %v1025_v29, 5  ;;  %v1031_v48 = vrot.slane %v1029_v32, 4  ;;  %v8880_v5 = vor.u32 %v1794_v30, %v1791_v46  ;;  %v2150_v32 = vld [vmem:[#allocation2 + $0xc] sm:$0xf] }
  0xb7   : > { %v1787_v11 = vsel %vm11376_vm7, %v1778_v37, %v1786_v19  ;;  %v8884_v35 = vsel %vm8836_vm6, %v2415_v18, %v2422_v34  ;;  %v2424_v51 = vrot.slane %v2419_v58, 4  ;;  %v1055_v50 = vshll.u32 %v939_v39, 16  ;;  %v2151_v54 = vld [vmem:[#allocation2 + $0x10] sm:$0xf]  ;;  %v805_v37 = vpop.permute.xlu1 %804  ;;  %v8966_v6 = vld [vmem:[#allocation2 + $0x18] sm:$0xf] }
  0xb8   : > { %11551 = vst [vmem:[#allocation12_spill] sm:$0xff] %v8884_v35  ;;  %v1059_v49 = vshrl.u32 %v939_v39, 16  ;;  %7484 = vmatprep.mubr.bf16.mxu1 %v1787_v11  ;;  %v8893_v55 = vrot.slane %v1035_v38, 5  ;;  %v1041_v0 = vrot.slane %v1039_v62, 4  ;;  %v1796_v13 = vsel %vm11376_vm7, %v1786_v19, %v8880_v5 }
  0xb9   : > { %vm11353_vm1 = vcmp.ne.s16.totalorder %v8861_v17, 0  ;;  %v1023_v15 = vrot.slane %v1022_v8, 4  ;;  %v8904_v18 = vsel %vm8836_vm6, %v2424_v51, %v2431_v43  ;;  %v8908_v58 = vsel %vm8836_vm6, %v2433_v20, %v2440_v56  ;;  %7485 = vmatmul.mubr.bf16.vlgmr.msra.gmra.mxu1 %v1796_v13  ;;  %v8945_v43 = vld [vmem:[#allocation2 + $0x20] sm:$0xf] }
  0xba   : > { %11554 = vst [vmem:[#allocation13_spill] sm:$0xff] %v8904_v18  ;;  %11555 = vst [vmem:[#allocation14_spill] sm:$0xff] %v8908_v58  ;;  %vm11348_vm2 = vcmp.ne.s16.totalorder %v8884_v35, 0  ;;  %v1032_v16 = vor.u32 %v1031_v48, %v1027_v12  ;;  %v938_v22 = vsel %vm8886_vm0, 65537, %v11364_v3  ;;  %vm2316_vm3 = vcmp.eq.s32.totalorder %v2236_v33, 1  ;;  %7565 = vmatpush3.bf16.msra.mxu1 %v8821_v52 }
  0xbb   : > { %v1028_v46 = vsel %vm8689_vm10, %v1023_v15, %v1027_v12  ;;  %v8917_v1 = vrot.slane %v1055_v50, 5  ;;  %v1061_v30 = vrot.slane %v1059_v49, 4  ;;  %vm2315_vm4 = vcmp.eq.s32.totalorder %v2233_v40, 1  ;;  %7566 = vmatprep.subr.bf16.mxu1 %v7923_v4  ;;  %vm8924_vm13 = vmpackc.low %vm2316_vm3, %vm2316_vm3 }
  0xbc   : > { %vm11350_vm5 = vcmp.ne.s16.totalorder %v8904_v18, 0  ;;  %vm11349_vm8 = vcmp.ne.s16.totalorder %v8908_v58, 0  ;;  %v1042_v29 = vor.u32 %v1041_v0, %v8893_v55  ;;  %vm2318_vm9 = vcmp.eq.s32.totalorder %v2242_v24, 1  ;;  %vm8938_vm0 = vmpackc.low %vm2315_vm4, %vm2315_vm4 }
  0xbd   : > { %v1045_v19 = vshll.u32 %v938_v22, 16  ;;  %v1049_v34 = vshrl.u32 %v938_v22, 16  ;;  %vm2317_vm14 = vcmp.eq.s32.totalorder %v2239_v21, 1  ;;  %v2729_v36 = vsel %vm11348_vm2, %v2149_v57, 0  ;;  %vm8950_vm2 = vmpackc.low %vm2318_vm9, %vm2318_vm9  ;;  %v802_v22 = vpop.permute.xlu0 %801 }
  0xbe   : > { %v2728_v38 = vsel %vm11353_vm1, %v2148_v23, 0  ;;  %v1033_v62 = vrot.slane %v1032_v16, 4  ;;  %vm8932_vm15 = vcmp.ne.s16.totalorder %v1028_v46, 0  ;;  %vm11354_vm3 = vsmask.f32 7424  ;;  %7567 = vmatpush3.bf16.msra.mxu1 %v7923_v4  ;;  %vm8960_vm4 = vmpackc.low %vm2317_vm14, %vm2317_vm14  ;;  %v7925_v46 = vld [vmem:[%s11344_s3 + $0xe8] sm:$0xff]  }
  0xbf   : > { %v2460_v8 = vrot.slane %v8816_v7, 4  ;;  %v2732_v56 = vsel %vm11352_vm11, %v2152_v59, 0  ;;  %v1062_v20 = vor.u32 %v1061_v30, %v8917_v1  ;;  %v2730_v12 = vsel %vm11350_vm5, %v2150_v32, 0  ;;  %7568 = vmatprep.subr.bf16.mxu1 %v7925_v46 }
  0xc0   : > { %v2733_v48 = vsel %vm11351_vm12, %v2153_v28, 0  ;;  %v1043_v11 = vrot.slane %v1042_v29, 4  ;;  %v2731_v50 = vsel %vm11349_vm8, %v2151_v54, 0  ;;  %v6669_v49 = vcombine.low %v2728_v38, %v2729_v36 }
  0xc1   : > { %v1323_v4 = vsel %vm8932_vm15, %v8966_v6, 0  ;;  %v1047_v0 = vrot.slane %v1045_v19, 5  ;;  %v1051_v13 = vrot.slane %v1049_v34, 4  ;;  %v6670_v24 = vcombine.low %v2730_v12, %v2731_v50  ;;  %v811_v19 = vpop.permute.xlu1 %810 }
  0xc2   : > { %v1038_v23 = vsel %vm8689_vm10, %v1033_v62, %v8893_v55  ;;  %v2380_v59 = vsel %vm8924_vm13, 65537, %v11364_v3  ;;  %v2864_v16 = vshll.u32 %v6669_v49, 16  ;;  %v8980_v21 = vrot.slane %v1062_v20, 4  ;;  %7569 = vmatpush3.bf16.msra.mxu1 %v7925_v46 }
  0xc3   : > { %v2379_v57 = vsel %vm8938_vm0, 65537, %v11364_v3  ;;  %v2382_v55 = vsel %vm8950_vm2, 65537, %v11364_v3  ;;  %v2381_v28 = vsel %vm8960_vm4, 65537, %v11364_v3  ;;  %v2862_v30 = vshrl.u32 %v6669_v49, 16 }
  0xc4   : > { %v2866_v29 = vrot.slane %v2864_v16, 1  ;;  %v2869_v32 = vshll.u32 %v6670_v24, 16  ;;  %vm877_vm9 = vcmp.eq.s32.totalorder %v805_v37, 1  ;;  %v1052_v34 = vor.u32 %v1051_v13, %v1047_v0 }
  0xc5   : > { %v2471_v52 = vshrl.u32 %v2380_v59, 16  ;;  %vm8994_vm13 = vmpackc.low %vm877_vm9, %vm877_vm9  ;;  %vm876_vm2 = vcmp.eq.s32.totalorder %v802_v22, 1  ;;  %v8998_v36 = vcombine.low %v2732_v56, %v2733_v48  ;;  %v2462_v38 = vshrl.u32 %v2379_v57, 16 }
  0xc6   : > { %v2489_v62 = vshrl.u32 %v2382_v55, 16  ;;  %v2867_v33 = vor.u32 %v2866_v29, %v2862_v30  ;;  %v2871_v20 = vrot.slane %v2869_v32, 1  ;;  %vm908_vm14 = vmpackc.low %vm876_vm2, %vm876_vm2  ;;  %v2480_v40 = vshrl.u32 %v2381_v28, 16 }
  0xc7   : > { %v2873_v12 = vshrl.u32 %v6670_v24, 16  ;;  %v2877_v37 = vshll.u32 %v8998_v36, 16  ;;  %vm879_vm0 = vcmp.eq.s32.totalorder %v811_v19, 1  ;;  %vm9001_vm4 = vcmp.ne.s16.totalorder %v1038_v23, 0 }
  0xc8   : > { %v11568_v51 = vmov 0  ;;  %v1048_v56 = vsel %vm8689_vm10, %v1043_v11, %v1047_v0  ;;  %v2872_v48 = vsel %vm11354_vm3, %v2867_v33, %v2871_v20  ;;  %v940_v50 = vsel %vm908_vm14, 65537, %v11364_v3  ;;  %vm911_vm9 = vmpackc.low %vm879_vm0, %vm879_vm0  ;;  %v7924_v11 = vld [vmem:[%s11344_s3 + $0x130] sm:$0xff]  }
  0xc9   : > { %v11569_v51 = vsel %vm9001_vm4, 4294967295, %v11568_v51  ;;  %v1053_v49 = vrot.slane %v1052_v34, 4  ;;  %v2875_v13 = vor.u32 %v2873_v12, %v2871_v20  ;;  %7532 = vmatprep.mubr.bf16.mxu0 %v2872_v48  ;;  %v941_v24 = vsel %vm8994_vm13, 65537, %v11364_v3  ;;  %v808_v34 = vpop.permute.xlu0 %807 }
  0xca   : > { %v9012_v16 = vrot.slane %v2877_v37, 1  ;;  %v2473_v23 = vrot.slane %v2471_v52, 7  ;;  %v2474_v22 = vshll.u32 %v2380_v59, 16  ;;  %v2464_v46 = vrot.slane %v2462_v38, 7 }
  0xcb   : > { %v9014_v30 = vrot.slane %v2489_v62, 7  ;;  %vm9019_vm2 = vcmp.ne.s16.totalorder %v1048_v56, 0  ;;  %v11570_v0 = vmov 0  ;;  %v2482_v29 = vrot.slane %v2480_v40, 7  ;;  %v9030_v40 = vld [vmem:[#allocation2 + $0x28] sm:$0xf] }
  0xcc   : > { %v11571_v0 = vsel %vm9019_vm2, 4294967295, %v11570_v0  ;;  %v1065_v32 = vshll.u32 %v940_v50, 16  ;;  %v2880_v19 = vsel %vm11354_vm3, %v2875_v13, %v9012_v16  ;;  %v2465_v52 = vshll.u32 %v2379_v57, 16 }
  0xcd   : > { %v2492_v59 = vshll.u32 %v2382_v55, 16  ;;  %v1075_v54 = vshll.u32 %v941_v24, 16  ;;  %v1079_v38 = vshrl.u32 %v941_v24, 16  ;;  %7533 = vmatmul.mubr.bf16.vlgmr.msra.gmra.mxu0 %v2880_v19  ;;  %v1058_v62 = vsel %vm8689_vm10, %v1053_v49, %v8917_v1  ;;  %v7926_v55 = vld [vmem:[%s11344_s3 + $0x128] sm:$0xff]   ;;  %v2248_v19 = vpop.permute.xlu1 %2247 }
  0xce   : > { %v2483_v33 = vshll.u32 %v2381_v28, 16  ;;  %v1069_v20 = vshrl.u32 %v940_v50, 16  ;;  %v943_v12 = vsel %vm911_vm9, 65537, %v11364_v3  ;;  %7613 = vmatpush3.bf16.msra.mxu0 %v8826_v61  ;;  %v2476_v37 = vor.u32 %v2474_v22, %v2473_v23  ;;  %v7927_v22 = vld [vmem:[%s11344_s3 + $0xe0] sm:$0xff]  }
  0xcf   : > { %v2467_v56 = vor.u32 %v2465_v52, %v2464_v46  ;;  %v2469_v48 = vrot.slane %v2464_v46, 4  ;;  %v2494_v57 = vor.u32 %v2492_v59, %v9014_v30  ;;  %7614 = vmatprep.subr.bf16.mxu0 %v7924_v11  ;;  %v2487_v1 = vrot.slane %v2482_v29, 4  ;;  %v8002_v46 = vld [vmem:[#allocation2 + $0x20] sm:$0xf]  ;;  %7570 = vmatprep.subr.bf16.mxu1 %v7927_v22 }
  0xd0   : > { %v2485_v13 = vor.u32 %v2483_v33, %v2482_v29  ;;  %v1067_v28 = vrot.slane %v1065_v32, 5  ;;  %vm878_vm13 = vcmp.eq.s32.totalorder %v808_v34, 1  ;;  %v9036_v50 = vrot.slane %v1075_v54, 5  ;;  %v2245_v54 = vpop.permute.xlu0 %2244  ;;  %7571 = vmatpush3.bf16.msra.mxu1 %v7927_v22 }
  0xd1   : > { %v1081_v49 = vrot.slane %v1079_v38, 4  ;;  %v1095_v61 = vshll.u32 %v943_v12, 16  ;;  %v1099_v24 = vshrl.u32 %v943_v12, 16  ;;  %v1325_v52 = vsel %vm9019_vm2, %v8002_v46, 0  ;;  %vm910_vm0 = vmpackc.low %vm878_vm13, %vm878_vm13  ;;  %v2157_v46 = vld [vmem:[#allocation2 + $0x28] sm:$0xf] }
  0xd2   : > { %v2478_v32 = vrot.slane %v2473_v23, 4  ;;  %v1071_v59 = vrot.slane %v1069_v20, 4  ;;  %7615 = vmatpush3.bf16.msra.mxu0 %v7924_v11  ;;  %vm9046_vm14 = vcmp.ne.s16.totalorder %v1058_v62, 0  ;;  %v11572_v38 = vmov 0  ;;  %v7928_v23 = vld [vmem:[%s11344_s3 + $0x120] sm:$0xff]  }
  0xd3   : > { %v11573_v38 = vsel %vm9046_vm14, 4294967295, %v11572_v38  ;;  %v9054_v33 = vsel %vm8836_vm6, %v2460_v8, %v2467_v56  ;;  %v9058_v12 = vsel %vm8836_vm6, %v2469_v48, %v2476_v37  ;;  %7616 = vmatprep.subr.bf16.mxu0 %v7926_v55  ;;  %v1068_v8 = vsel %vm8689_vm10, %v8980_v21, %v1067_v28  ;;  %v8003_v11 = vld [vmem:[#allocation2 + $0x1c] sm:$0xf] }
  0xd4   : > { %11574 = vst [vmem:[#allocation15_spill] sm:$0xff] %v11573_v38  ;;  %11575 = vst [vmem:[#allocation16_spill] sm:$0xff] %v9054_v33  ;;  %v9068_v7 = vsel %vm8836_vm6, %v2478_v32, %v2485_v13  ;;  %vm2320_vm9 = vcmp.eq.s32.totalorder %v2248_v19, 1  ;;  %v1324_v34 = vsel %vm9001_vm4, %v8003_v11, 0  ;;  %v9077_v62 = vsel %vm8836_vm6, %v2487_v1, %v2494_v57  ;;  %v9110_v11 = vld [vmem:[#allocation2 + $0x28] sm:$0xf] }
  0xd5   : > { %11576 = vst [vmem:[#allocation17_spill] sm:$0xff] %v9058_v12  ;;  %11577 = vst [vmem:[#allocation18_spill] sm:$0xff] %v9068_v7  ;;  %v1082_v20 = vor.u32 %v1081_v49, %v9036_v50  ;;  %v9080_v37 = vrot.slane %v1095_v61, 5  ;;  %v1101_v56 = vrot.slane %v1099_v24, 4  ;;  %v1072_v48 = vor.u32 %v1071_v59, %v1067_v28  ;;  %v2254_v28 = vpop.permute.xlu1 %2253  ;;  %v8004_v49 = vld [vmem:[#allocation2 + $0x24] sm:$0xf]  ;;  %v2251_v24 = vpop.permute.xlu0 %2250 }
  0xd6   : > { %11578 = vst [vmem:[#allocation19_spill] sm:$0xff] %v9077_v62  ;;  %v942_v13 = vsel %vm910_vm0, 65537, %v11364_v3  ;;  %vm2319_vm13 = vcmp.eq.s32.totalorder %v2245_v54, 1  ;;  %v6647_v21 = vcombine.low %v1323_v4, %v1324_v34  ;;  %7617 = vmatpush3.bf16.msra.mxu0 %v7926_v55  ;;  %vm11367_vm8 = vcmp.ne.s16.totalorder %v9054_v33, 0  ;;  %vm9095_vm11 = vmpackc.low %vm2320_vm9, %vm2320_vm9  ;;  %v9103_v4 = vld [vmem:[#allocation2 + $0x30] sm:$0xf] }
  0xd7   : > { %vm11355_vm5 = vcmp.ne.s16.totalorder %v9058_v12, 0  ;;  %vm9089_vm12 = vcmp.ne.s16.totalorder %v1068_v8, 0  ;;  %v11579_v57 = vmov 0  ;;  %v1326_v6 = vsel %vm9046_vm14, %v8004_v49, 0  ;;  %7618 = vmatprep.subr.bf16.mxu0 %v7928_v23  ;;  %vm2351_vm9 = vmpackc.low %vm2319_vm13, %vm2319_vm13  ;;  %v2154_v49 = vld [vmem:[#allocation2 + $0x1c] sm:$0xf] }
  0xd8   : > { %v11580_v57 = vsel %vm9089_vm12, 4294967295, %v11579_v57  ;;  %vm11366_vm0 = vcmp.ne.s16.totalorder %v9068_v7, 0  ;;  %vm11361_vm1 = vcmp.ne.s16.totalorder %v9077_v62, 0  ;;  %v1798_v55 = vshrl.u32 %v6647_v21, 16 }
  0xd9   : > { %v1801_v61 = vshll.u32 %v6647_v21, 16  ;;  %v9105_v19 = vrot.slane %v1082_v20, 4  ;;  %v1102_v22 = vor.u32 %v1101_v56, %v9080_v37  ;;  %v1085_v32 = vshll.u32 %v942_v13, 16  ;;  %v817_v10 = vpop.permute.xlu1 %816 }
  0xda   : > { %v6648_v59 = vcombine.low %v1325_v52, %v1326_v6  ;;  %v1073_v8 = vrot.slane %v1072_v48, 4  ;;  %v9118_v21 = vsel %vm9095_vm11, 65537, %v11364_v3  ;;  %v1800_v20 = vrot.slane %v1798_v55, 3  ;;  %7619 = vmatpush3.bf16.msra.mxu0 %v7928_v23  ;;  %v2155_v48 = vld [vmem:[#allocation2 + $0x20] sm:$0xf] }
  0xdb   : > { %v1089_v52 = vshrl.u32 %v942_v13, 16  ;;  %v1803_v56 = vrot.slane %v1801_v61, 4  ;;  %vm2322_vm13 = vcmp.eq.s32.totalorder %v2254_v28, 1  ;;  %v9124_v6 = vsel %vm2351_vm9, 65537, %v11364_v3 }
  0xdc   : > { %vm2321_vm3 = vcmp.eq.s32.totalorder %v2251_v24, 1  ;;  %v1807_v31 = vshrl.u32 %v6648_v59, 16  ;;  %v1810_v29 = vshll.u32 %v6648_v59, 16  ;;  %v1087_v1 = vrot.slane %v1085_v32, 5  ;;  %vm9131_vm11 = vmpackc.low %vm2322_vm13, %vm2322_vm13  ;;  %v814_v59 = vpop.permute.xlu0 %813 }
  0xdd   : > { %v2507_v15 = vshrl.u32 %v9118_v21, 16  ;;  %v1804_v55 = vor.u32 %v1803_v56, %v1800_v20  ;;  %v2734_v23 = vsel %vm11367_vm8, %v2154_v49, 0  ;;  %v9129_v34 = vrot.slane %v1102_v22, 4  ;;  %vm2353_vm9 = vmpackc.low %vm2321_vm3, %vm2321_vm3 }
  0xde   : > { %v1809_v28 = vrot.slane %v1807_v31, 3  ;;  %v1812_v61 = vrot.slane %v1810_v29, 4  ;;  %v2735_v54 = vsel %vm11355_vm5, %v2155_v48, 0  ;;  %v1078_v32 = vsel %vm8689_vm10, %v1073_v8, %v9036_v50  ;;  %v2156_v48 = vld [vmem:[#allocation2 + $0x24] sm:$0xf] }
  0xdf   : > { %v1091_v20 = vrot.slane %v1089_v52, 4  ;;  %v2498_v49 = vshrl.u32 %v9124_v6, 16  ;;  %v1805_v22 = vsel %vm11376_vm7, %v8880_v5, %v1804_v55  ;;  %v2510_v31 = vshll.u32 %v9118_v21, 16 }
  0xe0   : > { %7488 = vmatprep.mubr.bf16.mxu1 %v1805_v22  ;;  %v9146_v29 = vor.u32 %v1812_v61, %v1809_v28  ;;  %v6672_v56 = vcombine.low %v2734_v23, %v2735_v54  ;;  %vm881_vm13 = vcmp.eq.s32.totalorder %v817_v10, 1  ;;  %v1088_v50 = vsel %vm8689_vm10, %v9105_v19, %v1087_v1  ;;  %v823_v28 = vpop.permute.xlu1 %822  ;;  %v7930_v61 = vld [vmem:[%s11344_s3 + $0x118] sm:$0xff]  }
  0xe1   : > { %v9151_v8 = vrot.slane %v2507_v15, 7  ;;  %v9156_v5 = vsel %vm9131_vm11, 65537, %v11364_v3  ;;  %vm880_vm3 = vcmp.eq.s32.totalorder %v814_v59, 1  ;;  %v9159_v24 = vsel %vm2353_vm9, 65537, %v11364_v3  ;;  %v7929_v15 = vld [vmem:[%s11344_s3 + $0xd8] sm:$0xff]   ;;  %vm9169_vm11 = vmpackc.low %vm881_vm13, %vm881_vm13  ;;  %7620 = vmatprep.subr.bf16.mxu0 %v7930_v61 }
  0xe2   : > { %v1814_v21 = vsel %vm11376_vm7, %v1804_v55, %v9146_v29  ;;  %v2881_v54 = vshrl.u32 %v8998_v36, 16  ;;  %v2885_v52 = vshll.u32 %v6672_v56, 16  ;;  %vm912_vm5 = vmpackc.low %vm880_vm3, %vm880_vm3  ;;  %v1092_v19 = vor.u32 %v1091_v20, %v1087_v1  ;;  %7572 = vmatprep.subr.bf16.mxu1 %v7929_v15  ;;  %7621 = vmatpush3.bf16.msra.mxu0 %v7930_v61 }
  0xe3   : > { %v2500_v23 = vrot.slane %v2498_v49, 7  ;;  %7489 = vmatmul.mubr.bf16.gmra.mxu1 %v1814_v21  ;;  %v2736_v55 = vsel %vm11366_vm0, %v2156_v48, 0  ;;  %v2737_v36 = vsel %vm11361_vm1, %v2157_v46, 0  ;;  %vm9180_vm9 = vcmp.ne.s16.totalorder %v1078_v32, 0  ;;  %v820_v32 = vpop.permute.xlu0 %819 }
  0xe4   : > { %v11587_v1 = vmov 0  ;;  %v2883_v10 = vor.u32 %v2881_v54, %v9012_v16  ;;  %v2887_v59 = vrot.slane %v2885_v52, 1  ;;  %v944_v20 = vsel %vm912_vm5, 65537, %v11364_v3  ;;  %7573 = vmatpush3.bf16.msra.mxu1 %v7929_v15 }
  0xe5   : > { %v11588_v1 = vsel %vm9180_vm9, 4294967295, %v11587_v1  ;;  %vm9186_vm13 = vcmp.ne.s16.totalorder %v1088_v50, 0  ;;  %v11590_v49 = vmov 0  ;;  %v2501_v46 = vshll.u32 %v9124_v6, 16 }
  0xe6   : > { %11589 = vst [vmem:[#allocation20_spill] sm:$0xff] %v11588_v1  ;;  %v11591_v49 = vsel %vm9186_vm13, 4294967295, %v11590_v49  ;;  %v2525_v22 = vshrl.u32 %v9156_v5, 16  ;;  %v2516_v48 = vshrl.u32 %v9159_v24, 16  ;;  %vm11592_vm3 = vsmask.f32 7424 }
  0xe7   : > { %v2888_v21 = vsel %vm11592_vm3, %v2883_v10, %v2887_v59  ;;  %v945_v16 = vsel %vm9169_vm11, 65537, %v11364_v3  ;;  %v9197_v54 = vcombine.low %v2736_v55, %v2737_v36  ;;  %vm883_vm5 = vcmp.eq.s32.totalorder %v823_v28, 1  ;;  %v9203_v55 = vld [vmem:[#allocation2 + $0x30] sm:$0xf] }
  0xe8   : > { %v1093_v50 = vrot.slane %v1092_v19, 4  ;;  %v2512_v6 = vor.u32 %v2510_v31, %v9151_v8  ;;  %v2503_v52 = vor.u32 %v2501_v46, %v2500_v23  ;;  %7536 = vmatprep.mubr.bf16.mxu0 %v2888_v21  ;;  %v1105_v45 = vshll.u32 %v944_v20, 16  ;;  %vm915_vm11 = vmpackc.low %vm883_vm5, %vm883_vm5 }
  0xe9   : > { %v2505_v62 = vrot.slane %v2500_v23, 4  ;;  %v2889_v7 = vshrl.u32 %v6672_v56, 16  ;;  %v2893_v15 = vshll.u32 %v9197_v54, 16  ;;  %vm882_vm1 = vcmp.eq.s32.totalorder %v820_v32, 1 }
  0xea   : > { %v9201_v10 = vrot.slane %v2525_v22, 7  ;;  %v2518_v12 = vrot.slane %v2516_v48, 7  ;;  %v1115_v13 = vshll.u32 %v945_v16, 16  ;;  %v1119_v3 = vshrl.u32 %v945_v16, 16  ;;  %vm9217_vm3 = vmpackc.low %vm882_vm1, %vm882_vm1  ;;  %v2260_v48 = vpop.permute.xlu1 %2259 }
  0xeb   : > { %v1109_v19 = vshrl.u32 %v944_v20, 16  ;;  %v2891_v36 = vor.u32 %v2889_v7, %v2887_v59  ;;  %v9208_v28 = vrot.slane %v2893_v15, 1  ;;  %v1098_v56 = vsel %vm8689_vm10, %v1093_v50, %v9080_v37  ;;  %v9234_v59 = vld [vmem:[#allocation2 + $0x38] sm:$0xf]  ;;  %v7931_v50 = vld [vmem:[%s11344_s3 + $0xd0] sm:$0xff]  }
  0xec   : > { %v2528_v23 = vshll.u32 %v9156_v5, 16  ;;  %v2519_v61 = vshll.u32 %v9159_v24, 16  ;;  %v9215_v46 = vrot.slane %v1105_v45, 5  ;;  %v11595_v20 = vrot.slane %v9014_v30, 4  ;;  %7574 = vmatprep.subr.bf16.mxu1 %v7931_v50 }
  0xed   : > { %v9229_v37 = vsel %vm8836_vm6, %v2505_v62, %v2512_v6  ;;  %vm11598_vm5 = vsmask.f32 7424  ;;  %v11599_v45 = vmov 0   ;;  %v9237_v16 = vrot.slane %v1115_v13, 5  ;;  %v7932_v62 = vld [vmem:[%s11344_s3 + $0x110] sm:$0xff]   ;;  %7575 = vmatpush3.bf16.msra.mxu1 %v7931_v50 }
  0xee   : > { %v9225_v7 = vsel %vm8836_vm6, %v11595_v20, %v2503_v52  ;;  %11597 = vst [vmem:[#allocation22_spill] sm:$0xff] %v9229_v37  ;;  %v2896_v5 = vsel %vm11598_vm5, %v2891_v36, %v9208_v28  ;;  %v947_v24 = vsel %vm915_vm11, 65537, %v11599_v45  ;;  %v2530_v32 = vor.u32 %v2528_v23, %v9201_v10  ;;  %v2257_v36 = vpop.permute.xlu0 %2256  ;;  %7622 = vmatprep.subr.bf16.mxu0 %v7932_v62 }
  0xef   : > { %11596 = vst [vmem:[#allocation21_spill] sm:$0xff] %v9225_v7  ;;  %v2521_v21 = vor.u32 %v2519_v61, %v2518_v12  ;;  %v1121_v30 = vrot.slane %v1119_v3, 4  ;;  %7537 = vmatmul.mubr.bf16.gmra.mxu0 %v2896_v5  ;;  %v2523_v6 = vrot.slane %v2518_v12, 4  ;;  %v1111_v52 = vrot.slane %v1109_v19, 4  ;;  %v8007_v61 = vld [vmem:[#allocation2 + $0x2c] sm:$0xf] }
  0xf0   : > { %v946_v15 = vsel %vm9217_vm3, 65537, %v11599_v45  ;;  %vm2324_vm1 = vcmp.eq.s32.totalorder %v2260_v48, 1  ;;  %v1108_v3 = vsel %vm8689_vm10, %v9129_v34, %v9215_v46  ;;  %v1135_v13 = vshll.u32 %v947_v24, 16  ;;  %7623 = vmatpush3.bf16.msra.mxu0 %v7932_v62  ;;  %v7934_v62 = vld [vmem:[%s11344_s3 + $0x108] sm:$0xff]  }
  0xf1   : > { %v1139_v23 = vshrl.u32 %v947_v24, 16  ;;  %v1328_v20 = vsel %vm9180_vm9, %v8007_v61, 0  ;;  %vm9254_vm11 = vcmp.ne.s16.totalorder %v1098_v56, 0  ;;  %v11600_v12 = vmov 0  ;;  %vm2356_vm0 = vmpackc.low %vm2324_vm1, %vm2324_vm1  ;;  %v2266_v61 = vpop.permute.xlu1 %2265  ;;  %7624 = vmatprep.subr.bf16.mxu0 %v7934_v62 }
  0xf2   : > { %v11601_v12 = vsel %vm9254_vm11, 4294967295, %v11600_v12  ;;  %v2514_v22 = vrot.slane %v9151_v8, 4  ;;  %v1122_v34 = vor.u32 %v1121_v30, %v9237_v16  ;;  %v1125_v5 = vshll.u32 %v946_v15, 16 }
  0xf3   : > { %11602 = vst [vmem:[#allocation23_spill] sm:$0xff] %v11601_v12  ;;  %v11603_v56 = vsel %vm9089_vm12, %v9110_v11, 0  ;;  %v9277_v50 = vsel %vm8836_vm6, %v2523_v6, %v2530_v32  ;;  %v1112_v30 = vor.u32 %v1111_v52, %v9215_v46  ;;  %vm9280_vm8 = vcmp.ne.s16.totalorder %v1108_v3, 0  ;;  %v7933_v11 = vld [vmem:[%s11344_s3 + $0xc8] sm:$0xff]   ;;  %v9292_v6 = vld [vmem:[#allocation2 + $0x40] sm:$0xf] }
  0xf4   : > { %v6649_v24 = vcombine.low %v11603_v56, %v1328_v20  ;;  %v9273_v8 = vsel %vm8836_vm6, %v2514_v22, %v2521_v21  ;;  %11605 = vst [vmem:[#allocation25_spill] sm:$0xff] %v9277_v50  ;;  %v11606_v48 = vmov 0  ;;  %v9290_v21 = vrot.slane %v1135_v13, 5  ;;  %11609 = vst [vmem:[#allocation27_spill] sm:$0xff] %v9292_v6  ;;  %v2263_v22 = vpop.permute.xlu0 %2262  ;;  %v8008_v56 = vld [vmem:[#allocation2 + $0x34] sm:$0xf]  ;;  %7576 = vmatprep.subr.bf16.mxu1 %v7933_v11  ;;  %7625 = vmatpush3.bf16.msra.mxu0 %v7934_v62 }
  0xf5   : > { %11604 = vst [vmem:[#allocation24_spill] sm:$0xff] %v9273_v8  ;;  %v11607_v48 = vsel %vm9280_vm8, 4294967295, %v11606_v48  ;;  %v1141_v20 = vrot.slane %v1139_v23, 4  ;;  %vm2323_vm1 = vcmp.eq.s32.totalorder %v2257_v36, 1  ;;  %v1129_v46 = vshrl.u32 %v946_v15, 16  ;;  %7577 = vmatpush3.bf16.msra.mxu1 %v7933_v11  ;;  %v7935_v11 = vld [vmem:[%s11344_s3 + $0xc0] sm:$0xff]  }
  0xf6   : > { %11608 = vst [vmem:[#allocation26_spill] sm:$0xff] %v11607_v48  ;;  %v1816_v32 = vshrl.u32 %v6649_v24, 16  ;;  %v9295_v52 = vsel %vm2356_vm0, 65537, %v11599_v45  ;;  %v1819_v3 = vshll.u32 %v6649_v24, 16  ;;  %v1330_v19 = vsel %vm9254_vm11, %v8008_v56, 0  ;;  %vm9306_vm3 = vmpackc.low %vm2323_vm1, %vm2323_vm1  ;;  %7578 = vmatprep.subr.bf16.mxu1 %v7935_v11 }
  0xf7   : > { %v1123_v31 = vrot.slane %v1122_v34, 4  ;;  %v9300_v23 = vrot.slane %v1125_v5, 5  ;;  %v11612_v34 = vsel %vm9186_vm13, %v9203_v55, 0  ;;  %v2158_v56 = vld [vmem:[#allocation2 + $0x2c] sm:$0xf]  ;;  %v9317_v62 = vrot.slane %v1112_v30, 4 }
  0xf8   : > { %v1818_v33 = vrot.slane %v1816_v32, 3  ;;  %v1821_v24 = vrot.slane %v1819_v3, 4  ;;  %v6650_v5 = vcombine.low %v11612_v34, %v1330_v19  ;;  %v9319_v32 = vld [vmem:[#allocation2 + $0x38] sm:$0xf]  ;;  %v2543_v55 = vshrl.u32 %v9295_v52, 16  ;;  %v829_v34 = vpop.permute.xlu1 %828  ;;  %v826_v35 = vpop.permute.xlu0 %825 }
  0xf9   : > { %v2159_v19 = vld [vmem:[#allocation2 + $0x30] sm:$0xf]  ;;  %v1142_v13 = vor.u32 %v1141_v20, %v9290_v21  ;;  %v9329_v58 = vrot.slane %v1129_v46, 4  ;;  %v1128_v18 = vsel %vm8689_vm10, %v1123_v31, %v9300_v23  ;;  %v9337_v36 = vsel %vm9306_vm3, 65537, %v11599_v45  ;;  %7579 = vmatpush3.bf16.msra.mxu1 %v7935_v11 }
  0xfa   : > { %v1822_v30 = vor.u32 %v1821_v24, %v1818_v33  ;;  %vm2325_vm0 = vcmp.eq.s32.totalorder %v2263_v22, 1  ;;  %v1825_v3 = vshrl.u32 %v6650_v5, 16  ;;  %v1828_v46 = vshll.u32 %v6650_v5, 16 }
  0xfb   : > { %vm11613_vm5 = vcmp.ne.s16.totalorder %v9225_v7, 0  ;;  %vm11614_vm1 = vcmp.ne.s16.totalorder %v9229_v37, 0  ;;  %v1118_v31 = vsel %vm8689_vm10, %v9317_v62, %v9237_v16  ;;  %v9349_v15 = vrot.slane %v2543_v55, 7 }
  0xfc   : > { %v1823_v20 = vsel %vm11376_vm7, %v9146_v29, %v1822_v30  ;;  %v2738_v33 = vsel %vm11613_vm5, %v2158_v56, 0  ;;  %v2739_v24 = vsel %vm11614_vm1, %v2159_v19, 0  ;;  %v2546_v11 = vshll.u32 %v9295_v52, 16  ;;  %v2160_v56 = vld [vmem:[#allocation2 + $0x34] sm:$0xf]  ;;  %vm9364_vm1 = vmpackc.low %vm2325_vm0, %vm2325_vm0  ;;  %v832_v14 = vpop.permute.xlu0 %831 }
  0xfd   : > { %7492 = vmatprep.mubr.bf16.mxu1 %v1823_v20  ;;  %vm11615_vm3 = vcmp.eq.s32.totalorder %v2266_v61, 1  ;;  %v1827_v5 = vrot.slane %v1825_v3, 3  ;;  %vm9358_vm5 = vcmp.ne.s16.totalorder %v1128_v18, 0  ;;  %v11618_v19 = vmov 0  ;;  %v7936_v61 = vld [vmem:[%s11344_s3 + $0x100] sm:$0xff]   ;;  %v7937_v18 = vld [vmem:[%s11344_s3 + $0x178] sm:$0xff]  }
  0xfe   : > { %vm9354_vm7 = vmpackc.low %vm11615_vm3, %vm11615_vm3  ;;  %v11619_v19 = vsel %vm9358_vm5, 4294967295, %v11618_v19  ;;  %v1830_v52 = vrot.slane %v1828_v46, 4  ;;  %v9368_v62 = vcombine.low %v2738_v33, %v2739_v24  ;;  %vm885_vm13 = vcmp.eq.s32.totalorder %v829_v34, 1  ;;  %v835_v34 = vpop.permute.xlu1 %834  ;;  %7626 = vmatprep.subr.bf16.mxu0 %v7936_v61  ;;  %7660 = vmatprep.subr.bf16.mxu1 %v7937_v18  ;;  %v7939_v20 = vld [vmem:[%s11344_s3 + $0x1b8] sm:$0xff]  }
  0xff   : > { %11620 = vst [vmem:[#allocation28_spill] sm:$0xff] %v11619_v19  ;;  %v9376_v3 = vrot.slane %v1142_v13, 4  ;;  %v1132_v22 = vor.u32 %v9329_v58, %v9300_v23  ;;  %v2534_v55 = vshrl.u32 %v9337_v36, 16  ;;  %vm9381_vm0 = vmpackc.low %vm885_vm13, %vm885_vm13  ;;  %vm884_vm3 = vcmp.eq.s32.totalorder %v826_v35, 1  ;;  %v2161_v58 = vld [vmem:[#allocation2 + $0x38] sm:$0xf]  ;;  %7627 = vmatpush3.bf16.msra.mxu0 %v7936_v61 }
 0x100   : > { %v2537_v46 = vshll.u32 %v9337_v36, 16  ;;  %v9386_v33 = vor.u32 %v1830_v52, %v1827_v5  ;;  %v2897_v24 = vshrl.u32 %v9197_v54, 16  ;;  %v2901_v13 = vshll.u32 %v9368_v62, 16  ;;  %vm9390_vm11 = vmpackc.low %vm884_vm3, %vm884_vm3  ;;  %v9394_v23 = vld [vmem:[#allocation2 + $0x40] sm:$0xf]  ;;  %7708 = vmatprep.subr.bf16.mxu0 %v7939_v20 }
 0x101   : > { %v2390_v36 = vsel %vm9354_vm7, 65537, %v11599_v45  ;;  %v2389_v54 = vsel %vm9364_vm1, 65537, %v11599_v45  ;;  %vm11627_vm13 = vcmp.ne.s16.totalorder %v9273_v8, 0  ;;  %v2548_v52 = vor.u32 %v2546_v11, %v9349_v15 }
 0x102   : > { %v2740_v5 = vsel %vm11627_vm13, %v2160_v56, 0  ;;  %vm11628_vm3 = vsmask.f32 4352  ;;  %v2899_v7 = vor.u32 %v2897_v24, %v9208_v28  ;;  %v2903_v35 = vrot.slane %v2901_v13, 1  ;;  %v2272_v13 = vpop.permute.xlu1 %2271 }
 0x103   : > { %v1832_v18 = vsel %vm11628_vm3, %v1822_v30, %v9386_v33  ;;  %v2536_v2 = vrot.slane %v2534_v55, 7  ;;  %v949_v29 = vsel %vm9381_vm0, 65537, %v11599_v45  ;;  %v948_v56 = vsel %vm9390_vm11, 65537, %v11599_v45 }
 0x104   : > { %7493 = vmatmul.mubr.bf16.gmra.mxu1 %v1832_v18  ;;  %vm11629_vm7 = vcmp.ne.s16.totalorder %v9277_v50, 0  ;;  %vm9419_vm1 = vcmp.ne.s16.totalorder %v1118_v31, 0  ;;  %v11630_v16 = vmov 0  ;;  %v2561_v28 = vshrl.u32 %v2390_v36, 16 }
 0x105   : > { %v2741_v11 = vsel %vm11629_vm7, %v2161_v58, 0  ;;  %v11631_v16 = vsel %vm9419_vm1, 4294967295, %v11630_v16  ;;  %v2552_v30 = vshrl.u32 %v2389_v54, 16  ;;  %vm11633_vm13 = vsmask.f32 7424 }
 0x106   : > { %11632 = vst [vmem:[#allocation29_spill] sm:$0xff] %v11631_v16  ;;  %v2904_v61 = vsel %vm11633_vm13, %v2899_v7, %v2903_v35  ;;  %v9424_v55 = vcombine.low %v2740_v5, %v2741_v11  ;;  %v1145_v37 = vshll.u32 %v948_v56, 16  ;;  %v1149_v24 = vshrl.u32 %v948_v56, 16 }
 0x107   : > { %7540 = vmatprep.mubr.bf16.mxu0 %v2904_v61  ;;  %vm887_vm11 = vcmp.eq.s32.totalorder %v835_v34, 1  ;;  %vm886_vm0 = vcmp.eq.s32.totalorder %v832_v14, 1  ;;  %v1133_v31 = vrot.slane %v1132_v22, 4  ;;  %v1155_v58 = vshll.u32 %v949_v29, 16 }
 0x108   : > { %v1159_v18 = vshrl.u32 %v949_v29, 16  ;;  %v2909_v50 = vshll.u32 %v9424_v55, 16  ;;  %vm919_vm3 = vmpackc.low %vm887_vm11, %vm887_vm11  ;;  %v2550_v7 = vrot.slane %v9349_v15, 4  ;;  %v2539_v5 = vor.u32 %v2537_v46, %v2536_v2 }
 0x109   : > { %v2541_v11 = vrot.slane %v2536_v2, 4  ;;  %v2905_v8 = vshrl.u32 %v9368_v62, 16  ;;  %v2554_v47 = vrot.slane %v2552_v30, 7  ;;  %v951_v34 = vsel %vm919_vm3, 65537, %v11599_v45  ;;  %vm918_vm7 = vmpackc.low %vm886_vm0, %vm886_vm0  ;;  %v2269_v2 = vpop.permute.xlu0 %2268 }
 0x10a   : > { %v9432_v61 = vrot.slane %v2909_v50, 1  ;;  %vm2328_vm13 = vcmp.eq.s32.totalorder %v2272_v13, 1  ;;  %v9435_v14 = vrot.slane %v2561_v28, 7  ;;  %v1147_v22 = vrot.slane %v1145_v37, 5 }
 0x10b   : > { %v1151_v29 = vrot.slane %v1149_v24, 4  ;;  %v2907_v56 = vor.u32 %v2905_v8, %v2903_v35  ;;  %v2564_v53 = vshll.u32 %v2390_v36, 16  ;;  %v2555_v20 = vshll.u32 %v2389_v54, 16  ;;  %vm2360_vm0 = vmpackc.low %vm2328_vm13, %vm2328_vm13 }
 0x10c   : > { %v9437_v26 = vrot.slane %v1155_v58, 5  ;;  %v1161_v15 = vrot.slane %v1159_v18, 4  ;;  %vm11634_vm11 = vsmask.f32 7424  ;;  %v1175_v50 = vshll.u32 %v951_v34, 16  ;;  %v2278_v18 = vpop.permute.xlu1 %2277 }
 0x10d   : > { %v2912_v62 = vsel %vm11634_vm11, %v2907_v56, %v9432_v61  ;;  %v1179_v46 = vshrl.u32 %v951_v34, 16  ;;  %v950_v30 = vsel %vm918_vm7, 65537, %v11599_v45  ;;  %v1138_v28 = vsel %vm8689_vm10, %v1133_v31, %v9290_v21  ;;  %v8011_v34 = vld [vmem:[#allocation2 + $0x3c] sm:$0xf] }
 0x10e   : > { %v11635_v8 = vrot.slane %v9201_v10, 4  ;;  %v9453_v36 = vsel %vm8836_vm6, %v2541_v11, %v2548_v52  ;;  %v2557_v54 = vor.u32 %v2555_v20, %v2554_v47  ;;  %7541 = vmatmul.mubr.bf16.gmra.mxu0 %v2912_v62  ;;  %v2566_v37 = vor.u32 %v2564_v53, %v9435_v14 }
 0x10f   : > { %11637 = vst [vmem:[#allocation31_spill] sm:$0xff] %v9453_v36  ;;  %v2559_v24 = vrot.slane %v2554_v47, 4  ;;  %v1152_v13 = vor.u32 %v1151_v29, %v1147_v22  ;;  %vm2327_vm3 = vcmp.eq.s32.totalorder %v2269_v2, 1  ;;  %v1162_v58 = vor.u32 %v1161_v15, %v9437_v26 }
 0x110   : > { %v9449_v35 = vsel %vm8836_vm6, %v11635_v8, %v2539_v5  ;;  %v1148_v10 = vsel %vm8689_vm10, %v9376_v3, %v1147_v22  ;;  %v1165_v21 = vshll.u32 %v950_v30, 16  ;;  %v2392_v31 = vsel %vm2360_vm0, 65537, %v11599_v45  ;;  %vm2359_vm0 = vmpackc.low %vm2327_vm3, %vm2327_vm3  ;;  %v2275_v22 = vpop.permute.xlu0 %2274 }
 0x111   : > { %11636 = vst [vmem:[#allocation30_spill] sm:$0xff] %v9449_v35  ;;  %v9461_v5 = vrot.slane %v1175_v50, 5  ;;  %v1181_v52 = vrot.slane %v1179_v46, 4  ;;  %v1169_v11 = vshrl.u32 %v950_v30, 16  ;;  %v1332_v47 = vsel %vm9419_vm1, %v8011_v34, 0 }
 0x112   : > { %vm9465_vm7 = vcmp.ne.s16.totalorder %v1138_v28, 0  ;;  %v11638_v53 = vmov 0  ;;  %vm11404_vm13 = vcmp.ne.s16.totalorder %v9449_v35, 0  ;;  %v9473_v3 = vsel %vm8836_vm6, %v2550_v7, %v2557_v54  ;;  %v9494_v54 = vld [vmem:[#allocation2 + $0x48] sm:$0xf] }
 0x113   : > { %v11639_v53 = vsel %vm9465_vm7, 4294967295, %v11638_v53  ;;  %11641 = vst [vmem:[#allocation33_spill] sm:$0xff] %v9473_v3  ;;  %v9477_v29 = vsel %vm8836_vm6, %v2559_v24, %v2566_v37  ;;  %v9479_v56 = vrot.slane %v1152_v13, 4  ;;  %vm9481_vm1 = vcmp.ne.s16.totalorder %v1148_v10, 0 }
 0x114   : > { %11640 = vst [vmem:[#allocation32_spill] sm:$0xff] %v11639_v53  ;;  %11642 = vst [vmem:[#allocation34_spill] sm:$0xff] %v9477_v29  ;;  %v11643_v20 = vmov 0  ;;  %v2579_v15 = vshrl.u32 %v2392_v31, 16  ;;  %v1163_v62 = vrot.slane %v1162_v58, 4  ;;  %v1167_v50 = vrot.slane %v1165_v21, 5  ;;  %v838_v2 = vpop.permute.xlu0 %837 }
 0x115   : > { %v11644_v20 = vsel %vm9481_vm1, 4294967295, %v11643_v20  ;;  %v11645_v7 = vsel %vm9280_vm8, %v9319_v32, 0  ;;  %v1182_v30 = vor.u32 %v1181_v52, %v9461_v5  ;;  %v1171_v28 = vrot.slane %v1169_v11, 4  ;;  %v2162_v58 = vld [vmem:[#allocation2 + $0x3c] sm:$0xf]  ;;  %v841_v32 = vpop.permute.xlu1 %840 }
 0x116   : > { %v6651_v46 = vcombine.low %v11645_v7, %v1332_v47  ;;  %v2391_v8 = vsel %vm2359_vm0, 65537, %v11599_v45  ;;  %v1158_v10 = vsel %vm8689_vm10, %v9479_v56, %v9437_v26  ;;  %v9503_v21 = vrot.slane %v2579_v15, 7  ;;  %v2163_v11 = vld [vmem:[#allocation2 + $0x40] sm:$0xf] }
 0x117   : > { %v2582_v52 = vshll.u32 %v2392_v31, 16  ;;  %vm2329_vm0 = vcmp.eq.s32.totalorder %v2275_v22, 1  ;;  %v1168_v34 = vsel %vm8689_vm10, %v1163_v62, %v1167_v50  ;;  %v2570_v47 = vshrl.u32 %v2391_v8, 16  ;;  %v8013_v31 = vld [vmem:[#allocation2 + $0x44] sm:$0xf] }
 0x118   : > { %v1834_v24 = vshrl.u32 %v6651_v46, 16  ;;  %v1837_v13 = vshll.u32 %v6651_v46, 16  ;;  %v9507_v46 = vrot.slane %v1182_v30, 4  ;;  %v1172_v17 = vor.u32 %v1171_v28, %v1167_v50  ;;  %vm9509_vm3 = vmpackc.low %vm2329_vm0, %vm2329_vm0 }
 0x119   : > { %v2573_v42 = vshll.u32 %v2391_v8, 16  ;;  %vm2330_vm11 = vcmp.eq.s32.totalorder %v2278_v18, 1  ;;  %v1334_v22 = vsel %vm9465_vm7, %v8013_v31, 0  ;;  %v2742_v56 = vsel %vm11404_vm13, %v2162_v58, 0  ;;  %v2164_v8 = vld [vmem:[#allocation2 + $0x44] sm:$0xf] }
 0x11a   : > { %v1836_v7 = vrot.slane %v1834_v24, 3  ;;  %v1839_v37 = vrot.slane %v1837_v13, 4  ;;  %vm11648_vm8 = vcmp.ne.s16.totalorder %v9453_v36, 0  ;;  %vm9519_vm12 = vcmp.ne.s16.totalorder %v1168_v34, 0 }
 0x11b   : > { %v2743_v15 = vsel %vm11648_vm8, %v2163_v11, 0  ;;  %v11649_v62 = vmov 0  ;;  %v9524_v18 = vor.u32 %v2582_v52, %v9503_v21  ;;  %v11651_v50 = vsel %vm9358_vm5, %v9394_v23, 0  ;;  %vm9533_vm8 = vmpackc.low %vm2330_vm11, %vm2330_vm11  ;;  %v847_v52 = vpop.permute.xlu1 %846 }
 0x11c   : > { %v1840_v25 = vor.u32 %v1839_v37, %v1836_v7  ;;  %v11650_v62 = vsel %vm9519_vm12, 4294967295, %v11649_v62  ;;  %v6652_v30 = vcombine.low %v11651_v50, %v1334_v22  ;;  %v6676_v28 = vcombine.low %v2742_v56, %v2743_v15  ;;  %v2165_v37 = vld [vmem:[#allocation2 + $0x48] sm:$0xf] }
 0x11d   : > { %vm11652_vm0 = vsmask.f32 4352  ;;  %vm889_vm13 = vcmp.eq.s32.totalorder %v841_v32, 1  ;;  %vm888_vm7 = vcmp.eq.s32.totalorder %v838_v2, 1  ;;  %v9537_v11 = vrot.slane %v2570_v47, 7  ;;  %v844_v32 = vpop.permute.xlu0 %843 }
 0x11e   : > { %v1841_v13 = vsel %vm11652_vm0, %v9386_v33, %v1840_v25  ;;  %v2393_v23 = vsel %vm9509_vm3, 65537, %v11599_v45  ;;  %v1843_v34 = vshrl.u32 %v6652_v30, 16  ;;  %v1846_v7 = vshll.u32 %v6652_v30, 16  ;;  %vm921_vm9 = vmpackc.low %vm889_vm13, %vm889_vm13 }
 0x11f   : > { %7496 = vmatprep.mubr.bf16.mxu1 %v1841_v13  ;;  %v2913_v31 = vshrl.u32 %v9424_v55, 16  ;;  %v2917_v33 = vshll.u32 %v6676_v28, 16  ;;  %vm920_vm11 = vmpackc.low %vm888_vm7, %vm888_vm7  ;;  %vm11655_vm0 = vcmp.ne.s16.totalorder %v9473_v3, 0  ;;  %vm11656_vm2 = vcmp.ne.s16.totalorder %v9477_v29, 0  ;;  %v2284_v36 = vpop.permute.xlu1 %2283 }
 0x120   : > { %v2744_v22 = vsel %vm11655_vm0, %v2164_v8, 0  ;;  %v2745_v2 = vsel %vm11656_vm2, %v2165_v37, 0  ;;  %v2394_v47 = vsel %vm9533_vm8, 65537, %v11599_v45  ;;  %v1845_v26 = vrot.slane %v1843_v34, 3 }
 0x121   : > { %v1848_v56 = vrot.slane %v1846_v7, 4  ;;  %v953_v15 = vsel %vm921_vm9, 65537, %v11599_v45  ;;  %v1173_v50 = vrot.slane %v1172_v17, 4  ;;  %v2588_v30 = vshrl.u32 %v2393_v23, 16 }
 0x122   : > { %v2915_v55 = vor.u32 %v2913_v31, %v9432_v61  ;;  %v2919_v13 = vrot.slane %v2917_v33, 1  ;;  %v2575_v24 = vor.u32 %v2573_v42, %v9537_v11  ;;  %v952_v37 = vsel %vm920_vm11, 65537, %v11599_v45 }
 0x123   : > { %v9553_v8 = vor.u32 %v1848_v56, %v1845_v26  ;;  %v9556_v29 = vcombine.low %v2744_v22, %v2745_v2  ;;  %vm9558_vm2 = vcmp.ne.s16.totalorder %v1158_v10, 0  ;;  %v11657_v58 = vmov 0  ;;  %v2281_v2 = vpop.permute.xlu0 %2280 }
 0x124   : > { %v11658_v58 = vsel %vm9558_vm2, 4294967295, %v11657_v58  ;;  %v2597_v34 = vshrl.u32 %v2394_v47, 16  ;;  %vm11660_vm7 = vsmask.f32 7424  ;;  %v1195_v17 = vshll.u32 %v953_v15, 16 }
 0x125   : > { %11659 = vst [vmem:[#allocation35_spill] sm:$0xff] %v11658_v58  ;;  %v2920_v7 = vsel %vm11660_vm7, %v2915_v55, %v2919_v13  ;;  %v1199_v3 = vshrl.u32 %v953_v15, 16  ;;  %v2577_v61 = vrot.slane %v9537_v11, 4  ;;  %vm11661_vm9 = vsmask.f32 4352 }
 0x126   : > { %v1850_v42 = vsel %vm11661_vm9, %v1840_v25, %v9553_v8  ;;  %7544 = vmatprep.mubr.bf16.mxu0 %v2920_v7  ;;  %v2921_v31 = vshrl.u32 %v6676_v28, 16  ;;  %v2925_v33 = vshll.u32 %v9556_v29, 16  ;;  %v2590_v22 = vrot.slane %v2588_v30, 7  ;;  %v9573_v25 = vld [vmem:[#allocation2 + $0x50] sm:$0xf] }
 0x127   : > { %7497 = vmatmul.mubr.bf16.gmra.mxu1 %v1850_v42  ;;  %v1185_v10 = vshll.u32 %v952_v37, 16  ;;  %vm891_vm13 = vcmp.eq.s32.totalorder %v847_v52, 1  ;;  %vm890_vm3 = vcmp.eq.s32.totalorder %v844_v32, 1  ;;  %v1189_v26 = vshrl.u32 %v952_v37, 16  ;;  %v9642_v28 = vld [vmem:[#allocation2 + $0x58] sm:$0xf] }
 0x128   : > { %v2923_v56 = vor.u32 %v2921_v31, %v2919_v13  ;;  %v9567_v55 = vrot.slane %v2925_v33, 1  ;;  %vm9569_vm8 = vmpackc.low %vm891_vm13, %vm891_vm13  ;;  %vm2332_vm11 = vcmp.eq.s32.totalorder %v2284_v36, 1  ;;  %v9578_v11 = vrot.slane %v2597_v34, 7 }
 0x129   : > { %v9580_v52 = vrot.slane %v1195_v17, 5  ;;  %v1201_v32 = vrot.slane %v1199_v3, 4  ;;  %vm922_vm0 = vmpackc.low %vm890_vm3, %vm890_vm3  ;;  %v2600_v30 = vshll.u32 %v2394_v47, 16  ;;  %v2591_v13 = vshll.u32 %v2393_v23, 16 }
 0x12a   : > { %v2928_v37 = vsel %vm11660_vm7, %v2923_v56, %v9567_v55  ;;  %vm2331_vm9 = vcmp.eq.s32.totalorder %v2281_v2, 1  ;;  %v1178_v7 = vsel %vm8689_vm10, %v1173_v50, %v9461_v5  ;;  %v11664_v42 = vrot.slane %v9435_v14, 4  ;;  %vm2364_vm13 = vmpackc.low %vm2332_vm11, %vm2332_vm11 }
 0x12b   : > { %v1187_v17 = vrot.slane %v1185_v10, 5  ;;  %7545 = vmatmul.mubr.bf16.gmra.mxu0 %v2928_v37  ;;  %v955_v3 = vsel %vm9569_vm8, 65537, %v11599_v45  ;;  %v9601_v23 = vsel %vm8836_vm6, %v2577_v61, %v9524_v18  ;;  %v2593_v5 = vor.u32 %v2591_v13, %v2590_v22  ;;  %vm2363_vm3 = vmpackc.low %vm2331_vm9, %vm2331_vm9  ;;  %v2290_v37 = vpop.permute.xlu1 %2289 }
 0x12c   : > { %v9591_v34 = vsel %vm8836_vm6, %v11664_v42, %v2575_v24  ;;  %11666 = vst [vmem:[#allocation37_spill] sm:$0xff] %v9601_v23  ;;  %v1191_v14 = vrot.slane %v1189_v26, 4  ;;  %v954_v47 = vsel %vm922_vm0, 65537, %v11599_v45  ;;  %v2602_v24 = vor.u32 %v2600_v30, %v9578_v11  ;;  %v8015_v30 = vld [vmem:[#allocation2 + $0x4c] sm:$0xf] }
 0x12d   : > { %11665 = vst [vmem:[#allocation36_spill] sm:$0xff] %v9591_v34  ;;  %v2595_v50 = vrot.slane %v2590_v22, 4  ;;  %v1202_v31 = vor.u32 %v1201_v32, %v9580_v52  ;;  %v1205_v33 = vshll.u32 %v954_v47, 16  ;;  %vm9606_vm8 = vcmp.ne.s16.totalorder %v1178_v7, 0  ;;  %v2287_v7 = vpop.permute.xlu0 %2286 }
 0x12e   : > { %v11667_v36 = vmov 0  ;;  %v1215_v10 = vshll.u32 %v955_v3, 16  ;;  %v1219_v2 = vshrl.u32 %v955_v3, 16  ;;  %v2396_v18 = vsel %vm2364_vm13, 65537, %v11599_v45 }
 0x12f   : > { %v11668_v36 = vsel %vm9606_vm8, 4294967295, %v11667_v36  ;;  %vm11428_vm11 = vcmp.ne.s16.totalorder %v9591_v34, 0  ;;  %v1188_v61 = vsel %vm8689_vm10, %v9507_v46, %v1187_v17  ;;  %v1209_v22 = vshrl.u32 %v954_v47, 16  ;;  %v853_v35 = vpop.permute.xlu1 %852 }
 0x130   : > { %11669 = vst [vmem:[#allocation38_spill] sm:$0xff] %v11668_v36  ;;  %v11670_v26 = vrot.slane %v9503_v21, 4  ;;  %v1192_v15 = vor.u32 %v1191_v14, %v1187_v17  ;;  %v2395_v32 = vsel %vm2363_vm3, 65537, %v11599_v45  ;;  %v1336_v13 = vsel %vm9558_vm2, %v8015_v30, 0 }
 0x131   : > { %v9627_v42 = vsel %vm8836_vm6, %v2595_v50, %v2602_v24  ;;  %v1203_v46 = vrot.slane %v1202_v31, 4  ;;  %v1207_v3 = vrot.slane %v1205_v33, 5  ;;  %v2615_v21 = vshrl.u32 %v2396_v18, 16  ;;  %v850_v58 = vpop.permute.xlu0 %849 }
 0x132   : > { %v9620_v56 = vsel %vm8836_vm6, %v11670_v26, %v2593_v5  ;;  %11672 = vst [vmem:[#allocation40_spill] sm:$0xff] %v9627_v42  ;;  %vm9629_vm0 = vcmp.ne.s16.totalorder %v1188_v61, 0  ;;  %v11673_v47 = vmov 0  ;;  %v9633_v17 = vrot.slane %v1215_v10, 5 }
 0x133   : > { %11671 = vst [vmem:[#allocation39_spill] sm:$0xff] %v9620_v56  ;;  %v11674_v47 = vsel %vm9629_vm0, 4294967295, %v11673_v47  ;;  %v1221_v5 = vrot.slane %v1219_v2, 4  ;;  %v11675_v14 = vsel %vm9481_vm1, %v9494_v54, 0  ;;  %v1211_v24 = vrot.slane %v1209_v22, 4 }
 0x134   : > { %v6653_v26 = vcombine.low %v11675_v14, %v1336_v13  ;;  %v2606_v50 = vshrl.u32 %v2395_v32, 16  ;;  %v1193_v31 = vrot.slane %v1192_v15, 4  ;;  %v1208_v54 = vsel %vm8689_vm10, %v1203_v46, %v1207_v3  ;;  %v8017_v13 = vld [vmem:[#allocation2 + $0x54] sm:$0xf]  ;;  %v2167_v46 = vld [vmem:[#allocation2 + $0x50] sm:$0xf] }
 0x135   : > { %v9649_v2 = vrot.slane %v2615_v21, 7  ;;  %v1338_v22 = vsel %vm9606_vm8, %v8017_v13, 0  ;;  %v1222_v14 = vor.u32 %v1221_v5, %v9633_v17  ;;  %v2618_v15 = vshll.u32 %v2396_v18, 16 }
 0x136   : > { %v1852_v33 = vshrl.u32 %v6653_v26, 16  ;;  %v1855_v61 = vshll.u32 %v6653_v26, 16  ;;  %vm2334_vm3 = vcmp.eq.s32.totalorder %v2290_v37, 1  ;;  %v2166_v26 = vld [vmem:[#allocation2 + $0x4c] sm:$0xf]  ;;  %v1212_v53 = vor.u32 %v1211_v24, %v1207_v3 }
 0x137   : > { %v9654_v6 = vrot.slane %v2606_v50, 7  ;;  %vm2333_vm13 = vcmp.eq.s32.totalorder %v2287_v7, 1  ;;  %v1198_v21 = vsel %vm8689_vm10, %v1193_v31, %v9580_v52  ;;  %vm9659_vm9 = vcmp.ne.s16.totalorder %v1208_v54, 0  ;;  %vm2366_vm7 = vmpackc.low %vm2334_vm3, %vm2334_vm3  ;;  %v856_v7 = vpop.permute.xlu0 %855 }
 0x138   : > { %v1854_v30 = vrot.slane %v1852_v33, 3  ;;  %v1857_v10 = vrot.slane %v1855_v61, 4  ;;  %v11676_v13 = vmov 0  ;;  %v2609_v18 = vshll.u32 %v2395_v32, 16  ;;  %vm9677_vm8 = vmpackc.low %vm2333_vm13, %vm2333_vm13 }
 0x139   : > { %v11677_v13 = vsel %vm9659_vm9, 4294967295, %v11676_v13  ;;  %v11679_v5 = vsel %vm9519_vm12, %v9573_v25, 0  ;;  %v9668_v3 = vor.u32 %v2618_v15, %v9649_v2  ;;  %v2746_v52 = vsel %vm11428_vm11, %v2166_v26, 0  ;;  %v2169_v15 = vld [vmem:[#allocation2 + $0x58] sm:$0xf] }
 0x13a   : > { %11678 = vst [vmem:[#allocation41_spill] sm:$0xff] %v11677_v13  ;;  %v6654_v33 = vcombine.low %v11679_v5, %v1338_v22  ;;  %v1858_v24 = vor.u32 %v1857_v10, %v1854_v30  ;;  %v9675_v50 = vrot.slane %v1222_v14, 4  ;;  %vm11682_vm2 = vcmp.ne.s16.totalorder %v9601_v23, 0  ;;  %v9685_v30 = vld [vmem:[#allocation2 + $0x60] sm:$0xf] }
 0x13b   : > { %v2747_v61 = vsel %vm11682_vm2, %v2167_v46, 0  ;;  %v9683_v54 = vrot.slane %v1212_v53, 4  ;;  %v2611_v10 = vor.u32 %v2609_v18, %v9654_v6  ;;  %vm11683_vm13 = vsmask.f32 4352  ;;  %v2168_v14 = vld [vmem:[#allocation2 + $0x54] sm:$0xf]  ;;  %v2293_v36 = vpop.permute.xlu0 %2292 }
 0x13c   : > { %v1861_v25 = vshrl.u32 %v6654_v33, 16  ;;  %v1864_v31 = vshll.u32 %v6654_v33, 16  ;;  %v1859_v22 = vsel %vm11683_vm13, %v9553_v8, %v1858_v24  ;;  %v9694_v26 = vsel %vm2366_vm7, 65537, %v11599_v45  ;;  %v859_v33 = vpop.permute.xlu1 %858 }
 0x13d   : > { %7500 = vmatprep.mubr.bf16.mxu1 %v1859_v22  ;;  %v6678_v5 = vcombine.low %v2746_v52, %v2747_v61  ;;  %v9699_v37 = vsel %vm9677_vm8, 65537, %v11599_v45  ;;  %v2929_v18 = vshrl.u32 %v9556_v29, 16  ;;  %vm893_vm2 = vcmp.eq.s32.totalorder %v853_v35, 1 }
 0x13e   : > { %v1863_v46 = vrot.slane %v1861_v25, 3  ;;  %v1866_v53 = vrot.slane %v1864_v31, 4  ;;  %vm892_vm3 = vcmp.eq.s32.totalorder %v850_v58, 1  ;;  %vm925_vm13 = vmpackc.low %vm893_vm2, %vm893_vm2  ;;  %vm11684_vm7 = vcmp.ne.s16.totalorder %v9620_v56, 0 }
 0x13f   : > { %v2933_v22 = vshll.u32 %v6678_v5, 16  ;;  %v2748_v25 = vsel %vm11684_vm7, %v2168_v14, 0  ;;  %vm11685_vm11 = vcmp.ne.s16.totalorder %v9627_v42, 0  ;;  %vm9708_vm12 = vcmp.ne.s16.totalorder %v1198_v21, 0  ;;  %vm924_vm8 = vmpackc.low %vm892_vm3, %vm892_vm3 }
 0x140   : > { %v9702_v8 = vor.u32 %v1866_v53, %v1863_v46  ;;  %v2749_v52 = vsel %vm11685_vm11, %v2169_v15, 0  ;;  %v11686_v31 = vmov 0  ;;  %v2613_v32 = vrot.slane %v9654_v6, 4 }
 0x141   : > { %v11687_v31 = vsel %vm9708_vm12, 4294967295, %v11686_v31  ;;  %v2633_v29 = vshrl.u32 %v9694_v26, 16  ;;  %v957_v35 = vsel %vm925_vm13, 65537, %v11599_v45  ;;  %v9715_v58 = vcombine.low %v2748_v25, %v2749_v52  ;;  %v2296_v52 = vpop.permute.xlu1 %2295 }
 0x142   : > { %11688 = vst [vmem:[#allocation42_spill] sm:$0xff] %v11687_v31  ;;  %v2624_v61 = vshrl.u32 %v9699_v37, 16  ;;  %vm11689_vm2 = vsmask.f32 4352  ;;  %v2931_v15 = vor.u32 %v2929_v18, %v9567_v55  ;;  %v2935_v21 = vrot.slane %v2933_v22, 1 }
 0x143   : > { %v1868_v14 = vsel %vm11689_vm2, %v1858_v24, %v9702_v8  ;;  %v1235_v46 = vshll.u32 %v957_v35, 16  ;;  %v1239_v53 = vshrl.u32 %v957_v35, 16  ;;  %v956_v6 = vsel %vm924_vm8, 65537, %v11599_v45 }
 0x144   : > { %7501 = vmatmul.mubr.bf16.gmra.mxu1 %v1868_v14  ;;  %v2937_v42 = vshrl.u32 %v6678_v5, 16  ;;  %vm11690_vm11 = vsmask.f32 7424  ;;  %v1225_v23 = vshll.u32 %v956_v6, 16  ;;  %v1229_v34 = vshrl.u32 %v956_v6, 16 }
 0x145   : > { %v2936_v56 = vsel %vm11690_vm11, %v2931_v15, %v2935_v21  ;;  %v2941_v25 = vshll.u32 %v9715_v58, 16  ;;  %v9724_v48 = vrot.slane %v1235_v46, 5  ;;  %v1241_v24 = vrot.slane %v1239_v53, 4 }
 0x146   : > { %7548 = vmatprep.mubr.bf16.mxu0 %v2936_v56  ;;  %v2939_v55 = vor.u32 %v2937_v42, %v2935_v21  ;;  %vm895_vm3 = vcmp.eq.s32.totalorder %v859_v33, 1  ;;  %v1227_v18 = vrot.slane %v1225_v23, 5  ;;  %v1231_v22 = vrot.slane %v1229_v34, 4 }
 0x147   : > { %v9726_v35 = vrot.slane %v2941_v25, 1  ;;  %vm927_vm13 = vmpackc.low %vm895_vm3, %vm895_vm3  ;;  %vm894_vm7 = vcmp.eq.s32.totalorder %v856_v7, 1  ;;  %v1242_v5 = vor.u32 %v1241_v24, %v9724_v48  ;;  %vm2336_vm2 = vcmp.eq.s32.totalorder %v2296_v52, 1  ;;  %v8019_v24 = vld [vmem:[#allocation2 + $0x5c] sm:$0xf] }
 0x148   : > { %v959_v14 = vsel %vm927_vm13, 65537, %v11599_v45  ;;  %vm926_vm8 = vmpackc.low %vm894_vm7, %vm894_vm7  ;;  %vm2335_vm11 = vcmp.eq.s32.totalorder %v2293_v36, 1  ;;  %v1218_v56 = vsel %vm8689_vm10, %v9683_v54, %v9633_v17  ;;  %v11691_v42 = vrot.slane %v9578_v11, 4 }
 0x149   : > { %vm11693_vm3 = vsmask.f32 7424  ;;  %v1255_v7 = vshll.u32 %v959_v14, 16  ;;  %vm9742_vm1 = vmpackc.low %vm2336_vm2, %vm2336_vm2  ;;  %v9749_v36 = vsel %vm8836_vm6, %v2613_v32, %v9668_v3  ;;  %v2626_v17 = vrot.slane %v2624_v61, 7 }
 0x14a   : > { %v9738_v34 = vsel %vm8836_vm6, %v11691_v42, %v2611_v10  ;;  %v2944_v23 = vsel %vm11693_vm3, %v2939_v55, %v9726_v35  ;;  %11696 = vst [vmem:[#allocation44_spill] sm:$0xff] %v9749_v36  ;;  %v1259_v11 = vshrl.u32 %v959_v14, 16  ;;  %v958_v54 = vsel %vm926_vm8, 65537, %v11599_v45  ;;  %vm2367_vm13 = vmpackc.low %vm2335_vm11, %vm2335_vm11 }
 0x14b   : > { %11692 = vst [vmem:[#allocation43_spill] sm:$0xff] %v9738_v34  ;;  %7549 = vmatmul.mubr.bf16.gmra.mxu0 %v2944_v23  ;;  %v9752_v10 = vrot.slane %v2633_v29, 7  ;;  %v2636_v15 = vshll.u32 %v9694_v26, 16  ;;  %v2627_v21 = vshll.u32 %v9699_v37, 16  ;;  %v1232_v46 = vor.u32 %v1231_v22, %v1227_v18 }
 0x14c   : > { %v1243_v53 = vrot.slane %v1242_v5, 4  ;;  %v9756_v6 = vrot.slane %v1255_v7, 5  ;;  %v1245_v25 = vshll.u32 %v958_v54, 16  ;;  %v1249_v52 = vshrl.u32 %v958_v54, 16 }
 0x14d   : > { %v1261_v3 = vrot.slane %v1259_v11, 4  ;;  %v2400_v32 = vsel %vm9742_vm1, 65537, %v11599_v45  ;;  %v2399_v61 = vsel %vm2367_vm13, 65537, %v11599_v45  ;;  %v1340_v29 = vsel %vm9708_vm12, %v8019_v24, 0  ;;  %v2302_v11 = vpop.permute.xlu1 %2301  ;;  %v2299_v24 = vpop.permute.xlu0 %2298 }
 0x14e   : > { %v2629_v26 = vor.u32 %v2627_v21, %v2626_v17  ;;  %v1228_v37 = vsel %vm8689_vm10, %v9675_v50, %v1227_v18  ;;  %v1247_v55 = vrot.slane %v1245_v25, 5  ;;  %v1251_v22 = vrot.slane %v1249_v52, 4 }
 0x14f   : > { %v2638_v5 = vor.u32 %v2636_v15, %v9752_v10  ;;  %v2631_v14 = vrot.slane %v2626_v17, 4  ;;  %v2651_v42 = vshrl.u32 %v2400_v32, 16  ;;  %v2642_v23 = vshrl.u32 %v2399_v61, 16 }
 0x150   : > { %vm9768_vm7 = vcmp.ne.s16.totalorder %v1218_v56, 0  ;;  %v11697_v7 = vmov 0  ;;  %v1248_v33 = vsel %vm8689_vm10, %v1243_v53, %v1247_v55  ;;  %v11700_v50 = vsel %vm9629_vm0, %v9642_v28, 0 }
 0x151   : > { %v11698_v7 = vsel %vm9768_vm7, 4294967295, %v11697_v7  ;;  %v6655_v18 = vcombine.low %v11700_v50, %v1340_v29  ;;  %v9779_v54 = vrot.slane %v1232_v46, 4  ;;  %vm9781_vm8 = vcmp.ne.s16.totalorder %v1228_v37, 0  ;;  %v9804_v29 = vld [vmem:[#allocation2 + $0x68] sm:$0xf] }
 0x152   : > { %11699 = vst [vmem:[#allocation45_spill] sm:$0xff] %v11698_v7  ;;  %v11701_v17 = vmov 0  ;;  %v1262_v56 = vor.u32 %v1261_v3, %v9756_v6  ;;  %v1252_v15 = vor.u32 %v1251_v22, %v1247_v55  ;;  %v11704_v53 = vrot.slane %v9649_v2, 4  ;;  %v2170_v22 = vld [vmem:[#allocation2 + $0x5c] sm:$0xf] }
 0x153   : > { %v11702_v17 = vsel %vm9781_vm8, 4294967295, %v11701_v17  ;;  %v9794_v25 = vrot.slane %v2651_v42, 7  ;;  %v9798_v46 = vsel %vm8836_vm6, %v2631_v14, %v2638_v5  ;;  %vm9800_vm11 = vcmp.ne.s16.totalorder %v1248_v33, 0  ;;  %v2171_v33 = vld [vmem:[#allocation2 + $0x60] sm:$0xf] }
 0x154   : > { %11703 = vst [vmem:[#allocation46_spill] sm:$0xff] %v11702_v17  ;;  %v9792_v28 = vsel %vm8836_vm6, %v11704_v53, %v2629_v26  ;;  %11706 = vst [vmem:[#allocation48_spill] sm:$0xff] %v9798_v46  ;;  %v11707_v52 = vmov 0  ;;  %v2644_v3 = vrot.slane %v2642_v23, 7  ;;  %vm2338_vm3 = vcmp.eq.s32.totalorder %v2302_v11, 1 }
 0x155   : > { %11705 = vst [vmem:[#allocation47_spill] sm:$0xff] %v9792_v28  ;;  %v11708_v52 = vsel %vm9800_vm11, 4294967295, %v11707_v52  ;;  %v2654_v26 = vshll.u32 %v2400_v32, 16  ;;  %v1870_v37 = vshrl.u32 %v6655_v18, 16  ;;  %v1873_v55 = vshll.u32 %v6655_v18, 16  ;;  %vm2370_vm2 = vmpackc.low %vm2338_vm3, %vm2338_vm3 }
 0x156   : > { %11709 = vst [vmem:[#allocation49_spill] sm:$0xff] %v11708_v52  ;;  %v1238_v5 = vsel %vm8689_vm10, %v9779_v54, %v9724_v48  ;;  %v9813_v14 = vrot.slane %v1262_v56, 4  ;;  %v1253_v42 = vrot.slane %v1252_v15, 4  ;;  %v2645_v23 = vshll.u32 %v2399_v61, 16  ;;  %v9816_v50 = vld [vmem:[#allocation2 + $0x70] sm:$0xf] }
 0x157   : > { %v2656_v18 = vor.u32 %v2654_v26, %v9794_v25  ;;  %v1872_v53 = vrot.slane %v1870_v37, 3  ;;  %v1875_v2 = vrot.slane %v1873_v55, 4  ;;  %vm2337_vm1 = vcmp.eq.s32.totalorder %v2299_v24, 1  ;;  %v8022_v61 = vld [vmem:[#allocation2 + $0x64] sm:$0xf] }
 0x158   : > { %v2647_v54 = vor.u32 %v2645_v23, %v2644_v3  ;;  %v1342_v56 = vsel %vm9768_vm7, %v8022_v61, 0  ;;  %vm2369_vm12 = vmpackc.low %vm2337_vm1, %vm2337_vm1  ;;  %v11710_v26 = vsel %vm9659_vm9, %v9685_v30, 0  ;;  %vm11711_vm0 = vcmp.ne.s16.totalorder %v9738_v34, 0 }
 0x159   : > { %v1876_v15 = vor.u32 %v1875_v2, %v1872_v53  ;;  %v6656_v37 = vcombine.low %v11710_v26, %v1342_v56  ;;  %v2750_v11 = vsel %vm11711_vm0, %v2170_v22, 0  ;;  %vm11712_vm3 = vcmp.ne.s16.totalorder %v9749_v36, 0  ;;  %v865_v2 = vpop.permute.xlu1 %864  ;;  %v862_v53 = vpop.permute.xlu0 %861 }
 0x15a   : > { %v2751_v55 = vsel %vm11712_vm3, %v2171_v33, 0  ;;  %v2649_v24 = vrot.slane %v2644_v3, 4  ;;  %v9837_v23 = vsel %vm2370_vm2, 65537, %v11599_v45  ;;  %v2401_v61 = vsel %vm2369_vm12, 65537, %v11599_v45 }
 0x15b   : > { %v9840_v32 = vcombine.low %v2750_v11, %v2751_v55  ;;  %v1258_v30 = vsel %vm8689_vm10, %v1253_v42, %v9756_v6  ;;  %vm11713_vm1 = vsmask.f32 4352  ;;  %v2660_v56 = vshrl.u32 %v2401_v61, 16  ;;  %v8023_v11 = vld [vmem:[%s11342_s1] ss:$0 sm:$0xff] }
 0x15c   : > { %v1877_v22 = vsel %vm11713_vm1, %v9702_v8, %v1876_v15  ;;  %v1879_v26 = vshrl.u32 %v6656_v37, 16  ;;  %v1882_v3 = vshll.u32 %v6656_v37, 16  ;;  %v2945_v33 = vshrl.u32 %v9715_v58, 16  ;;  %v8024_v58 = vld [vmem:[%s11343_s2] ss:$0 sm:$0xff] }
 0x15d   : > { %7504 = vmatprep.mubr.bf16.mxu1 %v1877_v22  ;;  %v2949_v48 = vshll.u32 %v9840_v32, 16  ;;  %v11714_v55 = vunpack.c.h.bf16 %v8896_v9  ;;  %v2669_v6 = vshrl.u32 %v9837_v23, 16  ;;  %vm897_vm12 = vcmp.eq.s32.totalorder %v865_v2, 1 }
 0x15e   : > { %v1881_v42 = vrot.slane %v1879_v26, 3  ;;  %vm896_vm0 = vcmp.eq.s32.totalorder %v862_v53, 1  ;;  %v1884_v8 = vrot.slane %v1882_v3, 4  ;;  %v2947_v22 = vor.u32 %v2945_v33, %v9726_v35  ;;  %vm929_vm2 = vmpackc.low %vm897_vm12, %vm897_vm12  ;;  %v2173_v33 = vld [vmem:[#allocation2 + $0x68] sm:$0xf] }
 0x15f   : > { %v371_v21 = vmul.f32 %v8023_v11, %v11714_v55  ;;  %v2951_v37 = vrot.slane %v2949_v48, 1  ;;  %v11715_v34 = vrot.slane %v9752_v10, 4  ;;  %v9867_v2 = vsel %vm8836_vm6, %v2649_v24, %v2656_v18  ;;  %vm928_vm3 = vmpackc.low %vm896_vm0, %vm896_vm0  ;;  %v2172_v48 = vld [vmem:[#allocation2 + $0x64] sm:$0xf]  ;;  %v2308_v11 = vpop.permute.xlu1 %2307 }
 0x160   : > { %11717 = vst [vmem:[#allocation51_spill] sm:$0xff] %v9867_v2  ;;  %v2662_v53 = vrot.slane %v2660_v56, 7  ;;  %v961_v35 = vsel %vm929_vm2, 65537, %v11599_v45  ;;  %vm9870_vm1 = vcmp.ne.s16.totalorder %v1238_v5, 0  ;;  %v11718_v26 = vmov 0 }
 0x161   : > { %v410_v36 = vadd.f32 %v8024_v58, %v371_v21  ;;  %v9863_v9 = vsel %vm8836_vm6, %v11715_v34, %v2647_v54  ;;  %v11719_v26 = vsel %vm9870_vm1, 4294967295, %v11718_v26  ;;  %vm9874_vm12 = vcmp.ne.s16.totalorder %v1258_v30, 0  ;;  %v2305_v30 = vpop.permute.xlu0 %2304 }
 0x162   : > { %11716 = vst [vmem:[#allocation50_spill] sm:$0xff] %v9863_v9  ;;  %11720 = vst [vmem:[#allocation52_spill] sm:$0xff] %v11719_v26  ;;  %v11721_v21 = vmov 0  ;;  %v9878_v10 = vor.u32 %v1884_v8, %v1881_v42  ;;  %vm11724_vm13 = vsmask.f32 7424  ;;  %v1275_v18 = vshll.u32 %v961_v35, 16 }
 0x163   : > { %v11722_v21 = vsel %vm9874_vm12, 4294967295, %v11721_v21  ;;  %v2952_v34 = vsel %vm11724_vm13, %v2947_v22, %v2951_v37  ;;  %v442_v54 = vmax.f32 %v410_v36, 0.0  ;;  %v9881_v24 = vrot.slane %v2669_v6, 7 }
 0x164   : > { %11723 = vst [vmem:[#allocation53_spill] sm:$0xff] %v11722_v21  ;;  %v2672_v56 = vshll.u32 %v9837_v23, 16  ;;  %7552 = vmatprep.mubr.bf16.mxu0 %v2952_v34  ;;  %v1279_v3 = vshrl.u32 %v961_v35, 16  ;;  %v960_v5 = vsel %vm928_vm3, 65537, %v11599_v45  ;;  %v2663_v55 = vshll.u32 %v2401_v61, 16 }
 0x165   : > { %vm11725_vm0 = vsmask.f32 4352  ;;  %v6907_v8 = vpack.c.bf16 %v442_v54, %v442_v54  ;;  %vm11726_vm13 = vcmp.ne.s16.totalorder %v9792_v28, 0  ;;  %v9889_v6 = vrot.slane %v1275_v18, 5  ;;  %v10125_v28 = vld [vmem:[#allocation2 + $0x5c] sm:$0xf] }
 0x166   : > { %v1886_v42 = vsel %vm11725_vm0, %v1876_v15, %v9878_v10  ;;  %v2752_v36 = vsel %vm11726_vm13, %v2172_v48, 0  ;;  %v1281_v22 = vrot.slane %v1279_v3, 4  ;;  %v1265_v23 = vshll.u32 %v960_v5, 16 }
 0x167   : > { %7505 = vmatmul.mubr.bf16.gmra.mxu1 %v1886_v42  ;;  %v1269_v58 = vshrl.u32 %v960_v5, 16  ;;  %v2665_v35 = vor.u32 %v2663_v55, %v2662_v53  ;;  %608 = vst [vmem:[#allocation2 + $0x88] sm:$0xf] %v6907_v8  ;;  %vm11727_vm2 = vcmp.ne.s16.totalorder %v9798_v46, 0  ;;  %vm2340_vm3 = vcmp.eq.s32.totalorder %v2308_v11, 1 }
 0x168   : > { %v2753_v34 = vsel %vm11727_vm2, %v2173_v33, 0  ;;  %vm2339_vm7 = vcmp.eq.s32.totalorder %v2305_v30, 1  ;;  %v1282_v61 = vor.u32 %v1281_v22, %v9889_v6  ;;  %v1267_v15 = vrot.slane %v1265_v23, 5  ;;  %vm2372_vm0 = vmpackc.low %vm2340_vm3, %vm2340_vm3 }
 0x169   : > { %v1271_v54 = vrot.slane %v1269_v58, 4  ;;  %v9894_v7 = vcombine.low %v2752_v36, %v2753_v34  ;;  %vm11462_vm13 = vcmp.ne.s16.totalorder %v9863_v9, 0  ;;  %v2674_v48 = vor.u32 %v2672_v56, %v9881_v24  ;;  %vm2371_vm9 = vmpackc.low %vm2339_vm7, %vm2339_vm7  ;;  %v8025_v34 = vld [vmem:[#allocation2 + $0x6c] sm:$0xf] }
 0x16a   : > { %v2667_v18 = vrot.slane %v2662_v53, 4  ;;  %v2404_v3 = vsel %vm2372_vm0, 65537, %v11599_v45  ;;  %vm11461_vm14 = vcmp.ne.s16.totalorder %v9867_v2, 0  ;;  %v9900_v5 = vrot.slane %v1282_v61, 4  ;;  %v8026_v61 = vld [vmem:[#allocation2 + $0x74] sm:$0xf] }
 0x16b   : > { %v1272_v33 = vor.u32 %v1271_v54, %v1267_v15  ;;  %v2957_v11 = vshll.u32 %v9894_v7, 16  ;;  %v2676_v30 = vrot.slane %v9881_v24, 4  ;;  %v2953_v55 = vshrl.u32 %v9840_v32, 16  ;;  %v2179_v2 = vld [vmem:[#allocation2 + $0x80] sm:$0xf] }
 0x16c   : > { %v2687_v42 = vshrl.u32 %v2404_v3, 16  ;;  %v2403_v8 = vsel %vm2371_vm9, 65537, %v11599_v45  ;;  %v11728_v56 = vrot.slane %v9794_v25, 4  ;;  %vm11471_vm7 = vcmp.ne.s16.totalorder %v9900_v5, 0 }
 0x16d   : > { %v1268_v36 = vsel %vm8689_vm10, %v9813_v14, %v1267_v15  ;;  %v1273_v22 = vrot.slane %v1272_v33, 4  ;;  %v9918_v24 = vsel %vm8836_vm6, %v2667_v18, %v2674_v48  ;;  %v2955_v32 = vor.u32 %v2953_v55, %v2951_v37  ;;  %v8027_v14 = vld [vmem:[#allocation2 + $0x80] sm:$0xf]  ;;  %v2174_v55 = vld [vmem:[#allocation2 + $0x6c] sm:$0xf] }
 0x16e   : > { %v9910_v53 = vsel %vm8836_vm6, %v11728_v56, %v2665_v35  ;;  %11730 = vst [vmem:[#allocation55_spill] sm:$0xff] %v9918_v24  ;;  %v2959_v23 = vrot.slane %v2957_v11, 1  ;;  %v2689_v45 = vrot.slane %v2687_v42, 7  ;;  %v2690_v58 = vshll.u32 %v2404_v3, 16  ;;  %v2175_v42 = vld [vmem:[#allocation2 + $0x70] sm:$0xf] }
 0x16f   : > { %11729 = vst [vmem:[#allocation54_spill] sm:$0xff] %v9910_v53  ;;  %v2678_v25 = vshrl.u32 %v2403_v8, 16  ;;  %v1344_v35 = vsel %vm9870_vm1, %v8025_v34, 0  ;;  %v1346_v54 = vsel %vm9874_vm12, %v8026_v61, 0  ;;  %vm11470_vm9 = vcmp.ne.s16.totalorder %v9910_v53, 0  ;;  %v9952_v61 = vpop.f32.mrf.mxu1 }
 0x170   : > { %v1349_v15 = vsel %vm11471_vm7, %v8027_v14, 0  ;;  %vm9927_vm2 = vcmp.ne.s16.totalorder %v1268_v36, 0  ;;  %v11731_v37 = vmov 0  ;;  %vm11734_vm3 = vsmask.f32 7424  ;;  %11740 = vst [vmem:[#allocation58_spill] sm:$0xff] %v9952_v61 }
 0x171   : > { %v11732_v37 = vsel %vm9927_vm2, 4294967295, %v11731_v37  ;;  %v2960_v48 = vsel %vm11734_vm3, %v2955_v32, %v2959_v23  ;;  %v1278_v18 = vsel %vm8689_vm10, %v1273_v22, %v9889_v6  ;;  %v2692_v3 = vor.u32 %v2690_v58, %v2689_v45  ;;  %v8028_v22 = vld [vmem:[#allocation2 + $0x78] sm:$0xf]  ;;  %v2180_v58 = vld [vmem:[#allocation2 + $0x84] sm:$0x1] }
 0x172   : > { %11733 = vst [vmem:[#allocation56_spill] sm:$0xff] %v11732_v37  ;;  %7553 = vmatmul.mubr.bf16.gmra.mxu0 %v2960_v48  ;;  %v2694_v33 = vrot.slane %v2689_v45, 4  ;;  %v2680_v11 = vrot.slane %v2678_v25, 7  ;;  %vm11467_vm0 = vcmp.ne.s16.totalorder %v9918_v24, 0  ;;  %v2681_v56 = vshll.u32 %v2403_v8, 16  ;;  %v11792_v24 = vld [vmem:[#allocation6_spill] sm:$0xff] }
 0x173   : > { %v11735_v36 = vsel %vm9781_vm8, %v9804_v29, 0  ;;  %v11736_v32 = vsel %vm9800_vm11, %v9816_v50, 0  ;;  %v9944_v6 = vcombine.low %v1349_v15, %v1349_v15  ;;  %v1347_v45 = vsel %vm9927_vm2, %v8028_v22, 0  ;;  %v10308_v26 = vld [vmem:[#allocation2 + $0x88] sm:$0xf] }
 0x174   : > { %v6657_v34 = vcombine.low %v11735_v36, %v1344_v35  ;;  %v6658_v44 = vcombine.low %v11736_v32, %v1346_v54  ;;  %vm9948_vm10 = vcmp.ne.s16.totalorder %v2694_v33, 0  ;;  %v11737_v25 = vmov 0  ;;  %v2176_v36 = vld [vmem:[#allocation2 + $0x74] sm:$0xf]  ;;  %v2177_v32 = vld [vmem:[#allocation2 + $0x78] sm:$0xf] }
 0x175   : > { %v11738_v25 = vsel %vm9948_vm10, 4294967295, %v11737_v25  ;;  %v2685_v8 = vrot.slane %v2680_v11, 4  ;;  %vm9954_vm3 = vcmp.ne.s16.totalorder %v1278_v18, 0  ;;  %v11741_v29 = vmov 0  ;;  %v9967_v18 = vpop.f32.mrf.mxu0 }
 0x176   : > { %11739 = vst [vmem:[#allocation57_spill] sm:$0xff] %v11738_v25  ;;  %v11742_v29 = vsel %vm9954_vm3, 4294967295, %v11741_v29  ;;  %v2683_v50 = vor.u32 %v2681_v56, %v2680_v11  ;;  %v2754_v35 = vsel %vm11462_vm13, %v2174_v55, 0  ;;  %v2755_v54 = vsel %vm11461_vm14, %v2175_v42, 0  ;;  %11745 = vst [vmem:[#allocation61_spill] sm:$0xff] %v9967_v18 }
 0x177   : > { %11743 = vst [vmem:[#allocation59_spill] sm:$0xff] %v11742_v29  ;;  %v9964_v14 = vsel %vm8836_vm6, %v2685_v8, %v2692_v3  ;;  %v1888_v15 = vshrl.u32 %v6657_v34, 16  ;;  %v1891_v48 = vshll.u32 %v6657_v34, 16  ;;  %v2961_v33 = vshrl.u32 %v9894_v7, 16  ;;  %v9979_v34 = vpop.f32.mrf.mxu1  ;;  %v2178_v25 = vld [vmem:[#allocation2 + $0x7c] sm:$0xf] }
 0x178   : > { %11744 = vst [vmem:[#allocation60_spill] sm:$0xff] %v9964_v14  ;;  %v9971_v11 = vsel %vm9948_vm10, %v2180_v58, 0  ;;  %v9975_v55 = vsel %vm8836_vm6, %v2676_v30, %v2683_v50  ;;  %v1897_v42 = vshrl.u32 %v6658_v44, 16  ;;  %v1900_v56 = vshll.u32 %v6658_v44, 16  ;;  %11747 = vst [vmem:[#allocation63_spill] sm:$0xff] %v9979_v34 }
 0x179   : > { %11746 = vst [vmem:[#allocation62_spill] sm:$0xff] %v9975_v55  ;;  %vm11469_vm14 = vcmp.ne.s16.totalorder %v9975_v55, 0  ;;  %vm11468_vm13 = vcmp.ne.s16.totalorder %v9964_v14, 0  ;;  %v1890_v3 = vrot.slane %v1888_v15, 3  ;;  %v1893_v7 = vrot.slane %v1891_v48, 4  ;;  %v9987_v48 = vpop.f32.mrf.mxu0 }
 0x17a   : > { %v1899_v22 = vrot.slane %v1897_v42, 3  ;;  %v1902_v8 = vrot.slane %v1900_v56, 4  ;;  %v6682_v61 = vcombine.low %v2754_v35, %v2755_v54  ;;  %v2963_v58 = vor.u32 %v2961_v33, %v2959_v23  ;;  %v8029_v50 = vld [vmem:[#allocation2 + $0x7c] sm:$0xf]  ;;  %11748 = vst [vmem:[#allocation64_spill] sm:$0xff] %v9987_v48 }
 0x17b   : > { %v1894_v41 = vor.u32 %v1893_v7, %v1890_v3  ;;  %v2756_v30 = vsel %vm11470_vm9, %v2176_v36, 0  ;;  %v2757_v44 = vsel %vm11467_vm0, %v2177_v32, 0  ;;  %v1348_v15 = vsel %vm9954_vm3, %v8029_v50, 0  ;;  %v9995_v32 = vpop.f32.mrf.mxu1  ;;  %v10280_v18 = vld [vmem:[#allocation2 + $0x78] sm:$0xf] }
 0x17c   : > { %v1903_v34 = vor.u32 %v1902_v8, %v1899_v22  ;;  %v2965_v42 = vshll.u32 %v6682_v61, 16  ;;  %v6683_v56 = vcombine.low %v2756_v30, %v2757_v44  ;;  %v2969_v35 = vshrl.u32 %v6682_v61, 16  ;;  %11750 = vst [vmem:[#allocation65_spill] sm:$0xff] %v9995_v32  ;;  %11828 = vst [vmem:[#allocation84_spill] sm:$0xff] %v10280_v18 }
 0x17d   : > { %vm11749_vm6 = vsmask.f32 4352  ;;  %v6659_v54 = vcombine.low %v1347_v45, %v1348_v15  ;;  %v2758_v33 = vsel %vm11469_vm14, %v2178_v25, 0  ;;  %v2759_v36 = vsel %vm11468_vm13, %v2179_v2, 0  ;;  %v9999_v45 = vpop.f32.mrf.mxu0 }
 0x17e   : > { %v1895_v23 = vsel %vm11749_vm6, %v9878_v10, %v1894_v41  ;;  %vm11751_vm0 = vmmov %vm11749_vm6  ;;  %v2967_v7 = vrot.slane %v2965_v42, 1  ;;  %v2973_v22 = vshll.u32 %v6683_v56, 16  ;;  %v6684_v8 = vcombine.low %v2758_v33, %v2759_v36  ;;  %11752 = vst [vmem:[#allocation66_spill] sm:$0xff] %v9999_v45  ;;  %v10003_v33 = vpop.f32.mrf.mxu1 }
 0x17f   : > { %7508 = vmatprep.mubr.bf16.mxu1 %v1895_v23  ;;  %v1904_v3 = vsel %vm11751_vm0, %v1894_v41, %v1903_v34  ;;  %v1906_v61 = vshrl.u32 %v6659_v54, 16  ;;  %v1909_v30 = vshll.u32 %v6659_v54, 16  ;;  %v2977_v44 = vshrl.u32 %v6683_v56, 16  ;;  %11754 = vst [vmem:[#allocation67_spill] sm:$0xff] %v10003_v33  ;;  %v8033_v33 = vld [vmem:[#allocation2 + $0x20] sm:$0xf] }
 0x180   : > { %7509 = vmatmul.mubr.bf16.gmra.mxu1 %v1904_v3  ;;  %v1915_v10 = vshrl.u32 %v9944_v6, 16  ;;  %vm11753_vm6 = vsmask.f32 7424  ;;  %v2971_v50 = vor.u32 %v2969_v35, %v2967_v7  ;;  %v2975_v2 = vrot.slane %v2973_v22, 1 }
 0x181   : > { %v2968_v25 = vsel %vm11753_vm6, %v2963_v58, %v2967_v7  ;;  %v2981_v15 = vshll.u32 %v6684_v8, 16  ;;  %v1908_v23 = vrot.slane %v1906_v61, 3  ;;  %v1911_v32 = vrot.slane %v1909_v30, 4  ;;  %vm11755_vm0 = vmmov %vm11753_vm6  ;;  %v10009_v61 = vpop.f32.mrf.mxu0  ;;  %v10011_v30 = vld [vmem:[#allocation2 + $0x48] sm:$0xf] }
 0x182   : > { %7556 = vmatprep.mubr.bf16.mxu0 %v2968_v25  ;;  %v1917_v41 = vrot.slane %v1915_v10, 3  ;;  %v1918_v42 = vshll.u32 %v9944_v6, 16  ;;  %v2976_v54 = vsel %vm11755_vm0, %v2971_v50, %v2975_v2  ;;  %v2979_v56 = vor.u32 %v2977_v44, %v2975_v2  ;;  %11756 = vst [vmem:[#allocation68_spill] sm:$0xff] %v10009_v61  ;;  %vm11757_vm6 = vmmov %vm11755_vm0 }
 0x183   : > { %v2983_v36 = vrot.slane %v2981_v15, 1  ;;  %v6685_v3 = vcombine.low %v9971_v11, %v9971_v11  ;;  %7557 = vmatmul.mubr.bf16.gmra.mxu0 %v2976_v54  ;;  %v1912_v58 = vor.u32 %v1911_v32, %v1908_v23  ;;  %v2985_v7 = vshrl.u32 %v6684_v8, 16  ;;  %v10017_v8 = vld [vmem:[#allocation2 + $0x24] sm:$0xf]  ;;  %v10019_v15 = vpop.f32.mrf.mxu1 }
 0x184   : > { %v1920_v35 = vrot.slane %v1918_v42, 4  ;;  %v3416_v22 = vshrl.u32 %v8714_v27, 16  ;;  %v3419_v25 = vshll.u32 %v8714_v27, 16  ;;  %v3424_v44 = vshrl.u32 %v8736_v60, 16  ;;  %11759 = vst [vmem:[#allocation69_spill] sm:$0xff] %v10019_v15 }
 0x185   : > { %v2984_v6 = vsel %vm11757_vm6, %v2979_v56, %v2983_v36  ;;  %v2989_v10 = vshll.u32 %v6685_v3, 16  ;;  %vm11758_vm0 = vsmask.f32 4352  ;;  %v2987_v32 = vor.u32 %v2985_v7, %v2983_v36  ;;  %v10022_v3 = vld [vmem:[#allocation2 + $0x2c] sm:$0xf]  ;;  %v10032_v7 = vpop.f32.mrf.mxu0 }
 0x186   : > { %v1913_v50 = vsel %vm11758_vm0, %v1903_v34, %v1912_v58  ;;  %7560 = vmatprep.mubr.bf16.mxu0 %v2984_v6  ;;  %v1921_v11 = vor.u32 %v1920_v35, %v1917_v41  ;;  %v3418_v2 = vrot.slane %v3416_v22, 3  ;;  %v3421_v42 = vrot.slane %v3419_v25, 4  ;;  %vm11760_vm6 = vmmov %vm11758_vm0  ;;  %v10030_v35 = vld [vmem:[#allocation2 + $0x34] sm:$0xf]  ;;  %11761 = vst [vmem:[#allocation70_spill] sm:$0xff] %v10032_v7 }
 0x187   : > { %7512 = vmatprep.mubr.bf16.mxu1 %v1913_v50  ;;  %v2991_v23 = vrot.slane %v2989_v10, 1  ;;  %v3426_v54 = vrot.slane %v3424_v44, 3  ;;  %v3427_v56 = vshll.u32 %v8736_v60, 16  ;;  %v3433_v41 = vshrl.u32 %v8791_v63, 16  ;;  %v8030_v6 = vld [vmem:[#allocation2 + $0xc] sm:$0xf] }
 0x188   : > { %v1922_v34 = vsel %vm11760_vm6, %v1912_v58, %v1921_v11  ;;  %v3436_v36 = vshll.u32 %v8791_v63, 16  ;;  %vm11762_vm0 = vsmask.f32 7424  ;;  %v8031_v10 = vld [vmem:[#allocation2 + $0x10] sm:$0xf]  ;;  %v3290_v44 = vsel %vm9001_vm4, %v10017_v8, 0 }
 0x189   : > { %7513 = vmatmul.mubr.bf16.gmra.mxu1 %v1922_v34  ;;  %v2992_v22 = vsel %vm11762_vm0, %v2987_v32, %v2991_v23  ;;  %v3429_v60 = vrot.slane %v3427_v56, 4  ;;  %v6719_v25 = vcombine.low %v8030_v6, %v8031_v10  ;;  %v10038_v58 = vld [vmem:[#allocation2 + $0x50] sm:$0xf]  ;;  %v3435_v50 = vrot.slane %v3433_v41, 3  ;;  %v10047_v23 = vpop.f32.mrf.mxu1  ;;  %v8032_v15 = vld [vmem:[#allocation2 + $0x1c] sm:$0xf] }
 0x18a   : > { %v3438_v11 = vrot.slane %v3436_v36, 4  ;;  %v11763_v63 = vsel %vm8932_vm15, %v8945_v43, 0  ;;  %vm11764_vm6 = vnez %v11573_v38  ;;  %11765 = vst [vmem:[#allocation71_spill] sm:$0xff] %v10047_v23  ;;  %v3422_v56 = vor.u32 %v3421_v42, %v3418_v2  ;;  %v10060_v2 = vld [vmem:[#allocation2 + $0x3c] sm:$0xf]  ;;  %v10062_v42 = vpop.f32.mrf.mxu0 }
 0x18b   : > { %v6697_v27 = vcombine.low %v11763_v63, %v3290_v44  ;;  %v3292_v32 = vsel %vm11764_vm6, %v10022_v3, 0  ;;  %v3430_v34 = vor.u32 %v3429_v60, %v3426_v54  ;;  %vm11766_vm0 = vnez %v11571_v0  ;;  %7561 = vmatmul.mubr.bf16.gmra.mxu0 %v2992_v22  ;;  %11771 = vst [vmem:[#allocation72_spill] sm:$0xff] %v10062_v42  ;;  %v10067_v54 = vld [vmem:[#allocation2 + $0x58] sm:$0xf]  ;;  %v10221_v38 = vld [vmem:[#allocation2 + $0x74] sm:$0xf] }
 0x18c   : > { %v11767_v6 = vsel %vm11766_vm0, %v9030_v40, 0  ;;  %vm11768_vm13 = vnez %v11588_v1  ;;  %v3439_v43 = vor.u32 %v3438_v11, %v3435_v50  ;;  %vm11769_vm14 = vnez %v11580_v57  ;;  %7628 = vmatprep.mubr.bf16.mxu0 %v6719_v25 }
 0x18d   : > { %v6698_v10 = vcombine.low %v11767_v6, %v3292_v32  ;;  %v3294_v41 = vsel %vm11768_vm13, %v10030_v35, 0  ;;  %v3442_v36 = vshrl.u32 %v6697_v27, 16  ;;  %v3445_v44 = vshll.u32 %v6697_v27, 16  ;;  %v10071_v6 = vld [vmem:[#allocation2 + $0x44] sm:$0xf] }
 0x18e   : > { %v11770_v63 = vsel %vm11769_vm14, %v9103_v4, 0  ;;  %vm11772_vm9 = vnez %v11644_v20  ;;  %vm11773_vm7 = vsmask.f32 4352  ;;  %vm11778_vm13 = vnez %v11591_v49 }
 0x18f   : > { %v6699_v61 = vcombine.low %v11770_v63, %v3294_v41  ;;  %v3431_v22 = vsel %vm11773_vm7, %v3422_v56, %v3430_v34  ;;  %v3451_v60 = vshrl.u32 %v6698_v10, 16  ;;  %v3454_v27 = vshll.u32 %v6698_v10, 16  ;;  %vm11774_vm10 = vmmov %vm11773_vm7  ;;  %v10073_v41 = vpop.f32.mrf.mxu1  ;;  %v7940_v63 = vld [vmem:[%s11344_s3 + $0x170] sm:$0xff]   ;;  %v10084_v10 = vld [vmem:[#allocation2 + $0x60] sm:$0xf] }
 0x190   : > { %7580 = vmatprep.mubr.bf16.mxu1 %v3431_v22  ;;  %v3440_v50 = vsel %vm11774_vm10, %v3430_v34, %v3439_v43  ;;  %v3444_v4 = vrot.slane %v3442_v36, 3  ;;  %v3447_v11 = vrot.slane %v3445_v44, 4  ;;  %11775 = vst [vmem:[#allocation73_spill] sm:$0xff] %v10073_v41  ;;  %vm11776_vm7 = vnez %v11601_v12  ;;  %v10171_v12 = vld [vmem:[#allocation2 + $0x6c] sm:$0xf] }
 0x191   : > { %v3460_v32 = vshrl.u32 %v6699_v61, 16  ;;  %v3453_v40 = vrot.slane %v3451_v60, 3  ;;  %v3456_v23 = vrot.slane %v3454_v27, 4  ;;  %v3463_v56 = vshll.u32 %v6699_v61, 16  ;;  %v10090_v60 = vld [vmem:[#allocation2 + $0x4c] sm:$0xf]  ;;  %v10092_v61 = vpop.f32.mrf.mxu0  ;;  %7581 = vmatmul.mubr.bf16.vlgmr.msra.gmra.mxu1 %v3440_v50 }
 0x192   : > { %v3296_v25 = vsel %vm11776_vm7, %v10060_v2, 0  ;;  %vm11777_vm10 = vnez %v11650_v62  ;;  %v3448_v36 = vor.u32 %v3447_v11, %v3444_v4  ;;  %v11779_v22 = vsel %vm11778_vm13, %v9234_v59, 0  ;;  %11780 = vst [vmem:[#allocation74_spill] sm:$0xff] %v10092_v61  ;;  %v8034_v11 = vld [vmem:[%s11344_s3 + $0x178] sm:$0xff]   ;;  %v7943_v50 = vld [vmem:[%s11344_s3 + $0x1b0] sm:$0xff]  }
 0x193   : > { %v3462_v44 = vrot.slane %v3460_v32, 3  ;;  %v6700_v41 = vcombine.low %v11779_v22, %v3296_v25  ;;  %v3457_v27 = vor.u32 %v3456_v23, %v3453_v40  ;;  %v6721_v14 = vcombine.low %v8032_v15, %v8033_v33  ;;  %7661 = vmatpush3.bf16.msra.mxu1 %v8034_v11  ;;  %v11783_v32 = vld [vmem:[#allocation26_spill] sm:$0xff]  ;;  %v11785_v33 = vld [vmem:[#allocation27_spill] sm:$0xff]  ;;  %v10110_v22 = vpop.f32.mrf.mxu1  ;;  %v8036_v61 = vld [vmem:[#allocation2 + $0x28] sm:$0xf] }
 0x194   : > { %v3465_v55 = vrot.slane %v3463_v56, 4  ;;  %vm11781_vm7 = vnez %v11631_v16  ;;  %vm11782_vm6 = vsmask.f32 4352  ;;  %vm11784_vm4 = vnez %v11783_v32  ;;  %v10108_v25 = vld [vmem:[#allocation2 + $0x54] sm:$0xf]  ;;  %11787 = vst [vmem:[#allocation27_spill] sm:$0xff] %v10110_v22  ;;  %7662 = vmatprep.subr.bf16.mxu1 %v7940_v63 }
 0x195   : > { %v3298_v4 = vsel %vm11781_vm7, %v10071_v6, 0  ;;  %v3449_v59 = vsel %vm11782_vm6, %v3439_v43, %v3448_v36  ;;  %v3469_v23 = vshrl.u32 %v6700_v41, 16  ;;  %v3472_v40 = vshll.u32 %v6700_v41, 16  ;;  %v7944_v41 = vld [vmem:[%s11344_s3 + $0x168] sm:$0xff]  }
 0x196   : > { %v11786_v15 = vsel %vm11784_vm4, %v11785_v33, 0  ;;  %vm11788_vm7 = vnez %v11674_v47  ;;  %7584 = vmatprep.mubr.bf16.mxu1 %v3449_v59  ;;  %v3458_v43 = vsel %vm11782_vm6, %v3448_v36, %v3457_v27  ;;  %v3466_v34 = vor.u32 %v3465_v55, %v3462_v44  ;;  %v11789_v33 = vld [vmem:[#allocation32_spill] sm:$0xff]  ;;  %v10127_v36 = vpop.f32.mrf.mxu0  ;;  %v8035_v55 = vld [vmem:[%s11344_s3 + $0x1b8] sm:$0xff]  }
 0x197   : > { %v6701_v56 = vcombine.low %v11786_v15, %v3298_v4  ;;  %v3305_v11 = vsel %vm11788_vm7, %v10084_v10, 0  ;;  %vm11790_vm2 = vnez %v11789_v33  ;;  %v11791_v15 = vld [vmem:[#allocation3_spill] sm:$0xff]  ;;  %v3471_v53 = vrot.slane %v3469_v23, 3  ;;  %7663 = vmatpush3.bf16.msra.mxu1 %v7940_v63  ;;  %v7947_v63 = vld [vmem:[%s11344_s3 + $0x1a8] sm:$0xff]  }
 0x198   : > { %v3300_v4 = vsel %vm11790_vm2, %v10090_v60, 0  ;;  %v11793_v22 = vcombine.low %v11791_v15, %v11792_v24  ;;  %v3474_v9 = vrot.slane %v3472_v40, 4  ;;  %11794 = vst [vmem:[#allocation3_spill] sm:$0xff] %v10127_v36  ;;  %v3467_v44 = vsel %vm11782_vm6, %v3457_v27, %v3466_v34  ;;  %7664 = vmatprep.subr.bf16.mxu1 %v7944_v41  ;;  %v10162_v7 = vpop.f32.mrf.mxu0 }
 0x199   : > { %v3478_v46 = vshrl.u32 %v6701_v56, 16  ;;  %v3481_v59 = vshll.u32 %v6701_v56, 16  ;;  %v6722_v24 = vcombine.low %v10017_v8, %v8036_v61  ;;  %v11795_v23 = vsel %vm9358_vm5, %v10011_v30, 0  ;;  %v11796_v56 = vld [vmem:[#allocation35_spill] sm:$0xff]  ;;  %v10145_v8 = vld [vmem:[#allocation2 + $0x64] sm:$0xf]  ;;  %v10147_v61 = vpop.f32.mrf.mxu1  ;;  %7585 = vmatmul.mubr.bf16.gmra.mxu1 %v3458_v43 }
 0x19a   : > { %7629 = vmatmul.mubr.bf16.vlgmr.msra.gmra.mxu0 %v11793_v22  ;;  %v6702_v40 = vcombine.low %v11795_v23, %v3300_v4  ;;  %vm11797_vm2 = vnez %v11796_v56  ;;  %v3475_v15 = vor.u32 %v3474_v9, %v3471_v53  ;;  %11799 = vst [vmem:[#allocation6_spill] sm:$0xff] %v10147_v61  ;;  %v8037_v4 = vld [vmem:[#allocation2 + $0x30] sm:$0xf]  ;;  %11803 = vst [vmem:[#allocation75_spill] sm:$0xff] %v10162_v7  ;;  %7588 = vmatprep.mubr.bf16.mxu1 %v3467_v44 }
 0x19b   : > { %7709 = vmatpush3.bf16.msra.mxu0 %v8035_v55  ;;  %7632 = vmatprep.mubr.bf16.mxu0 %v6721_v14  ;;  %v3302_v22 = vsel %vm11797_vm2, %v10108_v25, 0  ;;  %v3480_v36 = vrot.slane %v3478_v46, 3  ;;  %v3483_v55 = vrot.slane %v3481_v59, 4  ;;  %v11798_v14 = vsel %vm11772_vm9, %v10038_v58, 0  ;;  %v7948_v46 = vld [vmem:[%s11344_s3 + $0x160] sm:$0xff]   ;;  %v11800_v59 = vld [vmem:[#allocation38_spill] sm:$0xff] }
 0x19c   : > { %7710 = vmatprep.subr.bf16.mxu0 %v7943_v50  ;;  %v6703_v27 = vcombine.low %v11798_v14, %v3302_v22  ;;  %v6723_v23 = vcombine.low %v10022_v3, %v8037_v4  ;;  %v3487_v9 = vshrl.u32 %v6702_v40, 16  ;;  %v3490_v53 = vshll.u32 %v6702_v40, 16  ;;  %v10159_v14 = vld [vmem:[#allocation2 + $0x68] sm:$0xf]  ;;  %7665 = vmatpush3.bf16.msra.mxu1 %v7944_v41  ;;  %v7952_v41 = vld [vmem:[%s11344_s3 + $0x158] sm:$0xff]  }
 0x19d   : > { %vm11801_vm6 = vnez %v11800_v59  ;;  %vm11802_vm2 = vsmask.f32 4352  ;;  %v3484_v42 = vor.u32 %v3483_v55, %v3480_v36  ;;  %v11804_v40 = vsel %vm11777_vm10, %v10067_v54, 0  ;;  %7666 = vmatprep.subr.bf16.mxu1 %v7948_v46 }
 0x19e   : > { %v3304_v22 = vsel %vm11801_vm6, %v10125_v28, 0  ;;  %v3476_v61 = vsel %vm11802_vm2, %v3466_v34, %v3475_v15  ;;  %v3496_v3 = vshrl.u32 %v6703_v27, 16  ;;  %v3499_v4 = vshll.u32 %v6703_v27, 16  ;;  %v10177_v27 = vpop.f32.mrf.mxu1 }
 0x19f   : > { %7711 = vmatpush3.bf16.msra.mxu0 %v7943_v50  ;;  %v3489_v56 = vrot.slane %v3487_v9, 3  ;;  %v3492_v33 = vrot.slane %v3490_v53, 4  ;;  %v6704_v16 = vcombine.low %v11804_v40, %v3304_v22  ;;  %vm11805_vm6 = vnez %v11687_v31  ;;  %v7951_v50 = vld [vmem:[%s11344_s3 + $0x1a0] sm:$0xff]   ;;  %11806 = vst [vmem:[#allocation76_spill] sm:$0xff] %v10177_v27  ;;  %v10188_v40 = vpop.f32.mrf.mxu0  ;;  %v4177_v31 = vld [vmem:[#allocation2 + $0xc] sm:$0xf] }
 0x1a0   : > { %v3306_v59 = vsel %vm11805_vm6, %v10145_v8, 0  ;;  %v3485_v34 = vsel %vm11802_vm2, %v3475_v15, %v3484_v42  ;;  %v3498_v36 = vrot.slane %v3496_v3, 3  ;;  %v3501_v43 = vrot.slane %v3499_v4, 4  ;;  %7712 = vmatprep.subr.bf16.mxu0 %v7947_v63  ;;  %11810 = vst [vmem:[#allocation77_spill] sm:$0xff] %v10188_v40  ;;  %7667 = vmatpush3.bf16.msra.mxu1 %v7948_v46  ;;  %v4182_v40 = vld [vmem:[#allocation2 + $0x20] sm:$0xf] }
 0x1a1   : > { %v6705_v55 = vcombine.low %v3305_v11, %v3306_v59  ;;  %vm11807_vm7 = vnez %v11677_v13  ;;  %v3493_v53 = vor.u32 %v3492_v33, %v3489_v56  ;;  %v3505_v44 = vshrl.u32 %v6704_v16, 16  ;;  %v11808_v11 = vld [vmem:[#allocation45_spill] sm:$0xff]  ;;  %7668 = vmatprep.subr.bf16.mxu1 %v7952_v41  ;;  %7589 = vmatmul.mubr.bf16.gmra.mxu1 %v3476_v61  ;;  %v7959_v61 = vld [vmem:[%s11344_s3 + $0x190] sm:$0xff]  }
 0x1a2   : > { %v3307_v9 = vsel %vm11807_vm7, %v10159_v14, 0  ;;  %v3508_v15 = vshll.u32 %v6704_v16, 16  ;;  %7633 = vmatmul.mubr.bf16.gmra.mxu0 %v6722_v24  ;;  %v3502_v22 = vor.u32 %v3501_v43, %v3498_v36  ;;  %vm11809_vm2 = vnez %v11808_v11  ;;  %v4181_v16 = vld [vmem:[#allocation2 + $0x1c] sm:$0xf]  ;;  %v8039_v11 = vld [vmem:[#allocation2 + $0x40] sm:$0xf]  ;;  %7592 = vmatprep.mubr.bf16.mxu1 %v3485_v34 }
 0x1a3   : > { %v3514_v3 = vshrl.u32 %v6705_v55, 16  ;;  %v3517_v4 = vshll.u32 %v6705_v55, 16  ;;  %v3308_v59 = vsel %vm11809_vm2, %v10171_v12, 0  ;;  %7636 = vmatprep.mubr.bf16.mxu0 %v6723_v23  ;;  %7713 = vmatpush3.bf16.msra.mxu0 %v7947_v63  ;;  %vm11811_vm6 = vsmask.f32 4352  ;;  %v10196_v55 = vpop.f32.mrf.mxu1  ;;  %v7956_v63 = vld [vmem:[%s11344_s3 + $0x150] sm:$0xff]  }
 0x1a4   : > { %v10191_v33 = vsel %vm11811_vm6, %v3484_v42, %v3493_v53  ;;  %v3507_v56 = vrot.slane %v3505_v44, 3  ;;  %v3510_v27 = vrot.slane %v3508_v15, 4  ;;  %v6706_v7 = vcombine.low %v3307_v9, %v3308_v59  ;;  %vm11812_vm7 = vmmov %vm11811_vm6  ;;  %7714 = vmatprep.subr.bf16.mxu0 %v7951_v50  ;;  %11813 = vst [vmem:[#allocation78_spill] sm:$0xff] %v10196_v55  ;;  %v7955_v42 = vld [vmem:[%s11344_s3 + $0x198] sm:$0xff]   ;;  %v10206_v44 = vld [vmem:[#allocation2 + $0x30] sm:$0xf]  ;;  %v10211_v59 = vpop.f32.mrf.mxu0  ;;  %7669 = vmatpush3.bf16.msra.mxu1 %v7952_v41 }
 0x1a5   : > { %v10194_v24 = vsel %vm11812_vm7, %v3493_v53, %v3502_v22  ;;  %v3516_v36 = vrot.slane %v3514_v3, 3  ;;  %v3519_v43 = vrot.slane %v3517_v4, 4  ;;  %v10204_v53 = vld [vmem:[#allocation2 + $0x28] sm:$0xf]  ;;  %v10208_v15 = vld [vmem:[#allocation2 + $0x38] sm:$0xf]  ;;  %vm11816_vm7 = vmmov %vm11811_vm6  ;;  %7670 = vmatprep.subr.bf16.mxu1 %v7956_v63  ;;  %v6726_v29 = vcombine.low %v10071_v6, %v10011_v30 }
 0x1a6   : > { %v3511_v23 = vor.u32 %v3510_v27, %v3507_v56  ;;  %v3523_v46 = vshrl.u32 %v6706_v7, 16  ;;  %v3526_v9 = vshll.u32 %v6706_v7, 16  ;;  %v8038_v3 = vld [vmem:[#allocation2 + $0x38] sm:$0xf]  ;;  %11814 = vst [vmem:[#allocation79_spill] sm:$0xff] %v10211_v59  ;;  %v6725_v7 = vcombine.low %v10060_v2, %v8039_v11  ;;  %v11823_v34 = vld [vmem:[#allocation9_spill] sm:$0xff] }
 0x1a7   : > { %v6724_v4 = vcombine.low %v10030_v35, %v8038_v3  ;;  %v3520_v27 = vor.u32 %v3519_v43, %v3516_v36  ;;  %v10213_v56 = vld [vmem:[#allocation2 + $0x40] sm:$0xf]  ;;  %v10215_v55 = vld [vmem:[#allocation2 + $0x48] sm:$0xf]  ;;  %7715 = vmatpush3.bf16.msra.mxu0 %v7951_v50  ;;  %v10223_v35 = vld [vmem:[#allocation2 + $0x50] sm:$0xf]  ;;  %v10233_v50 = vpop.f32.mrf.mxu1  ;;  %v6727_v30 = vcombine.low %v10090_v60, %v10038_v58 }
 0x1a8   : > { %11815 = vst [vmem:[#allocation80_spill] sm:$0xff] %v10215_v55  ;;  %v10219_v45 = vsel %vm11816_vm7, %v3502_v22, %v3511_v23  ;;  %v3525_v48 = vrot.slane %v3523_v46, 3  ;;  %v3528_v1 = vrot.slane %v3526_v9, 4  ;;  %11817 = vst [vmem:[#allocation81_spill] sm:$0xff] %v10223_v35  ;;  %v10231_v2 = vld [vmem:[#allocation2 + $0x7c] sm:$0xf]  ;;  %7716 = vmatprep.subr.bf16.mxu0 %v7955_v42  ;;  %7671 = vmatpush3.bf16.msra.mxu1 %v7956_v63 }
 0x1a9   : > { %v10226_v36 = vsel %vm11811_vm6, %v3511_v23, %v3520_v27  ;;  %11818 = vst [vmem:[#allocation82_spill] sm:$0xff] %v10233_v50  ;;  %v11819_v22 = vld [vmem:[#allocation10_spill] sm:$0xff]  ;;  %v11821_v43 = vld [vmem:[#allocation8_spill] sm:$0xff]  ;;  %vm11824_vm10 = vcmp.ne.s16.totalorder %v11823_v34, 0  ;;  %v10247_v23 = vld [vmem:[#allocation2 + $0x58] sm:$0xf]  ;;  %v10303_v21 = vpop.f32.mrf.mxu1  ;;  %7593 = vmatmul.mubr.bf16.gmra.mxu1 %v10191_v33 }
 0x1aa   : > { %vm11820_vm7 = vcmp.ne.s16.totalorder %v11819_v22, 0  ;;  %vm11822_vm2 = vcmp.ne.s16.totalorder %v11821_v43, 0  ;;  %v10245_v41 = vsel %vm11824_vm10, %v4182_v40, 0  ;;  %11825 = vst [vmem:[#allocation8_spill] sm:$0xff] %v10247_v23  ;;  %v10249_v9 = vld [vmem:[#allocation2 + $0x60] sm:$0xf]  ;;  %v10253_v50 = vor.u32 %v3528_v1, %v3525_v48  ;;  %7637 = vmatmul.mubr.bf16.gmra.mxu0 %v6724_v4  ;;  %v10272_v22 = vpop.f32.mrf.mxu0  ;;  %vm11829_vm10 = vmmov %vm11811_vm6  ;;  %7596 = vmatprep.mubr.bf16.mxu1 %v10194_v24 }
 0x1ab   : > { %v10237_v11 = vsel %vm11820_vm7, %v4177_v31, 0  ;;  %v10241_v46 = vsel %vm11822_vm2, %v4181_v16, 0  ;;  %v10251_v3 = vld [vmem:[#allocation2 + $0x70] sm:$0xf]  ;;  %v7960_v31 = vld [vmem:[%s11344_s3 + $0x148] sm:$0xff]   ;;  %v3310_v1 = vsel %vm9870_vm1, %v10221_v38, 0  ;;  %7640 = vmatprep.mubr.bf16.mxu0 %v6725_v7  ;;  %7717 = vmatpush3.bf16.msra.mxu0 %v7955_v42  ;;  %vm11831_vm2 = vnez %v11650_v62  ;;  %v10354_v58 = vpop.f32.mrf.mxu1 }
 0x1ac   : > { %v10261_v40 = vld [vmem:[#allocation2 + $0x68] sm:$0xf]  ;;  %v10263_v43 = vld [vmem:[#allocation2 + $0x70] sm:$0xf]  ;;  %v10265_v34 = vld [vmem:[#allocation2 + $0x78] sm:$0xf]  ;;  %v10284_v4 = vsel %vm11829_vm10, %v3520_v27, %v10253_v50  ;;  %7718 = vmatprep.subr.bf16.mxu0 %v7959_v61  ;;  %7672 = vmatprep.subr.bf16.mxu1 %v7960_v31  ;;  %v10329_v55 = vpop.f32.mrf.mxu0  ;;  %vm11833_vm6 = vnez %v11674_v47  ;;  %vm11834_vm7 = vnez %v11677_v13  ;;  %vm11835_vm10 = vnez %v11732_v37 }
 0x1ad   : > { %11826 = vst [vmem:[#allocation9_spill] sm:$0xff] %v10263_v43  ;;  %v10270_v48 = vld [vmem:[#allocation2 + $0x84] sm:$0xf]  ;;  %11827 = vst [vmem:[#allocation83_spill] sm:$0xff] %v10272_v22  ;;  %v3312_v22 = vsel %vm9874_vm12, %v10231_v2, 0  ;;  %v3309_v27 = vsel %vm9781_vm8, %v10251_v3, 0  ;;  %7673 = vmatpush3.bf16.msra.mxu1 %v7960_v31  ;;  %v11887_v49 = vcombine.low %v10221_v38, %v10265_v34 }
 0x1ae   : > { %v10301_v7 = vld [vmem:[#allocation2 + $0x80] sm:$0xf]  ;;  %11830 = vst [vmem:[#allocation85_spill] sm:$0xff] %v10303_v21  ;;  %v3311_v59 = vsel %vm9800_vm11, %v10265_v34, 0  ;;  %v6707_v16 = vcombine.low %v3309_v27, %v3310_v1  ;;  %v3314_v42 = vsel %vm9954_vm3, %v10270_v48, 0  ;;  %v7963_v35 = vld [vmem:[%s11344_s3 + $0x188] sm:$0xff]   ;;  %vm11844_vm11 = vnez %v11569_v51 }
 0x1af   : > { %v7964_v63 = vld [vmem:[%s11344_s3 + $0x140] sm:$0xff]   ;;  %v6708_v19 = vcombine.low %v3311_v59, %v3312_v22  ;;  %11832 = vst [vmem:[#allocation86_spill] sm:$0xff] %v10329_v55  ;;  %v4763_v23 = vld [vmem:[#allocation2 + $0x90] sm:$0xf]  ;;  %v3313_v1 = vsel %vm11835_vm10, %v10301_v7, 0  ;;  %7719 = vmatpush3.bf16.msra.mxu0 %v7959_v61  ;;  %vm11836_vm3 = vcmp.ne.s16.totalorder %v9900_v5, 0  ;;  %v10375_v5 = vcombine.low %v10241_v46, %v10245_v41 }
 0x1b0   : > { %v10325_v27 = vld [vmem:[#allocation2 + $0x80] sm:$0xf]  ;;  %v3315_v59 = vsel %vm11836_vm3, %v10308_v26, 0  ;;  %v6709_v22 = vcombine.low %v3313_v1, %v3314_v42  ;;  %v3532_v60 = vshrl.u32 %v6707_v16, 16  ;;  %7720 = vmatprep.subr.bf16.mxu0 %v7963_v35  ;;  %7674 = vmatprep.subr.bf16.mxu1 %v7964_v63  ;;  %v11839_v6 = vld [vmem:[#allocation5_spill] sm:$0xff]  ;;  %v10362_v24 = vld [vmem:[%s11344_s3 + $0x1f8] sm:$0xff]  }
 0x1b1   : > { %v7967_v33 = vld [vmem:[%s11344_s3 + $0x180] sm:$0xff]   ;;  %v4905_v55 = vshrl.u32 %v11839_v6, 16  ;;  %v4908_v37 = vshll.u32 %v11839_v6, 16  ;;  %v10369_v42 = vsel %vm11836_vm3, %v4763_v23, 0  ;;  %v3535_v1 = vshll.u32 %v6707_v16, 16  ;;  %7675 = vmatpush3.bf16.msra.mxu1 %v7964_v63  ;;  %v10382_v23 = vpop.f32.mrf.mxu1 }
 0x1b2   : > { %v11837_v21 = vld [vmem:[#allocation4_spill] sm:$0xff]  ;;  %7641 = vmatmul.mubr.bf16.gmra.mxu0 %v6726_v29  ;;  %v6710_v18 = vcombine.low %v3315_v59, %v3315_v59  ;;  %v3544_v6 = vshll.u32 %v6708_v19, 16  ;;  %v3550_v13 = vshrl.u32 %v6709_v22, 16  ;;  %v10380_v29 = vld [vmem:[%s11344_s3 + $0x238] sm:$0xff]   ;;  %11840 = vst [vmem:[#allocation5_spill] sm:$0xff] %v10382_v23  ;;  %7756 = vmatprep.subr.bf16.mxu1 %v10362_v24  ;;  %v11947_v62 = vsel %vm11833_vm6, %v10261_v40, 0 }
 0x1b3   : > { %v4897_v32 = vshrl.u32 %v11837_v21, 16  ;;  %11838 = vst [vmem:[#allocation4_spill] sm:$0xff] %v10354_v58  ;;  %v4900_v61 = vshll.u32 %v11837_v21, 16  ;;  %v3541_v21 = vshrl.u32 %v6708_v19, 16  ;;  %v10371_v58 = vpop.f32.mrf.mxu0  ;;  %7644 = vmatprep.mubr.bf16.mxu0 %v6727_v30  ;;  %7721 = vmatpush3.bf16.msra.mxu0 %v7963_v35  ;;  %v4907_v52 = vrot.slane %v4905_v55, 3  ;;  %v11891_v38 = vld [vmem:[#allocation80_spill] sm:$0xff] }
 0x1b4   : > { %7722 = vmatprep.subr.bf16.mxu0 %v7967_v33  ;;  %v4910_v31 = vrot.slane %v4908_v37, 4  ;;  %v6728_v19 = vcombine.low %v10108_v25, %v10067_v54  ;;  %v3534_v35 = vrot.slane %v3532_v60, 3  ;;  %v3553_v55 = vshll.u32 %v6709_v22, 16  ;;  %v4738_v63 = vld [vmem:[#allocation2 + $0x2c] sm:$0xf]  ;;  %7597 = vmatmul.mubr.bf16.gmra.mxu1 %v10219_v45  ;;  %v11841_v54 = vld [vmem:[#allocation7_spill] sm:$0xff]  ;;  %v10401_v45 = vpop.f32.mrf.mxu1 }
 0x1b5   : > { %v4899_v17 = vrot.slane %v4897_v32, 3  ;;  %v4902_v43 = vrot.slane %v4900_v61, 4  ;;  %v6729_v32 = vcombine.low %v10125_v28, %v10084_v10  ;;  %v3537_v37 = vrot.slane %v3535_v1, 4  ;;  %v10389_v30 = vpop.f32.mrf.mxu0  ;;  %v4178_v23 = vld [vmem:[#allocation2 + $0x10] sm:$0xf]  ;;  %7600 = vmatprep.mubr.bf16.mxu1 %v10226_v36  ;;  %11843 = vst [vmem:[#allocation7_spill] sm:$0xff] %v10401_v45 }
 0x1b6   : > { %v3543_v46 = vrot.slane %v3541_v21, 3  ;;  %v4911_v16 = vor.u32 %v4910_v31, %v4907_v52  ;;  %v3546_v59 = vrot.slane %v3544_v6, 4  ;;  %v3559_v61 = vshrl.u32 %v6710_v18, 16 }
 0x1b7   : > { %v4903_v41 = vor.u32 %v4902_v43, %v4899_v17  ;;  %7723 = vmatpush3.bf16.msra.mxu0 %v7967_v33  ;;  %v4914_v25 = vshrl.u32 %v11841_v54, 16  ;;  %v4917_v28 = vshll.u32 %v11841_v54, 16  ;;  %v6730_v10 = vcombine.low %v10145_v8, %v10159_v14  ;;  %v4179_v33 = vld [vmem:[#allocation2 + $0x14] sm:$0xf]  ;;  %v11845_v8 = vld [vmem:[#allocation12_spill] sm:$0xff] }
 0x1b8   : > { %v3552_v17 = vrot.slane %v3550_v13, 3  ;;  %v3562_v52 = vshll.u32 %v6710_v18, 16  ;;  %vm11842_vm3 = vsmask.f32 4352  ;;  %7804 = vmatprep.subr.bf16.mxu0 %v10380_v29  ;;  %v3555_v22 = vrot.slane %v3553_v55, 4  ;;  %v10413_v55 = vpop.f32.mrf.mxu0 }
 0x1b9   : > { %v10398_v43 = vsel %vm11842_vm3, %v4903_v41, %v4911_v16  ;;  %v4916_v60 = vrot.slane %v4914_v25, 3  ;;  %v4919_v31 = vrot.slane %v4917_v28, 4  ;;  %v4771_v1 = vsel %vm11844_vm11, %v4738_v63, 0  ;;  %v4180_v18 = vld [vmem:[#allocation2 + $0x18] sm:$0xf]  ;;  %11848 = vst [vmem:[#allocation12_spill] sm:$0xff] %v10413_v55  ;;  %v7486_v63 = vpop.f32.mrf.mxu1 }
 0x1ba   : > { %7645 = vmatmul.mubr.bf16.gmra.mxu0 %v6728_v19  ;;  %v3538_v36 = vor.u32 %v3537_v37, %v3534_v35  ;;  %v6731_v13 = vcombine.low %v10171_v12, %v10251_v3  ;;  %vm11846_vm3 = vcmp.ne.s16.totalorder %v11845_v8, 0  ;;  %v11847_v21 = vsel %vm8932_vm15, %v10204_v53, 0  ;;  %v10419_v12 = vld [vmem:[#allocation2 + $0x34] sm:$0xf]  ;;  %v4742_v54 = vld [vmem:[#allocation2 + $0x3c] sm:$0xf] }
 0x1bb   : > { %v4211_v14 = vsel %vm11846_vm3, %v4178_v23, 0  ;;  %v6771_v6 = vcombine.low %v11847_v21, %v4771_v1  ;;  %7648 = vmatprep.mubr.bf16.mxu0 %v6729_v32  ;;  %v3547_v41 = vor.u32 %v3546_v59, %v3543_v46  ;;  %v10417_v19 = vrot.slane %v3559_v61, 3  ;;  %11849 = vst [vmem:[#allocation87_spill] sm:$0xff] %v10419_v12  ;;  %v11850_v23 = vld [vmem:[#allocation13_spill] sm:$0xff]  ;;  %v11852_v32 = vld [vmem:[#allocation14_spill] sm:$0xff] }
 0x1bc   : > { %v4920_v35 = vor.u32 %v4919_v31, %v4916_v60  ;;  %v10421_v3 = vrot.slane %v3562_v52, 4  ;;  %vm11851_vm11 = vcmp.ne.s16.totalorder %v11850_v23, 0  ;;  %v10425_v25 = vor.u32 %v3555_v22, %v3552_v17  ;;  %v7534_v31 = vpop.f32.mrf.mxu0  ;;  %7601 = vmatmul.mubr.bf16.gmra.mxu1 %v10284_v4  ;;  %v4183_v22 = vld [vmem:[#allocation2 + $0x24] sm:$0xf]  ;;  %v11857_v1 = vld [vmem:[#allocation61_spill] sm:$0xff] }
 0x1bd   : > { %v4212_v39 = vsel %vm11851_vm11, %v4179_v33, 0  ;;  %v4923_v37 = vshrl.u32 %v6771_v6, 16  ;;  %v4926_v53 = vshll.u32 %v6771_v6, 16  ;;  %vm11853_vm15 = vcmp.ne.s16.totalorder %v11852_v32, 0  ;;  %v4184_v6 = vld [vmem:[#allocation2 + $0x28] sm:$0xf] }
 0x1be   : > { %v4213_v46 = vsel %vm11853_vm15, %v4180_v18, 0  ;;  %v10430_v59 = vcombine.low %v10237_v11, %v4211_v14  ;;  %vm11854_vm3 = vsmask.f32 4352  ;;  %v2030_v11 = vadd.f32 %v7486_v63, %v11857_v1  ;;  %v11858_v18 = vld [vmem:[#allocation15_spill] sm:$0xff]  ;;  %v11860_v14 = vld [vmem:[#allocation20_spill] sm:$0xff] }
 0x1bf   : > { %v10433_v61 = vsel %vm11854_vm3, %v4911_v16, %v4920_v35  ;;  %vm11855_vm12 = vmmov %vm11854_vm3  ;;  %v4925_v33 = vrot.slane %v4923_v37, 3  ;;  %v4928_v60 = vrot.slane %v4926_v53, 4  ;;  %vm11859_vm15 = vnez %v11858_v18  ;;  %v2021_v53 = vpop.f32.mrf.mxu1 }
 0x1c0   : > { %v3539_v28 = vsel %vm11855_vm12, %v10253_v50, %v3538_v36  ;;  %vm11856_vm11 = vmmov %vm11854_vm3  ;;  %v4773_v16 = vsel %vm11859_vm15, %v10419_v12, 0  ;;  %vm11861_vm3 = vnez %v11860_v14  ;;  %v10447_v21 = vcombine.low %v4212_v39, %v4213_v46  ;;  %v11870_v14 = vld [vmem:[#allocation64_spill] sm:$0xff]  ;;  %v10485_v12 = vld [vmem:[#allocation2 + $0x4c] sm:$0xf] }
 0x1c1   : > { %v3548_v17 = vsel %vm11856_vm11, %v3538_v36, %v3547_v41  ;;  %v4775_v50 = vsel %vm11861_vm3, %v4742_v54, 0  ;;  %7604 = vmatprep.mubr.bf16.mxu1 %v3539_v28  ;;  %v4929_v37 = vor.u32 %v4928_v60, %v4925_v33  ;;  %v11862_v4 = vsel %vm11766_vm0, %v10206_v44, 0  ;;  %vm11864_vm12 = vmmov %vm11856_vm11  ;;  %v11866_v44 = vld [vmem:[#allocation16_spill] sm:$0xff]  ;;  %v3091_v60 = vpop.f32.mrf.mxu0  ;;  %11877 = vst [vmem:[#allocation15_spill] sm:$0xff] %v10485_v12 }
 0x1c2   : > { %v6772_v36 = vcombine.low %v11862_v4, %v4773_v16  ;;  %v11863_v63 = vsel %vm11769_vm14, %v10208_v15, 0  ;;  %v3557_v18 = vsel %vm11864_vm12, %v3547_v41, %v10425_v25  ;;  %v3565_v39 = vor.u32 %v10421_v3, %v10417_v19  ;;  %7649 = vmatmul.mubr.bf16.gmra.mxu0 %v6730_v10  ;;  %v4185_v15 = vld [vmem:[#allocation2 + $0x2c] sm:$0xf]  ;;  %v4186_v3 = vld [vmem:[#allocation2 + $0x30] sm:$0xf] }
 0x1c3   : > { %v6773_v1 = vcombine.low %v11863_v63, %v4775_v50  ;;  %v4345_v54 = vshll.u32 %v10430_v59, 16  ;;  %v10462_v46 = vadd.f32 %v7534_v31, %v2030_v11  ;;  %v4343_v0 = vshrl.u32 %v10430_v59, 16  ;;  %7652 = vmatprep.mubr.bf16.mxu0 %v6731_v13  ;;  %v11868_v41 = vld [vmem:[#allocation17_spill] sm:$0xff]  ;;  %v10475_v4 = vld [vmem:[#allocation2 + $0x44] sm:$0xf] }
 0x1c4   : > { %vm11867_vm0 = vcmp.ne.s16.totalorder %v11866_v44, 0  ;;  %v10468_v57 = vsel %vm11856_vm11, %v4920_v35, %v4929_v37  ;;  %v4932_v33 = vshrl.u32 %v6772_v36, 16  ;;  %vm11869_vm14 = vcmp.ne.s16.totalorder %v11868_v41, 0  ;;  %v7487_v35 = vpop.f32.mrf.mxu1  ;;  %11871 = vst [vmem:[#allocation14_spill] sm:$0xff] %v10475_v4  ;;  %7605 = vmatmul.mubr.bf16.gmra.mxu1 %v3548_v17  ;;  %v4188_v17 = vld [vmem:[#allocation2 + $0x38] sm:$0xf] }
 0x1c5   : > { %11865 = vst [vmem:[#allocation13_spill] sm:$0xff] %v10462_v46  ;;  %v4216_v28 = vsel %vm11867_vm0, %v4183_v22, 0  ;;  %v4217_v19 = vsel %vm11869_vm14, %v4184_v6, 0  ;;  %v4935_v16 = vshll.u32 %v6772_v36, 16  ;;  %v4941_v31 = vshrl.u32 %v6773_v1, 16  ;;  %v11872_v6 = vld [vmem:[#allocation18_spill] sm:$0xff]  ;;  %7608 = vmatprep.mubr.bf16.mxu1 %v3557_v18  ;;  %vm11882_vm0 = vmmov %vm11856_vm11 }
 0x1c6   : > { %v4944_v11 = vshll.u32 %v6773_v1, 16  ;;  %v4350_v10 = vshll.u32 %v10447_v21, 16  ;;  %v4358_v59 = vshll.u32 %v10375_v5, 16  ;;  %v2022_v22 = vadd.f32 %v2021_v53, %v11870_v14  ;;  %v11874_v1 = vld [vmem:[#allocation19_spill] sm:$0xff]  ;;  %v7535_v53 = vpop.f32.mrf.mxu0  ;;  %vm11883_vm11 = vmmov %vm11882_vm0 }
 0x1c7   : > { %v4934_v50 = vrot.slane %v4932_v33, 3  ;;  %v4347_v63 = vrot.slane %v4345_v54, 1  ;;  %v4937_v52 = vrot.slane %v4935_v16, 4  ;;  %v4943_v13 = vrot.slane %v4941_v31, 3  ;;  %v11878_v54 = vld [vmem:[#allocation66_spill] sm:$0xff]  ;;  %v11879_v31 = vld [vmem:[#allocation23_spill] sm:$0xff] }
 0x1c8   : > { %v4946_v51 = vrot.slane %v4944_v11, 4  ;;  %v10477_v55 = vcombine.low %v4216_v28, %v4217_v19  ;;  %vm11873_vm15 = vcmp.ne.s16.totalorder %v11872_v6, 0  ;;  %vm11875_vm3 = vcmp.ne.s16.totalorder %v11874_v1, 0 }
 0x1c9   : > { %v4218_v36 = vsel %vm11873_vm15, %v4185_v15, 0  ;;  %v4219_v46 = vsel %vm11875_vm3, %v4186_v3, 0  ;;  %v10483_v45 = vadd.f32 %v3091_v60, %v2022_v22  ;;  %v4938_v33 = vor.u32 %v4937_v52, %v4934_v50  ;;  %v4187_v22 = vld [vmem:[#allocation2 + $0x34] sm:$0xf]  ;;  %v11884_v50 = vld [vmem:[#allocation29_spill] sm:$0xff] }
 0x1ca   : > { %v4947_v14 = vor.u32 %v4946_v51, %v4943_v13  ;;  %v2033_v16 = vadd.f32 %v7487_v35, %v11878_v54  ;;  %vm11880_vm12 = vnez %v11879_v31  ;;  %v4352_v19 = vrot.slane %v4350_v10, 1  ;;  %7653 = vmatmul.mubr.bf16.gmra.mxu0 %v11887_v49  ;;  %v10540_v54 = vld [vmem:[#allocation2 + $0x5c] sm:$0xf] }
 0x1cb   : > { %11876 = vst [vmem:[#allocation61_spill] sm:$0xff] %v10483_v45  ;;  %v4777_v28 = vsel %vm11880_vm12, %v10475_v4, 0  ;;  %v4354_v15 = vshrl.u32 %v10447_v21, 16  ;;  %v4360_v11 = vrot.slane %v4358_v59, 1  ;;  %v11881_v60 = vsel %vm11778_vm13, %v10213_v56, 0  ;;  %vm11888_vm13 = vmmov %vm11882_vm0 }
 0x1cc   : > { %v6774_v3 = vcombine.low %v11881_v60, %v4777_v28  ;;  %v10497_v51 = vsel %vm11882_vm0, %v4929_v37, %v4938_v33  ;;  %v10500_v52 = vsel %vm11883_vm11, %v4938_v33, %v4947_v14  ;;  %vm11885_vm14 = vnez %v11884_v50  ;;  %v11895_v28 = vld [vmem:[#allocation22_spill] sm:$0xff]  ;;  %11902 = vst [vmem:[#allocation18_spill] sm:$0xff] %v10540_v54  ;;  %v4193_v45 = vld [vmem:[#allocation2 + $0x4c] sm:$0xf]  ;;  %v4196_v4 = vld [vmem:[#allocation2 + $0x58] sm:$0xf] }
 0x1cd   : > { %v4779_v18 = vsel %vm11885_vm14, %v10485_v12, 0  ;;  %v10505_v10 = vadd.f32 %v7535_v53, %v2033_v16  ;;  %v4366_v56 = vshll.u32 %v10477_v55, 16  ;;  %v10511_v21 = vcombine.low %v4218_v36, %v4219_v46  ;;  %v11893_v36 = vld [vmem:[#allocation21_spill] sm:$0xff] }
 0x1ce   : > { %v4950_v59 = vshrl.u32 %v6774_v3, 16  ;;  %v4953_v37 = vshll.u32 %v6774_v3, 16  ;;  %v3566_v35 = vsel %vm11888_vm13, %v10425_v25, %v3565_v39  ;;  %v11889_v13 = vcombine.low %v10231_v2, %v10301_v7  ;;  %v10528_v39 = vpop.f32.mrf.mxu1  ;;  %v4189_v2 = vld [vmem:[#allocation2 + $0x3c] sm:$0xf] }
 0x1cf   : > { %11886 = vst [vmem:[#allocation20_spill] sm:$0xff] %v10505_v10  ;;  %v6734_v53 = vcombine.low %v10270_v48, %v10308_v26  ;;  %v4348_v33 = vor.u32 %v4347_v63, %v4343_v0  ;;  %v11892_v34 = vsel %vm11784_vm4, %v11891_v38, 0  ;;  %v4356_v46 = vor.u32 %v4354_v15, %v4352_v19  ;;  %11897 = vst [vmem:[#allocation16_spill] sm:$0xff] %v10528_v39  ;;  %v10531_v63 = vld [vmem:[#allocation2 + $0x54] sm:$0xf]  ;;  %v11921_v39 = vld [vmem:[#allocation72_spill] sm:$0xff] }
 0x1d0   : > { %7656 = vmatprep.mubr.bf16.mxu0 %v11889_v13  ;;  %v6775_v16 = vcombine.low %v11892_v34, %v4779_v18  ;;  %vm11894_vm15 = vcmp.ne.s16.totalorder %v11893_v36, 0  ;;  %vm11896_vm3 = vcmp.ne.s16.totalorder %v11895_v28, 0  ;;  %v4952_v7 = vrot.slane %v4950_v59, 3  ;;  %11898 = vst [vmem:[#allocation17_spill] sm:$0xff] %v10531_v63  ;;  %v4190_v18 = vld [vmem:[#allocation2 + $0x40] sm:$0xf]  ;;  %v7490_v49 = vpop.f32.mrf.mxu1  ;;  %7609 = vmatmul.mubr.bf16.gmra.mxu1 %v3566_v35 }
 0x1d1   : > { %v4220_v31 = vsel %vm11894_vm15, %v4187_v22, 0  ;;  %v4221_v25 = vsel %vm11896_vm3, %v4188_v17, 0  ;;  %v4362_v60 = vshrl.u32 %v10375_v5, 16  ;;  %v4955_v26 = vrot.slane %v4953_v37, 4  ;;  %v10536_v17 = vpop.f32.mrf.mxu0  ;;  %v11905_v34 = vld [vmem:[#allocation32_spill] sm:$0xff]  ;;  %v11907_v35 = vld [vmem:[#allocation25_spill] sm:$0xff] }
 0x1d2   : > { %v4959_v48 = vshrl.u32 %v6775_v16, 16  ;;  %v4962_v0 = vshll.u32 %v6775_v16, 16  ;;  %vm11899_vm4 = vsmask.f32 7424  ;;  %v4368_v50 = vrot.slane %v4366_v56, 1  ;;  %11901 = vst [vmem:[#allocation64_spill] sm:$0xff] %v10536_v17  ;;  %7657 = vmatmul.mubr.bf16.gmra.mxu0 %v6734_v53 }
 0x1d3   : > { %v4353_v3 = vsel %vm11899_vm4, %v4348_v33, %v4352_v19  ;;  %vm11900_vm12 = vmmov %vm11899_vm4  ;;  %v4374_v22 = vshll.u32 %v10511_v21, 16  ;;  %v10538_v59 = vcombine.low %v4220_v31, %v4221_v25  ;;  %v4956_v5 = vor.u32 %v4955_v26, %v4952_v7  ;;  %v11903_v33 = vld [vmem:[#allocation24_spill] sm:$0xff]  ;;  %7724 = vmatprep.mubr.bf16.mxu0 %v10398_v43  ;;  %v11916_v53 = vld [vmem:[#allocation70_spill] sm:$0xff] }
 0x1d4   : > { %v4361_v15 = vsel %vm11900_vm12, %v4356_v46, %v4360_v11  ;;  %v4961_v37 = vrot.slane %v4959_v48, 3  ;;  %v4964_v13 = vrot.slane %v4962_v0, 4  ;;  %7676 = vmatprep.mubr.bf16.mxu1 %v4353_v3  ;;  %v4364_v38 = vor.u32 %v4362_v60, %v4360_v11  ;;  %v7538_v46 = vpop.f32.mrf.mxu0  ;;  %v11910_v11 = vld [vmem:[#allocation81_spill] sm:$0xff]  ;;  %vm11912_vm15 = vmmov %vm11899_vm4  ;;  %v4191_v3 = vld [vmem:[#allocation2 + $0x44] sm:$0xf] }
 0x1d5   : > { %v4370_v19 = vshrl.u32 %v10477_v55, 16  ;;  %vm11904_vm0 = vcmp.ne.s16.totalorder %v11903_v33, 0  ;;  %vm11906_vm11 = vnez %v11905_v34  ;;  %vm11908_vm14 = vcmp.ne.s16.totalorder %v11907_v35, 0  ;;  %v11913_v34 = vld [vmem:[#allocation35_spill] sm:$0xff]  ;;  %vm11915_vm4 = vmmov %vm11888_vm13  ;;  %v11917_v43 = vld [vmem:[#allocation8_spill] sm:$0xff] }
 0x1d6   : > { %v4222_v56 = vsel %vm11904_vm0, %v4189_v2, 0  ;;  %v4781_v16 = vsel %vm11906_vm11, %v10531_v63, 0  ;;  %v4223_v31 = vsel %vm11908_vm14, %v4190_v18, 0  ;;  %v10551_v25 = vsel %vm11888_vm13, %v4947_v14, %v4956_v5  ;;  %v2037_v18 = vpop.f32.mrf.mxu1  ;;  %vm11936_vm13 = vmmov %vm11915_vm4 }
 0x1d7   : > { %v4965_v7 = vor.u32 %v4964_v13, %v4961_v37  ;;  %v11911_v60 = vsel %vm9358_vm5, %v11910_v11, 0  ;;  %v4369_v2 = vsel %vm11912_vm15, %v4364_v38, %v4368_v50  ;;  %v4372_v48 = vor.u32 %v4370_v19, %v4368_v50  ;;  %v4192_v37 = vld [vmem:[#allocation2 + $0x48] sm:$0xf]  ;;  %v7970_v50 = vld [vmem:[%s11344_s3 + $0x1f0] sm:$0xff]  }
 0x1d8   : > { %v6776_v55 = vcombine.low %v11911_v60, %v4781_v16  ;;  %v4376_v0 = vrot.slane %v4374_v22, 1  ;;  %vm11914_vm3 = vnez %v11913_v34  ;;  %v4382_v14 = vshll.u32 %v10538_v59, 16  ;;  %v3107_v34 = vpop.f32.mrf.mxu0  ;;  %7677 = vmatmul.mubr.bf16.vlgmr.msra.gmra.mxu1 %v4361_v15 }
 0x1d9   : > { %v4783_v10 = vsel %vm11914_vm3, %v10540_v54, 0  ;;  %v10564_v13 = vsel %vm11915_vm4, %v4956_v5, %v4965_v7  ;;  %v2046_v26 = vadd.f32 %v7490_v49, %v11916_v53  ;;  %v4378_v22 = vshrl.u32 %v10511_v21, 16  ;;  %v11919_v5 = vld [vmem:[#allocation30_spill] sm:$0xff]  ;;  %v11923_v21 = vld [vmem:[#allocation31_spill] sm:$0xff]  ;;  %7757 = vmatpush3.bf16.msra.mxu1 %v10362_v24  ;;  %7680 = vmatprep.mubr.bf16.mxu1 %v4369_v2  ;;  %v11929_v24 = vld [vmem:[#allocation33_spill] sm:$0xff] }
 0x1da   : > { %v4968_v16 = vshrl.u32 %v6776_v55, 16  ;;  %v10571_v38 = vcombine.low %v4222_v56, %v4223_v31  ;;  %v4971_v19 = vshll.u32 %v6776_v55, 16  ;;  %v11918_v11 = vsel %vm11772_vm9, %v11917_v43, 0  ;;  %v4194_v49 = vld [vmem:[#allocation2 + $0x50] sm:$0xf]  ;;  %v7491_v43 = vpop.f32.mrf.mxu1  ;;  %vm11925_vm9 = vmmov %vm11912_vm15  ;;  %7758 = vmatprep.subr.bf16.mxu1 %v7970_v50  ;;  %7725 = vmatmul.mubr.bf16.vlgmr.msra.gmra.mxu0 %v10433_v61 }
 0x1db   : > { %v6777_v60 = vcombine.low %v11918_v11, %v4783_v10  ;;  %vm11920_vm5 = vcmp.ne.s16.totalorder %v11919_v5, 0  ;;  %v2038_v54 = vadd.f32 %v2037_v18, %v11921_v39  ;;  %v10580_v63 = vadd.f32 %v7538_v46, %v2046_v26  ;;  %v4195_v31 = vld [vmem:[#allocation2 + $0x54] sm:$0xf]  ;;  %7728 = vmatprep.mubr.bf16.mxu0 %v10468_v57  ;;  %7805 = vmatpush3.bf16.msra.mxu0 %v10380_v29 }
 0x1dc   : > { %v4224_v17 = vsel %vm11920_vm5, %v4191_v3, 0  ;;  %v4970_v53 = vrot.slane %v4968_v16, 3  ;;  %vm11924_vm12 = vcmp.ne.s16.totalorder %v11923_v21, 0  ;;  %v4973_v55 = vrot.slane %v4971_v19, 4  ;;  %v10587_v16 = vld [vmem:[#allocation2 + $0x64] sm:$0xf]  ;;  %vm11945_vm5 = vmmov %vm11925_vm9  ;;  %v10648_v40 = vpop.f32.mrf.mxu1 }
 0x1dd   : > { %11922 = vst [vmem:[#allocation19_spill] sm:$0xff] %v10580_v63  ;;  %v4225_v56 = vsel %vm11924_vm12, %v4192_v37, 0  ;;  %v4977_v20 = vshrl.u32 %v6777_v60, 16  ;;  %v4980_v12 = vshll.u32 %v6777_v60, 16  ;;  %v4377_v10 = vsel %vm11925_vm9, %v4372_v48, %v4376_v0  ;;  %11927 = vst [vmem:[#allocation23_spill] sm:$0xff] %v10587_v16  ;;  %v7971_v39 = vld [vmem:[%s11344_s3 + $0x230] sm:$0xff]   ;;  %7759 = vmatpush3.bf16.msra.mxu1 %v7970_v50 }
 0x1de   : > { %v4380_v11 = vor.u32 %v4378_v22, %v4376_v0  ;;  %v4384_v3 = vrot.slane %v4382_v14, 1  ;;  %v10585_v5 = vadd.f32 %v3107_v34, %v2038_v54  ;;  %v4390_v46 = vshll.u32 %v10571_v38, 16  ;;  %v10594_v48 = vld [vmem:[#allocation2 + $0x6c] sm:$0xf]  ;;  %v7539_v0 = vpop.f32.mrf.mxu0  ;;  %v11931_v26 = vld [vmem:[#allocation34_spill] sm:$0xff]  ;;  %7806 = vmatprep.subr.bf16.mxu0 %v7971_v39  ;;  %vm11946_vm12 = vmmov %vm11936_vm13  ;;  %11948 = vst [vmem:[#allocation80_spill] sm:$0xff] %v10648_v40 }
 0x1df   : > { %v4974_v18 = vor.u32 %v4973_v55, %v4970_v53  ;;  %v4979_v15 = vrot.slane %v4977_v20, 3  ;;  %v4982_v37 = vrot.slane %v4980_v12, 4  ;;  %11928 = vst [vmem:[#allocation29_spill] sm:$0xff] %v10594_v48  ;;  %v7972_v54 = vld [vmem:[%s11344_s3 + $0x1e8] sm:$0xff]   ;;  %v10599_v14 = vcombine.low %v4224_v17, %v4225_v56  ;;  %v11933_v19 = vld [vmem:[#allocation74_spill] sm:$0xff]  ;;  %v11934_v12 = vld [vmem:[#allocation36_spill] sm:$0xff]  ;;  %7807 = vmatpush3.bf16.msra.mxu0 %v7971_v39 }
 0x1e0   : > { %11926 = vst [vmem:[#allocation66_spill] sm:$0xff] %v10585_v5  ;;  %vm11930_vm0 = vcmp.ne.s16.totalorder %v11929_v24, 0  ;;  %vm11932_vm11 = vcmp.ne.s16.totalorder %v11931_v26, 0  ;;  %v2049_v60 = vadd.f32 %v7491_v43, %v11933_v19  ;;  %vm11935_vm14 = vcmp.ne.s16.totalorder %v11934_v12, 0  ;;  %v11937_v17 = vld [vmem:[#allocation38_spill] sm:$0xff]  ;;  %7760 = vmatprep.subr.bf16.mxu1 %v7972_v54  ;;  %v7973_v50 = vld [vmem:[%s11344_s3 + $0x228] sm:$0xff]   ;;  %7681 = vmatmul.mubr.bf16.gmra.mxu1 %v4377_v10  ;;  %v7494_v10 = vpop.f32.mrf.mxu1  ;;  %vm11953_vm6 = vmmov %vm11946_vm12 }
 0x1e1   : > { %v4226_v2 = vsel %vm11930_vm0, %v4193_v45, 0  ;;  %v4227_v22 = vsel %vm11932_vm11, %v4194_v49, 0  ;;  %v4228_v34 = vsel %vm11935_vm14, %v4195_v31, 0  ;;  %v10610_v53 = vsel %vm11936_vm13, %v4965_v7, %v4974_v18  ;;  %v11939_v45 = vld [vmem:[#allocation37_spill] sm:$0xff]  ;;  %v11942_v7 = vld [vmem:[#allocation42_spill] sm:$0xff]  ;;  %7761 = vmatpush3.bf16.msra.mxu1 %v7972_v54  ;;  %7808 = vmatprep.subr.bf16.mxu0 %v7973_v50  ;;  %vm11962_vm14 = vmmov %vm11953_vm6 }
 0x1e2   : > { %v4983_v55 = vor.u32 %v4982_v37, %v4979_v15  ;;  %vm11938_vm15 = vnez %v11937_v17  ;;  %vm11940_vm3 = vcmp.ne.s16.totalorder %v11939_v45, 0  ;;  %v11941_v61 = vsel %vm11831_vm2, %v10249_v9, 0  ;;  %vm11952_vm2 = vmmov %vm11945_vm5  ;;  %v4197_v54 = vld [vmem:[#allocation2 + $0x5c] sm:$0xf]  ;;  %7729 = vmatmul.mubr.bf16.gmra.mxu0 %v10497_v51  ;;  %v2053_v40 = vpop.f32.mrf.mxu1 }
 0x1e3   : > { %v4785_v56 = vsel %vm11938_vm15, %v10587_v16, 0  ;;  %v4229_v49 = vsel %vm11940_vm3, %v4196_v4, 0  ;;  %vm11943_vm4 = vnez %v11942_v7  ;;  %v10626_v43 = vadd.f32 %v7539_v0, %v2049_v60  ;;  %7732 = vmatprep.mubr.bf16.mxu0 %v10500_v52  ;;  %7809 = vmatpush3.bf16.msra.mxu0 %v7973_v50  ;;  %v11960_v50 = vld [vmem:[#allocation40_spill] sm:$0xff]  ;;  %v12000_v16 = vld [vmem:[#allocation51_spill] sm:$0xff] }
 0x1e4   : > { %v6778_v31 = vcombine.low %v11941_v61, %v4785_v56  ;;  %v4787_v20 = vsel %vm11943_vm4, %v10594_v48, 0  ;;  %v4385_v15 = vsel %vm11945_vm5, %v4380_v11, %v4384_v3  ;;  %v4386_v29 = vshrl.u32 %v10538_v59, 16  ;;  %v7974_v59 = vld [vmem:[%s11344_s3 + $0x1e0] sm:$0xff]   ;;  %vm11988_vm4 = vmmov %vm11953_vm6 }
 0x1e5   : > { %11944 = vst [vmem:[#allocation26_spill] sm:$0xff] %v10626_v43  ;;  %v10631_v57 = vsel %vm11946_vm12, %v4974_v18, %v4983_v55  ;;  %v6779_v9 = vcombine.low %v11947_v62, %v4787_v20  ;;  %v4392_v4 = vrot.slane %v4390_v46, 1  ;;  %v4398_v37 = vshll.u32 %v10599_v14, 16  ;;  %v7975_v56 = vld [vmem:[%s11344_s3 + $0x220] sm:$0xff]   ;;  %7684 = vmatprep.mubr.bf16.mxu1 %v4385_v15  ;;  %7762 = vmatprep.subr.bf16.mxu1 %v7974_v59  ;;  %v7976_v20 = vld [vmem:[%s11344_s3 + $0x1d8] sm:$0xff]   ;;  %v11964_v43 = vld [vmem:[#allocation9_spill] sm:$0xff] }
 0x1e6   : > { %v4986_v11 = vshrl.u32 %v6778_v31, 16  ;;  %v4989_v18 = vshll.u32 %v6778_v31, 16  ;;  %v10644_v0 = vcombine.low %v4226_v2, %v4227_v22  ;;  %v10646_v47 = vcombine.low %v4228_v34, %v4229_v49  ;;  %v10654_v34 = vpop.f32.mrf.mxu0  ;;  %v10656_v49 = vld [vmem:[#allocation2 + $0x74] sm:$0xf]  ;;  %v10658_v31 = vld [vmem:[#allocation2 + $0x7c] sm:$0xf]  ;;  %7763 = vmatpush3.bf16.msra.mxu1 %v7974_v59  ;;  %7810 = vmatprep.subr.bf16.mxu0 %v7975_v56  ;;  %vm11989_vm5 = vmmov %vm11988_vm4 }
 0x1e7   : > { %v4995_v19 = vshrl.u32 %v6779_v9, 16  ;;  %v4998_v46 = vshll.u32 %v6779_v9, 16  ;;  %v4388_v60 = vor.u32 %v4386_v29, %v4384_v3  ;;  %v4394_v17 = vshrl.u32 %v10571_v38, 16  ;;  %11949 = vst [vmem:[#allocation21_spill] sm:$0xff] %v10654_v34  ;;  %11950 = vst [vmem:[#allocation22_spill] sm:$0xff] %v10656_v49  ;;  %7764 = vmatprep.subr.bf16.mxu1 %v7976_v20  ;;  %v7977_v59 = vld [vmem:[%s11344_s3 + $0x218] sm:$0xff]   ;;  %7811 = vmatpush3.bf16.msra.mxu0 %v7975_v56 }
 0x1e8   : > { %v4988_v61 = vrot.slane %v4986_v11, 3  ;;  %v4991_v7 = vrot.slane %v4989_v18, 4  ;;  %11951 = vst [vmem:[#allocation24_spill] sm:$0xff] %v10658_v31  ;;  %v4400_v39 = vrot.slane %v4398_v37, 1  ;;  %v4198_v15 = vld [vmem:[#allocation2 + $0x60] sm:$0xf]  ;;  %7812 = vmatprep.subr.bf16.mxu0 %v7977_v59 }
 0x1e9   : > { %v4997_v2 = vrot.slane %v4995_v19, 3  ;;  %v5000_v22 = vrot.slane %v4998_v46, 4  ;;  %v4393_v3 = vsel %vm11952_vm2, %v4388_v60, %v4392_v4  ;;  %v4396_v38 = vor.u32 %v4394_v17, %v4392_v4  ;;  %v7542_v4 = vpop.f32.mrf.mxu0  ;;  %v4199_v37 = vld [vmem:[#allocation2 + $0x64] sm:$0xf]  ;;  %v4200_v19 = vld [vmem:[#allocation2 + $0x68] sm:$0xf] }
 0x1ea   : > { %v4992_v29 = vor.u32 %v4991_v7, %v4988_v61  ;;  %v4402_v62 = vshrl.u32 %v10599_v14, 16  ;;  %v4406_v9 = vshll.u32 %v10644_v0, 16  ;;  %v4414_v11 = vshll.u32 %v10646_v47, 16  ;;  %v11954_v60 = vld [vmem:[#allocation45_spill] sm:$0xff]  ;;  %v11957_v61 = vld [vmem:[#allocation75_spill] sm:$0xff]  ;;  %7685 = vmatmul.mubr.bf16.gmra.mxu1 %v4393_v3  ;;  %7733 = vmatmul.mubr.bf16.gmra.mxu0 %v10551_v25 }
 0x1eb   : > { %v10668_v18 = vor.u32 %v5000_v22, %v4997_v2  ;;  %vm11955_vm9 = vnez %v11954_v60  ;;  %v4791_v17 = vsel %vm9870_vm1, %v10658_v31, 0  ;;  %v2062_v7 = vadd.f32 %v7494_v10, %v11957_v61  ;;  %v11958_v2 = vld [vmem:[#allocation39_spill] sm:$0xff]  ;;  %vm11966_vm1 = vmmov %vm11952_vm2  ;;  %v10710_v31 = vld [vmem:[#allocation2 + $0x88] sm:$0xf]  ;;  %7765 = vmatpush3.bf16.msra.mxu1 %v7976_v20  ;;  %7736 = vmatprep.mubr.bf16.mxu0 %v10564_v13 }
 0x1ec   : > { %v10672_v46 = vsel %vm11953_vm6, %v4983_v55, %v4992_v29  ;;  %v4789_v51 = vsel %vm11955_vm9, %v10656_v49, 0  ;;  %vm11959_vm0 = vcmp.ne.s16.totalorder %v11958_v2, 0  ;;  %vm11961_vm11 = vcmp.ne.s16.totalorder %v11960_v50, 0  ;;  %11975 = vst [vmem:[#allocation25_spill] sm:$0xff] %v10710_v31  ;;  %v10721_v56 = vld [vmem:[#allocation2 + $0x84] sm:$0xf]  ;;  %7813 = vmatpush3.bf16.msra.mxu0 %v7977_v59  ;;  %vm11982_vm15 = vmmov %vm11966_vm1 }
 0x1ed   : > { %v4230_v52 = vsel %vm11959_vm0, %v4197_v54, 0  ;;  %v4231_v22 = vsel %vm11961_vm11, %v4198_v15, 0  ;;  %v10687_v55 = vsel %vm11962_vm14, %v4992_v29, %v10668_v18  ;;  %v11965_v34 = vsel %vm11834_vm7, %v11964_v43, 0  ;;  %v7978_v54 = vld [vmem:[%s11344_s3 + $0x1d0] sm:$0xff]   ;;  %v11968_v29 = vld [vmem:[#allocation84_spill] sm:$0xff]  ;;  %11977 = vst [vmem:[#allocation28_spill] sm:$0xff] %v10721_v56  ;;  %vm12002_vm11 = vmmov %vm11988_vm4 }
 0x1ee   : > { %v6780_v14 = vcombine.low %v11965_v34, %v4789_v51  ;;  %v4401_v5 = vsel %vm11966_vm1, %v4396_v38, %v4400_v39  ;;  %v4404_v10 = vor.u32 %v4402_v62, %v4400_v39  ;;  %v11969_v61 = vsel %vm9781_vm8, %v11968_v29, 0  ;;  %v11971_v38 = vld [vmem:[#allocation43_spill] sm:$0xff]  ;;  %v11973_v62 = vld [vmem:[#allocation44_spill] sm:$0xff]  ;;  %7766 = vmatprep.subr.bf16.mxu1 %v7978_v54  ;;  %v10728_v20 = vld [vmem:[#allocation2 + $0x8c] sm:$0xf] }
 0x1ef   : > { %v6781_v60 = vcombine.low %v11969_v61, %v4791_v17  ;;  %v10704_v43 = vadd.f32 %v7542_v4, %v2062_v7  ;;  %v4408_v34 = vrot.slane %v4406_v9, 1  ;;  %vm11972_vm7 = vcmp.ne.s16.totalorder %v11971_v38, 0  ;;  %v3123_v61 = vpop.f32.mrf.mxu0  ;;  %7688 = vmatprep.mubr.bf16.mxu1 %v4401_v5  ;;  %v11976_v7 = vld [vmem:[#allocation77_spill] sm:$0xff]  ;;  %11978 = vst [vmem:[#allocation81_spill] sm:$0xff] %v10728_v20  ;;  %vm11981_vm8 = vmmov %vm11966_vm1  ;;  %7767 = vmatpush3.bf16.msra.mxu1 %v7978_v54  ;;  %v4203_v25 = vld [vmem:[#allocation2 + $0x74] sm:$0xf] }
 0x1f0   : > { %v4232_v39 = vsel %vm11972_vm7, %v4199_v37, 0  ;;  %vm11974_vm13 = vcmp.ne.s16.totalorder %v11973_v62, 0  ;;  %v5004_v63 = vshrl.u32 %v6780_v14, 16  ;;  %v10712_v49 = vcombine.low %v4230_v52, %v4231_v22  ;;  %v11984_v13 = vld [vmem:[#allocation53_spill] sm:$0xff]  ;;  %vm12003_vm14 = vmmov %vm11966_vm1 }
 0x1f1   : > { %11970 = vst [vmem:[#allocation32_spill] sm:$0xff] %v10704_v43  ;;  %v4233_v51 = vsel %vm11974_vm13, %v4200_v19, 0  ;;  %v5007_v15 = vshll.u32 %v6780_v14, 16  ;;  %v5013_v29 = vshrl.u32 %v6781_v60, 16  ;;  %v5016_v17 = vshll.u32 %v6781_v60, 16  ;;  %v7979_v19 = vld [vmem:[%s11344_s3 + $0x210] sm:$0xff]   ;;  %v7543_v48 = vpop.f32.mrf.mxu0  ;;  %vm12008_vm13 = vmmov %vm11988_vm4 }
 0x1f2   : > { %v4410_v9 = vshrl.u32 %v10644_v0, 16  ;;  %v10715_v4 = vrot.slane %v4414_v11, 1  ;;  %v5006_v37 = vrot.slane %v5004_v63, 3  ;;  %v2054_v3 = vadd.f32 %v2053_v40, %v11976_v7  ;;  %v7495_v0 = vpop.f32.mrf.mxu1  ;;  %v7980_v63 = vld [vmem:[%s11344_s3 + $0x1c8] sm:$0xff]   ;;  %v4202_v7 = vld [vmem:[#allocation2 + $0x70] sm:$0xf]  ;;  %7814 = vmatprep.subr.bf16.mxu0 %v7979_v19  ;;  %7737 = vmatmul.mubr.bf16.gmra.mxu0 %v10610_v53 }
 0x1f3   : > { %v10723_v52 = vcombine.low %v4232_v39, %v4233_v51  ;;  %v5009_v22 = vrot.slane %v5007_v15, 4  ;;  %v5015_v5 = vrot.slane %v5013_v29, 3  ;;  %v5018_v14 = vrot.slane %v5016_v17, 4  ;;  %v4201_v17 = vld [vmem:[#allocation2 + $0x6c] sm:$0xf]  ;;  %7768 = vmatprep.subr.bf16.mxu1 %v7980_v63  ;;  %7815 = vmatpush3.bf16.msra.mxu0 %v7979_v19 }
 0x1f4   : > { %v10732_v11 = vcombine.low %v10369_v42, %v10369_v42  ;;  %v4794_v60 = vsel %vm11835_vm10, %v10710_v31, 0  ;;  %v4412_v39 = vor.u32 %v4410_v9, %v4408_v34  ;;  %v10738_v51 = vadd.f32 %v3123_v61, %v2054_v3  ;;  %v11983_v61 = vld [vmem:[#allocation79_spill] sm:$0xff]  ;;  %7769 = vmatpush3.bf16.msra.mxu1 %v7980_v63  ;;  %7740 = vmatprep.mubr.bf16.mxu0 %v10631_v57 }
 0x1f5   : > { %v4409_v15 = vsel %vm11981_vm8, %v4404_v10, %v4408_v34  ;;  %v4422_v29 = vshll.u32 %v10712_v49, 16  ;;  %v5010_v42 = vor.u32 %v5009_v22, %v5006_v37  ;;  %v5019_v43 = vor.u32 %v5018_v14, %v5015_v5  ;;  %v11986_v34 = vld [vmem:[#allocation59_spill] sm:$0xff]  ;;  %v11990_v5 = vld [vmem:[#allocation49_spill] sm:$0xff] }
 0x1f6   : > { %11980 = vst [vmem:[#allocation35_spill] sm:$0xff] %v10738_v51  ;;  %v4417_v40 = vsel %vm11982_vm15, %v4412_v39, %v10715_v4  ;;  %v2065_v9 = vadd.f32 %v7495_v0, %v11983_v61  ;;  %vm11985_vm10 = vnez %v11984_v13  ;;  %vm11987_vm3 = vnez %v11986_v34  ;;  %v4204_v3 = vld [vmem:[#allocation2 + $0x78] sm:$0xf]  ;;  %v7981_v39 = vld [vmem:[%s11344_s3 + $0x208] sm:$0xff]   ;;  %v7982_v61 = vld [vmem:[%s11344_s3 + $0x1c0] sm:$0xff]   ;;  %7689 = vmatmul.mubr.bf16.gmra.mxu1 %v4409_v15 }
 0x1f7   : > { %v4793_v10 = vsel %vm11985_vm10, %v10721_v56, 0  ;;  %v4795_v59 = vsel %vm11987_vm3, %v10728_v20, 0  ;;  %v4430_v37 = vshll.u32 %v10723_v52, 16  ;;  %v10755_v22 = vsel %vm11988_vm4, %v10668_v18, %v5010_v42  ;;  %v11993_v13 = vld [vmem:[#allocation47_spill] sm:$0xff]  ;;  %v11995_v34 = vld [vmem:[#allocation48_spill] sm:$0xff]  ;;  %7692 = vmatprep.mubr.bf16.mxu1 %v4417_v40  ;;  %v11998_v56 = vld [vmem:[#allocation50_spill] sm:$0xff]  ;;  %7816 = vmatprep.subr.bf16.mxu0 %v7981_v39 }
 0x1f8   : > { %v10758_v54 = vsel %vm11989_vm5, %v5010_v42, %v5019_v43  ;;  %vm11991_vm12 = vnez %v11990_v5  ;;  %vm11994_vm2 = vcmp.ne.s16.totalorder %v11993_v13, 0  ;;  %vm11996_vm6 = vcmp.ne.s16.totalorder %v11995_v34, 0  ;;  %7770 = vmatprep.subr.bf16.mxu1 %v7982_v61  ;;  %7817 = vmatpush3.bf16.msra.mxu0 %v7981_v39  ;;  %vm12013_vm3 = vmmov %vm11988_vm4 }
 0x1f9   : > { %v11992_v14 = vsel %vm11991_vm12, %v10325_v27, 0  ;;  %v4234_v18 = vsel %vm11994_vm2, %v4201_v17, 0  ;;  %v4235_v42 = vsel %vm11996_vm6, %v4202_v7, 0  ;;  %v6783_v51 = vcombine.low %v4794_v60, %v4795_v59  ;;  %v4206_v59 = vld [vmem:[#allocation2 + $0x80] sm:$0xf]  ;;  %7771 = vmatpush3.bf16.msra.mxu1 %v7982_v61  ;;  %vm12015_vm4 = vmmov %vm11981_vm8 }
 0x1fa   : > { %v6782_v0 = vcombine.low %v11992_v14, %v4793_v10  ;;  %v10774_v20 = vadd.f32 %v7543_v48, %v2065_v9  ;;  %v4418_v27 = vshrl.u32 %v10646_v47, 16  ;;  %v4424_v10 = vrot.slane %v4422_v29, 1  ;;  %v7983_v48 = vld [vmem:[%s11344_s3 + $0x200] sm:$0xff]   ;;  %v4205_v9 = vld [vmem:[#allocation2 + $0x7c] sm:$0xf]  ;;  %7741 = vmatmul.mubr.bf16.gmra.mxu0 %v10672_v46  ;;  %vm12016_vm5 = vmmov %vm12015_vm4 }
 0x1fb   : > { %vm11999_vm9 = vcmp.ne.s16.totalorder %v11998_v56, 0  ;;  %vm12001_vm0 = vcmp.ne.s16.totalorder %v12000_v16, 0  ;;  %v5031_v34 = vshrl.u32 %v6783_v51, 16  ;;  %v5034_v7 = vshll.u32 %v6783_v51, 16  ;;  %7818 = vmatprep.subr.bf16.mxu0 %v7983_v48  ;;  %7744 = vmatprep.mubr.bf16.mxu0 %v10687_v55  ;;  %v5658_v55 = vld [vmem:[#allocation2 + $0x14] sm:$0xf] }
 0x1fc   : > { %11997 = vst [vmem:[#allocation70_spill] sm:$0xff] %v10774_v20  ;;  %v5022_v5 = vshrl.u32 %v6782_v0, 16  ;;  %v5025_v14 = vshll.u32 %v6782_v0, 16  ;;  %v4236_v31 = vsel %vm11999_vm9, %v4203_v25, 0  ;;  %v4237_v17 = vsel %vm12001_vm0, %v4204_v3, 0  ;;  %7819 = vmatpush3.bf16.msra.mxu0 %v7983_v48 }
 0x1fd   : > { %v6755_v60 = vcombine.low %v4234_v18, %v4235_v42  ;;  %v5040_v19 = vshrl.u32 %v10732_v11, 16  ;;  %v4426_v29 = vshrl.u32 %v10712_v49, 16  ;;  %v4432_v40 = vrot.slane %v4430_v37, 1  ;;  %v4207_v37 = vld [vmem:[#allocation2 + $0x84] sm:$0xf] }
 0x1fe   : > { %v5024_v47 = vrot.slane %v5022_v5, 3  ;;  %v5027_v15 = vrot.slane %v5025_v14, 4  ;;  %v5033_v25 = vrot.slane %v5031_v34, 3  ;;  %v5036_v63 = vrot.slane %v5034_v7, 4  ;;  %v4208_v34 = vld [vmem:[#allocation2 + $0x88] sm:$0xf] }
 0x1ff   : > { %v10788_v51 = vcombine.low %v4236_v31, %v4237_v17  ;;  %v5042_v0 = vrot.slane %v5040_v19, 3  ;;  %v5043_v18 = vshll.u32 %v10732_v11, 16  ;;  %v4420_v42 = vor.u32 %v4418_v27, %v10715_v4  ;;  %v12004_v17 = vld [vmem:[#allocation54_spill] sm:$0xff]  ;;  %v12006_v7 = vld [vmem:[#allocation55_spill] sm:$0xff]  ;;  %v10800_v4 = vpop.f32.mrf.mxu1  ;;  %v12011_v19 = vld [vmem:[#allocation60_spill] sm:$0xff] }
 0x200   : > { %v5028_v3 = vor.u32 %v5027_v15, %v5024_v47  ;;  %v5037_v5 = vor.u32 %v5036_v63, %v5033_v25  ;;  %v4428_v53 = vor.u32 %v4426_v29, %v4424_v10  ;;  %v4438_v49 = vshll.u32 %v6755_v60, 16 }
 0x201   : > { %v5045_v31 = vrot.slane %v5043_v18, 4  ;;  %v4425_v14 = vsel %vm12003_vm14, %v4420_v42, %v4424_v10  ;;  %vm12005_vm1 = vcmp.ne.s16.totalorder %v12004_v17, 0  ;;  %vm12007_vm7 = vcmp.ne.s16.totalorder %v12006_v7, 0  ;;  %v12009_v10 = vld [vmem:[#allocation62_spill] sm:$0xff]  ;;  %v7498_v25 = vpop.f32.mrf.mxu1  ;;  %v10816_v18 = vpop.f32.mrf.mxu0  ;;  %vm12025_vm14 = vmmov %vm12015_vm4 }
 0x202   : > { %v10793_v57 = vsel %vm12002_vm11, %v5019_v43, %v5028_v3  ;;  %v4238_v39 = vsel %vm12005_vm1, %v4205_v9, 0  ;;  %v4239_v11 = vsel %vm12007_vm7, %v4206_v59, 0  ;;  %v10803_v61 = vsel %vm12008_vm13, %v5028_v3, %v5037_v5  ;;  %7693 = vmatmul.mubr.bf16.gmra.mxu1 %v4425_v14  ;;  %7745 = vmatmul.mubr.bf16.gmra.mxu0 %v10755_v22  ;;  %vm12024_vm11 = vmmov %vm12015_vm4 }
 0x203   : > { %v4433_v27 = vsel %vm11981_vm8, %v4428_v53, %v4432_v40  ;;  %v4446_v43 = vshll.u32 %v10788_v51, 16  ;;  %v5046_v47 = vor.u32 %v5045_v31, %v5042_v0  ;;  %vm12010_vm15 = vcmp.ne.s16.totalorder %v12009_v10, 0  ;;  %v2069_v48 = vpop.f32.mrf.mxu1  ;;  %v7546_v14 = vpop.f32.mrf.mxu0  ;;  %7748 = vmatprep.mubr.bf16.mxu0 %v10758_v54  ;;  %vm12028_vm13 = vmmov %vm12015_vm4 }
 0x204   : > { %7696 = vmatprep.mubr.bf16.mxu1 %v4433_v27  ;;  %v4240_v15 = vsel %vm12010_vm15, %v4207_v37, 0  ;;  %vm12012_vm10 = vcmp.ne.s16.totalorder %v12011_v19, 0  ;;  %v4440_v63 = vrot.slane %v4438_v49, 1  ;;  %v6757_v9 = vcombine.low %v4238_v39, %v4239_v11  ;;  %v12014_v37 = vld [vmem:[#allocation86_spill] sm:$0xff] }
 0x205   : > { %v4241_v29 = vsel %vm12012_vm10, %v4208_v34, 0  ;;  %v10812_v59 = vsel %vm12013_vm3, %v5037_v5, %v5046_v47  ;;  %v4434_v3 = vshrl.u32 %v10723_v52, 16  ;;  %v4442_v0 = vshrl.u32 %v6755_v60, 16  ;;  %v7499_v49 = vpop.f32.mrf.mxu1  ;;  %v4209_v52 = vld [vmem:[#allocation2 + $0x8c] sm:$0x1]  ;;  %v3139_v20 = vpop.f32.mrf.mxu0  ;;  %vm12032_vm10 = vmmov %vm12015_vm4 }
 0x206   : > { %v4448_v42 = vrot.slane %v4446_v43, 1  ;;  %v6758_v53 = vcombine.low %v4240_v15, %v4241_v29  ;;  %v2078_v34 = vadd.f32 %v7498_v25, %v12014_v37  ;;  %v4454_v5 = vshll.u32 %v6757_v9, 16  ;;  %v5659_v47 = vld [vmem:[#allocation2 + $0x18] sm:$0xf]  ;;  %v5660_v29 = vld [vmem:[#allocation2 + $0x1c] sm:$0xf] }
 0x207   : > { %v4436_v31 = vor.u32 %v4434_v3, %v4432_v40  ;;  %v4444_v39 = vor.u32 %v4442_v0, %v4440_v63  ;;  %v2070_v11 = vadd.f32 %v2069_v48, %v10371_v58  ;;  %v2081_v40 = vadd.f32 %v7499_v49, %v10389_v30  ;;  %v5661_v25 = vld [vmem:[#allocation2 + $0x20] sm:$0xf]  ;;  %v7547_v58 = vpop.f32.mrf.mxu0  ;;  %v12017_v3 = vld [vmem:[#allocation57_spill] sm:$0xff] }
 0x208   : > { %v10821_v46 = vadd.f32 %v7546_v14, %v2078_v34  ;;  %v4462_v43 = vshll.u32 %v6758_v53, 16  ;;  %vm12018_vm12 = vnez %v12017_v3  ;;  %v4456_v0 = vrot.slane %v4454_v5, 1  ;;  %v12020_v34 = vld [vmem:[#allocation10_spill] sm:$0xff] }
 0x209   : > { %v4441_v27 = vsel %vm12015_vm4, %v4436_v31, %v4440_v63  ;;  %v4449_v60 = vsel %vm12016_vm5, %v4444_v39, %v4448_v42  ;;  %v10826_v15 = vadd.f32 %v3139_v20, %v2070_v11  ;;  %v4242_v48 = vsel %vm12018_vm12, %v4209_v52, 0  ;;  %v12085_v3 = vld [vmem:[#allocation6_spill] sm:$0xff] }
 0x20a   : > { %7697 = vmatmul.mubr.bf16.gmra.mxu1 %v4441_v27  ;;  %vm12019_vm2 = vcmp.ne.s16.totalorder %v11845_v8, 0  ;;  %v10832_v37 = vadd.f32 %v7547_v58, %v2081_v40  ;;  %vm12021_vm6 = vcmp.ne.s16.totalorder %v12020_v34, 0  ;;  %v4450_v30 = vshrl.u32 %v10788_v51, 16  ;;  %v5664_v51 = vld [vmem:[#allocation2 + $0x2c] sm:$0xf]  ;;  %7749 = vmatmul.mubr.bf16.gmra.mxu0 %v10793_v57 }
 0x20b   : > { %7700 = vmatprep.mubr.bf16.mxu1 %v4449_v60  ;;  %v5692_v63 = vsel %vm12019_vm2, %v5659_v47, 0  ;;  %v5691_v31 = vsel %vm12021_vm6, %v5658_v55, 0  ;;  %v4458_v20 = vshrl.u32 %v6757_v9, 16  ;;  %v4464_v49 = vrot.slane %v4462_v43, 1  ;;  %7752 = vmatprep.mubr.bf16.mxu0 %v10803_v61  ;;  %v8041_v58 = vld [vmem:[#allocation2 + $0x18] sm:$0xf] }
 0x20c   : > { %vm12022_vm9 = vcmp.ne.s16.totalorder %v11850_v23, 0  ;;  %vm12023_vm0 = vcmp.ne.s16.totalorder %v11852_v32, 0  ;;  %v4452_v39 = vor.u32 %v4450_v30, %v4448_v42  ;;  %v6759_v5 = vcombine.low %v4242_v48, %v4242_v48  ;;  %v5665_v23 = vld [vmem:[#allocation2 + $0x30] sm:$0xf]  ;;  %v5666_v34 = vld [vmem:[#allocation2 + $0x34] sm:$0xf] }
 0x20d   : > { %v5693_v14 = vsel %vm12022_vm9, %v5660_v29, 0  ;;  %v5694_v8 = vsel %vm12023_vm0, %v5661_v25, 0  ;;  %v6817_v11 = vcombine.low %v5691_v31, %v5692_v63  ;;  %v4460_v52 = vor.u32 %v4458_v20, %v4456_v0  ;;  %v8040_v25 = vld [vmem:[#allocation2 + $0x14] sm:$0xf]  ;;  %v5667_v31 = vld [vmem:[#allocation2 + $0x38] sm:$0xf]  ;;  %vm12039_vm9 = vmmov %vm12016_vm5 }
 0x20e   : > { %v4457_v27 = vsel %vm12024_vm11, %v4452_v39, %v4456_v0  ;;  %v6818_v47 = vcombine.low %v5693_v14, %v5694_v8  ;;  %v4466_v54 = vshrl.u32 %v6758_v53, 16  ;;  %v4470_v9 = vshll.u32 %v6759_v5, 16  ;;  %v5668_v20 = vld [vmem:[#allocation2 + $0x3c] sm:$0xf] }
 0x20f   : > { %v4465_v22 = vsel %vm12025_vm14, %v4460_v52, %v4464_v49  ;;  %v5826_v55 = vshll.u32 %v6817_v11, 16  ;;  %vm12026_vm1 = vcmp.ne.s16.totalorder %v11866_v44, 0  ;;  %vm12027_vm7 = vcmp.ne.s16.totalorder %v11868_v41, 0  ;;  %v10854_v44 = vpop.f32.mrf.mxu1  ;;  %v12029_v41 = vld [vmem:[#allocation11_spill] sm:$0xff]  ;;  %vm12046_vm14 = vmmov %vm12016_vm5 }
 0x210   : > { %v4468_v32 = vor.u32 %v4466_v54, %v4464_v49  ;;  %v5831_v60 = vshll.u32 %v6818_v47, 16  ;;  %v5697_v42 = vsel %vm12026_vm1, %v5664_v51, 0  ;;  %v5698_v43 = vsel %vm12027_vm7, %v5665_v23, 0  ;;  %v5669_v49 = vld [vmem:[#allocation2 + $0x40] sm:$0xf] }
 0x211   : > { %v4472_v40 = vrot.slane %v4470_v9, 1  ;;  %v5828_v29 = vrot.slane %v5826_v55, 1  ;;  %v6793_v53 = vcombine.low %v8040_v25, %v8041_v58  ;;  %v5824_v0 = vshrl.u32 %v6817_v11, 16  ;;  %v7502_v11 = vpop.f32.mrf.mxu1  ;;  %v8042_v52 = vld [vmem:[#allocation2 + $0x1c] sm:$0xf] }
 0x212   : > { %7701 = vmatmul.mubr.bf16.gmra.mxu1 %v4457_v27  ;;  %v5833_v63 = vrot.slane %v5831_v60, 1  ;;  %v10852_v57 = vcombine.low %v5697_v42, %v5698_v43  ;;  %v5839_v30 = vshll.u32 %v12029_v41, 16  ;;  %vm12030_vm8 = vcmp.ne.s16.totalorder %v11872_v6, 0  ;;  %7753 = vmatmul.mubr.bf16.gmra.mxu0 %v10812_v59  ;;  %v8043_v27 = vld [vmem:[#allocation2 + $0x20] sm:$0xf] }
 0x213   : > { %7704 = vmatprep.mubr.bf16.mxu1 %v4465_v22  ;;  %v4473_v48 = vsel %vm12028_vm13, %v4468_v32, %v4472_v40  ;;  %v5829_v61 = vor.u32 %v5828_v29, %v5824_v0  ;;  %v5699_v14 = vsel %vm12030_vm8, %v5666_v34, 0  ;;  %vm12031_vm15 = vcmp.ne.s16.totalorder %v11874_v1, 0  ;;  %v8044_v9 = vld [vmem:[#allocation2 + $0x24] sm:$0xf]  ;;  %v8045_v55 = vld [vmem:[#allocation2 + $0x28] sm:$0xf]  ;;  %v2085_v32 = vpop.f32.mrf.mxu1  ;;  %v10869_v40 = vpop.f32.mrf.mxu0  ;;  %vm12049_vm13 = vmmov %vm12016_vm5 }
 0x214   : > { %v5700_v8 = vsel %vm12031_vm15, %v5667_v31, 0  ;;  %v5847_v5 = vshll.u32 %v10852_v57, 16  ;;  %v6794_v22 = vcombine.low %v8042_v52, %v8043_v27  ;;  %vm12033_vm3 = vcmp.ne.s16.totalorder %v11893_v36, 0  ;;  %v5670_v25 = vld [vmem:[#allocation2 + $0x44] sm:$0xf] }
 0x215   : > { %v5834_v39 = vsel %vm12032_vm10, %v5829_v61, %v5833_v63  ;;  %v5701_v51 = vsel %vm12033_vm3, %v5668_v20, 0  ;;  %vm12034_vm4 = vcmp.ne.s16.totalorder %v11895_v28, 0  ;;  %v5835_v54 = vshrl.u32 %v6818_v47, 16  ;;  %v7503_v36 = vpop.f32.mrf.mxu1  ;;  %v5671_v58 = vld [vmem:[#allocation2 + $0x48] sm:$0xf]  ;;  %v12035_v28 = vld [vmem:[#allocation58_spill] sm:$0xff]  ;;  %v7550_v34 = vpop.f32.mrf.mxu0  ;;  %vm12053_vm10 = vmmov %vm12016_vm5 }
 0x216   : > { %7820 = vmatprep.mubr.bf16.mxu0 %v5834_v39  ;;  %v5702_v6 = vsel %vm12034_vm4, %v5669_v49, 0  ;;  %v5841_v1 = vrot.slane %v5839_v30, 1  ;;  %v6795_v59 = vcombine.low %v8044_v9, %v8045_v55  ;;  %v6821_v23 = vcombine.low %v5699_v14, %v5700_v8  ;;  %v5673_v31 = vld [vmem:[#allocation2 + $0x50] sm:$0xf]  ;;  %v12036_v61 = vld [vmem:[#allocation63_spill] sm:$0xff] }
 0x217   : > { %v5837_v60 = vor.u32 %v5835_v54, %v5833_v63  ;;  %v5843_v42 = vshrl.u32 %v12029_v41, 16  ;;  %v5849_v43 = vrot.slane %v5847_v5, 1  ;;  %v10871_v29 = vcombine.low %v5701_v51, %v5702_v6  ;;  %v5672_v63 = vld [vmem:[#allocation2 + $0x4c] sm:$0xf]  ;;  %v8046_v8 = vld [vmem:[#allocation2 + $0x30] sm:$0xf]  ;;  %v2088_v52 = vpop.f32.mrf.mxu1  ;;  %v3155_v27 = vpop.f32.mrf.mxu0 }
 0x218   : > { %v2094_v47 = vadd.f32 %v7502_v11, %v12035_v28  ;;  %v5855_v0 = vshll.u32 %v6821_v23, 16  ;;  %v2086_v41 = vadd.f32 %v2085_v32, %v12036_v61  ;;  %vm12037_vm2 = vcmp.ne.s16.totalorder %v11903_v33, 0  ;;  %v8047_v39 = vld [vmem:[#allocation2 + $0x2c] sm:$0xf]  ;;  %v12041_v33 = vld [vmem:[#allocation30_spill] sm:$0xff]  ;;  %v12044_v55 = vld [vmem:[#allocation87_spill] sm:$0xff] }
 0x219   : > { %v5703_v20 = vsel %vm12037_vm2, %v5670_v25, 0  ;;  %vm12038_vm6 = vcmp.ne.s16.totalorder %v11907_v35, 0  ;;  %v6796_v5 = vcombine.low %v8047_v39, %v8046_v8  ;;  %v5863_v11 = vshll.u32 %v10871_v29, 16  ;;  %v8048_v9 = vld [vmem:[#allocation2 + $0x38] sm:$0xf] }
 0x21a   : > { %7705 = vmatmul.mubr.bf16.gmra.mxu1 %v4473_v48  ;;  %v5845_v48 = vor.u32 %v5843_v42, %v5841_v1  ;;  %v10876_v30 = vadd.f32 %v7550_v34, %v2094_v47  ;;  %v5704_v49 = vsel %vm12038_vm6, %v5671_v58, 0  ;;  %v10885_v6 = vadd.f32 %v3155_v27, %v2086_v41  ;;  %v12045_v25 = vld [vmem:[#allocation67_spill] sm:$0xff]  ;;  %v5674_v34 = vld [vmem:[#allocation2 + $0x54] sm:$0xf]  ;;  %v8049_v8 = vld [vmem:[#allocation2 + $0x40] sm:$0xf] }
 0x21b   : > { %7772 = vmatprep.mubr.bf16.mxu1 %v6793_v53  ;;  %v5842_v53 = vsel %vm12016_vm5, %v5837_v60, %v5841_v1  ;;  %vm12042_vm0 = vcmp.ne.s16.totalorder %v12041_v33, 0  ;;  %vm12043_vm11 = vcmp.ne.s16.totalorder %v11923_v21, 0  ;;  %v5857_v1 = vrot.slane %v5855_v0, 1  ;;  %v7551_v60 = vpop.f32.mrf.mxu0  ;;  %v5675_v21 = vld [vmem:[#allocation2 + $0x58] sm:$0xf] }
 0x21c   : > { %7821 = vmatmul.mubr.bf16.vlgmr.msra.gmra.mxu0 %v5842_v53  ;;  %v5850_v14 = vsel %vm12039_vm9, %v5845_v48, %v5849_v43  ;;  %v5705_v54 = vsel %vm12042_vm0, %v5672_v63, 0  ;;  %v5706_v35 = vsel %vm12043_vm11, %v5673_v31, 0  ;;  %v6823_v32 = vcombine.low %v5703_v20, %v5704_v49  ;;  %v5676_v41 = vld [vmem:[#allocation2 + $0x5c] sm:$0xf]  ;;  %v8051_v27 = vld [vmem:[#allocation2 + $0x48] sm:$0xf]  ;;  %vm12060_vm9 = vmmov %vm12016_vm5 }
 0x21d   : > { %7824 = vmatprep.mubr.bf16.mxu0 %v5850_v14  ;;  %v5851_v42 = vshrl.u32 %v10852_v57, 16  ;;  %v2089_v58 = vadd.f32 %v2088_v52, %v12045_v25  ;;  %v5865_v47 = vrot.slane %v5863_v11, 1  ;;  %v10896_v53 = vcombine.low %v5705_v54, %v5706_v35  ;;  %v3158_v48 = vpop.f32.mrf.mxu0  ;;  %v5677_v57 = vld [vmem:[#allocation2 + $0x60] sm:$0xf]  ;;  %v8050_v39 = vld [vmem:[#allocation2 + $0x3c] sm:$0xf] }
 0x21e   : > { %v5871_v61 = vshll.u32 %v6823_v32, 16  ;;  %vm12047_vm1 = vcmp.ne.s16.totalorder %v11929_v24, 0  ;;  %vm12048_vm7 = vcmp.ne.s16.totalorder %v11931_v26, 0  ;;  %vm12050_vm8 = vcmp.ne.s16.totalorder %v11934_v12, 0 }
 0x21f   : > { %v5853_v0 = vor.u32 %v5851_v42, %v5849_v43  ;;  %v10898_v63 = vadd.f32 %v3158_v48, %v2089_v58  ;;  %v5708_v49 = vsel %vm12048_vm7, %v5675_v21, 0  ;;  %v5879_v43 = vshll.u32 %v10896_v53, 16  ;;  %v5681_v42 = vld [vmem:[#allocation2 + $0x70] sm:$0xf]  ;;  %v12056_v48 = vld [vmem:[#allocation15_spill] sm:$0xff] }
 0x220   : > { %v5709_v11 = vsel %vm12050_vm8, %v5676_v41, 0  ;;  %vm12051_vm15 = vcmp.ne.s16.totalorder %v11939_v45, 0  ;;  %v5873_v24 = vrot.slane %v5871_v61, 1  ;;  %v5867_v33 = vshrl.u32 %v10871_v29, 16  ;;  %v5680_v45 = vld [vmem:[#allocation2 + $0x6c] sm:$0xf] }
 0x221   : > { %v5858_v20 = vsel %vm12046_vm14, %v5853_v0, %v5857_v1  ;;  %v5710_v52 = vsel %vm12051_vm15, %v5677_v57, 0  ;;  %v5875_v54 = vshrl.u32 %v6823_v32, 16  ;;  %v5881_v35 = vrot.slane %v5879_v43, 1  ;;  %v12059_v61 = vld [vmem:[#allocation17_spill] sm:$0xff]  ;;  %v5683_v43 = vld [vmem:[#allocation2 + $0x78] sm:$0xf]  ;;  %vm12064_vm14 = vmmov %vm12016_vm5 }
 0x222   : > { %7773 = vmatmul.mubr.bf16.vlgmr.msra.gmra.mxu1 %v6794_v22  ;;  %v12040_v22 = vld [vmem:[#allocation65_spill] sm:$0xff]  ;;  %vm12054_vm3 = vcmp.ne.s16.totalorder %v11958_v2, 0  ;;  %vm12055_vm4 = vcmp.ne.s16.totalorder %v11960_v50, 0  ;;  %vm12057_vm2 = vcmp.ne.s16.totalorder %v11971_v38, 0  ;;  %vm12058_vm6 = vcmp.ne.s16.totalorder %v11973_v62, 0 }
 0x223   : > { %7776 = vmatprep.mubr.bf16.mxu1 %v6795_v59  ;;  %v2097_v51 = vadd.f32 %v7503_v36, %v12040_v22  ;;  %v6797_v59 = vcombine.low %v12044_v55, %v8048_v9  ;;  %v5859_v36 = vshrl.u32 %v6821_v23, 16  ;;  %v5707_v23 = vsel %vm12047_vm1, %v5674_v34, 0  ;;  %v12052_v22 = vld [vmem:[#allocation14_spill] sm:$0xff]  ;;  %v5678_v9 = vld [vmem:[#allocation2 + $0x64] sm:$0xf] }
 0x224   : > { %7825 = vmatmul.mubr.bf16.gmra.mxu0 %v5858_v20  ;;  %v6799_v26 = vcombine.low %v12052_v22, %v8051_v27  ;;  %v5679_v55 = vld [vmem:[#allocation2 + $0x68] sm:$0xf]  ;;  %v5877_v12 = vor.u32 %v5875_v54, %v5873_v24  ;;  %v5711_v58 = vsel %vm12054_vm3, %v5678_v9, 0  ;;  %v5713_v21 = vsel %vm12057_vm2, %v5680_v45, 0  ;;  %vm12081_vm2 = vmmov %vm12016_vm5 }
 0x225   : > { %v10894_v28 = vadd.f32 %v7551_v60, %v2097_v51  ;;  %v5861_v31 = vor.u32 %v5859_v36, %v5857_v1  ;;  %v6825_v51 = vcombine.low %v5707_v23, %v5708_v49  ;;  %v10913_v1 = vcombine.low %v5709_v11, %v5710_v52  ;;  %v5685_v11 = vld [vmem:[#allocation2 + $0x80] sm:$0xf] }
 0x226   : > { %v5712_v29 = vsel %vm12055_vm4, %v5679_v55, 0  ;;  %v5882_v32 = vsel %vm12016_vm5, %v5877_v12, %v5881_v35  ;;  %v5714_v0 = vsel %vm12058_vm6, %v5681_v42, 0  ;;  %v5883_v57 = vshrl.u32 %v10896_v53, 16  ;;  %v12062_v53 = vld [vmem:[#allocation48_spill] sm:$0xff]  ;;  %v12068_v12 = vld [vmem:[#allocation23_spill] sm:$0xff]  ;;  %vm12087_vm6 = vmmov %vm12081_vm2 }
 0x227   : > { %v5866_v14 = vsel %vm12049_vm13, %v5861_v31, %v5865_v47  ;;  %v5887_v60 = vshll.u32 %v6825_v51, 16  ;;  %v5895_v36 = vshll.u32 %v10913_v1, 16  ;;  %v8053_v31 = vld [vmem:[#allocation2 + $0x58] sm:$0xf]  ;;  %v6827_v41 = vcombine.low %v5711_v58, %v5712_v29  ;;  %vm12070_vm13 = vmmov %vm12016_vm5 }
 0x228   : > { %7828 = vmatprep.mubr.bf16.mxu0 %v5866_v14  ;;  %v6801_v50 = vcombine.low %v12059_v61, %v8053_v31  ;;  %v5891_v20 = vshrl.u32 %v6825_v51, 16  ;;  %v10929_v49 = vcombine.low %v5713_v21, %v5714_v0  ;;  %v5682_v14 = vld [vmem:[#allocation2 + $0x74] sm:$0xf]  ;;  %vm12061_vm0 = vcmp.ne.s16.totalorder %v11993_v13, 0  ;;  %v8054_v51 = vld [vmem:[#allocation2 + $0x60] sm:$0xf] }
 0x229   : > { %v5889_v2 = vrot.slane %v5887_v60, 1  ;;  %v5897_v23 = vrot.slane %v5895_v36, 1  ;;  %v5903_v62 = vshll.u32 %v6827_v41, 16  ;;  %vm12063_vm11 = vcmp.ne.s16.totalorder %v12062_v53, 0  ;;  %v5687_v36 = vld [vmem:[#allocation2 + $0x88] sm:$0xf] }
 0x22a   : > { %7777 = vmatmul.mubr.bf16.gmra.mxu1 %v6796_v5  ;;  %v6798_v5 = vcombine.low %v8050_v39, %v8049_v8  ;;  %v5885_v8 = vor.u32 %v5883_v57, %v5881_v35  ;;  %v7506_v39 = vpop.f32.mrf.mxu1  ;;  %v5716_v27 = vsel %vm12063_vm11, %v5683_v43, 0  ;;  %vm12066_vm1 = vcmp.ne.s16.totalorder %v11998_v56, 0  ;;  %v5689_v21 = vld [vmem:[#allocation2 + $0x90] sm:$0xf]  ;;  %v12069_v0 = vld [vmem:[#allocation69_spill] sm:$0xff]  ;;  %v12075_v43 = vld [vmem:[#allocation71_spill] sm:$0xff] }
 0x22b   : > { %7780 = vmatprep.mubr.bf16.mxu1 %v6797_v59  ;;  %v5869_v59 = vor.u32 %v5867_v33, %v5865_v47  ;;  %v8052_v47 = vld [vmem:[#allocation2 + $0x50] sm:$0xf]  ;;  %v5893_v38 = vor.u32 %v5891_v20, %v5889_v2  ;;  %vm12067_vm7 = vcmp.ne.s16.totalorder %v12000_v16, 0  ;;  %v5905_v55 = vrot.slane %v5903_v62, 1  ;;  %v12074_v20 = vld [vmem:[#allocation29_spill] sm:$0xff] }
 0x22c   : > { %v6800_v34 = vcombine.low %v12056_v48, %v8052_v47  ;;  %v5890_v52 = vsel %vm12060_vm9, %v5885_v8, %v5889_v2  ;;  %v12065_v33 = vld [vmem:[#allocation18_spill] sm:$0xff]  ;;  %v5718_v9 = vsel %vm12067_vm7, %v5685_v11, 0  ;;  %v2101_v13 = vpop.f32.mrf.mxu1  ;;  %v5899_v42 = vshrl.u32 %v10913_v1, 16  ;;  %v8057_v11 = vld [vmem:[#allocation2 + $0x78] sm:$0xf]  ;;  %vm12093_vm9 = vmmov %vm12081_vm2 }
 0x22d   : > { %v5874_v25 = vsel %vm12053_vm10, %v5869_v59, %v5873_v24  ;;  %v5715_v24 = vsel %vm12061_vm0, %v5682_v14, 0  ;;  %v5898_v22 = vsel %vm12064_vm14, %v5893_v38, %v5897_v23  ;;  %v6802_v54 = vcombine.low %v12065_v33, %v8054_v51  ;;  %v8055_v59 = vld [vmem:[#allocation2 + $0x68] sm:$0xf]  ;;  %vm12073_vm10 = vmmov %vm12016_vm5  ;;  %v8056_v57 = vld [vmem:[#allocation2 + $0x70] sm:$0xf] }
 0x22e   : > { %7829 = vmatmul.mubr.bf16.gmra.mxu0 %v5874_v25  ;;  %v6803_v60 = vcombine.low %v12068_v12, %v8055_v59  ;;  %v6829_v45 = vcombine.low %v5715_v24, %v5716_v27  ;;  %v5907_v25 = vshrl.u32 %v6827_v41, 16  ;;  %v5901_v56 = vor.u32 %v5899_v42, %v5897_v23  ;;  %v7507_v47 = vpop.f32.mrf.mxu1  ;;  %v12079_v27 = vld [vmem:[#allocation73_spill] sm:$0xff]  ;;  %v5690_v59 = vld [vmem:[#allocation2 + $0x94] sm:$0x1] }
 0x22f   : > { %7832 = vmatprep.mubr.bf16.mxu0 %v5882_v32  ;;  %v5686_v32 = vld [vmem:[#allocation2 + $0x84] sm:$0xf]  ;;  %v2110_v2 = vadd.f32 %v7506_v39, %v12069_v0  ;;  %vm12071_vm8 = vcmp.ne.s16.totalorder %v12004_v17, 0  ;;  %vm12072_vm15 = vcmp.ne.s16.totalorder %v12006_v7, 0  ;;  %v6804_v23 = vcombine.low %v12074_v20, %v8056_v57 }
 0x230   : > { %v5909_v48 = vor.u32 %v5907_v25, %v5905_v55  ;;  %v5919_v16 = vshll.u32 %v6829_v45, 16  ;;  %v5906_v31 = vsel %vm12070_vm13, %v5901_v56, %v5905_v55  ;;  %v5719_v1 = vsel %vm12071_vm8, %v5686_v32, 0  ;;  %v2104_v39 = vpop.f32.mrf.mxu1  ;;  %v8058_v56 = vld [vmem:[#allocation2 + $0x80] sm:$0xf] }
 0x231   : > { %v5720_v61 = vsel %vm12072_vm15, %v5687_v36, 0  ;;  %v2102_v8 = vadd.f32 %v2101_v13, %v12075_v43  ;;  %vm12076_vm3 = vcmp.ne.s16.totalorder %v12009_v10, 0  ;;  %vm12077_vm4 = vcmp.ne.s16.totalorder %v12011_v19, 0 }
 0x232   : > { %7781 = vmatmul.mubr.bf16.gmra.mxu1 %v6798_v5  ;;  %v5684_v5 = vld [vmem:[#allocation2 + $0x7c] sm:$0xf]  ;;  %v5722_v7 = vsel %vm12077_vm4, %v5689_v21, 0  ;;  %v6831_v53 = vcombine.low %v5719_v1, %v5720_v61  ;;  %v5915_v51 = vshrl.u32 %v10929_v49, 16  ;;  %v5723_v36 = vsel %vm12018_vm12, %v5690_v59, 0  ;;  %vm12086_vm12 = vmmov %vm12081_vm2 }
 0x233   : > { %7784 = vmatprep.mubr.bf16.mxu1 %v6799_v26  ;;  %v5911_v26 = vshll.u32 %v10929_v49, 16  ;;  %v5717_v35 = vsel %vm12066_vm1, %v5684_v5, 0  ;;  %v5921_v5 = vrot.slane %v5919_v16, 1  ;;  %v12083_v16 = vld [vmem:[#allocation25_spill] sm:$0xff] }
 0x234   : > { %v10945_v29 = vcombine.low %v5717_v35, %v5718_v9  ;;  %v12080_v9 = vld [vmem:[#allocation27_spill] sm:$0xff]  ;;  %v5935_v42 = vshll.u32 %v6831_v53, 16  ;;  %v5939_v1 = vshrl.u32 %v6831_v53, 16 }
 0x235   : > { %v5913_v58 = vrot.slane %v5911_v26, 1  ;;  %v2105_v19 = vadd.f32 %v2104_v39, %v12080_v9 }
 0x236   : > { %7833 = vmatmul.mubr.bf16.gmra.mxu0 %v5890_v52  ;;  %v5927_v14 = vshll.u32 %v10945_v29, 16  ;;  %v12078_v52 = vld [vmem:[#allocation22_spill] sm:$0xff]  ;;  %v5931_v0 = vshrl.u32 %v10945_v29, 16  ;;  %v12088_v29 = vld [vmem:[#allocation76_spill] sm:$0xff] }
 0x237   : > { %7836 = vmatprep.mubr.bf16.mxu0 %v5898_v22  ;;  %v5914_v41 = vsel %vm12073_vm10, %v5909_v48, %v5913_v58  ;;  %v6805_v24 = vcombine.low %v12078_v52, %v8057_v11  ;;  %v2113_v22 = vadd.f32 %v7507_v47, %v12079_v27  ;;  %v5917_v55 = vor.u32 %v5915_v51, %v5913_v58  ;;  %v12082_v47 = vld [vmem:[#allocation24_spill] sm:$0xff]  ;;  %v12090_v27 = vld [vmem:[#allocation78_spill] sm:$0xff] }
 0x238   : > { %v5929_v10 = vrot.slane %v5927_v14, 1  ;;  %v6806_v58 = vcombine.low %v12082_v47, %v8058_v56  ;;  %v5937_v48 = vrot.slane %v5935_v42, 1 }
 0x239   : > { %v5922_v32 = vsel %vm12016_vm5, %v5917_v55, %v5921_v5 }
 0x23a   : > { %7785 = vmatmul.mubr.bf16.gmra.mxu1 %v6800_v34  ;;  %v5688_v34 = vld [vmem:[#allocation2 + $0x8c] sm:$0xf]  ;;  %v5941_v57 = vor.u32 %v5939_v1, %v5937_v48 }
 0x23b   : > { %7788 = vmatprep.mubr.bf16.mxu1 %v6801_v50  ;;  %v7554_v50 = vpop.f32.mrf.mxu0  ;;  %v5721_v17 = vsel %vm12076_vm3, %v5688_v34, 0  ;;  %v12084_v34 = vld [vmem:[#allocation28_spill] sm:$0xff] }
 0x23c   : > { %v10957_v38 = vadd.f32 %v7554_v50, %v2110_v2  ;;  %v6832_v35 = vcombine.low %v5721_v17, %v5722_v7  ;;  %v6807_v21 = vcombine.low %v12084_v34, %v12083_v16  ;;  %v6833_v2 = vcombine.low %v5723_v36, %v5723_v36  ;;  %v12094_v36 = vld [vmem:[#allocation4_spill] sm:$0xff]  ;;  %v12095_v16 = vld [vmem:[#allocation5_spill] sm:$0xff] }
 0x23d   : > { %v3171_v62 = vpop.f32.mrf.mxu0  ;;  %v5933_v50 = vor.u32 %v5931_v0, %v5929_v10 }
 0x23e   : > { %7837 = vmatmul.mubr.bf16.gmra.mxu0 %v5906_v31  ;;  %v10965_v26 = vadd.f32 %v3171_v62, %v2102_v8  ;;  %v5951_v14 = vshll.u32 %v6833_v2, 16  ;;  %v8059_v62 = vld [vmem:[#allocation2 + $0x90] sm:$0xf]  ;;  %v5947_v52 = vshrl.u32 %v6832_v35, 16 }
 0x23f   : > { %7840 = vmatprep.mubr.bf16.mxu0 %v5914_v41  ;;  %v7555_v33 = vpop.f32.mrf.mxu0 }
 0x240   : > { %v10969_v13 = vadd.f32 %v7555_v33, %v2113_v22  ;;  %v7510_v31 = vpop.f32.mrf.mxu1  ;;  %v5953_v59 = vrot.slane %v5951_v14, 1  ;;  %v12098_v14 = vld [vmem:[#allocation68_spill] sm:$0xff] }
 0x241   : > { %v3174_v12 = vpop.f32.mrf.mxu0  ;;  %v2126_v20 = vadd.f32 %v7510_v31, %v12085_v3  ;;  %v12096_v31 = vld [vmem:[#allocation7_spill] sm:$0xff] }
 0x242   : > { %7789 = vmatmul.mubr.bf16.gmra.mxu1 %v6802_v54  ;;  %v5923_v54 = vshrl.u32 %v6829_v45, 16  ;;  %v10971_v25 = vadd.f32 %v3174_v12, %v2105_v19  ;;  %v5943_v45 = vshll.u32 %v6832_v35, 16  ;;  %v2117_v41 = vpop.f32.mrf.mxu1 }
 0x243   : > { %7792 = vmatprep.mubr.bf16.mxu1 %v6803_v60  ;;  %v7558_v8 = vpop.f32.mrf.mxu0  ;;  %v2118_v7 = vadd.f32 %v2117_v41, %v12088_v29  ;;  %v12100_v29 = vld [vmem:[#allocation61_spill] sm:$0xff] }
 0x244   : > { %v5925_v60 = vor.u32 %v5923_v54, %v5921_v5  ;;  %v5945_v61 = vrot.slane %v5943_v45, 1  ;;  %v7511_v43 = vpop.f32.mrf.mxu1  ;;  %v10985_v39 = vadd.f32 %v7558_v8, %v2126_v20  ;;  %v12089_v5 = vld [vmem:[#allocation81_spill] sm:$0xff] }
 0x245   : > { %v6808_v11 = vcombine.low %v12089_v5, %v8059_v62  ;;  %v3187_v53 = vpop.f32.mrf.mxu0  ;;  %v2129_v22 = vadd.f32 %v7511_v43, %v12090_v27  ;;  %v12099_v43 = vld [vmem:[#allocation16_spill] sm:$0xff] }
 0x246   : > { %7841 = vmatmul.mubr.bf16.gmra.mxu0 %v5922_v32  ;;  %v5930_v49 = vsel %vm12081_vm2, %v5925_v60, %v5929_v10  ;;  %v5946_v17 = vsel %vm12087_vm6, %v5941_v57, %v5945_v61  ;;  %v10989_v51 = vadd.f32 %v3187_v53, %v2118_v7  ;;  %v5949_v33 = vor.u32 %v5947_v52, %v5945_v61  ;;  %v12091_v10 = vld [vmem:[#allocation82_spill] sm:$0xff]  ;;  %v12092_v60 = vld [vmem:[#allocation85_spill] sm:$0xff]  ;;  %v12102_v53 = vld [vmem:[#allocation20_spill] sm:$0xff] }
 0x247   : > { %7844 = vmatprep.mubr.bf16.mxu0 %v5930_v49  ;;  %v7559_v54 = vpop.f32.mrf.mxu0  ;;  %v12097_v57 = vld [vmem:[#allocation13_spill] sm:$0xff]  ;;  %v2025_v8 = vadd.f32 %v12099_v43, %v12098_v14 }
 0x248   : > { %v10992_v19 = vadd.f32 %v7559_v54, %v2129_v22  ;;  %v5954_v35 = vsel %vm12093_vm9, %v5949_v33, %v5953_v59 }
 0x249   : > { %v3190_v12 = vpop.f32.mrf.mxu0 }
 0x24a   : > { %7793 = vmatmul.mubr.bf16.gmra.mxu1 %v6804_v23  ;;  %v5938_v23 = vsel %vm12086_vm12, %v5933_v50, %v5937_v48 }
 0x24b   : > { %7796 = vmatprep.mubr.bf16.mxu1 %v6805_v24  ;;  %v2120_v24 = vpop.f32.mrf.mxu1  ;;  %v7562_v45 = vpop.f32.mrf.mxu0 }
 0x24c   : > { %v2121_v9 = vadd.f32 %v2120_v24, %v12091_v10 }
 0x24d   : > { %v7514_v55 = vpop.f32.mrf.mxu1  ;;  %v3203_v48 = vpop.f32.mrf.mxu0 }
 0x24e   : > { %7845 = vmatmul.mubr.bf16.gmra.mxu0 %v5938_v23  ;;  %v2142_v42 = vadd.f32 %v7514_v55, %v12092_v60  ;;  %v10995_v32 = vadd.f32 %v3190_v12, %v2121_v9  ;;  %v12103_v12 = vld [vmem:[#allocation19_spill] sm:$0xff] }
 0x24f   : > { %7848 = vmatprep.mubr.bf16.mxu0 %v5946_v17  ;;  %v2133_v49 = vpop.f32.mrf.mxu1  ;;  %v7563_v2 = vpop.f32.mrf.mxu0 }
 0x250   : > { %v2134_v56 = vadd.f32 %v2133_v49, %v12094_v36  ;;  %v10999_v47 = vadd.f32 %v7562_v45, %v2142_v42  ;;  %v12104_v49 = vld [vmem:[#allocation3_spill] sm:$0xff]  ;;  %v12105_v45 = vld [vmem:[#allocation80_spill] sm:$0xff] }
 0x251   : > { %v3206_v41 = vpop.f32.mrf.mxu0  ;;  %v2041_v36 = vadd.f32 %v12105_v45, %v12104_v49 }
 0x252   : > { %7797 = vmatmul.mubr.bf16.gmra.mxu1 %v6806_v58  ;;  %v7515_v58 = vpop.f32.mrf.mxu1 }
 0x253   : > { %7800 = vmatprep.mubr.bf16.mxu1 %v6807_v21  ;;  %v2145_v34 = vadd.f32 %v7515_v58, %v12095_v16  ;;  %v11002_v21 = vadd.f32 %v3203_v48, %v2134_v56  ;;  %v12106_v58 = vld [vmem:[#allocation66_spill] sm:$0xff] }
 0x254   : > { %v2136_v0 = vpop.f32.mrf.mxu1 }
 0x255   : > { %v2137_v1 = vadd.f32 %v2136_v0, %v12096_v31  ;;  %v11005_v61 = vadd.f32 %v7563_v2, %v2145_v34  ;;  %v12107_v0 = vld [vmem:[#allocation21_spill] sm:$0xff] }
 0x256   : > { %7849 = vmatmul.mubr.bf16.gmra.mxu0 %v5954_v35  ;;  %v7582_v50 = vpop.f32.mrf.mxu1  ;;  %v3223_v2 = vadd.f32 %v12107_v0, %v2041_v36  ;;  %v12113_v0 = vld [vmem:[#allocation12_spill] sm:$0xff] }
 0x257   : > { %v3794_v3 = vadd.f32 %v7582_v50, %v12097_v57  ;;  %v11008_v20 = vadd.f32 %v3206_v41, %v2137_v1  ;;  %v12108_v1 = vld [vmem:[#allocation26_spill] sm:$0xff] }
 0x258   : > { %v3665_v23 = vpop.f32.mrf.mxu1 }
 0x259   : > { %v3792_v7 = vadd.f32 %v3665_v23, %v12100_v29 }
 0x25a   : > { %7801 = vmatmul.mubr.bf16.gmra.mxu1 %v6808_v11  ;;  %v7630_v17 = vpop.f32.mrf.mxu0  ;;  %v7583_v5 = vpop.f32.mrf.mxu1  ;;  %v12101_v11 = vld [vmem:[#allocation64_spill] sm:$0xff] }
 0x25b   : > { %v11013_v62 = vadd.f32 %v7630_v17, %v3794_v3  ;;  %v3219_v52 = vadd.f32 %v12101_v11, %v2025_v8  ;;  %v3795_v27 = vadd.f32 %v7583_v5, %v12102_v53  ;;  %v12109_v17 = vld [vmem:[#allocation32_spill] sm:$0xff]  ;;  %v12110_v11 = vld [vmem:[#allocation83_spill] sm:$0xff] }
 0x25c   : > { %v4018_v24 = vpop.f32.mrf.mxu0  ;;  %v3668_v33 = vpop.f32.mrf.mxu1  ;;  %v12111_v53 = vld [vmem:[#allocation35_spill] sm:$0xff] }
 0x25d   : > { %v11017_v22 = vadd.f32 %v4018_v24, %v3792_v7  ;;  %v3793_v10 = vadd.f32 %v3668_v33, %v3219_v52  ;;  %v2057_v52 = vadd.f32 %v10800_v4, %v12110_v11 }
 0x25e   : > { %v7631_v54 = vpop.f32.mrf.mxu0  ;;  %v7586_v55 = vpop.f32.mrf.mxu1 }
 0x25f   : > { %v11019_v9 = vadd.f32 %v7631_v54, %v3795_v27  ;;  %v3798_v60 = vadd.f32 %v7586_v55, %v12103_v12 }
 0x260   : > { %v4021_v59 = vpop.f32.mrf.mxu0  ;;  %v3681_v35 = vpop.f32.mrf.mxu1 }
 0x261   : > { %v11022_v42 = vadd.f32 %v4021_v59, %v3793_v10  ;;  %v3796_v48 = vadd.f32 %v3681_v35, %v12106_v58  ;;  %v3227_v10 = vadd.f32 %v10816_v18, %v2057_v52  ;;  %v12112_v59 = vld [vmem:[#allocation70_spill] sm:$0xff]  ;;  %v2073_v18 = vadd.f32 %v10854_v44, %v12113_v0 }
 0x262   : > { %v7634_v56 = vpop.f32.mrf.mxu0  ;;  %v7587_v34 = vpop.f32.mrf.mxu1 }
 0x263   : > { %v11027_v16 = vadd.f32 %v7634_v56, %v3798_v60  ;;  %v3799_v50 = vadd.f32 %v7587_v34, %v12108_v1 }
 0x264   : > { %v4034_v31 = vpop.f32.mrf.mxu0  ;;  %v3684_v57 = vpop.f32.mrf.mxu1 }
 0x265   : > { %v11031_v41 = vadd.f32 %v4034_v31, %v3796_v48  ;;  %v3797_v23 = vadd.f32 %v3684_v57, %v3223_v2  ;;  %v3231_v57 = vadd.f32 %v10869_v40, %v2073_v18 }
 0x266   : > { %v7635_v3 = vpop.f32.mrf.mxu0  ;;  %v7590_v43 = vpop.f32.mrf.mxu1 }
 0x267   : > { %v11033_v14 = vadd.f32 %v7635_v3, %v3799_v50  ;;  %v3802_v29 = vadd.f32 %v7590_v43, %v12109_v17 }
 0x268   : > { %v4037_v8 = vpop.f32.mrf.mxu0  ;;  %v3697_v5 = vpop.f32.mrf.mxu1 }
 0x269   : > { %v11036_v7 = vadd.f32 %v4037_v8, %v3797_v23  ;;  %v3800_v27 = vadd.f32 %v3697_v5, %v12111_v53 }
 0x26a   : > { %v7638_v24 = vpop.f32.mrf.mxu0  ;;  %v7591_v54 = vpop.f32.mrf.mxu1 }
 0x26b   : > { %v11041_v33 = vadd.f32 %v7638_v24, %v3802_v29  ;;  %v3803_v12 = vadd.f32 %v7591_v54, %v12112_v59 }
 0x26c   : > { %v4050_v55 = vpop.f32.mrf.mxu0  ;;  %v3700_v35 = vpop.f32.mrf.mxu1 }
 0x26d   : > { %v11045_v60 = vadd.f32 %v4050_v55, %v3800_v27  ;;  %v3801_v45 = vadd.f32 %v3700_v35, %v3227_v10 }
 0x26e   : > { %v7639_v49 = vpop.f32.mrf.mxu0  ;;  %v7594_v56 = vpop.f32.mrf.mxu1 }
 0x26f   : > { %v11047_v36 = vadd.f32 %v7639_v49, %v3803_v12  ;;  %v3806_v58 = vadd.f32 %v7594_v56, %v10821_v46 }
 0x270   : > { %v4053_v4 = vpop.f32.mrf.mxu0  ;;  %v3713_v34 = vpop.f32.mrf.mxu1 }
 0x271   : > { %v11050_v48 = vadd.f32 %v4053_v4, %v3801_v45  ;;  %v3804_v31 = vadd.f32 %v3713_v34, %v10826_v15 }
 0x272   : > { %v7642_v2 = vpop.f32.mrf.mxu0  ;;  %v7595_v50 = vpop.f32.mrf.mxu1 }
 0x273   : > { %v11055_v1 = vadd.f32 %v7642_v2, %v3806_v58  ;;  %v3807_v23 = vadd.f32 %v7595_v50, %v10832_v37 }
 0x274   : > { %v4066_v3 = vpop.f32.mrf.mxu0  ;;  %v3716_v46 = vpop.f32.mrf.mxu1 }
 0x275   : > { %v11059_v43 = vadd.f32 %v4066_v3, %v3804_v31  ;;  %v3805_v17 = vadd.f32 %v3716_v46, %v3231_v57 }
 0x276   : > { %v7643_v8 = vpop.f32.mrf.mxu0  ;;  %v7598_v5 = vpop.f32.mrf.mxu1 }
 0x277   : > { %v11061_v29 = vadd.f32 %v7643_v8, %v3807_v23  ;;  %v3810_v11 = vadd.f32 %v7598_v5, %v10876_v30 }
 0x278   : > { %v4069_v44 = vpop.f32.mrf.mxu0  ;;  %v3729_v52 = vpop.f32.mrf.mxu1 }
 0x279   : > { %v11064_v15 = vadd.f32 %v4069_v44, %v3805_v17  ;;  %v3808_v40 = vadd.f32 %v3729_v52, %v10885_v6 }
 0x27a   : > { %v7646_v24 = vpop.f32.mrf.mxu0  ;;  %v7599_v37 = vpop.f32.mrf.mxu1 }
 0x27b   : > { %v11067_v53 = vadd.f32 %v7646_v24, %v3810_v11  ;;  %v3811_v54 = vadd.f32 %v7599_v37, %v10894_v28 }
 0x27c   : > { %v4082_v27 = vpop.f32.mrf.mxu0  ;;  %v3732_v55 = vpop.f32.mrf.mxu1 }
 0x27d   : > { %v11070_v10 = vadd.f32 %v4082_v27, %v3808_v40  ;;  %v3809_v12 = vadd.f32 %v3732_v55, %v10898_v63 }
 0x27e   : > { %v7647_v59 = vpop.f32.mrf.mxu0  ;;  %v7602_v30 = vpop.f32.mrf.mxu1 }
 0x27f   : > { %v11073_v35 = vadd.f32 %v7647_v59, %v3811_v54  ;;  %v3814_v45 = vadd.f32 %v7602_v30, %v10957_v38 }
 0x280   : > { %v4085_v49 = vpop.f32.mrf.mxu0  ;;  %v3745_v6 = vpop.f32.mrf.mxu1 }
 0x281   : > { %v11076_v56 = vadd.f32 %v4085_v49, %v3809_v12  ;;  %v3812_v58 = vadd.f32 %v3745_v6, %v10965_v26 }
 0x282   : > { %v7650_v4 = vpop.f32.mrf.mxu0  ;;  %v7603_v28 = vpop.f32.mrf.mxu1 }
 0x283   : > { %v11079_v34 = vadd.f32 %v7650_v4, %v3814_v45  ;;  %v3815_v18 = vadd.f32 %v7603_v28, %v10969_v13 }
 0x284   : > { %v4098_v0 = vpop.f32.mrf.mxu0  ;;  %v3748_v63 = vpop.f32.mrf.mxu1 }
 0x285   : > { %v11082_v2 = vadd.f32 %v4098_v0, %v3812_v58  ;;  %v3813_v50 = vadd.f32 %v3748_v63, %v10971_v25 }
 0x286   : > { %v7651_v31 = vpop.f32.mrf.mxu0  ;;  %v7606_v38 = vpop.f32.mrf.mxu1 }
 0x287   : > { %v11085_v57 = vadd.f32 %v7651_v31, %v3815_v18  ;;  %v3818_v23 = vadd.f32 %v7606_v38, %v10985_v39 }
 0x288   : > { %v4101_v3 = vpop.f32.mrf.mxu0  ;;  %v3761_v26 = vpop.f32.mrf.mxu1 }
 0x289   : > { %12114 = vst [vmem:[#allocation8_spill] sm:$0xff] %v11085_v57  ;;  %v11088_v46 = vadd.f32 %v4101_v3, %v3813_v50  ;;  %v3816_v17 = vadd.f32 %v3761_v26, %v10989_v51 }
 0x28a   : > { %v7654_v8 = vpop.f32.mrf.mxu0  ;;  %v7607_v13 = vpop.f32.mrf.mxu1 }
 0x28b   : > { %12115 = vst [vmem:[#allocation72_spill] sm:$0xff] %v11088_v46  ;;  %v11091_v5 = vadd.f32 %v7654_v8, %v3818_v23  ;;  %v3819_v11 = vadd.f32 %v7607_v13, %v10992_v19 }
 0x28c   : > { %v4114_v44 = vpop.f32.mrf.mxu0  ;;  %v3764_v25 = vpop.f32.mrf.mxu1 }
 0x28d   : > { %v11094_v52 = vadd.f32 %v4114_v44, %v3816_v17  ;;  %v3817_v40 = vadd.f32 %v3764_v25, %v10995_v32 }
 0x28e   : > { %v7655_v24 = vpop.f32.mrf.mxu0 }
 0x28f   : > { %12116 = vst [vmem:[#allocation31_spill] sm:$0xff] %v11094_v52  ;;  %v11097_v37 = vadd.f32 %v7655_v24, %v3819_v11 }
 0x290   : > { %v7610_v39 = vpop.f32.mrf.mxu1  ;;  %v4117_v27 = vpop.f32.mrf.mxu0 }
 0x291   : > { %12117 = vst [vmem:[#allocation33_spill] sm:$0xff] %v11097_v37  ;;  %v3822_v54 = vadd.f32 %v7610_v39, %v10999_v47  ;;  %v11100_v55 = vadd.f32 %v4117_v27, %v3817_v40 }
 0x292   : > { %v3777_v51 = vpop.f32.mrf.mxu1  ;;  %v7658_v59 = vpop.f32.mrf.mxu0 }
 0x293   : > { %12118 = vst [vmem:[#allocation34_spill] sm:$0xff] %v11100_v55  ;;  %v3820_v12 = vadd.f32 %v3777_v51, %v11002_v21  ;;  %v11103_v30 = vadd.f32 %v7658_v59, %v3822_v54 }
 0x294   : > { %v7611_v19 = vpop.f32.mrf.mxu1  ;;  %v4130_v49 = vpop.f32.mrf.mxu0 }
 0x295   : > { %v3823_v45 = vadd.f32 %v7611_v19, %v11005_v61  ;;  %v11106_v6 = vadd.f32 %v4130_v49, %v3820_v12 }
 0x296   : > { %v3780_v32 = vpop.f32.mrf.mxu1  ;;  %v7659_v4 = vpop.f32.mrf.mxu0 }
 0x297   : > { %12119 = vst [vmem:[#allocation74_spill] sm:$0xff] %v11106_v6  ;;  %v3821_v58 = vadd.f32 %v3780_v32, %v11008_v20  ;;  %v11109_v28 = vadd.f32 %v7659_v4, %v3823_v45 }
 0x298   : > { %v7678_v47 = vpop.f32.mrf.mxu1  ;;  %v4133_v0 = vpop.f32.mrf.mxu0 }
 0x299   : > { %12120 = vst [vmem:[#allocation36_spill] sm:$0xff] %v11109_v28  ;;  %v4701_v18 = vadd.f32 %v7678_v47, %v11013_v62  ;;  %v11112_v63 = vadd.f32 %v4133_v0, %v3821_v58 }
 0x29a   : > { %v4572_v21 = vpop.f32.mrf.mxu1  ;;  %v7726_v31 = vpop.f32.mrf.mxu0 }
 0x29b   : > { %12121 = vst [vmem:[#allocation38_spill] sm:$0xff] %v11112_v63  ;;  %v4699_v50 = vadd.f32 %v4572_v21, %v11017_v22  ;;  %v11115_v38 = vadd.f32 %v7726_v31, %v4701_v18 }
 0x29c   : > { %v11117_v61 = vpop.f32.mrf.mxu1  ;;  %v5146_v3 = vpop.f32.mrf.mxu0 }
 0x29d   : > { %v11119_v23 = vadd.f32 %v5146_v3, %v4699_v50 }
 0x29e   : > { %v11121_v20 = vpop.f32.mrf.mxu1  ;;  %v11123_v26 = vpop.f32.mrf.mxu0 }
 0x2a0   : > { %v7682_v8 = vpop.f32.mrf.mxu1  ;;  %v11125_v17 = vpop.f32.mrf.mxu0 }
 0x2a1   : > { %v4705_v62 = vadd.f32 %v7682_v8, %v11027_v16 }
 0x2a2   : > { %v11128_v13 = vpop.f32.mrf.mxu1  ;;  %v7730_v44 = vpop.f32.mrf.mxu0 }
 0x2a3   : > { %v11130_v22 = vadd.f32 %v7730_v44, %v4705_v62 }
 0x2a4   : > { %v11132_v11 = vpop.f32.mrf.mxu1  ;;  %v11134_v25 = vpop.f32.mrf.mxu0 }
 0x2a6   : > { %v11136_v24 = vpop.f32.mrf.mxu1  ;;  %v11138_v40 = vpop.f32.mrf.mxu0 }
 0x2a8   : > { %v11140_v27 = vpop.f32.mrf.mxu0 }
 0x2aa   : > { %v7686_v39 = vpop.f32.mrf.mxu1  ;;  %v7734_v16 = vpop.f32.mrf.mxu0 }
 0x2ab   : > { %v4709_v54 = vadd.f32 %v7686_v39, %v11041_v33 }
 0x2ac   : > { %v11143_v51 = vpop.f32.mrf.mxu1  ;;  %v11149_v19 = vpop.f32.mrf.mxu0 }
 0x2ad   : > { %v11145_v59 = vadd.f32 %v7734_v16, %v4709_v54 }
 0x2ae   : > { %v11147_v12 = vpop.f32.mrf.mxu1  ;;  %v11153_v45 = vpop.f32.mrf.mxu0 }
 0x2b0   : > { %v11151_v49 = vpop.f32.mrf.mxu1  ;;  %v11155_v4 = vpop.f32.mrf.mxu0 }
 0x2b2   : > { %v7738_v33 = vpop.f32.mrf.mxu0 }
 0x2b4   : > { %v11164_v21 = vpop.f32.mrf.mxu0 }
 0x2b6   : > { %v7690_v32 = vpop.f32.mrf.mxu1  ;;  %v11168_v50 = vpop.f32.mrf.mxu0 }
 0x2b7   : > { %v4713_v58 = vadd.f32 %v7690_v32, %v11055_v1 }
 0x2b8   : > { %v11158_v47 = vpop.f32.mrf.mxu1  ;;  %v11170_v8 = vpop.f32.mrf.mxu0 }
 0x2b9   : > { %v11160_v0 = vadd.f32 %v7738_v33, %v4713_v58 }
 0x2ba   : > { %v11162_v18 = vpop.f32.mrf.mxu1  ;;  %v7742_v1 = vpop.f32.mrf.mxu0 }
 0x2bc   : > { %v11166_v31 = vpop.f32.mrf.mxu1  ;;  %v11179_v16 = vpop.f32.mrf.mxu0 }
 0x2be   : > { %v11183_v58 = vpop.f32.mrf.mxu0 }
 0x2c0   : > { %v11185_v63 = vpop.f32.mrf.mxu0 }
 0x2c1   : > { %12122 = vst [vmem:[#allocation37_spill] sm:$0xff] %v11185_v63 }
 0x2c2   : > { %v7694_v3 = vpop.f32.mrf.mxu1 }
 0x2c3   : > { %v4717_v62 = vadd.f32 %v7694_v3, %v11067_v53  ;;  %v7746_v53 = vpop.f32.mrf.mxu0 }
 0x2c4   : > { %v11173_v44 = vpop.f32.mrf.mxu1 }
 0x2c5   : > { %v11175_v39 = vadd.f32 %v7742_v1, %v4717_v62  ;;  %v11194_v1 = vpop.f32.mrf.mxu0 }
 0x2c6   : > { %v11177_v54 = vpop.f32.mrf.mxu1  ;;  %12125 = vst [vmem:[#allocation52_spill] sm:$0xff] %v11194_v1 }
 0x2c7   : > { %v11198_v37 = vpop.f32.mrf.mxu0 }
 0x2c8   : > { %v11181_v32 = vpop.f32.mrf.mxu1  ;;  %12127 = vst [vmem:[#allocation39_spill] sm:$0xff] %v11198_v37 }
 0x2c9   : > { %v11200_v46 = vpop.f32.mrf.mxu0 }
 0x2ca   : > { %v7698_v33 = vpop.f32.mrf.mxu1  ;;  %12128 = vst [vmem:[#allocation40_spill] sm:$0xff] %v11200_v46 }
 0x2cb   : > { %v4721_v28 = vadd.f32 %v7698_v33, %v11079_v34  ;;  %v7750_v34 = vpop.f32.mrf.mxu0 }
 0x2cc   : > { %v11188_v6 = vpop.f32.mrf.mxu1 }
 0x2cd   : > { %v11190_v3 = vadd.f32 %v7746_v53, %v4721_v28  ;;  %v11209_v53 = vpop.f32.mrf.mxu0 }
 0x2ce   : > { %v11192_v62 = vpop.f32.mrf.mxu1  ;;  %12130 = vst [vmem:[#allocation9_spill] sm:$0xff] %v11209_v53 }
 0x2cf   : > { %12123 = vst [vmem:[#allocation42_spill] sm:$0xff] %v11190_v3  ;;  %12124 = vst [vmem:[#allocation45_spill] sm:$0xff] %v11192_v62  ;;  %v11213_v1 = vpop.f32.mrf.mxu0 }
 0x2d0   : > { %v11196_v55 = vpop.f32.mrf.mxu1  ;;  %12132 = vst [vmem:[#allocation84_spill] sm:$0xff] %v11213_v1 }
 0x2d1   : > { %12126 = vst [vmem:[#allocation75_spill] sm:$0xff] %v11196_v55  ;;  %v11215_v37 = vpop.f32.mrf.mxu0 }
 0x2d2   : > { %v7702_v52 = vpop.f32.mrf.mxu1  ;;  %12133 = vst [vmem:[#allocation43_spill] sm:$0xff] %v11215_v37 }
 0x2d3   : > { %v4725_v57 = vadd.f32 %v7702_v52, %v11091_v5  ;;  %v7754_v5 = vpop.f32.mrf.mxu0 }
 0x2d4   : > { %v11203_v63 = vpop.f32.mrf.mxu1 }
 0x2d5   : > { %v11205_v33 = vadd.f32 %v7750_v34, %v4725_v57  ;;  %v11224_v34 = vpop.f32.mrf.mxu0 }
 0x2d6   : > { %v11207_v28 = vpop.f32.mrf.mxu1  ;;  %12137 = vst [vmem:[#allocation79_spill] sm:$0xff] %v11224_v34 }
 0x2d7   : > { %12129 = vst [vmem:[#allocation41_spill] sm:$0xff] %v11205_v33  ;;  %v11230_v1 = vpop.f32.mrf.mxu0 }
 0x2d8   : > { %v11211_v3 = vpop.f32.mrf.mxu1  ;;  %12139 = vst [vmem:[#allocation59_spill] sm:$0xff] %v11230_v1 }
 0x2d9   : > { %12131 = vst [vmem:[#allocation46_spill] sm:$0xff] %v11211_v3  ;;  %v4702_v3 = vadd.f32 %v11117_v61, %v11019_v9  ;;  %v4703_v61 = vadd.f32 %v11128_v13, %v11031_v41 }
 0x2da   : > { %v7706_v55 = vpop.f32.mrf.mxu1 }
 0x2db   : > { %v4729_v46 = vadd.f32 %v7706_v55, %v11103_v30  ;;  %v4700_v55 = vadd.f32 %v11121_v20, %v11022_v42  ;;  %v11234_v30 = vpop.f32.mrf.mxu0  ;;  %v4706_v20 = vadd.f32 %v11132_v11, %v11033_v14 }
 0x2dc   : > { %v11218_v62 = vpop.f32.mrf.mxu1  ;;  %12140 = vst [vmem:[#allocation49_spill] sm:$0xff] %v11234_v30 }
 0x2dd   : > { %12134 = vst [vmem:[#allocation44_spill] sm:$0xff] %v11218_v62  ;;  %v11220_v52 = vadd.f32 %v7754_v5, %v4729_v46  ;;  %v5276_v46 = vadd.f32 %v11123_v26, %v4702_v3  ;;  %v7822_v5 = vpop.f32.mrf.mxu0  ;;  %v5274_v9 = vadd.f32 %v11125_v17, %v4700_v55  ;;  %v4704_v17 = vadd.f32 %v11136_v24, %v11036_v7 }
 0x2de   : > { %v11222_v57 = vpop.f32.mrf.mxu1 }
 0x2df   : > { %12135 = vst [vmem:[#allocation77_spill] sm:$0xff] %v11220_v52  ;;  %12136 = vst [vmem:[#allocation56_spill] sm:$0xff] %v11222_v57  ;;  %v6053_v1 = vpop.f32.mrf.mxu0  ;;  %v5278_v55 = vadd.f32 %v11140_v27, %v4704_v17 }
 0x2e0   : > { %v11226_v33 = vpop.f32.mrf.mxu1 }
 0x2e1   : > { %12138 = vst [vmem:[#allocation53_spill] sm:$0xff] %v11226_v33  ;;  %v7823_v26 = vpop.f32.mrf.mxu0 }
 0x2e2   : > { %v7774_v53 = vpop.f32.mrf.mxu1 }
 0x2e3   : > { %v5628_v34 = vadd.f32 %v7774_v53, %v11115_v38  ;;  %v5277_v38 = vadd.f32 %v11134_v25, %v4703_v61  ;;  %v6056_v41 = vpop.f32.mrf.mxu0 }
 0x2e4   : > { %v5499_v37 = vpop.f32.mrf.mxu1 }
 0x2e5   : > { %v5626_v52 = vadd.f32 %v5499_v37, %v11119_v23  ;;  %v6182_v62 = vadd.f32 %v7822_v5, %v5628_v34  ;;  %v7826_v53 = vpop.f32.mrf.mxu0 }
 0x2e6   : > { %v7775_v33 = vpop.f32.mrf.mxu1 }
 0x2e7   : > { %v5629_v57 = vadd.f32 %v7775_v33, %v5276_v46  ;;  %v6180_v30 = vadd.f32 %v6053_v1, %v5626_v52  ;;  %v5280_v1 = vadd.f32 %v11138_v40, %v4706_v20  ;;  %v4707_v46 = vadd.f32 %v11143_v51, %v11045_v60  ;;  %v6069_v5 = vpop.f32.mrf.mxu0 }
 0x2e8   : > { %v5502_v42 = vpop.f32.mrf.mxu1  ;;  %v6411_v61 = vmul.f32 %v6182_v62, %v6182_v62 }
 0x2e9   : > { %v5627_v3 = vadd.f32 %v5502_v42, %v5274_v9  ;;  %v6183_v37 = vadd.f32 %v7823_v26, %v5629_v57  ;;  %v6409_v33 = vmul.f32 %v6180_v30, %v6180_v30 }
 0x2ea   : > { %v7778_v23 = vpop.f32.mrf.mxu1 }
 0x2eb   : > { %v7087_v14 = vpack.c.bf16 %v6183_v37, %v6182_v62  ;;  %v6181_v13 = vadd.f32 %v6056_v41, %v5627_v3  ;;  %v5632_v57 = vadd.f32 %v7778_v23, %v11130_v22  ;;  %v4708_v22 = vadd.f32 %v11151_v49, %v11050_v48  ;;  %v7827_v23 = vpop.f32.mrf.mxu0 }
 0x2ec   : > { %v5515_v11 = vpop.f32.mrf.mxu1  ;;  %v6412_v3 = vmul.f32 %v6183_v37, %v6183_v37 }
 0x2ed   : > { %v5630_v25 = vadd.f32 %v5515_v11, %v5277_v38  ;;  %7189 = vst [vmem:[%s11252_s20 + $0x8] sm:$0xff] %v7087_v14   ;;  %v7082_v52 = vpack.c.bf16 %v6181_v13, %v6180_v30  ;;  %v6372_v7 = vadd.f32 %v6181_v13, %v6180_v30  ;;  %v6410_v24 = vmul.f32 %v6181_v13, %v6181_v13  ;;  %v6072_v14 = vpop.f32.mrf.mxu0 }
 0x2ee   : > { %v7779_v34 = vpop.f32.mrf.mxu1  ;;  %v4710_v30 = vadd.f32 %v11147_v12, %v11047_v36  ;;  %v6186_v17 = vadd.f32 %v7826_v53, %v5632_v57  ;;  %v5282_v53 = vadd.f32 %v11155_v4, %v4708_v22 }
 0x2ef   : > { %v5633_v9 = vadd.f32 %v7779_v34, %v5280_v1  ;;  %7083 = vst [vmem:[%s11252_s20] sm:$0xff] %v7082_v52   ;;  %v6373_v40 = vadd.f32 %v6372_v7, %v6182_v62  ;;  %v6441_v42 = vadd.f32 %v6410_v24, %v6409_v33  ;;  %v6184_v20 = vadd.f32 %v6069_v5, %v5630_v25  ;;  %v7830_v49 = vpop.f32.mrf.mxu0 }
 0x2f0   : > { %v5518_v26 = vpop.f32.mrf.mxu1  ;;  %v5281_v62 = vadd.f32 %v11149_v19, %v4707_v46  ;;  %v5284_v12 = vadd.f32 %v11153_v45, %v4710_v30  ;;  %v4714_v45 = vadd.f32 %v11162_v18, %v11061_v29  ;;  %v6415_v5 = vmul.f32 %v6186_v17, %v6186_v17 }
 0x2f1   : > { %v5631_v27 = vadd.f32 %v5518_v26, %v5278_v55  ;;  %v6442_v38 = vadd.f32 %v6441_v42, %v6411_v61  ;;  %v6374_v60 = vadd.f32 %v6373_v40, %v6183_v37  ;;  %v6187_v51 = vadd.f32 %v7827_v23, %v5633_v9  ;;  %v6085_v55 = vpop.f32.mrf.mxu0 }
 0x2f2   : > { %v7782_v41 = vpop.f32.mrf.mxu1  ;;  %v6413_v11 = vmul.f32 %v6184_v20, %v6184_v20  ;;  %v4711_v37 = vadd.f32 %v11158_v47, %v11059_v43  ;;  %v4712_v30 = vadd.f32 %v11166_v31, %v11064_v15  ;;  %v5288_v23 = vadd.f32 %v11168_v50, %v4714_v45 }
 0x2f3   : > { %v6375_v13 = vadd.f32 %v6374_v60, %v6184_v20  ;;  %v6443_v1 = vadd.f32 %v6442_v38, %v6412_v3  ;;  %v7097_v33 = vpack.c.bf16 %v6187_v51, %v6186_v17  ;;  %v6185_v48 = vadd.f32 %v6072_v14, %v5631_v27  ;;  %v7831_v43 = vpop.f32.mrf.mxu0 }
 0x2f4   : > { %v5531_v36 = vpop.f32.mrf.mxu1  ;;  %v5636_v19 = vadd.f32 %v7782_v41, %v11145_v59  ;;  %v5285_v42 = vadd.f32 %v11164_v21, %v4711_v37  ;;  %v6416_v22 = vmul.f32 %v6187_v51, %v6187_v51  ;;  %v5286_v50 = vadd.f32 %v11170_v8, %v4712_v30 }
 0x2f5   : > { %v5634_v25 = vadd.f32 %v5531_v36, %v5281_v62  ;;  %v6444_v52 = vadd.f32 %v6443_v1, %v6413_v11  ;;  %7191 = vst [vmem:[%s11252_s20 + $0x18] sm:$0xff] %v7097_v33   ;;  %v7092_v24 = vpack.c.bf16 %v6185_v48, %v6184_v20  ;;  %v6376_v57 = vadd.f32 %v6375_v13, %v6185_v48  ;;  %v6088_v18 = vpop.f32.mrf.mxu0 }
 0x2f6   : > { %v7783_v7 = vpop.f32.mrf.mxu1  ;;  %v6414_v34 = vmul.f32 %v6185_v48, %v6185_v48  ;;  %v6190_v59 = vadd.f32 %v7830_v49, %v5636_v19  ;;  %v4715_v13 = vadd.f32 %v11173_v44, %v11070_v10  ;;  %v4718_v48 = vadd.f32 %v11177_v54, %v11073_v35 }
 0x2f7   : > { %v5637_v46 = vadd.f32 %v7783_v7, %v5284_v12  ;;  %7190 = vst [vmem:[%s11252_s20 + $0x10] sm:$0xff] %v7092_v24   ;;  %v6377_v4 = vadd.f32 %v6376_v57, %v6186_v17  ;;  %v6188_v40 = vadd.f32 %v6085_v55, %v5634_v25  ;;  %v7834_v21 = vpop.f32.mrf.mxu0  ;;  %v4716_v24 = vadd.f32 %v11181_v32, %v11076_v56 }
 0x2f8   : > { %v5534_v9 = vpop.f32.mrf.mxu1  ;;  %v6445_v61 = vadd.f32 %v6444_v52, %v6414_v34  ;;  %v6419_v49 = vmul.f32 %v6190_v59, %v6190_v59  ;;  %v5292_v55 = vadd.f32 %v11183_v58, %v4718_v48 }
 0x2f9   : > { %v5635_v47 = vadd.f32 %v5534_v9, %v5282_v53  ;;  %v6191_v26 = vadd.f32 %v7831_v43, %v5637_v46  ;;  %v6378_v29 = vadd.f32 %v6377_v4, %v6187_v51  ;;  %v6417_v41 = vmul.f32 %v6188_v40, %v6188_v40  ;;  %v6101_v36 = vpop.f32.mrf.mxu0 }
 0x2fa   : > { %v7786_v20 = vpop.f32.mrf.mxu1  ;;  %v6446_v3 = vadd.f32 %v6445_v61, %v6415_v5  ;;  %v4719_v43 = vadd.f32 %v11188_v6, %v11082_v2 }
 0x2fb   : > { %v7107_v27 = vpack.c.bf16 %v6191_v26, %v6190_v59  ;;  %v6189_v38 = vadd.f32 %v6088_v18, %v5635_v47  ;;  %v6379_v60 = vadd.f32 %v6378_v29, %v6188_v40  ;;  %v5640_v51 = vadd.f32 %v7786_v20, %v11160_v0  ;;  %v7835_v37 = vpop.f32.mrf.mxu0  ;;  %v12143_v29 = vld [vmem:[#allocation45_spill] sm:$0xff] }
 0x2fc   : > { %v5547_v17 = vpop.f32.mrf.mxu1  ;;  %v6447_v62 = vadd.f32 %v6446_v3, %v6416_v22  ;;  %v5289_v0 = vadd.f32 %v11179_v16, %v4715_v13  ;;  %v6420_v57 = vmul.f32 %v6191_v26, %v6191_v26  ;;  %v12142_v3 = vld [vmem:[#allocation8_spill] sm:$0xff] }
 0x2fd   : > { %v5638_v14 = vadd.f32 %v5547_v17, %v5285_v42  ;;  %7193 = vst [vmem:[%s11252_s20 + $0x28] sm:$0xff] %v7107_v27   ;;  %v7102_v15 = vpack.c.bf16 %v6189_v38, %v6188_v40  ;;  %v6418_v31 = vmul.f32 %v6189_v38, %v6189_v38  ;;  %v6380_v33 = vadd.f32 %v6379_v60, %v6189_v38  ;;  %v6104_v54 = vpop.f32.mrf.mxu0  ;;  %v12145_v13 = vld [vmem:[#allocation72_spill] sm:$0xff] }
 0x2fe   : > { %v7787_v11 = vpop.f32.mrf.mxu1  ;;  %v6448_v1 = vadd.f32 %v6447_v62, %v6417_v41  ;;  %v6194_v19 = vadd.f32 %v7834_v21, %v5640_v51  ;;  %v4722_v18 = vadd.f32 %v12143_v29, %v12142_v3  ;;  %v12144_v41 = vld [vmem:[#allocation52_spill] sm:$0xff] }
 0x2ff   : > { %v5641_v12 = vadd.f32 %v7787_v11, %v5288_v23  ;;  %7192 = vst [vmem:[%s11252_s20 + $0x20] sm:$0xff] %v7102_v15   ;;  %v6381_v53 = vadd.f32 %v6380_v33, %v6190_v59  ;;  %v6192_v44 = vadd.f32 %v6101_v36, %v5638_v14  ;;  %v7838_v16 = vpop.f32.mrf.mxu0  ;;  %v12141_v59 = vld [vmem:[#allocation37_spill] sm:$0xff]  ;;  %v12146_v15 = vld [vmem:[#allocation75_spill] sm:$0xff] }
 0x300   : > { %v5550_v25 = vpop.f32.mrf.mxu1  ;;  %v6449_v10 = vadd.f32 %v6448_v1, %v6418_v31  ;;  %v5290_v58 = vadd.f32 %v12141_v59, %v4716_v24  ;;  %v6423_v23 = vmul.f32 %v6194_v19, %v6194_v19  ;;  %v4720_v31 = vadd.f32 %v12146_v15, %v12145_v13  ;;  %v12147_v33 = vld [vmem:[#allocation39_spill] sm:$0xff]  ;;  %v12149_v24 = vld [vmem:[#allocation42_spill] sm:$0xff] }
 0x301   : > { %v5639_v52 = vadd.f32 %v5550_v25, %v5286_v50  ;;  %v6195_v7 = vadd.f32 %v7835_v37, %v5641_v12  ;;  %v6382_v35 = vadd.f32 %v6381_v53, %v6191_v26  ;;  %v6421_v4 = vmul.f32 %v6192_v44, %v6192_v44  ;;  %v6117_v30 = vpop.f32.mrf.mxu0 }
 0x302   : > { %v7790_v8 = vpop.f32.mrf.mxu1  ;;  %v6450_v34 = vadd.f32 %v6449_v10, %v6419_v49  ;;  %v5296_v36 = vadd.f32 %v12147_v33, %v4722_v18  ;;  %v12155_v18 = vld [vmem:[#allocation84_spill] sm:$0xff] }
 0x303   : > { %v7117_v46 = vpack.c.bf16 %v6195_v7, %v6194_v19  ;;  %v6193_v45 = vadd.f32 %v6104_v54, %v5639_v52  ;;  %v6383_v9 = vadd.f32 %v6382_v35, %v6192_v44  ;;  %v5644_v47 = vadd.f32 %v7790_v8, %v11175_v39  ;;  %v7839_v17 = vpop.f32.mrf.mxu0  ;;  %v12148_v52 = vld [vmem:[#allocation31_spill] sm:$0xff] }
 0x304   : > { %v5563_v5 = vpop.f32.mrf.mxu1  ;;  %v6451_v61 = vadd.f32 %v6450_v34, %v6420_v57  ;;  %v5293_v39 = vadd.f32 %v12144_v41, %v4719_v43  ;;  %v6424_v51 = vmul.f32 %v6195_v7, %v6195_v7  ;;  %v12150_v34 = vld [vmem:[#allocation40_spill] sm:$0xff] }
 0x305   : > { %v5642_v40 = vadd.f32 %v5563_v5, %v5289_v0  ;;  %7195 = vst [vmem:[%s11252_s20 + $0x38] sm:$0xff] %v7117_v46   ;;  %v7112_v56 = vpack.c.bf16 %v6193_v45, %v6192_v44  ;;  %v6422_v32 = vmul.f32 %v6193_v45, %v6193_v45  ;;  %v6384_v20 = vadd.f32 %v6383_v9, %v6193_v45  ;;  %v6120_v1 = vpop.f32.mrf.mxu0  ;;  %v12151_v5 = vld [vmem:[#allocation33_spill] sm:$0xff] }
 0x306   : > { %v7791_v42 = vpop.f32.mrf.mxu1  ;;  %v6452_v26 = vadd.f32 %v6451_v61, %v6421_v4  ;;  %v6198_v62 = vadd.f32 %v7838_v16, %v5644_v47  ;;  %v4723_v0 = vadd.f32 %v11203_v63, %v12148_v52  ;;  %v5294_v35 = vadd.f32 %v12150_v34, %v4720_v31 }
 0x307   : > { %v5645_v22 = vadd.f32 %v7791_v42, %v5292_v55  ;;  %7194 = vst [vmem:[%s11252_s20 + $0x30] sm:$0xff] %v7112_v56   ;;  %v6385_v38 = vadd.f32 %v6384_v20, %v6194_v19  ;;  %v6196_v6 = vadd.f32 %v6117_v30, %v5642_v40  ;;  %v7842_v44 = vpop.f32.mrf.mxu0  ;;  %v4726_v9 = vadd.f32 %v11207_v28, %v12151_v5  ;;  %v12154_v20 = vld [vmem:[#allocation46_spill] sm:$0xff] }
 0x308   : > { %v5566_v27 = vpop.f32.mrf.mxu1  ;;  %v6453_v2 = vadd.f32 %v6452_v26, %v6422_v32  ;;  %v6427_v4 = vmul.f32 %v6198_v62, %v6198_v62  ;;  %v12152_v32 = vld [vmem:[#allocation9_spill] sm:$0xff]  ;;  %v12153_v26 = vld [vmem:[#allocation34_spill] sm:$0xff] }
 0x309   : > { %v5643_v60 = vadd.f32 %v5566_v27, %v5290_v58  ;;  %v6199_v21 = vadd.f32 %v7839_v17, %v5645_v22  ;;  %v6386_v50 = vadd.f32 %v6385_v38, %v6195_v7  ;;  %v6425_v53 = vmul.f32 %v6196_v6, %v6196_v6  ;;  %v6133_v46 = vpop.f32.mrf.mxu0 }
 0x30a   : > { %v7794_v14 = vpop.f32.mrf.mxu1  ;;  %v6454_v11 = vadd.f32 %v6453_v2, %v6423_v23  ;;  %v5297_v47 = vadd.f32 %v12152_v32, %v4723_v0  ;;  %v4724_v30 = vadd.f32 %v12154_v20, %v12153_v26  ;;  %v5300_v23 = vadd.f32 %v12155_v18, %v4726_v9 }
 0x30b   : > { %v7127_v12 = vpack.c.bf16 %v6199_v21, %v6198_v62  ;;  %v6197_v48 = vadd.f32 %v6120_v1, %v5643_v60  ;;  %v6387_v25 = vadd.f32 %v6386_v50, %v6196_v6  ;;  %v5648_v7 = vadd.f32 %v7794_v14, %v12149_v24  ;;  %v7843_v43 = vpop.f32.mrf.mxu0  ;;  %v12157_v14 = vld [vmem:[#allocation44_spill] sm:$0xff]  ;;  %v12159_v50 = vld [vmem:[#allocation43_spill] sm:$0xff] }
 0x30c   : > { %v5579_v49 = vpop.f32.mrf.mxu1  ;;  %v6455_v10 = vadd.f32 %v6454_v11, %v6424_v51  ;;  %v6428_v22 = vmul.f32 %v6199_v21, %v6199_v21  ;;  %v12158_v51 = vld [vmem:[#allocation41_spill] sm:$0xff]  ;;  %v5298_v1 = vadd.f32 %v12159_v50, %v4724_v30  ;;  %v12162_v24 = vld [vmem:[#allocation79_spill] sm:$0xff] }
 0x30d   : > { %v5646_v37 = vadd.f32 %v5579_v49, %v5293_v39  ;;  %7197 = vst [vmem:[%s11252_s20 + $0x48] sm:$0xff] %v7127_v12   ;;  %v7122_v19 = vpack.c.bf16 %v6197_v48, %v6196_v6  ;;  %v6426_v8 = vmul.f32 %v6197_v48, %v6197_v48  ;;  %v6388_v55 = vadd.f32 %v6387_v25, %v6197_v48  ;;  %v6136_v29 = vpop.f32.mrf.mxu0  ;;  %v12160_v49 = vld [vmem:[#allocation36_spill] sm:$0xff]  ;;  %v12166_v30 = vld [vmem:[#allocation77_spill] sm:$0xff] }
 0x30e   : > { %v7795_v57 = vpop.f32.mrf.mxu1  ;;  %v6456_v54 = vadd.f32 %v6455_v10, %v6425_v53  ;;  %v6202_v42 = vadd.f32 %v7842_v44, %v5648_v7  ;;  %v12161_v25 = vld [vmem:[#allocation56_spill] sm:$0xff] }
 0x30f   : > { %v5649_v45 = vadd.f32 %v7795_v57, %v5296_v36  ;;  %7196 = vst [vmem:[%s11252_s20 + $0x40] sm:$0xff] %v7122_v19   ;;  %v6389_v16 = vadd.f32 %v6388_v55, %v6198_v62  ;;  %v6200_v40 = vadd.f32 %v6133_v46, %v5646_v37  ;;  %v7846_v41 = vpop.f32.mrf.mxu0  ;;  %v12156_v62 = vld [vmem:[#allocation74_spill] sm:$0xff]  ;;  %v4730_v53 = vadd.f32 %v12161_v25, %v12160_v49  ;;  %v12164_v55 = vld [vmem:[#allocation53_spill] sm:$0xff] }
 0x310   : > { %v5582_v61 = vpop.f32.mrf.mxu1  ;;  %v6457_v63 = vadd.f32 %v6456_v54, %v6426_v8  ;;  %v4727_v13 = vadd.f32 %v12157_v14, %v12156_v62  ;;  %v6431_v10 = vmul.f32 %v6202_v42, %v6202_v42  ;;  %v12163_v54 = vld [vmem:[#allocation38_spill] sm:$0xff] }
 0x311   : > { %v5647_v56 = vadd.f32 %v5582_v61, %v5294_v35  ;;  %v6203_v59 = vadd.f32 %v7843_v43, %v5649_v45  ;;  %v6390_v28 = vadd.f32 %v6389_v16, %v6199_v21  ;;  %v6429_v17 = vmul.f32 %v6200_v40, %v6200_v40  ;;  %v6149_v12 = vpop.f32.mrf.mxu0  ;;  %v12165_v61 = vld [vmem:[#allocation59_spill] sm:$0xff] }
 0x312   : > { %v7798_v58 = vpop.f32.mrf.mxu1  ;;  %v6458_v3 = vadd.f32 %v6457_v63, %v6427_v4  ;;  %v5301_v7 = vadd.f32 %v12162_v24, %v4727_v13  ;;  %v4728_v46 = vadd.f32 %v12164_v55, %v12163_v54  ;;  %v5304_v16 = vadd.f32 %v12165_v61, %v4730_v53 }
 0x313   : > { %v7137_v27 = vpack.c.bf16 %v6203_v59, %v6202_v42  ;;  %v6201_v38 = vadd.f32 %v6136_v29, %v5647_v56  ;;  %v6391_v6 = vadd.f32 %v6390_v28, %v6200_v40  ;;  %v5652_v21 = vadd.f32 %v7798_v58, %v12158_v51  ;;  %v7847_v19 = vpop.f32.mrf.mxu0  ;;  %v12167_v28 = vld [vmem:[#allocation49_spill] sm:$0xff] }
 0x314   : > { %v5595_v2 = vpop.f32.mrf.mxu1  ;;  %v6459_v60 = vadd.f32 %v6458_v3, %v6428_v22  ;;  %v6432_v45 = vmul.f32 %v6203_v59, %v6203_v59 }
 0x315   : > { %v5650_v39 = vadd.f32 %v5595_v2, %v5297_v47  ;;  %7199 = vst [vmem:[%s11252_s20 + $0x58] sm:$0xff] %v7137_v27   ;;  %v7132_v15 = vpack.c.bf16 %v6201_v38, %v6200_v40  ;;  %v6430_v31 = vmul.f32 %v6201_v38, %v6201_v38  ;;  %v6392_v36 = vadd.f32 %v6391_v6, %v6201_v38  ;;  %v6152_v4 = vpop.f32.mrf.mxu0 }
 0x316   : > { %v7799_v11 = vpop.f32.mrf.mxu1  ;;  %v6460_v33 = vadd.f32 %v6459_v60, %v6429_v17  ;;  %v6206_v57 = vadd.f32 %v7846_v41, %v5652_v21 }
 0x317   : > { %v5653_v48 = vadd.f32 %v7799_v11, %v5300_v23  ;;  %7198 = vst [vmem:[%s11252_s20 + $0x50] sm:$0xff] %v7132_v15   ;;  %v6393_v37 = vadd.f32 %v6392_v36, %v6202_v42  ;;  %v6204_v0 = vadd.f32 %v6149_v12, %v5650_v39  ;;  %v7850_v42 = vpop.f32.mrf.mxu0 }
 0x318   : > { %v5598_v44 = vpop.f32.mrf.mxu1  ;;  %v6461_v52 = vadd.f32 %v6460_v33, %v6430_v31  ;;  %v6435_v38 = vmul.f32 %v6206_v57, %v6206_v57 }
 0x319   : > { %v5651_v8 = vadd.f32 %v5598_v44, %v5298_v1  ;;  %v6207_v34 = vadd.f32 %v7847_v19, %v5653_v48  ;;  %v6394_v9 = vadd.f32 %v6393_v37, %v6203_v59  ;;  %v6433_v32 = vmul.f32 %v6204_v0, %v6204_v0  ;;  %v6165_v23 = vpop.f32.mrf.mxu0 }
 0x31a   : > { %v7802_v35 = vpop.f32.mrf.mxu1  ;;  %v6462_v5 = vadd.f32 %v6461_v52, %v6431_v10  ;;  %v5302_v59 = vadd.f32 %v12167_v28, %v4728_v46 }
 0x31b   : > { %v7147_v63 = vpack.c.bf16 %v6207_v34, %v6206_v57  ;;  %v6205_v40 = vadd.f32 %v6152_v4, %v5651_v8  ;;  %v6395_v56 = vadd.f32 %v6394_v9, %v6204_v0  ;;  %v5656_v22 = vadd.f32 %v7802_v35, %v12166_v30  ;;  %v7851_v41 = vpop.f32.mrf.mxu0 }
 0x31c   : > { %v5611_v43 = vpop.f32.mrf.mxu1  ;;  %v6463_v47 = vadd.f32 %v6462_v5, %v6432_v45  ;;  %v6436_v13 = vmul.f32 %v6207_v34, %v6207_v34 }
 0x31d   : > { %v5654_v58 = vadd.f32 %v5611_v43, %v5301_v7  ;;  %7201 = vst [vmem:[%s11252_s20 + $0x68] sm:$0xff] %v7147_v63   ;;  %v7142_v26 = vpack.c.bf16 %v6205_v40, %v6204_v0  ;;  %v6434_v20 = vmul.f32 %v6205_v40, %v6205_v40  ;;  %v6396_v18 = vadd.f32 %v6395_v56, %v6205_v40  ;;  %v6168_v51 = vpop.f32.mrf.mxu0 }
 0x31e   : > { %v7803_v3 = vpop.f32.mrf.mxu1  ;;  %v6464_v29 = vadd.f32 %v6463_v47, %v6433_v32  ;;  %v6210_v62 = vadd.f32 %v7850_v42, %v5656_v22  ;;  %v6478_v7 = vlaneseq }
 0x31f   : > { %v5657_v27 = vadd.f32 %v7803_v3, %v5304_v16  ;;  %7200 = vst [vmem:[%s11252_s20 + $0x60] sm:$0xff] %v7142_v26   ;;  %v6397_v6 = vadd.f32 %v6396_v18, %v6206_v57  ;;  %v6208_v60 = vadd.f32 %v6165_v23, %v5654_v58 }
 0x320   : > { %v5614_v2 = vpop.f32.mrf.mxu1  ;;  %v6465_v17 = vadd.f32 %v6464_v29, %v6434_v20  ;;  %v6439_v25 = vmul.f32 %v6210_v62, %v6210_v62  ;;  %v6479_v55 = vshrl.u32 %v6478_v7, 7 }
 0x321   : > { %v5655_v39 = vadd.f32 %v5614_v2, %v5302_v59  ;;  %v6211_v14 = vadd.f32 %v7851_v41, %v5657_v27  ;;  %v6398_v31 = vadd.f32 %v6397_v6, %v6207_v34  ;;  %v6437_v1 = vmul.f32 %v6208_v60, %v6208_v60 }
 0x322   : > { %v6466_v15 = vadd.f32 %v6465_v17, %v6435_v38  ;;  %vm6481_vm0 = vcmp.eq.s32.totalorder %v6479_v55, 1  ;;  %vm6480_vm11 = vcmp.eq.s32.totalorder %v6479_v55, 0 }
 0x323   : > { %v7157_v21 = vpack.c.bf16 %v6211_v14, %v6210_v62  ;;  %v6209_v11 = vadd.f32 %v6168_v51, %v5655_v39  ;;  %v6399_v50 = vadd.f32 %v6398_v31, %v6208_v60  ;;  %v6440_v44 = vmul.f32 %v6211_v14, %v6211_v14 }
 0x324   : > { %v6467_v33 = vadd.f32 %v6466_v15, %v6436_v13 }
 0x325   : > { %7203 = vst [vmem:[%s11252_s20 + $0x78] sm:$0xff] %v7157_v21   ;;  %v7152_v36 = vpack.c.bf16 %v6209_v11, %v6208_v60  ;;  %v6438_v12 = vmul.f32 %v6209_v11, %v6209_v11  ;;  %v6400_v49 = vadd.f32 %v6399_v50, %v6209_v11 }
 0x326   : > { %v6468_v48 = vadd.f32 %v6467_v33, %v6437_v1 }
 0x327   : > { %7202 = vst [vmem:[%s11252_s20 + $0x70] sm:$0xff] %v7152_v36   ;;  %v6401_v53 = vadd.f32 %v6400_v49, %v6210_v62 }
 0x328   : > { %v6469_v10 = vadd.f32 %v6468_v48, %v6438_v12 }
 0x329   : > { %v6402_v37 = vadd.f32 %v6401_v53, %v6211_v14 }
 0x32a   : > { %v6470_v52 = vadd.f32 %v6469_v10, %v6439_v25 }
 0x32b   : > { %v6403_v0 = vrot.slane %v6402_v37, 4 }
 0x32c   : > { %v6471_v19 = vadd.f32 %v6470_v52, %v6440_v44 }
 0x32d   : > { %v6404_v8 = vadd.f32 %v6403_v0, %v6402_v37 }
 0x32e   : > { %v6472_v24 = vrot.slane %v6471_v19, 4 }
 0x32f   : > { %v6405_v57 = vrot.slane %v6404_v8, 2 }
 0x330   : > { %v6473_v34 = vadd.f32 %v6472_v24, %v6471_v19 }
 0x331   : > { %v6406_v35 = vadd.f32 %v6405_v57, %v6404_v8 }
 0x332   : > { %v6474_v54 = vrot.slane %v6473_v34, 2 }
 0x333   : > { %v6407_v45 = vrot.slane %v6406_v35, 1 }
 0x334   : > { %v6475_v46 = vadd.f32 %v6474_v54, %v6473_v34 }
 0x335   : > { %v6408_v4 = vadd.f32 %v6407_v45, %v6406_v35 }
 0x336   : > { %v6476_v5 = vrot.slane %v6475_v46, 1 }
 0x338   : > { %v6477_v9 = vadd.f32 %v6476_v5, %v6475_v46 }
 0x33a   : > { %v6484_v61 = vsel %vm6481_vm0, %v6477_v9, 0.0 }
 0x33b   : > { %v6487_v16 = vsel %vm6480_vm11, %v6408_v4, %v6484_v61 }
 0x33c   : > { %6488 = vst [vmem:[%s265_s29] sm:$0xff] %v6487_v16 }
 0x33d PF: > { %s17_s21 = sadd.s32 1, %s8066_s21  }
 0x33e   : > { %p14_p5 = scmp.ge.s32.totalorder %s17_s21, 4  }
 0x340   :  { %16 = sbr.rel (!%p14_p5) target bundleno = 1 (0x1), region = 82 }

</bundles_post_ra>
